<compile_context>
chip_gen: v7x
topology: tpu7x:2x2x1
jax: 0.10.0
libtpu: 0.0.40
codegen_flags: <defaults>
</compile_context>

<pallas_src>
import functools
import math

import jax
import jax.numpy as jnp
from jax import lax
from jax.experimental import pallas as pl
from jax.experimental.pallas import tpu as pltpu


def _memory_kernel(q_ref, mem_t_ref, bias_ref, tri_ref, out_ref, *, k):
    # q_ref:     (tm, dim)            query rows for this grid step
    # mem_t_ref: (dim, num_item_pad)  transposed memory pool (grid-constant)
    # bias_ref:  (2, num_item_pad)    row 0: 0 / -1e30 score bias for padding
    #                                 row 1: 0 / -2.0  work  bias for padding
    # tri_ref:   (nip, nip) bf16      strictly-lower-triangular ones (constant)
    # out_ref:   (dim, tm)            transposed output tile (lane-dense store)
    q = q_ref[...].astype(jnp.float32)
    mt = mem_t_ref[...].astype(jnp.float32)
    bias = bias_ref[...]
    score_bias = bias[0:1, :]           # (1, nip) broadcasts over rows
    work_bias = bias[1:2, :]            # (1, nip)
    tri = tri_ref[...]                  # bf16, used only as an MXU operand

    # scores = query @ mempool^T  -> (tm, num_item_pad); padded columns pushed
    # to -1e30 with a single broadcast add (no per-step iota/compare/select).
    scores = jnp.dot(q, mt, preferred_element_type=jnp.float32) + score_bias

    # first softmax over memory items (exact divide: selection-critical)
    s_max = jnp.max(scores, axis=-1, keepdims=True)
    e1 = jnp.exp(scores - s_max)
    p = e1 / jnp.sum(e1, axis=-1, keepdims=True)

    exp_p = jnp.exp(p)  # hoisted out of the top-k loop (one EUP pass)

    def body(_, carry):
        work, e2 = carry
        m = jnp.max(work, axis=-1, keepdims=True)      # single XLU reduction
        is_max = work == m
        # Exclusive prefix count of earlier maxima on the otherwise-idle MXU;
        # the lowest-index maximum is the one with zero maxima before it
        # (exactly matches torch.topk / lax.top_k tie-break).  bf16 operands
        # (values are 0/1, counts <= nip=128) with f32 accumulation -> exact.
        prefix = jnp.dot(is_max.astype(jnp.bfloat16), tri,
                         preferred_element_type=jnp.float32)
        sel = jnp.logical_and(is_max, prefix == 0.0)
        e2 = jnp.where(sel, exp_p, e2)
        work = jnp.where(sel, -1.0, work)
        return work, e2

    # padded columns start at ~-2.0 (< the -1.0 "already taken" marker), so
    # they can never be selected; valid probabilities are untouched (bias 0).
    work0 = p + work_bias
    _, e2 = lax.fori_loop(0, k, body, (work0, jnp.zeros_like(p)), unroll=True)

    # Second softmax over the selected top-k probabilities.  p is in (0, 1],
    # so exp(p) needs no max shift.  Normalize with the EUP approx reciprocal
    # (otherwise-idle slot) plus one Newton step to restore ~f32 accuracy.
    denom = jnp.sum(e2, axis=-1, keepdims=True)
    inv = pl.reciprocal(denom, approx=True)
    inv = inv * (2.0 - denom * inv)
    att = e2 * inv

    # output^T = mempool^T @ att^T  -> (dim, tm); lane dim is tm => unmasked vst
    out_ref[...] = lax.dot_general(
        mt, att, (((1,), (1,)), ((), ())),
        preferred_element_type=jnp.float32,
    ).astype(out_ref.dtype)


def _pick_tm(m_rows):
    # v7x has 2 TensorCores and the single "parallel" row axis is the only
    # thing sharding them: never let the grid collapse to one step when the
    # row count allows >= 2.  Larger tiles amortize the ~0.35 us/step overhead.
    for cand in (512, 256, 128):
        if m_rows > cand:           # ceil(m_rows / cand) >= 2
            return cand
    return 128                      # tiny inputs: single step is unavoidable


def memory_forward(x, mempool, *, k=10, tm=None):
    """x: (N, C, H, W) or (M, C) float; mempool: (num_item, C).

    Returns (output in x's layout, scalar dis-loss), matching Memory.forward.
    """
    x = x.astype(jnp.float32)
    mempool = mempool.astype(jnp.float32)
    num_item, dim = mempool.shape
    assert num_item >= k

    if x.ndim == 4:
        n, c, h, w = x.shape
        assert c == dim
        # NCHW -> (N*H*W, C), same row order as permute(0,2,3,1).view(-1, C)
        q = jnp.transpose(x, (0, 2, 3, 1)).reshape(-1, c)
    else:
        c = x.shape[-1]
        assert c == dim
        q = x.reshape(-1, c)

    m_rows = q.shape[0]
    if tm is None:
        tm = _pick_tm(m_rows)
    m_pad = pl.cdiv(m_rows, tm) * tm
    if m_pad != m_rows:
        q = jnp.pad(q, ((0, m_pad - m_rows), (0, 0)))

    # lane-align the memory items; present the pool transposed: (dim, items)
    ni_pad = pl.cdiv(num_item, 128) * 128
    mem_t = jnp.pad(mempool.T, ((0, 0), (0, ni_pad - num_item)))

    # precomputed grid-constant helpers (hoisted out of the kernel body):
    #   bias row 0: additive score mask (0 valid / -1e30 padded)
    #   bias row 1: additive work-value guard (0 valid / -2.0 padded)
    col = jnp.arange(ni_pad)
    valid = col < num_item
    bias = jnp.stack(
        [jnp.where(valid, 0.0, -1e30), jnp.where(valid, 0.0, -2.0)], axis=0
    ).astype(jnp.float32)                                   # (2, ni_pad)
    # strictly-lower-triangular ones: tri[j, i] = 1 iff j < i (bf16 MXU operand)
    tri = (jnp.arange(ni_pad)[:, None] < jnp.arange(ni_pad)[None, :]).astype(
        jnp.bfloat16
    )                                                       # (ni_pad, ni_pad)

    out_t = pl.pallas_call(
        functools.partial(_memory_kernel, k=k),
        out_shape=jax.ShapeDtypeStruct((dim, m_pad), jnp.float32),
        grid_spec=pltpu.PrefetchScalarGridSpec(
            num_scalar_prefetch=0,
            grid=(m_pad // tm,),
            in_specs=[
                pl.BlockSpec((tm, dim), lambda i: (i, 0)),
                # grid-constant blocks below; tiny (<< 100 KB) at this size so
                # default double-buffering is fine.  If num_item/dim grow,
                # single-buffer these and re-check v7x's 64 MiB VMEM budget.
                pl.BlockSpec((dim, ni_pad), lambda i: (0, 0)),
                pl.BlockSpec((2, ni_pad), lambda i: (0, 0)),
                pl.BlockSpec((ni_pad, ni_pad), lambda i: (0, 0)),
            ],
            out_specs=pl.BlockSpec((dim, tm), lambda i: (0, i)),
        ),
        compiler_params=pltpu.CompilerParams(
            dimension_semantics=("parallel",),
        ),
    )(q, mem_t, bias, tri)

    out_rows = out_t[:, :m_rows]                       # (dim, M)
    if x.ndim == 4:
        out = jnp.transpose(out_rows.reshape(c, n, h, w), (1, 0, 2, 3))
    else:
        out = out_rows.T.reshape(x.shape)

    # dis-loss depends only on the memory pool: plain JAX (hoisted from kernel)
    cos = jnp.dot(mempool, mempool.T) * 0.5
    loss = jnp.mean(jnp.abs(cos * (1.0 - jnp.eye(num_item, dtype=cos.dtype))))
    return out, loss


def _reference_forward(x, mempool, k=10):
    """Pure-JAX reference mirroring the PyTorch code (for a sanity check)."""
    n, c, h, w = x.shape
    q = jnp.transpose(x, (0, 2, 3, 1)).reshape(-1, c)
    att = q @ mempool.T
    att = jax.nn.softmax(att, axis=1)
    val, idx = lax.top_k(att, k)
    val = jax.nn.softmax(val, axis=1)
    sparse = jnp.zeros_like(att)
    sparse = jax.vmap(lambda s, i, v: s.at[i].set(v))(sparse, idx, val)
    out = sparse @ mempool
    out = jnp.transpose(out.reshape(n, h, w, c), (0, 3, 1, 2))
    m = mempool.shape[0]
    cos = (mempool @ mempool.T) / 2.0
    loss = jnp.mean(jnp.abs(cos * (1.0 - jnp.eye(m))))
    return out, loss


if __name__ == "__main__":
    key = jax.random.PRNGKey(0)
    k_mem, k_x = jax.random.split(key)

    N, C, H, W = 2, 4, 16, 16          # small NCHW input, dim == C
    NUM_ITEM, TOPK = 100, 10           # module defaults

    # deterministic init: uniform(-stdv, stdv) with stdv = 1/sqrt(dim)
    stdv = 1.0 / math.sqrt(C)
    mempool = jax.random.uniform(
        k_mem, (NUM_ITEM, C), dtype=jnp.float32, minval=-stdv, maxval=stdv
    )
    x = jax.random.normal(k_x, (N, C, H, W), dtype=jnp.float32)

    out, loss = memory_forward(x, mempool, k=TOPK)
    jax.block_until_ready((out, loss))

    ref_out, ref_loss = _reference_forward(x, mempool, k=TOPK)
    # output tolerance: the only sub-f32 op is the Newton-refined approx
    # reciprocal in the final normalization (error << 1e-5 relative).
    assert jnp.allclose(out, ref_out, atol=1e-4, rtol=1e-5), float(
        jnp.max(jnp.abs(out - ref_out))
    )
    assert jnp.allclose(loss, ref_loss, atol=1e-6, rtol=1e-5)

    print("KERNEL_OK")
</pallas_src>

<mosaic_0001>
module attributes {stable_mosaic.version = 11 : i64} {
  func.func @_memory_kernel(%arg0: i32, %arg1: memref<256x4xf32, #tpu.memory_space<vmem>>, %arg2: memref<4x128xf32, #tpu.memory_space<vmem>>, %arg3: memref<2x128xf32, #tpu.memory_space<vmem>>, %arg4: memref<128x128xbf16, #tpu.memory_space<vmem>>, %arg5: memref<4x256xf32, #tpu.memory_space<vmem>>) attributes {dimension_semantics = [#tpu.dimension_semantics<parallel>], iteration_bounds = array<i64: 2>, scalar_prefetch = 0 : i64, scratch_operands = 0 : i64, tpu.core_type = #tpu.core_type<tc>, window_params = [{transform_indices = @transform_0, window_bounds = array<i64: 256, 4>}, {pipeline_mode = #tpu.pipeline_mode<synchronous>, transform_indices = @transform_1, window_bounds = array<i64: 4, 128>}, {pipeline_mode = #tpu.pipeline_mode<synchronous>, transform_indices = @transform_2, window_bounds = array<i64: 2, 128>}, {pipeline_mode = #tpu.pipeline_mode<synchronous>, transform_indices = @transform_3, window_bounds = array<i64: 128, 128>}, {transform_indices = @transform_4, window_bounds = array<i64: 4, 256>}]} {
    %c0 = arith.constant 0 : index
    %c0_0 = arith.constant 0 : index
    %0 = vector.load %arg1[%c0, %c0_0] : memref<256x4xf32, #tpu.memory_space<vmem>>, vector<256x4xf32>
    %c0_1 = arith.constant 0 : index
    %c0_2 = arith.constant 0 : index
    %1 = vector.load %arg2[%c0_1, %c0_2] : memref<4x128xf32, #tpu.memory_space<vmem>>, vector<4x128xf32>
    %c0_3 = arith.constant 0 : index
    %c0_4 = arith.constant 0 : index
    %2 = vector.load %arg3[%c0_3, %c0_4] : memref<2x128xf32, #tpu.memory_space<vmem>>, vector<2x128xf32>
    %3 = vector.extract_strided_slice %2 {offsets = [0, 0], sizes = [1, 128], strides = [1, 1]} : vector<2x128xf32> to vector<1x128xf32>
    %4 = vector.extract_strided_slice %2 {offsets = [1, 0], sizes = [1, 128], strides = [1, 1]} : vector<2x128xf32> to vector<1x128xf32>
    %c0_5 = arith.constant 0 : index
    %c0_6 = arith.constant 0 : index
    %5 = vector.load %arg4[%c0_5, %c0_6] : memref<128x128xbf16, #tpu.memory_space<vmem>>, vector<128x128xbf16>
    %cst = arith.constant dense<0.000000e+00> : vector<256x128xf32>
    %6 = tpu.matmul %0, %1, %cst {dimension_numbers = #tpu.dot_dimension_numbers<[1], [0], [0], [1], [0, 0, 1, 1], [], []>} : vector<256x4xf32>, vector<4x128xf32>, vector<256x128xf32> -> vector<256x128xf32>
    %7 = vector.broadcast %3 : vector<1x128xf32> to vector<256x128xf32>
    %8 = arith.addf %6, %7 : vector<256x128xf32>
    %cst_7 = arith.constant dense<0xFF800000> : vector<256xf32>
    %9 = vector.multi_reduction <maximumf>, %8, %cst_7 [1] : vector<256x128xf32> to vector<256xf32>
    %10 = vector.shape_cast %9 : vector<256xf32> to vector<256x1xf32>
    %11 = vector.broadcast %10 : vector<256x1xf32> to vector<256x128xf32>
    %12 = arith.subf %8, %11 : vector<256x128xf32>
    %13 = math.exp %12 : vector<256x128xf32>
    %cst_8 = arith.constant dense<0.000000e+00> : vector<256xf32>
    %14 = vector.multi_reduction <add>, %13, %cst_8 [1] : vector<256x128xf32> to vector<256xf32>
    %15 = vector.shape_cast %14 : vector<256xf32> to vector<256x1xf32>
    %16 = vector.broadcast %15 : vector<256x1xf32> to vector<256x128xf32>
    %17 = arith.divf %13, %16 : vector<256x128xf32>
    %18 = math.exp %17 : vector<256x128xf32>
    %19 = vector.broadcast %4 : vector<1x128xf32> to vector<256x128xf32>
    %20 = arith.addf %17, %19 : vector<256x128xf32>
    %cst_9 = arith.constant 0.000000e+00 : f32
    %21 = vector.broadcast %cst_9 : f32 to vector<256x128xf32>
    %c0_i32 = arith.constant 0 : i32
    %cst_10 = arith.constant dense<0xFF800000> : vector<256xf32>
    %22 = vector.multi_reduction <maximumf>, %20, %cst_10 [1] : vector<256x128xf32> to vector<256xf32>
    %23 = vector.shape_cast %22 : vector<256xf32> to vector<256x1xf32>
    %24 = vector.broadcast %23 : vector<256x1xf32> to vector<256x128xf32>
    %25 = arith.cmpf oeq, %20, %24 : vector<256x128xf32>
    %26 = arith.extui %25 : vector<256x128xi1> to vector<256x128xi32>
    %27 = arith.sitofp %26 : vector<256x128xi32> to vector<256x128xf32>
    %28 = arith.truncf %27 : vector<256x128xf32> to vector<256x128xbf16>
    %cst_11 = arith.constant dense<0.000000e+00> : vector<256x128xf32>
    %29 = tpu.matmul %28, %5, %cst_11 {dimension_numbers = #tpu.dot_dimension_numbers<[1], [0], [0], [1], [0, 0, 1, 1], [], []>} : vector<256x128xbf16>, vector<128x128xbf16>, vector<256x128xf32> -> vector<256x128xf32>
    %cst_12 = arith.constant 0.000000e+00 : f32
    %30 = vector.broadcast %cst_12 : f32 to vector<256x128xf32>
    %31 = arith.cmpf oeq, %29, %30 : vector<256x128xf32>
    %32 = arith.andi %25, %31 : vector<256x128xi1>
    %33 = arith.select %32, %18, %21 : vector<256x128xi1>, vector<256x128xf32>
    %cst_13 = arith.constant -1.000000e+00 : f32
    %34 = vector.broadcast %cst_13 : f32 to vector<256x128xf32>
    %35 = arith.select %32, %34, %20 : vector<256x128xi1>, vector<256x128xf32>
    %c1_i32 = arith.constant 1 : i32
    %cst_14 = arith.constant dense<0xFF800000> : vector<256xf32>
    %36 = vector.multi_reduction <maximumf>, %35, %cst_14 [1] : vector<256x128xf32> to vector<256xf32>
    %37 = vector.shape_cast %36 : vector<256xf32> to vector<256x1xf32>
    %38 = vector.broadcast %37 : vector<256x1xf32> to vector<256x128xf32>
    %39 = arith.cmpf oeq, %35, %38 : vector<256x128xf32>
    %40 = arith.extui %39 : vector<256x128xi1> to vector<256x128xi32>
    %41 = arith.sitofp %40 : vector<256x128xi32> to vector<256x128xf32>
    %42 = arith.truncf %41 : vector<256x128xf32> to vector<256x128xbf16>
    %cst_15 = arith.constant dense<0.000000e+00> : vector<256x128xf32>
    %43 = tpu.matmul %42, %5, %cst_15 {dimension_numbers = #tpu.dot_dimension_numbers<[1], [0], [0], [1], [0, 0, 1, 1], [], []>} : vector<256x128xbf16>, vector<128x128xbf16>, vector<256x128xf32> -> vector<256x128xf32>
    %cst_16 = arith.constant 0.000000e+00 : f32
    %44 = vector.broadcast %cst_16 : f32 to vector<256x128xf32>
    %45 = arith.cmpf oeq, %43, %44 : vector<256x128xf32>
    %46 = arith.andi %39, %45 : vector<256x128xi1>
    %47 = arith.select %46, %18, %33 : vector<256x128xi1>, vector<256x128xf32>
    %cst_17 = arith.constant -1.000000e+00 : f32
    %48 = vector.broadcast %cst_17 : f32 to vector<256x128xf32>
    %49 = arith.select %46, %48, %35 : vector<256x128xi1>, vector<256x128xf32>
    %c2_i32 = arith.constant 2 : i32
    %cst_18 = arith.constant dense<0xFF800000> : vector<256xf32>
    %50 = vector.multi_reduction <maximumf>, %49, %cst_18 [1] : vector<256x128xf32> to vector<256xf32>
    %51 = vector.shape_cast %50 : vector<256xf32> to vector<256x1xf32>
    %52 = vector.broadcast %51 : vector<256x1xf32> to vector<256x128xf32>
    %53 = arith.cmpf oeq, %49, %52 : vector<256x128xf32>
    %54 = arith.extui %53 : vector<256x128xi1> to vector<256x128xi32>
    %55 = arith.sitofp %54 : vector<256x128xi32> to vector<256x128xf32>
    %56 = arith.truncf %55 : vector<256x128xf32> to vector<256x128xbf16>
    %cst_19 = arith.constant dense<0.000000e+00> : vector<256x128xf32>
    %57 = tpu.matmul %56, %5, %cst_19 {dimension_numbers = #tpu.dot_dimension_numbers<[1], [0], [0], [1], [0, 0, 1, 1], [], []>} : vector<256x128xbf16>, vector<128x128xbf16>, vector<256x128xf32> -> vector<256x128xf32>
    %cst_20 = arith.constant 0.000000e+00 : f32
    %58 = vector.broadcast %cst_20 : f32 to vector<256x128xf32>
    %59 = arith.cmpf oeq, %57, %58 : vector<256x128xf32>
    %60 = arith.andi %53, %59 : vector<256x128xi1>
    %61 = arith.select %60, %18, %47 : vector<256x128xi1>, vector<256x128xf32>
    %cst_21 = arith.constant -1.000000e+00 : f32
    %62 = vector.broadcast %cst_21 : f32 to vector<256x128xf32>
    %63 = arith.select %60, %62, %49 : vector<256x128xi1>, vector<256x128xf32>
    %c3_i32 = arith.constant 3 : i32
    %cst_22 = arith.constant dense<0xFF800000> : vector<256xf32>
    %64 = vector.multi_reduction <maximumf>, %63, %cst_22 [1] : vector<256x128xf32> to vector<256xf32>
    %65 = vector.shape_cast %64 : vector<256xf32> to vector<256x1xf32>
    %66 = vector.broadcast %65 : vector<256x1xf32> to vector<256x128xf32>
    %67 = arith.cmpf oeq, %63, %66 : vector<256x128xf32>
    %68 = arith.extui %67 : vector<256x128xi1> to vector<256x128xi32>
    %69 = arith.sitofp %68 : vector<256x128xi32> to vector<256x128xf32>
    %70 = arith.truncf %69 : vector<256x128xf32> to vector<256x128xbf16>
    %cst_23 = arith.constant dense<0.000000e+00> : vector<256x128xf32>
    %71 = tpu.matmul %70, %5, %cst_23 {dimension_numbers = #tpu.dot_dimension_numbers<[1], [0], [0], [1], [0, 0, 1, 1], [], []>} : vector<256x128xbf16>, vector<128x128xbf16>, vector<256x128xf32> -> vector<256x128xf32>
    %cst_24 = arith.constant 0.000000e+00 : f32
    %72 = vector.broadcast %cst_24 : f32 to vector<256x128xf32>
    %73 = arith.cmpf oeq, %71, %72 : vector<256x128xf32>
    %74 = arith.andi %67, %73 : vector<256x128xi1>
    %75 = arith.select %74, %18, %61 : vector<256x128xi1>, vector<256x128xf32>
    %cst_25 = arith.constant -1.000000e+00 : f32
    %76 = vector.broadcast %cst_25 : f32 to vector<256x128xf32>
    %77 = arith.select %74, %76, %63 : vector<256x128xi1>, vector<256x128xf32>
    %c4_i32 = arith.constant 4 : i32
    %cst_26 = arith.constant dense<0xFF800000> : vector<256xf32>
    %78 = vector.multi_reduction <maximumf>, %77, %cst_26 [1] : vector<256x128xf32> to vector<256xf32>
    %79 = vector.shape_cast %78 : vector<256xf32> to vector<256x1xf32>
    %80 = vector.broadcast %79 : vector<256x1xf32> to vector<256x128xf32>
    %81 = arith.cmpf oeq, %77, %80 : vector<256x128xf32>
    %82 = arith.extui %81 : vector<256x128xi1> to vector<256x128xi32>
    %83 = arith.sitofp %82 : vector<256x128xi32> to vector<256x128xf32>
    %84 = arith.truncf %83 : vector<256x128xf32> to vector<256x128xbf16>
    %cst_27 = arith.constant dense<0.000000e+00> : vector<256x128xf32>
    %85 = tpu.matmul %84, %5, %cst_27 {dimension_numbers = #tpu.dot_dimension_numbers<[1], [0], [0], [1], [0, 0, 1, 1], [], []>} : vector<256x128xbf16>, vector<128x128xbf16>, vector<256x128xf32> -> vector<256x128xf32>
    %cst_28 = arith.constant 0.000000e+00 : f32
    %86 = vector.broadcast %cst_28 : f32 to vector<256x128xf32>
    %87 = arith.cmpf oeq, %85, %86 : vector<256x128xf32>
    %88 = arith.andi %81, %87 : vector<256x128xi1>
    %89 = arith.select %88, %18, %75 : vector<256x128xi1>, vector<256x128xf32>
    %cst_29 = arith.constant -1.000000e+00 : f32
    %90 = vector.broadcast %cst_29 : f32 to vector<256x128xf32>
    %91 = arith.select %88, %90, %77 : vector<256x128xi1>, vector<256x128xf32>
    %c5_i32 = arith.constant 5 : i32
    %cst_30 = arith.constant dense<0xFF800000> : vector<256xf32>
    %92 = vector.multi_reduction <maximumf>, %91, %cst_30 [1] : vector<256x128xf32> to vector<256xf32>
    %93 = vector.shape_cast %92 : vector<256xf32> to vector<256x1xf32>
    %94 = vector.broadcast %93 : vector<256x1xf32> to vector<256x128xf32>
    %95 = arith.cmpf oeq, %91, %94 : vector<256x128xf32>
    %96 = arith.extui %95 : vector<256x128xi1> to vector<256x128xi32>
    %97 = arith.sitofp %96 : vector<256x128xi32> to vector<256x128xf32>
    %98 = arith.truncf %97 : vector<256x128xf32> to vector<256x128xbf16>
    %cst_31 = arith.constant dense<0.000000e+00> : vector<256x128xf32>
    %99 = tpu.matmul %98, %5, %cst_31 {dimension_numbers = #tpu.dot_dimension_numbers<[1], [0], [0], [1], [0, 0, 1, 1], [], []>} : vector<256x128xbf16>, vector<128x128xbf16>, vector<256x128xf32> -> vector<256x128xf32>
    %cst_32 = arith.constant 0.000000e+00 : f32
    %100 = vector.broadcast %cst_32 : f32 to vector<256x128xf32>
    %101 = arith.cmpf oeq, %99, %100 : vector<256x128xf32>
    %102 = arith.andi %95, %101 : vector<256x128xi1>
    %103 = arith.select %102, %18, %89 : vector<256x128xi1>, vector<256x128xf32>
    %cst_33 = arith.constant -1.000000e+00 : f32
    %104 = vector.broadcast %cst_33 : f32 to vector<256x128xf32>
    %105 = arith.select %102, %104, %91 : vector<256x128xi1>, vector<256x128xf32>
    %c6_i32 = arith.constant 6 : i32
    %cst_34 = arith.constant dense<0xFF800000> : vector<256xf32>
    %106 = vector.multi_reduction <maximumf>, %105, %cst_34 [1] : vector<256x128xf32> to vector<256xf32>
    %107 = vector.shape_cast %106 : vector<256xf32> to vector<256x1xf32>
    %108 = vector.broadcast %107 : vector<256x1xf32> to vector<256x128xf32>
    %109 = arith.cmpf oeq, %105, %108 : vector<256x128xf32>
    %110 = arith.extui %109 : vector<256x128xi1> to vector<256x128xi32>
    %111 = arith.sitofp %110 : vector<256x128xi32> to vector<256x128xf32>
    %112 = arith.truncf %111 : vector<256x128xf32> to vector<256x128xbf16>
    %cst_35 = arith.constant dense<0.000000e+00> : vector<256x128xf32>
    %113 = tpu.matmul %112, %5, %cst_35 {dimension_numbers = #tpu.dot_dimension_numbers<[1], [0], [0], [1], [0, 0, 1, 1], [], []>} : vector<256x128xbf16>, vector<128x128xbf16>, vector<256x128xf32> -> vector<256x128xf32>
    %cst_36 = arith.constant 0.000000e+00 : f32
    %114 = vector.broadcast %cst_36 : f32 to vector<256x128xf32>
    %115 = arith.cmpf oeq, %113, %114 : vector<256x128xf32>
    %116 = arith.andi %109, %115 : vector<256x128xi1>
    %117 = arith.select %116, %18, %103 : vector<256x128xi1>, vector<256x128xf32>
    %cst_37 = arith.constant -1.000000e+00 : f32
    %118 = vector.broadcast %cst_37 : f32 to vector<256x128xf32>
    %119 = arith.select %116, %118, %105 : vector<256x128xi1>, vector<256x128xf32>
    %c7_i32 = arith.constant 7 : i32
    %cst_38 = arith.constant dense<0xFF800000> : vector<256xf32>
    %120 = vector.multi_reduction <maximumf>, %119, %cst_38 [1] : vector<256x128xf32> to vector<256xf32>
    %121 = vector.shape_cast %120 : vector<256xf32> to vector<256x1xf32>
    %122 = vector.broadcast %121 : vector<256x1xf32> to vector<256x128xf32>
    %123 = arith.cmpf oeq, %119, %122 : vector<256x128xf32>
    %124 = arith.extui %123 : vector<256x128xi1> to vector<256x128xi32>
    %125 = arith.sitofp %124 : vector<256x128xi32> to vector<256x128xf32>
    %126 = arith.truncf %125 : vector<256x128xf32> to vector<256x128xbf16>
    %cst_39 = arith.constant dense<0.000000e+00> : vector<256x128xf32>
    %127 = tpu.matmul %126, %5, %cst_39 {dimension_numbers = #tpu.dot_dimension_numbers<[1], [0], [0], [1], [0, 0, 1, 1], [], []>} : vector<256x128xbf16>, vector<128x128xbf16>, vector<256x128xf32> -> vector<256x128xf32>
    %cst_40 = arith.constant 0.000000e+00 : f32
    %128 = vector.broadcast %cst_40 : f32 to vector<256x128xf32>
    %129 = arith.cmpf oeq, %127, %128 : vector<256x128xf32>
    %130 = arith.andi %123, %129 : vector<256x128xi1>
    %131 = arith.select %130, %18, %117 : vector<256x128xi1>, vector<256x128xf32>
    %cst_41 = arith.constant -1.000000e+00 : f32
    %132 = vector.broadcast %cst_41 : f32 to vector<256x128xf32>
    %133 = arith.select %130, %132, %119 : vector<256x128xi1>, vector<256x128xf32>
    %c8_i32 = arith.constant 8 : i32
    %cst_42 = arith.constant dense<0xFF800000> : vector<256xf32>
    %134 = vector.multi_reduction <maximumf>, %133, %cst_42 [1] : vector<256x128xf32> to vector<256xf32>
    %135 = vector.shape_cast %134 : vector<256xf32> to vector<256x1xf32>
    %136 = vector.broadcast %135 : vector<256x1xf32> to vector<256x128xf32>
    %137 = arith.cmpf oeq, %133, %136 : vector<256x128xf32>
    %138 = arith.extui %137 : vector<256x128xi1> to vector<256x128xi32>
    %139 = arith.sitofp %138 : vector<256x128xi32> to vector<256x128xf32>
    %140 = arith.truncf %139 : vector<256x128xf32> to vector<256x128xbf16>
    %cst_43 = arith.constant dense<0.000000e+00> : vector<256x128xf32>
    %141 = tpu.matmul %140, %5, %cst_43 {dimension_numbers = #tpu.dot_dimension_numbers<[1], [0], [0], [1], [0, 0, 1, 1], [], []>} : vector<256x128xbf16>, vector<128x128xbf16>, vector<256x128xf32> -> vector<256x128xf32>
    %cst_44 = arith.constant 0.000000e+00 : f32
    %142 = vector.broadcast %cst_44 : f32 to vector<256x128xf32>
    %143 = arith.cmpf oeq, %141, %142 : vector<256x128xf32>
    %144 = arith.andi %137, %143 : vector<256x128xi1>
    %145 = arith.select %144, %18, %131 : vector<256x128xi1>, vector<256x128xf32>
    %cst_45 = arith.constant -1.000000e+00 : f32
    %146 = vector.broadcast %cst_45 : f32 to vector<256x128xf32>
    %147 = arith.select %144, %146, %133 : vector<256x128xi1>, vector<256x128xf32>
    %c9_i32 = arith.constant 9 : i32
    %cst_46 = arith.constant dense<0xFF800000> : vector<256xf32>
    %148 = vector.multi_reduction <maximumf>, %147, %cst_46 [1] : vector<256x128xf32> to vector<256xf32>
    %149 = vector.shape_cast %148 : vector<256xf32> to vector<256x1xf32>
    %150 = vector.broadcast %149 : vector<256x1xf32> to vector<256x128xf32>
    %151 = arith.cmpf oeq, %147, %150 : vector<256x128xf32>
    %152 = arith.extui %151 : vector<256x128xi1> to vector<256x128xi32>
    %153 = arith.sitofp %152 : vector<256x128xi32> to vector<256x128xf32>
    %154 = arith.truncf %153 : vector<256x128xf32> to vector<256x128xbf16>
    %cst_47 = arith.constant dense<0.000000e+00> : vector<256x128xf32>
    %155 = tpu.matmul %154, %5, %cst_47 {dimension_numbers = #tpu.dot_dimension_numbers<[1], [0], [0], [1], [0, 0, 1, 1], [], []>} : vector<256x128xbf16>, vector<128x128xbf16>, vector<256x128xf32> -> vector<256x128xf32>
    %cst_48 = arith.constant 0.000000e+00 : f32
    %156 = vector.broadcast %cst_48 : f32 to vector<256x128xf32>
    %157 = arith.cmpf oeq, %155, %156 : vector<256x128xf32>
    %158 = arith.andi %151, %157 : vector<256x128xi1>
    %159 = arith.select %158, %18, %145 : vector<256x128xi1>, vector<256x128xf32>
    %cst_49 = arith.constant -1.000000e+00 : f32
    %160 = vector.broadcast %cst_49 : f32 to vector<256x128xf32>
    %161 = arith.select %158, %160, %147 : vector<256x128xi1>, vector<256x128xf32>
    %cst_50 = arith.constant dense<0.000000e+00> : vector<256xf32>
    %162 = vector.multi_reduction <add>, %159, %cst_50 [1] : vector<256x128xf32> to vector<256xf32>
    %163 = vector.shape_cast %162 : vector<256xf32> to vector<256x1xf32>
    %164 = tpu.reciprocal %163 {approx = true} : vector<256x1xf32> -> vector<256x1xf32>
    %165 = arith.mulf %163, %164 : vector<256x1xf32>
    %cst_51 = arith.constant 2.000000e+00 : f32
    %166 = vector.broadcast %cst_51 : f32 to vector<256x1xf32>
    %167 = arith.subf %166, %165 : vector<256x1xf32>
    %168 = arith.mulf %164, %167 : vector<256x1xf32>
    %169 = vector.broadcast %168 : vector<256x1xf32> to vector<256x128xf32>
    %170 = arith.mulf %159, %169 : vector<256x128xf32>
    %cst_52 = arith.constant dense<0.000000e+00> : vector<4x256xf32>
    %171 = tpu.matmul %1, %170, %cst_52 {dimension_numbers = #tpu.dot_dimension_numbers<[1], [1], [0], [0], [0, 0, 1, 0], [], []>} : vector<4x128xf32>, vector<256x128xf32>, vector<4x256xf32> -> vector<4x256xf32>
    %c0_53 = arith.constant 0 : index
    %c0_54 = arith.constant 0 : index
    %172 = vector.load %arg5[%c0_53, %c0_54] : memref<4x256xf32, #tpu.memory_space<vmem>>, vector<4x256xf32>
    tpu.vector_store %arg5[%c0_53, %c0_54], %171 {strides = array<i32>} : memref<4x256xf32, #tpu.memory_space<vmem>>, vector<4x256xf32>,
    return
  }
  func.func @transform_0(%arg0: i32) -> (i32, i32) {
    %c0_i32 = arith.constant 0 : i32
    %c0_i32_0 = arith.constant 0 : i32
    return %arg0, %c0_i32 : i32, i32
  }
  func.func @transform_1(%arg0: i32) -> (i32, i32) {
    %c0_i32 = arith.constant 0 : i32
    %c0_i32_0 = arith.constant 0 : i32
    %c0_i32_1 = arith.constant 0 : i32
    return %c0_i32, %c0_i32_0 : i32, i32
  }
  func.func @transform_2(%arg0: i32) -> (i32, i32) {
    %c0_i32 = arith.constant 0 : i32
    %c0_i32_0 = arith.constant 0 : i32
    %c0_i32_1 = arith.constant 0 : i32
    return %c0_i32, %c0_i32_0 : i32, i32
  }
  func.func @transform_3(%arg0: i32) -> (i32, i32) {
    %c0_i32 = arith.constant 0 : i32
    %c0_i32_0 = arith.constant 0 : i32
    %c0_i32_1 = arith.constant 0 : i32
    return %c0_i32, %c0_i32_0 : i32, i32
  }
  func.func @transform_4(%arg0: i32) -> (i32, i32) {
    %c0_i32 = arith.constant 0 : i32
    %c0_i32_0 = arith.constant 0 : i32
    return %c0_i32, %arg0 : i32, i32
  }
}

</mosaic_0001>

<bundles_post_ra>
// kernel: tpu_custom_call.1
= control target key start
LH: loop header
LB: loop body
LE: loop exit
PB: predicated region body
PF: predicated region fallthrough
CT: control target
= control target key end

     0   :  { %9 = vsyncpa [#allocation3], 0  ;;  %s16968_s0 = inlined_call_operand.vmem [shape: f32[512,4], index: 0, kind: input, shape index: {}]   ;;  %s16969_s1 = inlined_call_operand.vmem [shape: f32[4,128], index: 1, kind: input, shape index: {}]   ;;  %s16970_s2 = inlined_call_operand.vmem [shape: f32[2,128], index: 2, kind: input, shape index: {}]   ;;  %s16971_s3 = inlined_call_operand.vmem [shape: bf16[128,128], index: 3, kind: input, shape index: {}]   ;;  %s16972_s4 = inlined_call_operand.hbm [shape: f32[4,512], index: 4, kind: output, shape index: {}]  }
   0x1   :  { %11 = vsyncpa [#allocation3 + $0x1], 0  ;;  %s8002_s15 = smov 0   ;;  %s8004_s16 = smov 0  }
   0x2   :  { %s8006_s17 = smov 0   ;;  %s8008_s18 = smov 0  }
   0x3 LB: > { %s8023_s19 = sadd.s32 4294967295, %s7973_s18   ;;  %s6008_s20 = sadd.s32 4294967294, %s7973_s18   ;;  %s7973_s18 = sphi %s8008_s18, %s20488_s18   ;;  %s7969_s17 = sphi %s8006_s17, %s20487_s17   ;;  %s7965_s16 = sphi %s8004_s16, %s20486_s16   ;;  %s7961_s15 = sphi %s8002_s15, %s20485_s15  }
   0x4   : > { %s8027_s21 = sadd.s32 1, %s7973_s18   ;;  %s113_s22 = sadd.s32 1, %s7969_s17 }
   0x5   : > { %s110_s23 = ssub.s32 %s7973_s18, %s8027_s21  ;;  %p123_p0 = scmp.ne.s32.totalorder %s7969_s17, %s7965_s16 }
   0x6   : > { %p111_p1 = scmp.eq.s32.totalorder %s110_s23, 0  ;;  %p124_p2 = scmp.eq.s32.totalorder %s8023_s19, 1 }
   0x7   : > { %p129_p3 = scmp.ne.s32.totalorder %s7965_s16, %s7961_s15  ;;  %p130_p4 = scmp.eq.s32.totalorder %s6008_s20, 1 }
   0x8   : > { %s8038_s24 = scalar_select %p111_p1, %s7969_s17, %s113_s22  }
   0x9   : > { %p8040_p5 = por %p124_p2, %p123_p0  ;;  %p8044_p6 = por %p130_p4, %p129_p3 }
   0xa   : > { %p6011_p7 = scmp.ge.s32.totalorder %s7973_s18, 1  ;;  %p166_p8 = scmp.lt.s32.totalorder %s7973_s18, 3 }
   0xc   : > { %p167_p9 = pnand %p6011_p7, %p166_p8 }
   0xe   : > { %170 = sbr.rel (%p167_p9) target bundleno = 4719 (0x126f), region = 36 }
  0x15   : > { %v232_v0 = vld [vmem:[%s16969_s1] sm:$0xf]  ;;  %vm351_vm0 = vcmask 1043456   ;;  %s6013_s29 = sshll.u32 %s8023_s19, 5  ;;  %vm254_vm1 = vcmask 31744   ;;  %v250_v33 = vlaneseq  ;;  %s189_s9 = sand.u32 1, %s7965_s16  }
  0x16   : > { %7009 = vmatprep.subr.msk.mxu0 %vm351_vm0, %v232_v0  ;;  %p193_p10 = scmp.lt.s32.totalorder %s6013_s29, 63  ;;  %7571 = vmatprep.subr.msk.mxu1 %vm351_vm0, %v232_v0  ;;  %v8129_v36 = vld [vmem:[%s16970_s2] sm:$0x3]  ;;  %s6012_s10 = sshll.u32 %s189_s9, 3 }
  0x17   : > { %7010 = vmatpush3.msk.msra.mxu0 %vm351_vm0, %v232_v0  ;;  %7572 = vmatpush3.msk.msra.mxu1 %vm351_vm0, %v232_v0  ;;  %v8123_v34 = vshrl.u32 %v250_v33, 7  ;;  %s6701_s11 = sshll.u32 %s8023_s19, 7  ;;  %s191_s12 = scalar_lea.vmem [#allocation2], %s6012_s10 }
  0x18   : > { %s20490_s29 = smov (!%p193_p10, %s6013_s29), 63  ;;  %s5949_s13 = sshll.u32 %s191_s12, 4  ;;  %s16928_s13 = int_to_ptr.vmem [resolvable:$true] %s5949_s13 }
  0x19   : > { %s6014_s30 = sshll.u32 %s20490_s29, 3  ;;  %v252_v35 = vsub.s32 0, %v8123_v34  ;;  %s16926_s22 = scalar_lea.hbm %s16972_s4, %s6701_s11 }
  0x1a   : > { %s8057_s7 = scalar_lea.vmem %s16968_s0, %s6014_s30  ;;  %s5935_s23 = scalar_lea.sflag [#allocation3], %s189_s9 }
  0x1b   : > { %v200_v1 = vld [vmem:[%s8057_s7] sm:$0xff]  ;;  %v201_v2 = vld [vmem:[%s8057_s7 + $0x8] sm:$0xff]  ;;  %v202_v3 = vld [vmem:[%s8057_s7 + $0x10] sm:$0xff]  ;;  %v8132_v37 = vrot.slane %v8129_v36, %v252_v35  ;;  %s7911_s27 = scalar_lea.vmem %s16928_s13, 128  ;;  %s7976_s19 = smov [#allocation2]  }
  0x1c   : > { %7011 = vmatprep.mubr.msk.f32.mxu0 %vm254_vm1, %v200_v1  ;;  %v203_v4 = vld [vmem:[%s8057_s7 + $0x18] sm:$0xff]  ;;  %v204_v5 = vld [vmem:[%s8057_s7 + $0x20] sm:$0xff]  ;;  %v217_v7 = vld [vmem:[%s8057_s7 + $0x88] sm:$0xff]  ;;  %p7912_p11 = scmp.ne.s32.totalorder %s16928_s13, %s7911_s27  ;;  %s7915_s28 = sshll.u32 %s7976_s19, 4  ;;  %s7916_s28 = int_to_ptr.vmem [resolvable:$false] %s7915_s28 }
  0x1d   : > { %7012 = vmatmul.mubr.msk.f32.vlgmr.msra.gmra.mrb[0].mxu0 %vm254_vm1, %v201_v2  ;;  %v216_v6 = vld [vmem:[%s8057_s7 + $0x80] sm:$0xff]  ;;  %v218_v8 = vld [vmem:[%s8057_s7 + $0x90] sm:$0xff]  ;;  %v205_v9 = vld [vmem:[%s8057_s7 + $0x28] sm:$0xff]  ;;  %s7917_s29 = scalar_lea.vmem %s7916_s28, 256  ;;  %p7918_p0 = scmp.lt.s32.totalorder %s16928_s13, %s7916_s28 }
  0x1e   : > { %7014 = vmatprep.mubr.msk.f32.mxu0 %vm254_vm1, %v202_v3  ;;  %7035 = vmatprep.mubr.msk.f32.mxu1 %vm254_vm1, %v216_v6  ;;  %v206_v10 = vld [vmem:[%s8057_s7 + $0x30] sm:$0xff]  ;;  %v219_v11 = vld [vmem:[%s8057_s7 + $0x98] sm:$0xff]  ;;  %v220_v12 = vld [vmem:[%s8057_s7 + $0xa0] sm:$0xff]  ;;  %p7913_p12 = pnand %p7912_p11, %p8040_p5  ;;  %p7919_p1 = scmp.lt.s32.totalorder %s7917_s29, %s7911_s27 }
  0x1f   : > { %7036 = vmatmul.mubr.msk.f32.vlgmr.msra.gmra.mrb[0].mxu1 %vm254_vm1, %v217_v7  ;;  %v207_v13 = vld [vmem:[%s8057_s7 + $0x38] sm:$0xff]  ;;  %v208_v14 = vld [vmem:[%s8057_s7 + $0x40] sm:$0xff]  ;;  %v221_v15 = vld [vmem:[%s8057_s7 + $0xa8] sm:$0xff] }
  0x20   : > { %7038 = vmatprep.mubr.msk.f32.mxu1 %vm254_vm1, %v218_v8  ;;  %v222_v16 = vld [vmem:[%s8057_s7 + $0xb0] sm:$0xff]  ;;  %v209_v17 = vld [vmem:[%s8057_s7 + $0x48] sm:$0xff]  ;;  %v223_v19 = vld [vmem:[%s8057_s7 + $0xb8] sm:$0xff]  ;;  %p7914_p13 = pneg %p7913_p12  ;;  %p7920_p2 = por %p7919_p1, %p7918_p0 }
  0x21   : > { %7015 = vmatmul.mubr.msk.f32.gmra.mrb[2].mxu0 %vm254_vm1, %v203_v4  ;;  %v210_v18 = vld [vmem:[%s8057_s7 + $0x50] sm:$0xff]  ;;  %v224_v20 = vld [vmem:[%s8057_s7 + $0xc0] sm:$0xff]  ;;  %v211_v21 = vld [vmem:[%s8057_s7 + $0x58] sm:$0xff] }
  0x22   : > { %7017 = vmatprep.mubr.msk.f32.mxu0 %vm254_vm1, %v204_v5  ;;  %v212_v22 = vld [vmem:[%s8057_s7 + $0x60] sm:$0xff]  ;;  %v225_v23 = vld [vmem:[%s8057_s7 + $0xc8] sm:$0xff]  ;;  %v226_v24 = vld [vmem:[%s8057_s7 + $0xd0] sm:$0xff]  ;;  %p7921_p3 = pnand %p7920_p2, %p7914_p13 }
  0x23   : > { %7039 = vmatmul.mubr.msk.f32.gmra.mrb[2].mxu1 %vm254_vm1, %v219_v11  ;;  %v213_v25 = vld [vmem:[%s8057_s7 + $0x68] sm:$0xff]  ;;  %v214_v26 = vld [vmem:[%s8057_s7 + $0x70] sm:$0xff]  ;;  %v227_v27 = vld [vmem:[%s8057_s7 + $0xd8] sm:$0xff] }
  0x24   : > { %7041 = vmatprep.mubr.msk.f32.mxu1 %vm254_vm1, %v220_v12  ;;  %v228_v28 = vld [vmem:[%s8057_s7 + $0xe0] sm:$0xff]  ;;  %v215_v29 = vld [vmem:[%s8057_s7 + $0x78] sm:$0xff]  ;;  %v229_v30 = vld [vmem:[%s8057_s7 + $0xe8] sm:$0xff] }
  0x25   : > { %7018 = vmatmul.mubr.msk.f32.gmra.mrb[4].mxu0 %vm254_vm1, %v205_v9  ;;  %v230_v31 = vld [vmem:[%s8057_s7 + $0xf0] sm:$0xff]  ;;  %v231_v32 = vld [vmem:[%s8057_s7 + $0xf8] sm:$0xff] }
  0x26   : > { %7020 = vmatprep.mubr.msk.f32.mxu0 %vm254_vm1, %v206_v10 }
  0x27   : > { %7042 = vmatmul.mubr.msk.f32.gmra.mrb[4].mxu1 %vm254_vm1, %v221_v15 }
  0x28   : > { %7044 = vmatprep.mubr.msk.f32.mxu1 %vm254_vm1, %v222_v16 }
  0x29   : > { %7021 = vmatmul.mubr.msk.f32.gmra.mrb[6].mxu0 %vm254_vm1, %v207_v13 }
  0x2a   : > { %7023 = vmatprep.mubr.msk.f32.mxu0 %vm254_vm1, %v208_v14 }
  0x2b   : > { %7045 = vmatmul.mubr.msk.f32.gmra.mrb[6].mxu1 %vm254_vm1, %v223_v19 }
  0x2c   : > { %7047 = vmatprep.mubr.msk.f32.mxu1 %vm254_vm1, %v224_v20 }
  0x2d   : > { %7024 = vmatmul.mubr.msk.f32.gmra.mrb[8].mxu0 %vm254_vm1, %v209_v17 }
  0x2e   : > { %7026 = vmatprep.mubr.msk.f32.mxu0 %vm254_vm1, %v210_v18 }
  0x2f   : > { %7048 = vmatmul.mubr.msk.f32.gmra.mrb[8].mxu1 %vm254_vm1, %v225_v23 }
  0x30   : > { %7050 = vmatprep.mubr.msk.f32.mxu1 %vm254_vm1, %v226_v24 }
  0x31   : > { %7027 = vmatmul.mubr.msk.f32.gmra.mrb[10].mxu0 %vm254_vm1, %v211_v21 }
  0x32   : > { %7029 = vmatprep.mubr.msk.f32.mxu0 %vm254_vm1, %v212_v22 }
  0x33   : > { %7051 = vmatmul.mubr.msk.f32.gmra.mrb[10].mxu1 %vm254_vm1, %v227_v27 }
  0x34   : > { %7053 = vmatprep.mubr.msk.f32.mxu1 %vm254_vm1, %v228_v28 }
  0x35   : > { %7030 = vmatmul.mubr.msk.f32.gmra.mrb[12].mxu0 %vm254_vm1, %v213_v25 }
  0x36   : > { %7032 = vmatprep.mubr.msk.f32.mxu0 %vm254_vm1, %v214_v26 }
  0x37   : > { %7054 = vmatmul.mubr.msk.f32.gmra.mrb[12].mxu1 %vm254_vm1, %v229_v30 }
  0x38   : > { %7056 = vmatprep.mubr.msk.f32.mxu1 %vm254_vm1, %v230_v31 }
  0x39   : > { %7033 = vmatmul.mubr.msk.f32.gmra.mrb[14].mxu0 %vm254_vm1, %v215_v29 }
  0x3b   : > { %7057 = vmatmul.mubr.msk.f32.gmra.mrb[14].mxu1 %vm254_vm1, %v231_v32 }
  0xf0   : > { %v7013_v38 = vpop.f32.mrb[0].mxu0 }
  0xf1   : > { %v421_v39 = vpop.f32.mrb[1].mxu0  ;;  %v8142_v45 = vadd.f32 %v7013_v38, %v8132_v37 }
  0xf2   : > { %v8135_v40 = vadd.f32 %v421_v39, %v8132_v37  ;;  %v7037_v44 = vpop.f32.mrb[0].mxu1 }
  0xf3   : > { %v501_v46 = vpop.f32.mrb[1].mxu1  ;;  %v8204_v24 = vadd.f32 %v7037_v44, %v8132_v37 }
  0xf4   : > { %v7016_v41 = vpop.f32.mrb[2].mxu0  ;;  %580 = vmax.xlane.f32.xlu0 %v8135_v40  ;;  %v8198_v20 = vadd.f32 %v501_v46, %v8132_v37 }
  0xf5   : > { %v8139_v42 = vadd.f32 %v7016_v41, %v8132_v37  ;;  %v431_v43 = vpop.f32.mrb[3].mxu0 }
  0xf6   : > { %v8147_v48 = vadd.f32 %v431_v43, %v8132_v37  ;;  %v7040_v50 = vpop.f32.mrb[2].mxu1 }
  0xf7   : > { %586 = vmax.xlane.f32.xlu1 %v8139_v42  ;;  %v511_v52 = vpop.f32.mrb[3].mxu1  ;;  %v8212_v26 = vadd.f32 %v7040_v50, %v8132_v37 }
  0xf8   : > { %v7019_v47 = vpop.f32.mrb[4].mxu0  ;;  %582 = vmax.xlane.f32.xlu0 %v8142_v45  ;;  %v8209_v25 = vadd.f32 %v511_v52, %v8132_v37 }
  0xf9   : > { %v441_v49 = vpop.f32.mrb[5].mxu0  ;;  %v8153_v53 = vadd.f32 %v7019_v47, %v8132_v37 }
  0xfa   : > { %v8150_v51 = vadd.f32 %v441_v49, %v8132_v37  ;;  %v7043_v56 = vpop.f32.mrb[4].mxu1 }
  0xfb   : > { %584 = vmax.xlane.f32.xlu1 %v8147_v48  ;;  %v521_v58 = vpop.f32.mrb[5].mxu1  ;;  %v8220_v28 = vadd.f32 %v7043_v56, %v8132_v37 }
  0xfc   : > { %v7022_v54 = vpop.f32.mrb[6].mxu0  ;;  %588 = vmax.xlane.f32.xlu0 %v8150_v51  ;;  %v8217_v27 = vadd.f32 %v521_v58, %v8132_v37 }
  0xfd   : > { %v451_v55 = vpop.f32.mrb[7].mxu0  ;;  %v8161_v59 = vadd.f32 %v7022_v54, %v8132_v37 }
  0xfe   : > { %v8158_v57 = vadd.f32 %v451_v55, %v8132_v37  ;;  %v7046_v62 = vpop.f32.mrb[6].mxu1 }
  0xff   : > { %590 = vmax.xlane.f32.xlu1 %v8153_v53  ;;  %v531_v0 = vpop.f32.mrb[7].mxu1  ;;  %v8228_v30 = vadd.f32 %v7046_v62, %v8132_v37 }
 0x100   : > { %v7025_v60 = vpop.f32.mrb[8].mxu0  ;;  %592 = vmax.xlane.f32.xlu0 %v8158_v57  ;;  %v8225_v29 = vadd.f32 %v531_v0, %v8132_v37 }
 0x101   : > { %v461_v61 = vpop.f32.mrb[9].mxu0  ;;  %v8169_v1 = vadd.f32 %v7025_v60, %v8132_v37 }
 0x102   : > { %v8166_v63 = vadd.f32 %v461_v61, %v8132_v37  ;;  %v7049_v4 = vpop.f32.mrb[8].mxu1 }
 0x103   : > { %594 = vmax.xlane.f32.xlu1 %v8161_v59  ;;  %v541_v6 = vpop.f32.mrb[9].mxu1  ;;  %v8236_v32 = vadd.f32 %v7049_v4, %v8132_v37 }
 0x104   : > { %v7028_v2 = vpop.f32.mrb[10].mxu0  ;;  %596 = vmax.xlane.f32.xlu0 %v8166_v63  ;;  %v8233_v31 = vadd.f32 %v541_v6, %v8132_v37 }
 0x105   : > { %v471_v3 = vpop.f32.mrb[11].mxu0  ;;  %v8177_v7 = vadd.f32 %v7028_v2, %v8132_v37 }
 0x106   : > { %v8174_v5 = vadd.f32 %v471_v3, %v8132_v37  ;;  %v7052_v10 = vpop.f32.mrb[10].mxu1 }
 0x107   : > { %598 = vmax.xlane.f32.xlu1 %v8169_v1  ;;  %v551_v12 = vpop.f32.mrb[11].mxu1  ;;  %v8244_v35 = vadd.f32 %v7052_v10, %v8132_v37 }
 0x108   : > { %v7031_v8 = vpop.f32.mrb[12].mxu0  ;;  %600 = vmax.xlane.f32.xlu0 %v8174_v5  ;;  %v8241_v33 = vadd.f32 %v551_v12, %v8132_v37 }
 0x109   : > { %v481_v9 = vpop.f32.mrb[13].mxu0  ;;  %v8185_v13 = vadd.f32 %v7031_v8, %v8132_v37 }
 0x10a   : > { %v8182_v11 = vadd.f32 %v481_v9, %v8132_v37  ;;  %v7055_v16 = vpop.f32.mrb[12].mxu1 }
 0x10b   : > { %602 = vmax.xlane.f32.xlu1 %v8177_v7  ;;  %v561_v18 = vpop.f32.mrb[13].mxu1  ;;  %v8252_v39 = vadd.f32 %v7055_v16, %v8132_v37 }
 0x10c   : > { %v7034_v14 = vpop.f32.mrb[14].mxu0  ;;  %604 = vmax.xlane.f32.xlu0 %v8182_v11  ;;  %v8249_v38 = vadd.f32 %v561_v18, %v8132_v37 }
 0x10d   : > { %v491_v15 = vpop.f32.mrb[15].mxu0  ;;  %v8193_v19 = vadd.f32 %v7034_v14, %v8132_v37 }
 0x10e   : > { %v8190_v17 = vadd.f32 %v491_v15, %v8132_v37  ;;  %v7058_v21 = vpop.f32.mrb[14].mxu1 }
 0x10f   : > { %606 = vmax.xlane.f32.xlu1 %v8185_v13  ;;  %v8201_v22 = vadd.f32 %v7058_v21, %v8132_v37  ;;  %v571_v23 = vpop.f32.mrb[15].mxu1 }
 0x110   : > { %608 = vmax.xlane.f32.xlu0 %v8190_v17  ;;  %v8257_v41 = vadd.f32 %v571_v23, %v8132_v37 }
 0x113   : > { %610 = vmax.xlane.f32.xlu1 %v8193_v19 }
 0x114   : > { %612 = vmax.xlane.f32.xlu0 %v8198_v20 }
 0x117   : > { %614 = vmax.xlane.f32.xlu1 %v8204_v24 }
 0x118   : > { %616 = vmax.xlane.f32.xlu0 %v8209_v25 }
 0x11b   : > { %618 = vmax.xlane.f32.xlu1 %v8212_v26 }
 0x11c   : > { %620 = vmax.xlane.f32.xlu0 %v8217_v27 }
 0x11f   : > { %622 = vmax.xlane.f32.xlu1 %v8220_v28 }
 0x120   : > { %624 = vmax.xlane.f32.xlu0 %v8225_v29 }
 0x123   : > { %626 = vmax.xlane.f32.xlu1 %v8228_v30 }
 0x124   : > { %628 = vmax.xlane.f32.xlu0 %v8233_v31 }
 0x127   : > { %630 = vmax.xlane.f32.xlu1 %v8236_v32 }
 0x128   : > { %632 = vmax.xlane.f32.xlu0 %v8241_v33 }
 0x12b   : > { %634 = vmax.xlane.f32.xlu1 %v8244_v35 }
 0x12c   : > { %636 = vmax.xlane.f32.xlu0 %v8249_v38 }
 0x12f   : > { %638 = vmax.xlane.f32.xlu1 %v8252_v39 }
 0x130   : > { %640 = vmax.xlane.f32.xlu0 %v8257_v41 }
 0x133   : > { %642 = vmax.xlane.f32.xlu1 %v8201_v22 }
 0x181   : > { %v581_v43 = vpop.xlane.xlu0 %580 }
 0x182   : > { %v644_v44 = vsub.f32 %v8135_v40, %v581_v43 }
 0x184   : > { %v676_v46 = vmul.f32 1.442695, %v644_v44  ;;  %v587_v47 = vpop.xlane.xlu1 %586 }
 0x185   : > { %v583_v49 = vpop.xlane.xlu0 %582  ;;  %v647_v50 = vsub.f32 %v8139_v42, %v587_v47 }
 0x186   : > { %7621 = vpow2.f32 %v676_v46  ;;  %v645_v52 = vsub.f32 %v8142_v45, %v583_v49 }
 0x187   : > { %v682_v58 = vmul.f32 1.442695, %v647_v50 }
 0x188   : > { %v678_v54 = vmul.f32 1.442695, %v645_v52  ;;  %v585_v37 = vpop.xlane.xlu1 %584 }
 0x189   : > { %v646_v55 = vsub.f32 %v8147_v48, %v585_v37  ;;  %v589_v56 = vpop.xlane.xlu0 %588 }
 0x18a   : > { %7623 = vpow2.f32 %v678_v54  ;;  %v648_v60 = vsub.f32 %v8150_v51, %v589_v56 }
 0x18b   : > { %v680_v61 = vmul.f32 1.442695, %v646_v55 }
 0x18c   : > { %v684_v62 = vmul.f32 1.442695, %v648_v60  ;;  %v591_v40 = vpop.xlane.xlu1 %590 }
 0x18d   : > { %7625 = vpow2.f32 %v680_v61  ;;  %v649_v0 = vsub.f32 %v8153_v53, %v591_v40  ;;  %v593_v2 = vpop.xlane.xlu0 %592 }
 0x18e   : > { %7627 = vpow2.f32 %v682_v58  ;;  %v650_v42 = vsub.f32 %v8158_v57, %v593_v2 }
 0x18f   : > { %v686_v45 = vmul.f32 1.442695, %v649_v0  ;;  %7629 = vpow2.f32 %v684_v62 }
 0x190   : > { %v8269_v3 = vpop.eup %7621  ;;  %v688_v48 = vmul.f32 1.442695, %v650_v42  ;;  %v595_v4 = vpop.xlane.xlu1 %594 }
 0x191   : > { %7631 = vpow2.f32 %v686_v45  ;;  %v651_v6 = vsub.f32 %v8161_v59, %v595_v4  ;;  %740 = vadd.xlane.f32.xlu0 %v8269_v3  ;;  %v597_v51 = vpop.xlane.xlu0 %596 }
 0x192   : > { %v652_v8 = vsub.f32 %v8166_v63, %v597_v51  ;;  %7633 = vpow2.f32 %v688_v48 }
 0x193   : > { %v690_v9 = vmul.f32 1.442695, %v651_v6 }
 0x194   : > { %v8274_v53 = vpop.eup %7623  ;;  %v692_v10 = vmul.f32 1.442695, %v652_v8  ;;  %v599_v57 = vpop.xlane.xlu1 %598 }
 0x195   : > { %7635 = vpow2.f32 %v690_v9  ;;  %v653_v12 = vsub.f32 %v8169_v1, %v599_v57  ;;  %742 = vadd.xlane.f32.xlu1 %v8274_v53  ;;  %v601_v14 = vpop.xlane.xlu0 %600 }
 0x196   : > { %v654_v15 = vsub.f32 %v8174_v5, %v601_v14  ;;  %7637 = vpow2.f32 %v692_v10 }
 0x197   : > { %v8279_v59 = vpop.eup %7625  ;;  %v694_v16 = vmul.f32 1.442695, %v653_v12 }
 0x198   : > { %v8281_v18 = vpop.eup %7627  ;;  %v696_v63 = vmul.f32 1.442695, %v654_v15  ;;  %v603_v21 = vpop.xlane.xlu1 %602  ;;  %744 = vadd.xlane.f32.xlu0 %v8279_v59 }
 0x199   : > { %7639 = vpow2.f32 %v694_v16  ;;  %v655_v23 = vsub.f32 %v8177_v7, %v603_v21  ;;  %746 = vadd.xlane.f32.xlu1 %v8281_v18  ;;  %v605_v1 = vpop.xlane.xlu0 %604  ;;  %v8286_v43 = vpop.eup %7629 }
 0x19a   : > { %v656_v5 = vsub.f32 %v8182_v11, %v605_v1  ;;  %7641 = vpow2.f32 %v696_v63 }
 0x19b   : > { %v8289_v44 = vpop.eup %7631  ;;  %v698_v46 = vmul.f32 1.442695, %v655_v23 }
 0x19c   : > { %v700_v47 = vmul.f32 1.442695, %v656_v5  ;;  %v607_v49 = vpop.xlane.xlu1 %606  ;;  %748 = vadd.xlane.f32.xlu0 %v8286_v43  ;;  %v8294_v52 = vpop.eup %7633 }
 0x19d   : > { %7643 = vpow2.f32 %v698_v46  ;;  %v657_v50 = vsub.f32 %v8185_v13, %v607_v49  ;;  %750 = vadd.xlane.f32.xlu1 %v8289_v44  ;;  %v609_v7 = vpop.xlane.xlu0 %608 }
 0x19e   : > { %v658_v54 = vsub.f32 %v8190_v17, %v609_v7  ;;  %7645 = vpow2.f32 %v700_v47 }
 0x19f   : > { %v8297_v37 = vpop.eup %7635  ;;  %v702_v11 = vmul.f32 1.442695, %v657_v50 }
 0x1a0   : > { %v704_v55 = vmul.f32 1.442695, %v658_v54  ;;  %v611_v56 = vpop.xlane.xlu1 %610  ;;  %752 = vadd.xlane.f32.xlu0 %v8294_v52  ;;  %v8302_v60 = vpop.eup %7637 }
 0x1a1   : > { %7647 = vpow2.f32 %v702_v11  ;;  %v659_v58 = vsub.f32 %v8193_v19, %v611_v56  ;;  %754 = vadd.xlane.f32.xlu1 %v8297_v37  ;;  %v613_v13 = vpop.xlane.xlu0 %612 }
 0x1a2   : > { %v660_v61 = vsub.f32 %v8198_v20, %v613_v13  ;;  %7649 = vpow2.f32 %v704_v55 }
 0x1a3   : > { %v8305_v62 = vpop.eup %7639  ;;  %v706_v17 = vmul.f32 1.442695, %v659_v58 }
 0x1a4   : > { %v708_v40 = vmul.f32 1.442695, %v660_v61  ;;  %v615_v0 = vpop.xlane.xlu1 %614  ;;  %756 = vadd.xlane.f32.xlu0 %v8302_v60  ;;  %v8310_v42 = vpop.eup %7641 }
 0x1a5   : > { %7651 = vpow2.f32 %v706_v17  ;;  %v661_v2 = vsub.f32 %v8204_v24, %v615_v0  ;;  %758 = vadd.xlane.f32.xlu1 %v8305_v62  ;;  %v617_v19 = vpop.xlane.xlu0 %616 }
 0x1a6   : > { %v662_v45 = vsub.f32 %v8209_v25, %v617_v19  ;;  %7653 = vpow2.f32 %v708_v40 }
 0x1a7   : > { %v8313_v48 = vpop.eup %7643  ;;  %v710_v20 = vmul.f32 1.442695, %v661_v2 }
 0x1a8   : > { %v712_v4 = vmul.f32 1.442695, %v662_v45  ;;  %v619_v6 = vpop.xlane.xlu1 %618  ;;  %760 = vadd.xlane.f32.xlu0 %v8310_v42  ;;  %v8318_v8 = vpop.eup %7645 }
 0x1a9   : > { %7655 = vpow2.f32 %v710_v20  ;;  %v663_v51 = vsub.f32 %v8212_v26, %v619_v6  ;;  %762 = vadd.xlane.f32.xlu1 %v8313_v48  ;;  %v621_v24 = vpop.xlane.xlu0 %620 }
 0x1aa   : > { %v664_v9 = vsub.f32 %v8217_v27, %v621_v24  ;;  %7657 = vpow2.f32 %v712_v4 }
 0x1ab   : > { %v8321_v10 = vpop.eup %7647  ;;  %v714_v25 = vmul.f32 1.442695, %v663_v51 }
 0x1ac   : > { %v716_v57 = vmul.f32 1.442695, %v664_v9  ;;  %v623_v12 = vpop.xlane.xlu1 %622  ;;  %764 = vadd.xlane.f32.xlu0 %v8318_v8  ;;  %v8326_v15 = vpop.eup %7649 }
 0x1ad   : > { %7659 = vpow2.f32 %v714_v25  ;;  %v665_v14 = vsub.f32 %v8220_v28, %v623_v12  ;;  %766 = vadd.xlane.f32.xlu1 %v8321_v10  ;;  %v625_v26 = vpop.xlane.xlu0 %624 }
 0x1ae   : > { %v666_v16 = vsub.f32 %v8225_v29, %v625_v26  ;;  %7661 = vpow2.f32 %v716_v57 }
 0x1af   : > { %v8329_v63 = vpop.eup %7651  ;;  %v718_v27 = vmul.f32 1.442695, %v665_v14 }
 0x1b0   : > { %v720_v21 = vmul.f32 1.442695, %v666_v16  ;;  %v627_v23 = vpop.xlane.xlu1 %626  ;;  %768 = vadd.xlane.f32.xlu0 %v8326_v15  ;;  %v8334_v5 = vpop.eup %7653  ;;  %v8393_v16 = vld [vmem:[%s16971_s3] sm:$0xff]  }
 0x1b1   : > { %7663 = vpow2.f32 %v718_v27  ;;  %v667_v1 = vsub.f32 %v8228_v30, %v627_v23  ;;  %770 = vadd.xlane.f32.xlu1 %v8329_v63  ;;  %v629_v28 = vpop.xlane.xlu0 %628  ;;  %v8398_v27 = vld [vmem:[%s16971_s3 + $0x8] sm:$0xff]   ;;  %7059 = vmatprep.subr.bf16.mxu1 %v8393_v16  ;;  %v8417_v23 = vld [vmem:[%s16971_s3 + $0x18] sm:$0xff]  }
 0x1b2   : > { %v668_v46 = vsub.f32 %v8233_v31, %v629_v28  ;;  %7665 = vpow2.f32 %v720_v21  ;;  %7107 = vmatprep.subr.bf16.mxu0 %v8393_v16  ;;  %7060 = vmatpush3.bf16.msra.mxu1 %v8393_v16  ;;  %v8408_v21 = vld [vmem:[%s16971_s3 + $0x10] sm:$0xff]   ;;  %v8435_v28 = vld [vmem:[%s16971_s3 + $0x28] sm:$0xff]  }
 0x1b3   : > { %v8337_v47 = vpop.eup %7655  ;;  %v722_v29 = vmul.f32 1.442695, %v667_v1  ;;  %7108 = vmatpush3.bf16.msra.mxu0 %v8393_v16  ;;  %7061 = vmatprep.subr.bf16.mxu1 %v8398_v27  ;;  %v8426_v1 = vld [vmem:[%s16971_s3 + $0x20] sm:$0xff]  }
 0x1b4   : > { %v724_v49 = vmul.f32 1.442695, %v668_v46  ;;  %v631_v50 = vpop.xlane.xlu1 %630  ;;  %772 = vadd.xlane.f32.xlu0 %v8334_v5  ;;  %v8342_v54 = vpop.eup %7657  ;;  %7109 = vmatprep.subr.bf16.mxu0 %v8398_v27 }
 0x1b5   : > { %7667 = vpow2.f32 %v722_v29  ;;  %v669_v7 = vsub.f32 %v8236_v32, %v631_v50  ;;  %774 = vadd.xlane.f32.xlu1 %v8337_v47  ;;  %v633_v30 = vpop.xlane.xlu0 %632 }
 0x1b6   : > { %v670_v11 = vsub.f32 %v8241_v33, %v633_v30  ;;  %7669 = vpow2.f32 %v724_v49  ;;  %7062 = vmatpush3.bf16.msra.mxu1 %v8398_v27  ;;  %v934_v49 = vsub.s32 1, %v8123_v34 }
 0x1b7   : > { %v8345_v55 = vpop.eup %7659  ;;  %v726_v31 = vmul.f32 1.442695, %v669_v7  ;;  %7110 = vmatpush3.bf16.msra.mxu0 %v8398_v27  ;;  %7063 = vmatprep.subr.bf16.mxu1 %v8408_v21 }
 0x1b8   : > { %v728_v56 = vmul.f32 1.442695, %v670_v11  ;;  %v635_v58 = vpop.xlane.xlu1 %634  ;;  %776 = vadd.xlane.f32.xlu0 %v8342_v54  ;;  %v8350_v61 = vpop.eup %7661  ;;  %7111 = vmatprep.subr.bf16.mxu0 %v8408_v21  ;;  %v8446_v30 = vrot.slane %v8129_v36, %v934_v49 }
 0x1b9   : > { %7671 = vpow2.f32 %v726_v31  ;;  %v671_v13 = vsub.f32 %v8244_v35, %v635_v58  ;;  %778 = vadd.xlane.f32.xlu1 %v8345_v55  ;;  %v637_v32 = vpop.xlane.xlu0 %636 }
 0x1ba   : > { %v672_v17 = vsub.f32 %v8249_v38, %v637_v32  ;;  %7673 = vpow2.f32 %v728_v56  ;;  %7064 = vmatpush3.bf16.msra.mxu1 %v8408_v21 }
 0x1bb   : > { %v8353_v40 = vpop.eup %7663  ;;  %v730_v33 = vmul.f32 1.442695, %v671_v13  ;;  %7112 = vmatpush3.bf16.msra.mxu0 %v8408_v21  ;;  %7065 = vmatprep.subr.bf16.mxu1 %v8417_v23 }
 0x1bc   : > { %v732_v0 = vmul.f32 1.442695, %v672_v17  ;;  %v639_v2 = vpop.xlane.xlu1 %638  ;;  %780 = vadd.xlane.f32.xlu0 %v8350_v61  ;;  %v8358_v45 = vpop.eup %7665  ;;  %7113 = vmatprep.subr.bf16.mxu0 %v8417_v23 }
 0x1bd   : > { %7675 = vpow2.f32 %v730_v33  ;;  %v673_v19 = vsub.f32 %v8252_v39, %v639_v2  ;;  %782 = vadd.xlane.f32.xlu1 %v8353_v40  ;;  %v641_v35 = vpop.xlane.xlu0 %640 }
 0x1be   : > { %v674_v20 = vsub.f32 %v8257_v41, %v641_v35  ;;  %7677 = vpow2.f32 %v732_v0  ;;  %7066 = vmatpush3.bf16.msra.mxu1 %v8417_v23 }
 0x1bf   : > { %v8361_v4 = vpop.eup %7667  ;;  %v734_v38 = vmul.f32 1.442695, %v673_v19  ;;  %7114 = vmatpush3.bf16.msra.mxu0 %v8417_v23  ;;  %7067 = vmatprep.subr.bf16.mxu1 %v8426_v1 }
 0x1c0   : > { %v736_v6 = vmul.f32 1.442695, %v674_v20  ;;  %v643_v51 = vpop.xlane.xlu1 %642  ;;  %784 = vadd.xlane.f32.xlu0 %v8358_v45  ;;  %v8366_v39 = vpop.eup %7669  ;;  %7115 = vmatprep.subr.bf16.mxu0 %v8426_v1 }
 0x1c1   : > { %7679 = vpow2.f32 %v734_v38  ;;  %v675_v24 = vsub.f32 %v8201_v22, %v643_v51  ;;  %786 = vadd.xlane.f32.xlu1 %v8361_v4 }
 0x1c2   : > { %7681 = vpow2.f32 %v736_v6  ;;  %7068 = vmatpush3.bf16.msra.mxu1 %v8426_v1 }
 0x1c3   : > { %v8368_v9 = vpop.eup %7671  ;;  %v738_v25 = vmul.f32 1.442695, %v675_v24  ;;  %7116 = vmatpush3.bf16.msra.mxu0 %v8426_v1  ;;  %7069 = vmatprep.subr.bf16.mxu1 %v8435_v28 }
 0x1c4   : > { %788 = vadd.xlane.f32.xlu0 %v8366_v39  ;;  %v8372_v41 = vpop.eup %7673  ;;  %7117 = vmatprep.subr.bf16.mxu0 %v8435_v28 }
 0x1c5   : > { %7683 = vpow2.f32 %v738_v25  ;;  %790 = vadd.xlane.f32.xlu1 %v8368_v9 }
 0x1c6   : > { %7070 = vmatpush3.bf16.msra.mxu1 %v8435_v28 }
 0x1c7   : > { %v8374_v57 = vpop.eup %7675  ;;  %7118 = vmatpush3.bf16.msra.mxu0 %v8435_v28 }
 0x1c8   : > { %792 = vadd.xlane.f32.xlu0 %v8372_v41  ;;  %v8378_v22 = vpop.eup %7677 }
 0x1c9   : > { %794 = vadd.xlane.f32.xlu1 %v8374_v57 }
 0x1cb   : > { %v8380_v12 = vpop.eup %7679 }
 0x1cc   : > { %796 = vadd.xlane.f32.xlu0 %v8378_v22  ;;  %v8384_v14 = vpop.eup %7681 }
 0x1cd   : > { %798 = vadd.xlane.f32.xlu1 %v8380_v12 }
 0x1cf   : > { %v8386_v26 = vpop.eup %7683 }
 0x1d0   : > { %800 = vadd.xlane.f32.xlu0 %v8384_v14 }
 0x1d1   : > { %802 = vadd.xlane.f32.xlu1 %v8386_v26 }
 0x21e   : > { %v741_v46 = vpop.xlane.xlu0 %740 }
 0x21f   : > { %7685 = vrcp.f32 %v741_v46 }
 0x222   : > { %v743_v29 = vpop.xlane.xlu1 %742 }
 0x223   : > { %7687 = vrcp.f32 %v743_v29 }
 0x225   : > { %v745_v50 = vpop.xlane.xlu0 %744 }
 0x226   : > { %7689 = vrcp.f32 %v745_v50  ;;  %v747_v7 = vpop.xlane.xlu1 %746 }
 0x227   : > { %7691 = vrcp.f32 %v747_v7 }
 0x229   : > { %v7686_v11 = vpop.eup %7685  ;;  %v749_v31 = vpop.xlane.xlu0 %748 }
 0x22a   : > { %7693 = vrcp.f32 %v749_v31  ;;  %v751_v56 = vpop.xlane.xlu1 %750  ;;  %v8449_v58 = vmul.f32 %v7686_v11, %v8269_v3 }
 0x22b   : > { %7695 = vrcp.f32 %v751_v56 }
 0x22c   : > { %v8453_v13 = vadd.f32 %v8446_v30, %v8449_v58 }
 0x22d   : > { %v7688_v34 = vpop.eup %7687  ;;  %v753_v32 = vpop.xlane.xlu0 %752 }
 0x22e   : > { %7697 = vrcp.f32 %v753_v32  ;;  %v755_v17 = vpop.xlane.xlu1 %754  ;;  %968 = vmax.xlane.f32.xlu0 %v8453_v13  ;;  %v8457_v36 = vmul.f32 %v7688_v34, %v8274_v53 }
 0x22f   : > { %7699 = vrcp.f32 %v755_v17 }
 0x230   : > { %v7690_v33 = vpop.eup %7689  ;;  %v8461_v3 = vadd.f32 %v8446_v30, %v8457_v36 }
 0x231   : > { %v7692_v0 = vpop.eup %7691  ;;  %v757_v2 = vpop.xlane.xlu0 %756  ;;  %v8464_v19 = vmul.f32 %v7690_v33, %v8279_v59 }
 0x232   : > { %7701 = vrcp.f32 %v757_v2  ;;  %970 = vmax.xlane.f32.xlu1 %v8461_v3  ;;  %v759_v35 = vpop.xlane.xlu1 %758  ;;  %v8468_v20 = vmul.f32 %v7692_v0, %v8281_v18 }
 0x233   : > { %v8472_v53 = vadd.f32 %v8446_v30, %v8464_v19  ;;  %7703 = vrcp.f32 %v759_v35 }
 0x234   : > { %v7694_v38 = vpop.eup %7693  ;;  %v8476_v6 = vadd.f32 %v8446_v30, %v8468_v20 }
 0x235   : > { %v7696_v51 = vpop.eup %7695  ;;  %972 = vmax.xlane.f32.xlu0 %v8472_v53  ;;  %v761_v59 = vpop.xlane.xlu0 %760  ;;  %v8480_v24 = vmul.f32 %v7694_v38, %v8286_v43 }
 0x236   : > { %7705 = vrcp.f32 %v761_v59  ;;  %974 = vmax.xlane.f32.xlu1 %v8476_v6  ;;  %v763_v18 = vpop.xlane.xlu1 %762  ;;  %v8484_v25 = vmul.f32 %v7696_v51, %v8289_v44 }
 0x237   : > { %v8488_v46 = vadd.f32 %v8446_v30, %v8480_v24  ;;  %7707 = vrcp.f32 %v763_v18 }
 0x238   : > { %v7698_v29 = vpop.eup %7697  ;;  %v8492_v49 = vadd.f32 %v8446_v30, %v8484_v25 }
 0x239   : > { %v7700_v50 = vpop.eup %7699  ;;  %976 = vmax.xlane.f32.xlu0 %v8488_v46  ;;  %v765_v43 = vpop.xlane.xlu0 %764  ;;  %v8496_v7 = vmul.f32 %v7698_v29, %v8294_v52  ;;  %v8513_v52 = vld [vmem:[%s16971_s3 + $0x30] sm:$0xff]  }
 0x23a   : > { %7709 = vrcp.f32 %v765_v43  ;;  %978 = vmax.xlane.f32.xlu1 %v8492_v49  ;;  %v767_v44 = vpop.xlane.xlu1 %766  ;;  %v8500_v11 = vmul.f32 %v7700_v50, %v8297_v37  ;;  %7071 = vmatprep.subr.bf16.mxu1 %v8513_v52 }
 0x23b   : > { %v8504_v31 = vadd.f32 %v8446_v30, %v8496_v7  ;;  %7711 = vrcp.f32 %v767_v44  ;;  %7072 = vmatpush3.bf16.msra.mxu1 %v8513_v52  ;;  %7119 = vmatprep.subr.bf16.mxu0 %v8513_v52 }
 0x23c   : > { %v7702_v56 = vpop.eup %7701  ;;  %v8508_v34 = vadd.f32 %v8446_v30, %v8500_v11  ;;  %7120 = vmatpush3.bf16.msra.mxu0 %v8513_v52 }
 0x23d   : > { %980 = vmax.xlane.f32.xlu0 %v8504_v31  ;;  %v769_v32 = vpop.xlane.xlu0 %768  ;;  %v8517_v37 = vmul.f32 %v7702_v56, %v8302_v60  ;;  %v7704_v17 = vpop.eup %7703 }
 0x23e   : > { %7713 = vrcp.f32 %v769_v32  ;;  %982 = vmax.xlane.f32.xlu1 %v8508_v34  ;;  %v771_v33 = vpop.xlane.xlu1 %770  ;;  %v8526_v2 = vmul.f32 %v7704_v17, %v8305_v62  ;;  %v8542_v62 = vld [vmem:[%s16971_s3 + $0x38] sm:$0xff]  }
 0x23f   : > { %v8523_v0 = vadd.f32 %v8446_v30, %v8517_v37  ;;  %7715 = vrcp.f32 %v771_v33  ;;  %7073 = vmatprep.subr.bf16.mxu1 %v8542_v62  ;;  %7121 = vmatprep.subr.bf16.mxu0 %v8542_v62 }
 0x240   : > { %v7706_v60 = vpop.eup %7705  ;;  %v8534_v38 = vadd.f32 %v8446_v30, %v8526_v2  ;;  %7074 = vmatpush3.bf16.msra.mxu1 %v8542_v62  ;;  %7122 = vmatpush3.bf16.msra.mxu0 %v8542_v62 }
 0x241   : > { %984 = vmax.xlane.f32.xlu0 %v8523_v0  ;;  %v773_v35 = vpop.xlane.xlu0 %772  ;;  %v8537_v51 = vmul.f32 %v7706_v60, %v8310_v42  ;;  %v7708_v59 = vpop.eup %7707  ;;  %7155 = vmatprep.subr.bf16.mxu1 %v8393_v16 }
 0x242   : > { %18145 = vst [vmem:[#allocation5_spill] sm:$0xff] %v8534_v38  ;;  %7717 = vrcp.f32 %v773_v35  ;;  %v775_v18 = vpop.xlane.xlu1 %774  ;;  %986 = vmax.xlane.f32.xlu1 %v8534_v38  ;;  %v8550_v50 = vmul.f32 %v7708_v59, %v8313_v48  ;;  %7203 = vmatprep.subr.bf16.mxu0 %v8393_v16 }
 0x243   : > { %v8547_v29 = vadd.f32 %v8446_v30, %v8537_v51  ;;  %7719 = vrcp.f32 %v775_v18 }
 0x244   : > { %v7710_v42 = vpop.eup %7709  ;;  %v8558_v44 = vadd.f32 %v8446_v30, %v8550_v50 }
 0x245   : > { %988 = vmax.xlane.f32.xlu0 %v8547_v29  ;;  %v777_v43 = vpop.xlane.xlu0 %776  ;;  %v8561_v56 = vmul.f32 %v7710_v42, %v8318_v8  ;;  %v7712_v48 = vpop.eup %7711 }
 0x246   : > { %7721 = vrcp.f32 %v777_v43  ;;  %v779_v32 = vpop.xlane.xlu1 %778  ;;  %990 = vmax.xlane.f32.xlu1 %v8558_v44  ;;  %v8572_v33 = vmul.f32 %v7712_v48, %v8321_v10 }
 0x247   : > { %18146 = vst [vmem:[#allocation6_spill] sm:$0xff] %v8561_v56  ;;  %v8569_v17 = vadd.f32 %v8446_v30, %v8561_v56  ;;  %7723 = vrcp.f32 %v779_v32 }
 0x248   : > { %18147 = vst [vmem:[#allocation7_spill] sm:$0xff] %v8572_v33  ;;  %v7714_v8 = vpop.eup %7713  ;;  %v8577_v35 = vadd.f32 %v8446_v30, %v8572_v33 }
 0x249   : > { %992 = vmax.xlane.f32.xlu0 %v8569_v17  ;;  %v781_v60 = vpop.xlane.xlu0 %780  ;;  %v8580_v59 = vmul.f32 %v7714_v8, %v8326_v15  ;;  %v7716_v18 = vpop.eup %7715 }
 0x24a   : > { %18148 = vst [vmem:[#allocation8_spill] sm:$0xff] %v8577_v35  ;;  %7725 = vrcp.f32 %v781_v60  ;;  %v783_v42 = vpop.xlane.xlu1 %782  ;;  %994 = vmax.xlane.f32.xlu1 %v8577_v35  ;;  %v8588_v43 = vmul.f32 %v7716_v18, %v8329_v63 }
 0x24b   : > { %v8585_v10 = vadd.f32 %v8446_v30, %v8580_v59  ;;  %7727 = vrcp.f32 %v783_v42 }
 0x24c   : > { %18149 = vst [vmem:[#allocation9_spill] sm:$0xff] %v8588_v43  ;;  %v7718_v48 = vpop.eup %7717  ;;  %v8593_v15 = vadd.f32 %v8446_v30, %v8588_v43 }
 0x24d   : > { %996 = vmax.xlane.f32.xlu0 %v8585_v10  ;;  %v785_v32 = vpop.xlane.xlu0 %784  ;;  %v8596_v8 = vmul.f32 %v7718_v48, %v8334_v5  ;;  %v7720_v60 = vpop.eup %7719 }
 0x24e   : > { %7729 = vrcp.f32 %v785_v32  ;;  %v787_v33 = vpop.xlane.xlu1 %786  ;;  %998 = vmax.xlane.f32.xlu1 %v8593_v15  ;;  %v8604_v18 = vmul.f32 %v7720_v60, %v8337_v47 }
 0x24f   : > { %18150 = vst [vmem:[#allocation10_spill] sm:$0xff] %v8596_v8  ;;  %v8601_v63 = vadd.f32 %v8446_v30, %v8596_v8  ;;  %7731 = vrcp.f32 %v787_v33 }
 0x250   : > { %18151 = vst [vmem:[#allocation11_spill] sm:$0xff] %v8604_v18  ;;  %v7722_v42 = vpop.eup %7721  ;;  %v8609_v5 = vadd.f32 %v8446_v30, %v8604_v18 }
 0x251   : > { %1000 = vmax.xlane.f32.xlu0 %v8601_v63  ;;  %v789_v43 = vpop.xlane.xlu0 %788  ;;  %v8612_v48 = vmul.f32 %v7722_v42, %v8342_v54  ;;  %v7724_v32 = vpop.eup %7723 }
 0x252   : > { %18152 = vst [vmem:[#allocation12_spill] sm:$0xff] %v8609_v5  ;;  %7733 = vrcp.f32 %v789_v43  ;;  %v791_v56 = vpop.xlane.xlu1 %790  ;;  %1002 = vmax.xlane.f32.xlu1 %v8609_v5  ;;  %v8620_v33 = vmul.f32 %v7724_v32, %v8345_v55 }
 0x253   : > { %18153 = vst [vmem:[#allocation13_spill] sm:$0xff] %v8612_v48  ;;  %v8617_v47 = vadd.f32 %v8446_v30, %v8612_v48  ;;  %7735 = vrcp.f32 %v791_v56 }
 0x254   : > { %18154 = vst [vmem:[#allocation14_spill] sm:$0xff] %v8620_v33  ;;  %v7726_v60 = vpop.eup %7725  ;;  %v8625_v54 = vadd.f32 %v8446_v30, %v8620_v33 }
 0x255   : > { %1004 = vmax.xlane.f32.xlu0 %v8617_v47  ;;  %v793_v18 = vpop.xlane.xlu0 %792  ;;  %v8628_v43 = vmul.f32 %v7726_v60, %v8350_v61  ;;  %v7728_v42 = vpop.eup %7727 }
 0x256   : > { %7737 = vrcp.f32 %v793_v18  ;;  %v795_v8 = vpop.xlane.xlu1 %794  ;;  %1006 = vmax.xlane.f32.xlu1 %v8625_v54  ;;  %v8636_v56 = vmul.f32 %v7728_v42, %v8353_v40 }
 0x257   : > { %18155 = vst [vmem:[#allocation15_spill] sm:$0xff] %v8628_v43  ;;  %v8633_v55 = vadd.f32 %v8446_v30, %v8628_v43  ;;  %7739 = vrcp.f32 %v795_v8 }
 0x258   : > { %18156 = vst [vmem:[#allocation16_spill] sm:$0xff] %v8636_v56  ;;  %v7730_v32 = vpop.eup %7729  ;;  %v8641_v61 = vadd.f32 %v8446_v30, %v8636_v56 }
 0x259   : > { %1008 = vmax.xlane.f32.xlu0 %v8633_v55  ;;  %v797_v33 = vpop.xlane.xlu0 %796  ;;  %v8644_v18 = vmul.f32 %v7730_v32, %v8358_v45  ;;  %v7732_v60 = vpop.eup %7731 }
 0x25a   : > { %18157 = vst [vmem:[#allocation17_spill] sm:$0xff] %v8641_v61  ;;  %7741 = vrcp.f32 %v797_v33  ;;  %v799_v48 = vpop.xlane.xlu1 %798  ;;  %1010 = vmax.xlane.f32.xlu1 %v8641_v61  ;;  %v8652_v8 = vmul.f32 %v7732_v60, %v8361_v4 }
 0x25b   : > { %18158 = vst [vmem:[#allocation18_spill] sm:$0xff] %v8644_v18  ;;  %v8649_v40 = vadd.f32 %v8446_v30, %v8644_v18  ;;  %7743 = vrcp.f32 %v799_v48  ;;  %v18175_v18 = vmov 1.0|1.0  }
 0x25c   : > { %18159 = vst [vmem:[#allocation19_spill] sm:$0xff] %v8652_v8  ;;  %v7734_v42 = vpop.eup %7733  ;;  %v8657_v45 = vadd.f32 %v8446_v30, %v8652_v8 }
 0x25d   : > { %1012 = vmax.xlane.f32.xlu0 %v8649_v40  ;;  %v801_v56 = vpop.xlane.xlu0 %800  ;;  %v8660_v33 = vmul.f32 %v7734_v42, %v8366_v39  ;;  %v7736_v32 = vpop.eup %7735 }
 0x25e   : > { %18160 = vst [vmem:[#allocation20_spill] sm:$0xff] %v8657_v45  ;;  %7745 = vrcp.f32 %v801_v56  ;;  %v803_v43 = vpop.xlane.xlu1 %802  ;;  %1014 = vmax.xlane.f32.xlu1 %v8657_v45  ;;  %v8668_v48 = vmul.f32 %v7736_v32, %v8368_v9 }
 0x25f   : > { %18161 = vst [vmem:[#allocation21_spill] sm:$0xff] %v8660_v33  ;;  %v8665_v4 = vadd.f32 %v8446_v30, %v8660_v33  ;;  %7747 = vrcp.f32 %v803_v43 }
 0x260   : > { %18162 = vst [vmem:[#allocation22_spill] sm:$0xff] %v8668_v48  ;;  %v7738_v60 = vpop.eup %7737  ;;  %v8673_v39 = vadd.f32 %v8446_v30, %v8668_v48 }
 0x261   : > { %1016 = vmax.xlane.f32.xlu0 %v8665_v4  ;;  %v8676_v56 = vmul.f32 %v7738_v60, %v8372_v41  ;;  %v7740_v42 = vpop.eup %7739 }
 0x262   : > { %18163 = vst [vmem:[#allocation23_spill] sm:$0xff] %v8673_v39  ;;  %1018 = vmax.xlane.f32.xlu1 %v8673_v39  ;;  %v8684_v9 = vmul.f32 %v7740_v42, %v8374_v57 }
 0x263   : > { %18164 = vst [vmem:[#allocation24_spill] sm:$0xff] %v8676_v56  ;;  %v8681_v33 = vadd.f32 %v8446_v30, %v8676_v56 }
 0x264   : > { %18165 = vst [vmem:[#allocation25_spill] sm:$0xff] %v8684_v9  ;;  %v7742_v43 = vpop.eup %7741  ;;  %v8689_v32 = vadd.f32 %v8446_v30, %v8684_v9 }
 0x265   : > { %1020 = vmax.xlane.f32.xlu0 %v8681_v33  ;;  %v8692_v41 = vmul.f32 %v7742_v43, %v8378_v22  ;;  %v7744_v60 = vpop.eup %7743 }
 0x266   : > { %18166 = vst [vmem:[#allocation26_spill] sm:$0xff] %v8689_v32  ;;  %1022 = vmax.xlane.f32.xlu1 %v8689_v32  ;;  %v8700_v57 = vmul.f32 %v7744_v60, %v8380_v12 }
 0x267   : > { %18167 = vst [vmem:[#allocation27_spill] sm:$0xff] %v8692_v41  ;;  %v8697_v48 = vadd.f32 %v8446_v30, %v8692_v41 }
 0x268   : > { %18169 = vst [vmem:[#allocation29_spill] sm:$0xff] %v8700_v57  ;;  %v7746_v42 = vpop.eup %7745  ;;  %v8705_v9 = vadd.f32 %v8446_v30, %v8700_v57 }
 0x269   : > { %18168 = vst [vmem:[#allocation28_spill] sm:$0xff] %v8697_v48  ;;  %1024 = vmax.xlane.f32.xlu0 %v8697_v48  ;;  %v8708_v22 = vmul.f32 %v7746_v42, %v8384_v14  ;;  %v7748_v43 = vpop.eup %7747 }
 0x26a   : > { %18170 = vst [vmem:[#allocation30_spill] sm:$0xff] %v8705_v9  ;;  %1026 = vmax.xlane.f32.xlu1 %v8705_v9  ;;  %v8716_v12 = vmul.f32 %v7748_v43, %v8386_v26  ;;  %v16991_v26 = vmov 1.0|1.0  }
 0x26b   : > { %18171 = vst [vmem:[#allocation31_spill] sm:$0xff] %v8708_v22  ;;  %v8713_v41 = vadd.f32 %v8446_v30, %v8708_v22 }
 0x26c   : > { %18173 = vst [vmem:[#allocation33_spill] sm:$0xff] %v8716_v12  ;;  %v8721_v60 = vadd.f32 %v8446_v30, %v8716_v12 }
 0x26d   : > { %18172 = vst [vmem:[#allocation32_spill] sm:$0xff] %v8713_v41  ;;  %1028 = vmax.xlane.f32.xlu0 %v8713_v41 }
 0x26e   : > { %1030 = vmax.xlane.f32.xlu1 %v8721_v60 }
 0x2bb   : > { %v8724_v14 = vpop.xlane.xlu0 %968 }
 0x2bc   : > { %vm1032_vm2 = vcmp.eq.f32.partialorder %v8453_v13, %v8724_v14 }
 0x2bf   : > { %v8726_v42 = vpop.xlane.xlu1 %970 }
 0x2c0   : > { %vm1033_vm3 = vcmp.eq.f32.partialorder %v8461_v3, %v8726_v42  ;;  %v886_v42 = vmul.f32 1.442695, %v8526_v2 }
 0x2c1   : > { %vm6088_vm4 = vmpackc.low %vm1033_vm3, %vm1032_vm2 }
 0x2c2   : > { %7075 = vmatprep.mubr.msk.bf16.mxu1 %vm6088_vm4, %v16991_v26  ;;  %v8739_v30 = vpop.xlane.xlu0 %972 }
 0x2c3   : > { %vm1034_vm5 = vcmp.eq.f32.partialorder %v8472_v53, %v8739_v30  ;;  %v8743_v43 = vpop.xlane.xlu1 %974 }
 0x2c4   : > { %vm1035_vm6 = vcmp.eq.f32.partialorder %v8476_v6, %v8743_v43  ;;  %v890_v43 = vmul.f32 1.442695, %v8550_v50 }
 0x2c5   : > { %vm6090_vm7 = vmpackc.low %vm1035_vm6, %vm1034_vm5 }
 0x2c6   : > { %7076 = vmatmul.mubr.msk.bf16.vlgmr.msra.gmra.mrb[16].mxu1 %vm6090_vm7, %v16991_v26  ;;  %v8754_v57 = vpop.xlane.xlu0 %976 }
 0x2c7   : > { %vm1036_vm8 = vcmp.eq.f32.partialorder %v8488_v46, %v8754_v57  ;;  %v8758_v12 = vpop.xlane.xlu1 %978  ;;  %7156 = vmatpush3.bf16.msra.mxu1 %v8393_v16 }
 0x2c8   : > { %vm1037_vm9 = vcmp.eq.f32.partialorder %v8492_v49, %v8758_v12  ;;  %7157 = vmatprep.subr.bf16.mxu1 %v8398_v27  ;;  %v18206_v12 = vld [vmem:[#allocation7_spill] sm:$0xff] }
 0x2c9   : > { %vm6092_vm10 = vmpackc.low %vm1037_vm9, %vm1036_vm8 }
 0x2ca   : > { %7079 = vmatprep.mubr.msk.bf16.mxu1 %vm6092_vm10, %v16991_v26  ;;  %v8771_v22 = vpop.xlane.xlu0 %980 }
 0x2cb   : > { %vm1038_vm11 = vcmp.eq.f32.partialorder %v8504_v31, %v8771_v22  ;;  %v8775_v56 = vpop.xlane.xlu1 %982  ;;  %7158 = vmatpush3.bf16.msra.mxu1 %v8398_v27 }
 0x2cc   : > { %vm1039_vm12 = vcmp.eq.f32.partialorder %v8508_v34, %v8775_v56  ;;  %7159 = vmatprep.subr.bf16.mxu1 %v8408_v21 }
 0x2cd   : > { %vm6094_vm13 = vmpackc.low %vm1039_vm12, %vm1038_vm11 }
 0x2ce   : > { %7080 = vmatmul.mubr.msk.bf16.gmra.mrb[20].mxu1 %vm6094_vm13, %v16991_v26  ;;  %v8788_v8 = vpop.xlane.xlu0 %984 }
 0x2cf   : > { %vm1040_vm14 = vcmp.eq.f32.partialorder %v8523_v0, %v8788_v8  ;;  %7160 = vmatpush3.bf16.msra.mxu1 %v8408_v21  ;;  %v8793_v27 = vpop.xlane.xlu1 %986 }
 0x2d0   : > { %18174 = vst [vmem:[#allocation34_spill] sm:$0xff] %v8793_v27  ;;  %7161 = vmatprep.subr.bf16.mxu1 %v8417_v23  ;;  %vm16997_vm15 = vcmp.eq.f32.partialorder %v8534_v38, %v8793_v27 }
 0x2d1   : > { %vm6096_vm0 = vmpackc.low %vm16997_vm15, %vm1040_vm14 }
 0x2d2   : > { %v8804_v26 = vpop.xlane.xlu0 %988  ;;  %7083 = vmatprep.mubr.msk.bf16.mxu1 %vm6096_vm0, %v18175_v18 }
 0x2d3   : > { %vm1042_vm1 = vcmp.eq.f32.partialorder %v8547_v29, %v8804_v26  ;;  %7162 = vmatpush3.bf16.msra.mxu1 %v8417_v23  ;;  %v8810_v21 = vpop.xlane.xlu1 %990  ;;  %v18212_v26 = vmov 0 }
 0x2d4   : > { %7163 = vmatprep.subr.bf16.mxu1 %v8426_v1  ;;  %vm17008_vm4 = vcmp.eq.f32.partialorder %v8558_v44, %v8810_v21 }
 0x2d5   : > { %vm6098_vm7 = vmpackc.low %vm17008_vm4, %vm1042_vm1 }
 0x2d6   : > { %v8821_v27 = vpop.xlane.xlu0 %992  ;;  %7084 = vmatmul.mubr.msk.bf16.gmra.mrb[24].mxu1 %vm6098_vm7, %v18175_v18 }
 0x2d7   : > { %vm17000_vm10 = vcmp.eq.f32.partialorder %v8569_v17, %v8821_v27  ;;  %v8826_v23 = vpop.xlane.xlu1 %994  ;;  %7164 = vmatpush3.bf16.msra.mxu1 %v8426_v1 }
 0x2d8   : > { %18176 = vst [vmem:[#allocation35_spill] sm:$0xff] %v8826_v23  ;;  %vm16998_vm13 = vcmp.eq.f32.partialorder %v8577_v35, %v8826_v23  ;;  %7165 = vmatprep.subr.bf16.mxu1 %v8435_v28 }
 0x2d9   : > { %vm6100_vm0 = vmpackc.low %vm16998_vm13, %vm17000_vm10 }
 0x2da   : > { %v8838_v38 = vpop.xlane.xlu0 %996  ;;  %7087 = vmatprep.mubr.msk.bf16.mxu1 %vm6100_vm0, %v18175_v18 }
 0x2db   : > { %vm17004_vm7 = vcmp.eq.f32.partialorder %v8585_v10, %v8838_v38  ;;  %v8843_v1 = vpop.xlane.xlu1 %998  ;;  %7166 = vmatpush3.bf16.msra.mxu1 %v8435_v28 }
 0x2dc   : > { %vm17001_vm15 = vcmp.eq.f32.partialorder %v8593_v15, %v8843_v1  ;;  %7167 = vmatprep.subr.bf16.mxu1 %v8513_v52 }
 0x2dd   : > { %vm6102_vm13 = vmpackc.low %vm17001_vm15, %vm17004_vm7 }
 0x2de   : > { %v8855_v23 = vpop.xlane.xlu0 %1000  ;;  %7088 = vmatmul.mubr.msk.bf16.gmra.mrb[28].mxu1 %vm6102_vm13, %v18175_v18 }
 0x2df   : > { %vm17007_vm0 = vcmp.eq.f32.partialorder %v8601_v63, %v8855_v23  ;;  %v8860_v28 = vpop.xlane.xlu1 %1002  ;;  %7168 = vmatpush3.bf16.msra.mxu1 %v8513_v52 }
 0x2e0   : > { %18177 = vst [vmem:[#allocation36_spill] sm:$0xff] %v8860_v28  ;;  %vm17005_vm10 = vcmp.eq.f32.partialorder %v8609_v5, %v8860_v28  ;;  %7169 = vmatprep.subr.bf16.mxu1 %v8542_v62 }
 0x2e1   : > { %vm6104_vm15 = vmpackc.low %vm17005_vm10, %vm17007_vm0 }
 0x2e2   : > { %v8872_v35 = vpop.xlane.xlu0 %1004  ;;  %7091 = vmatprep.mubr.msk.bf16.mxu1 %vm6104_vm15, %v18175_v18 }
 0x2e3   : > { %vm17012_vm13 = vcmp.eq.f32.partialorder %v8617_v47, %v8872_v35  ;;  %v8877_v52 = vpop.xlane.xlu1 %1006  ;;  %7170 = vmatpush3.bf16.msra.mxu1 %v8542_v62 }
 0x2e4   : > { %vm17011_vm7 = vcmp.eq.f32.partialorder %v8625_v54, %v8877_v52  ;;  %7251 = vmatprep.subr.bf16.mxu1 %v8393_v16 }
 0x2e5   : > { %vm6106_vm10 = vmpackc.low %vm17011_vm7, %vm17012_vm13 }
 0x2e6   : > { %v8889_v28 = vpop.xlane.xlu0 %1008  ;;  %7092 = vmatmul.mubr.msk.bf16.gmra.mrb[32].mxu1 %vm6106_vm10, %v18175_v18 }
 0x2e7   : > { %vm17017_vm15 = vcmp.eq.f32.partialorder %v8633_v55, %v8889_v28  ;;  %v8894_v62 = vpop.xlane.xlu1 %1010 }
 0x2e8   : > { %18178 = vst [vmem:[#allocation37_spill] sm:$0xff] %v8894_v62  ;;  %vm17016_vm0 = vcmp.eq.f32.partialorder %v8641_v61, %v8894_v62 }
 0x2e9   : > { %vm6108_vm4 = vmpackc.low %vm17016_vm0, %vm17017_vm15 }
 0x2ea   : > { %v8904_v16 = vpop.xlane.xlu0 %1012  ;;  %7095 = vmatprep.mubr.msk.bf16.mxu1 %vm6108_vm4, %v18175_v18 }
 0x2eb   : > { %vm17022_vm10 = vcmp.eq.f32.partialorder %v8649_v40, %v8904_v16  ;;  %v8909_v5 = vpop.xlane.xlu1 %1014 }
 0x2ec   : > { %18179 = vst [vmem:[#allocation38_spill] sm:$0xff] %v8909_v5  ;;  %vm17021_vm7 = vcmp.eq.f32.partialorder %v8657_v45, %v8909_v5 }
 0x2ed   : > { %vm6110_vm13 = vmpackc.low %vm17021_vm7, %vm17022_vm10 }
 0x2ee   : > { %v8919_v62 = vpop.xlane.xlu0 %1016  ;;  %7096 = vmatmul.mubr.msk.bf16.gmra.mrb[36].mxu1 %vm6110_vm13, %v18175_v18 }
 0x2ef   : > { %vm17027_vm4 = vcmp.eq.f32.partialorder %v8665_v4, %v8919_v62  ;;  %v8924_v61 = vpop.xlane.xlu1 %1018 }
 0x2f0   : > { %18180 = vst [vmem:[#allocation39_spill] sm:$0xff] %v8924_v61  ;;  %vm17026_vm0 = vcmp.eq.f32.partialorder %v8673_v39, %v8924_v61 }
 0x2f1   : > { %vm6112_vm15 = vmpackc.low %vm17026_vm0, %vm17027_vm4 }
 0x2f2   : > { %v8934_v5 = vpop.xlane.xlu0 %1020  ;;  %7099 = vmatprep.mubr.msk.bf16.mxu1 %vm6112_vm15, %v18175_v18 }
 0x2f3   : > { %vm17032_vm13 = vcmp.eq.f32.partialorder %v8681_v33, %v8934_v5  ;;  %v8939_v45 = vpop.xlane.xlu1 %1022 }
 0x2f4   : > { %18181 = vst [vmem:[#allocation40_spill] sm:$0xff] %v8939_v45  ;;  %vm17031_vm7 = vcmp.eq.f32.partialorder %v8689_v32, %v8939_v45 }
 0x2f5   : > { %vm6114_vm10 = vmpackc.low %vm17031_vm7, %vm17032_vm13 }
 0x2f6   : > { %v8949_v61 = vpop.xlane.xlu0 %1024  ;;  %7100 = vmatmul.mubr.msk.bf16.gmra.mrb[40].mxu1 %vm6114_vm10, %v18175_v18 }
 0x2f7   : > { %18182 = vst [vmem:[#allocation41_spill] sm:$0xff] %v8949_v61  ;;  %vm17046_vm15 = vcmp.eq.f32.partialorder %v8697_v48, %v8949_v61  ;;  %v8954_v39 = vpop.xlane.xlu1 %1026  ;;  %v874_v61 = vmul.f32 1.442695, %v8468_v20  ;;  %v870_v48 = vmul.f32 1.442695, %v8457_v36 }
 0x2f8   : > { %18183 = vst [vmem:[#allocation42_spill] sm:$0xff] %v8954_v39  ;;  %vm17044_vm0 = vcmp.eq.f32.partialorder %v8705_v9, %v8954_v39  ;;  %v872_v39 = vmul.f32 1.442695, %v8464_v19  ;;  %v868_v9 = vmul.f32 1.442695, %v8449_v58 }
 0x2f9   : > { %vm6116_vm4 = vmpackc.low %vm17044_vm0, %vm17046_vm15 }
 0x2fa   : > { %v8964_v45 = vpop.xlane.xlu0 %1028  ;;  %7103 = vmatprep.mubr.msk.bf16.mxu1 %vm6116_vm4, %v18175_v18  ;;  %7749 = vpow2.f32 %v872_v39 }
 0x2fb   : > { %18184 = vst [vmem:[#allocation43_spill] sm:$0xff] %v8964_v45  ;;  %vm17052_vm10 = vcmp.eq.f32.partialorder %v8713_v41, %v8964_v45  ;;  %v8969_v32 = vpop.xlane.xlu1 %1030  ;;  %7751 = vpow2.f32 %v868_v9  ;;  %v880_v45 = vmul.f32 1.442695, %v8496_v7  ;;  %v876_v41 = vmul.f32 1.442695, %v8480_v24 }
 0x2fc   : > { %18185 = vst [vmem:[#allocation44_spill] sm:$0xff] %v8969_v32  ;;  %vm17045_vm7 = vcmp.eq.f32.partialorder %v8721_v60, %v8969_v32  ;;  %7753 = vpow2.f32 %v874_v61  ;;  %v882_v32 = vmul.f32 1.442695, %v8500_v11 }
 0x2fd   : > { %vm6118_vm13 = vmpackc.low %vm17045_vm7, %vm17052_vm10  ;;  %7755 = vpow2.f32 %v870_v48  ;;  %v18223_v48 = vld [vmem:[#allocation5_spill] sm:$0xff] }
 0x2fe   : > { %7104 = vmatmul.mubr.msk.bf16.gmra.mrb[44].mxu1 %vm6118_vm13, %v18175_v18  ;;  %v878_v18 = vmul.f32 1.442695, %v8484_v25  ;;  %7757 = vpow2.f32 %v880_v45  ;;  %v18226_v25 = vmov 0 }
 0x2ff   : > { %7759 = vpow2.f32 %v876_v41 }
 0x300   : > { %7761 = vpow2.f32 %v882_v32  ;;  %v888_v32 = vmul.f32 1.442695, %v8537_v51 }
 0x301   : > { %7763 = vpow2.f32 %v878_v18 }
 0x302   : > { %7765 = vpow2.f32 %v888_v32 }
 0x304   : > { %v8988_v20 = vpop.eup %7749 }
 0x305   : > { %v8997_v7 = vpop.eup %7751 }
 0x306   : > { %v9009_v45 = vpop.eup %7753 }
 0x307   : > { %v9026_v9 = vpop.eup %7755 }
 0x399   : > { %v7077_v19 = vpop.f32.mrb[16].mxu1 }
 0x39a   : > { %vm1355_vm4 = vcmp.eq.f32.partialorder %v7077_v19, 0.0  ;;  %v1226_v58 = vpop.f32.mrb[17].mxu1 }
 0x39b   : > { %vm8993_vm13 = vmand %vm1034_vm5, %vm1355_vm4  ;;  %vm1353_vm0 = vcmp.eq.f32.partialorder %v1226_v58, 0.0  ;;  %v7078_v24 = vpop.f32.mrb[18].mxu1 }
 0x39c   : > { %vm9005_vm7 = vmand %vm1032_vm2, %vm1353_vm0  ;;  %vm1356_vm5 = vcmp.eq.f32.partialorder %v7078_v24, 0.0  ;;  %v1229_v61 = vpop.f32.mrb[19].mxu1  ;;  %v9058_v24 = vpop.eup %7757 }
 0x39d   : > { %vm9017_vm4 = vmand %vm1035_vm6, %vm1356_vm5  ;;  %vm1354_vm15 = vcmp.eq.f32.partialorder %v1229_v61, 0.0  ;;  %v9024_v39 = vsel %vm9005_vm7, -1.0, %v8453_v13  ;;  %v884_v13 = vmul.f32 1.442695, %v8517_v37  ;;  %v9055_v37 = vsel %vm8993_vm13, -1.0, %v8472_v53  ;;  %v9072_v50 = vpop.eup %7759 }
 0x39e   : > { %vm9035_vm2 = vmand %vm1033_vm3, %vm1354_vm15  ;;  %1481 = vmax.xlane.f32.xlu0 %v9024_v39  ;;  %v9070_v53 = vsel %vm9017_vm4, -1.0, %v8476_v6  ;;  %v9085_v6 = vpop.eup %7761  ;;  %v894_v61 = vmul.f32 1.442695, %v18206_v12  ;;  %v18216_v12 = vld [vmem:[#allocation13_spill] sm:$0xff]  ;;  %v18402_v11 = vsel %vm9017_vm4, %v9009_v45, 0.0 }
 0x39f   : > { %v9047_v51 = vsel %vm9035_vm2, -1.0, %v8461_v3  ;;  %7767 = vpow2.f32 %v884_v13  ;;  %18198 = vst [vmem:[#allocation45_spill] sm:$0xff] %v9085_v6 }
 0x3a0   : > { %1483 = vmax.xlane.f32.xlu1 %v9047_v51  ;;  %7769 = vpow2.f32 %v890_v43 }
 0x3a1   : > { %v7081_v19 = vpop.f32.mrb[20].mxu1  ;;  %7771 = vpow2.f32 %v886_v42  ;;  %v896_v42 = vmul.f32 1.442695, %v8580_v59 }
 0x3a2   : > { %vm1359_vm3 = vcmp.eq.f32.partialorder %v7081_v19, 0.0  ;;  %1485 = vmax.xlane.f32.xlu0 %v9055_v37  ;;  %v1242_v58 = vpop.f32.mrb[21].mxu1  ;;  %v9102_v19 = vpop.eup %7763 }
 0x3a3   : > { %vm9063_vm6 = vmand %vm1038_vm11, %vm1359_vm3  ;;  %vm1357_vm0 = vcmp.eq.f32.partialorder %v1242_v58, 0.0  ;;  %v7082_v2 = vpop.f32.mrb[22].mxu1  ;;  %18201 = vst [vmem:[#allocation46_spill] sm:$0xff] %v9102_v19  ;;  %v18205_v58 = vld [vmem:[#allocation9_spill] sm:$0xff]  ;;  %7773 = vpow2.f32 %v896_v42 }
 0x3a4   : > { %vm9080_vm11 = vmand %vm1036_vm8, %vm1357_vm0  ;;  %vm1360_vm15 = vcmp.eq.f32.partialorder %v7082_v2, 0.0  ;;  %1487 = vmax.xlane.f32.xlu1 %v9070_v53  ;;  %v1245_v32 = vpop.f32.mrb[23].mxu1  ;;  %v18204_v2 = vld [vmem:[#allocation6_spill] sm:$0xff]  ;;  %v898_v13 = vmul.f32 1.442695, %v18205_v58  ;;  %v9131_v30 = vsel %vm9063_vm6, -1.0, %v8504_v31  ;;  %v9139_v58 = vpop.eup %7765 }
 0x3a5   : > { %vm9093_vm5 = vmand %vm1039_vm12, %vm1360_vm15  ;;  %vm1358_vm8 = vcmp.eq.f32.partialorder %v1245_v32, 0.0  ;;  %v9100_v43 = vsel %vm9080_vm11, -1.0, %v8488_v46  ;;  %v892_v46 = vmul.f32 1.442695, %v18204_v2  ;;  %18207 = vst [vmem:[#allocation6_spill] sm:$0xff] %v9139_v58  ;;  %v18208_v31 = vmov 0 }
 0x3a6   : > { %vm9111_vm12 = vmand %vm1037_vm9, %vm1358_vm8  ;;  %1489 = vmax.xlane.f32.xlu0 %v9100_v43  ;;  %vm18217_vm8 = vcmp.eq.f32.partialorder %v8558_v44, %v8810_v21  ;;  %v18224_v21 = vld [vmem:[#allocation34_spill] sm:$0xff] }
 0x3a7   : > { %v9123_v59 = vsel %vm9111_vm12, -1.0, %v8492_v49  ;;  %7775 = vpow2.f32 %v892_v46  ;;  %v9137_v49 = vsel %vm9093_vm5, -1.0, %v8508_v34  ;;  %v18218_v34 = vmov 0 }
 0x3a8   : > { %1491 = vmax.xlane.f32.xlu1 %v9123_v59  ;;  %7777 = vpow2.f32 %v898_v13  ;;  %v18415_v22 = vsel %vm9111_vm12, %v9102_v19, 0.0 }
 0x3a9   : > { %v7085_v2 = vpop.f32.mrb[24].mxu1  ;;  %v9149_v46 = vpop.eup %7767  ;;  %7779 = vpow2.f32 %v894_v61  ;;  %v18231_v61 = vld [vmem:[#allocation11_spill] sm:$0xff] }
 0x3aa   : > { %1493 = vmax.xlane.f32.xlu0 %v9131_v30  ;;  %vm1363_vm9 = vcmp.eq.f32.partialorder %v7085_v2, 0.0  ;;  %v1258_v32 = vpop.f32.mrb[25].mxu1  ;;  %18211 = vst [vmem:[#allocation7_spill] sm:$0xff] %v9149_v46  ;;  %v904_v2 = vmul.f32 1.442695, %v18216_v12  ;;  %v18222_v12 = vld [vmem:[#allocation10_spill] sm:$0xff] }
 0x3ab   : > { %vm9144_vm3 = vmand %vm1042_vm1, %vm1363_vm9  ;;  %vm1361_vm0 = vcmp.eq.f32.partialorder %v1258_v32, 0.0  ;;  %v7086_v42 = vpop.f32.mrb[26].mxu1  ;;  %v9161_v32 = vpop.eup %7769  ;;  %v900_v41 = vmul.f32 1.442695, %v18222_v12 }
 0x3ac   : > { %v18209_v31 = vsel %vm9144_vm3, 4294967295, %v18208_v31  ;;  %1495 = vmax.xlane.f32.xlu1 %v9137_v49  ;;  %vm9157_vm15 = vmand %vm1040_vm14, %vm1361_vm0  ;;  %vm1364_vm1 = vcmp.eq.f32.partialorder %v7086_v42, 0.0  ;;  %v1261_v13 = vpop.f32.mrb[27].mxu1  ;;  %18215 = vst [vmem:[#allocation48_spill] sm:$0xff] %v9161_v32  ;;  %v9179_v42 = vpop.eup %7771  ;;  %vm18225_vm0 = vcmp.eq.f32.partialorder %v18223_v48, %v18224_v21  ;;  %v902_v32 = vmul.f32 1.442695, %v18231_v61 }
 0x3ad   : > { %18210 = vst [vmem:[#allocation9_spill] sm:$0xff] %v18209_v31  ;;  %v18213_v26 = vsel %vm9157_vm15, 4294967295, %v18212_v26  ;;  %vm9170_vm9 = vmand %vm18217_vm8, %vm1364_vm1  ;;  %vm1362_vm14 = vcmp.eq.f32.partialorder %v1261_v13, 0.0  ;;  %v9177_v8 = vsel %vm9157_vm15, -1.0, %v8523_v0  ;;  %v18229_v13 = vld [vmem:[#allocation14_spill] sm:$0xff]  ;;  %7781 = vpow2.f32 %v904_v2  ;;  %v9210_v46 = vpop.eup %7773  ;;  %v9697_v31 = vld [vmem:[%s16971_s3 + $0x20] sm:$0xff]  }
 0x3ae   : > { %18214 = vst [vmem:[#allocation47_spill] sm:$0xff] %v18213_v26  ;;  %v18219_v34 = vsel %vm9170_vm9, 4294967295, %v18218_v34  ;;  %18221 = vst [vmem:[#allocation49_spill] sm:$0xff] %v9179_v42  ;;  %1497 = vmax.xlane.f32.xlu0 %v9177_v8  ;;  %v906_v0 = vmul.f32 1.442695, %v18229_v13  ;;  %v9207_v26 = vsel %vm9144_vm3, -1.0, %v8547_v29  ;;  %7783 = vpow2.f32 %v900_v41 }
 0x3af   : > { %18220 = vst [vmem:[#allocation13_spill] sm:$0xff] %v18219_v34  ;;  %vm9188_vm1 = vmand %vm18225_vm0, %vm1362_vm14  ;;  %vm18233_vm14 = vcmp.eq.f32.partialorder %v8585_v10, %v8838_v38  ;;  %v9222_v29 = vsel %vm9170_vm9, -1.0, %v8558_v44  ;;  %v18239_v38 = vmov 0  ;;  %vm18244_vm9 = vcmp.eq.f32.partialorder %v8593_v15, %v8843_v1  ;;  %v18251_v1 = vld [vmem:[#allocation35_spill] sm:$0xff]  ;;  %v9675_v34 = vld [vmem:[%s16971_s3 + $0x18] sm:$0xff]  }
 0x3b0   : > { %v18227_v25 = vsel %vm9188_vm1, 4294967295, %v18226_v25  ;;  %v9200_v12 = vsel %vm9188_vm1, -1.0, %v18223_v48  ;;  %18232 = vst [vmem:[#allocation34_spill] sm:$0xff] %v9210_v46  ;;  %7785 = vpow2.f32 %v906_v0  ;;  %v18234_v48 = vmov 0  ;;  %18376 = vst [vmem:[#allocation68_spill] sm:$0xff] %v9675_v34 }
 0x3b1   : > { %18228 = vst [vmem:[#allocation10_spill] sm:$0xff] %v18227_v25  ;;  %18230 = vst [vmem:[#allocation5_spill] sm:$0xff] %v9200_v12  ;;  %1499 = vmax.xlane.f32.xlu1 %v9200_v12  ;;  %v7089_v21 = vpop.f32.mrb[28].mxu1  ;;  %v9224_v41 = vpop.eup %7775  ;;  %7787 = vpow2.f32 %v902_v32  ;;  %v18253_v42 = vmov 0  ;;  %v18258_v32 = vld [vmem:[#allocation16_spill] sm:$0xff] }
 0x3b2   : > { %vm1367_vm8 = vcmp.eq.f32.partialorder %v7089_v21, 0.0  ;;  %1501 = vmax.xlane.f32.xlu0 %v9207_v26  ;;  %v1274_v13 = vpop.f32.mrb[29].mxu1  ;;  %18237 = vst [vmem:[#allocation11_spill] sm:$0xff] %v9224_v41  ;;  %v9237_v44 = vpop.eup %7777  ;;  %v18243_v21 = vld [vmem:[#allocation18_spill] sm:$0xff]  ;;  %v18250_v41 = vld [vmem:[#allocation8_spill] sm:$0xff]  ;;  %18378 = vst [vmem:[#allocation70_spill] sm:$0xff] %v9697_v31 }
 0x3b3   : > { %vm9215_vm0 = vmand %vm18233_vm14, %vm1367_vm8  ;;  %vm1365_vm10 = vcmp.eq.f32.partialorder %v1274_v13, 0.0  ;;  %v7090_v2 = vpop.f32.mrb[30].mxu1  ;;  %vm18238_vm8 = vcmp.eq.f32.partialorder %v8569_v17, %v8821_v27  ;;  %18242 = vst [vmem:[#allocation51_spill] sm:$0xff] %v9237_v44  ;;  %v912_v13 = vmul.f32 1.442695, %v18243_v21  ;;  %v18245_v27 = vmov 0  ;;  %v9255_v61 = vpop.eup %7779 }
 0x3b4   : > { %v18235_v48 = vsel %vm9215_vm0, 4294967295, %v18234_v48  ;;  %vm9232_vm14 = vmand %vm18238_vm8, %vm1365_vm10  ;;  %vm1368_vm1 = vcmp.eq.f32.partialorder %v7090_v2, 0.0  ;;  %v1277_v0 = vpop.f32.mrb[31].mxu1  ;;  %18248 = vst [vmem:[#allocation52_spill] sm:$0xff] %v9255_v61  ;;  %v18249_v21 = vld [vmem:[#allocation15_spill] sm:$0xff]  ;;  %v9283_v25 = vsel %vm9215_vm0, -1.0, %v8585_v10 }
 0x3b5   : > { %18236 = vst [vmem:[#allocation14_spill] sm:$0xff] %v18235_v48  ;;  %v18240_v38 = vsel %vm9232_vm14, 4294967295, %v18239_v38  ;;  %1503 = vmax.xlane.f32.xlu1 %v9222_v29  ;;  %vm9246_vm15 = vmand %vm18244_vm9, %vm1368_vm1  ;;  %vm1366_vm10 = vcmp.eq.f32.partialorder %v1277_v0, 0.0  ;;  %v9253_v2 = vsel %vm9232_vm14, -1.0, %v8569_v17  ;;  %v908_v46 = vmul.f32 1.442695, %v18249_v21 }
 0x3b6   : > { %18241 = vst [vmem:[#allocation50_spill] sm:$0xff] %v18240_v38  ;;  %v18246_v27 = vsel %vm9246_vm15, 4294967295, %v18245_v27  ;;  %vm18252_vm9 = vcmp.eq.f32.partialorder %v18250_v41, %v18251_v1  ;;  %1505 = vmax.xlane.f32.xlu0 %v9253_v2  ;;  %v18256_v0 = vld [vmem:[#allocation19_spill] sm:$0xff]  ;;  %v910_v44 = vmul.f32 1.442695, %v18258_v32  ;;  %7789 = vpow2.f32 %v912_v13 }
 0x3b7   : > { %18247 = vst [vmem:[#allocation18_spill] sm:$0xff] %v18246_v27  ;;  %vm9264_vm1 = vmand %vm18252_vm9, %vm1366_vm10  ;;  %v914_v17 = vmul.f32 1.442695, %v18256_v0  ;;  %7791 = vpow2.f32 %v908_v46  ;;  %v9286_v38 = vpop.eup %7781  ;;  %vm18260_vm10 = vcmp.eq.f32.partialorder %v8617_v47, %v8872_v35  ;;  %v9298_v10 = vsel %vm9246_vm15, -1.0, %v8593_v15  ;;  %v9657_v27 = vld [vmem:[%s16971_s3 + $0x10] sm:$0xff]  }
 0x3b8   : > { %v18254_v42 = vsel %vm9264_vm1, 4294967295, %v18253_v42  ;;  %v9276_v21 = vsel %vm9264_vm1, -1.0, %v18250_v41  ;;  %18259 = vst [vmem:[#allocation35_spill] sm:$0xff] %v9286_v38  ;;  %v18261_v41 = vmov 0  ;;  %v9300_v46 = vpop.eup %7783  ;;  %v18266_v35 = vmov 0  ;;  %18374 = vst [vmem:[#allocation66_spill] sm:$0xff] %v9657_v27 }
 0x3b9   : > { %18255 = vst [vmem:[#allocation15_spill] sm:$0xff] %v18254_v42  ;;  %18257 = vst [vmem:[#allocation8_spill] sm:$0xff] %v9276_v21  ;;  %1507 = vmax.xlane.f32.xlu1 %v9276_v21  ;;  %v7093_v1 = vpop.f32.mrb[32].mxu1  ;;  %7793 = vpow2.f32 %v914_v17  ;;  %vm18271_vm15 = vcmp.eq.f32.partialorder %v8625_v54, %v8877_v52  ;;  %v18278_v52 = vld [vmem:[#allocation36_spill] sm:$0xff]  ;;  %v18280_v61 = vmov 0 }
 0x3ba   : > { %vm1371_vm8 = vcmp.eq.f32.partialorder %v7093_v1, 0.0  ;;  %1509 = vmax.xlane.f32.xlu0 %v9283_v25  ;;  %v1290_v0 = vpop.f32.mrb[33].mxu1  ;;  %18264 = vst [vmem:[#allocation16_spill] sm:$0xff] %v9300_v46  ;;  %7795 = vpow2.f32 %v910_v44  ;;  %v9313_v15 = vpop.eup %7785  ;;  %v18270_v1 = vld [vmem:[#allocation24_spill] sm:$0xff]  ;;  %v18285_v44 = vld [vmem:[#allocation22_spill] sm:$0xff] }
 0x3bb   : > { %vm9291_vm9 = vmand %vm18260_vm10, %vm1371_vm8  ;;  %vm1369_vm1 = vcmp.eq.f32.partialorder %v1290_v0, 0.0  ;;  %v7094_v13 = vpop.f32.mrb[34].mxu1  ;;  %vm18265_vm8 = vcmp.eq.f32.partialorder %v8601_v63, %v8855_v23  ;;  %18269 = vst [vmem:[#allocation54_spill] sm:$0xff] %v9313_v15  ;;  %v920_v0 = vmul.f32 1.442695, %v18270_v1  ;;  %v18272_v23 = vmov 0  ;;  %v9331_v32 = vpop.eup %7787 }
 0x3bc   : > { %v18262_v41 = vsel %vm9291_vm9, 4294967295, %v18261_v41  ;;  %vm9308_vm10 = vmand %vm18265_vm8, %vm1369_vm1  ;;  %vm1372_vm14 = vcmp.eq.f32.partialorder %v7094_v13, 0.0  ;;  %v1293_v17 = vpop.f32.mrb[35].mxu1  ;;  %18275 = vst [vmem:[#allocation55_spill] sm:$0xff] %v9331_v32  ;;  %v18276_v1 = vld [vmem:[#allocation21_spill] sm:$0xff]  ;;  %v18277_v46 = vld [vmem:[#allocation12_spill] sm:$0xff] }
 0x3bd   : > { %18263 = vst [vmem:[#allocation19_spill] sm:$0xff] %v18262_v41  ;;  %v18267_v35 = vsel %vm9308_vm10, 4294967295, %v18266_v35  ;;  %1511 = vmax.xlane.f32.xlu1 %v9298_v10  ;;  %vm9322_vm0 = vmand %vm18271_vm15, %vm1372_vm14  ;;  %vm1370_vm1 = vcmp.eq.f32.partialorder %v1293_v17, 0.0  ;;  %v9329_v13 = vsel %vm9308_vm10, -1.0, %v8601_v63  ;;  %v916_v38 = vmul.f32 1.442695, %v18276_v1 }
 0x3be   : > { %18268 = vst [vmem:[#allocation53_spill] sm:$0xff] %v18267_v35  ;;  %v18273_v23 = vsel %vm9322_vm0, 4294967295, %v18272_v23  ;;  %vm18279_vm15 = vcmp.eq.f32.partialorder %v18277_v46, %v18278_v52  ;;  %1513 = vmax.xlane.f32.xlu0 %v9329_v13  ;;  %v18283_v17 = vld [vmem:[#allocation25_spill] sm:$0xff]  ;;  %v918_v15 = vmul.f32 1.442695, %v18285_v44  ;;  %7797 = vpow2.f32 %v920_v0  ;;  %v18298_v44 = vld [vmem:[#allocation20_spill] sm:$0xff] }
 0x3bf   : > { %18274 = vst [vmem:[#allocation24_spill] sm:$0xff] %v18273_v23  ;;  %vm9340_vm14 = vmand %vm18279_vm15, %vm1370_vm1  ;;  %v922_v63 = vmul.f32 1.442695, %v18283_v17  ;;  %v9359_v42 = vsel %vm9291_vm9, -1.0, %v8617_v47  ;;  %7799 = vpow2.f32 %v916_v38  ;;  %vm18287_vm1 = vcmp.eq.f32.partialorder %v8649_v40, %v8904_v16 }
 0x3c0   : > { %v18281_v61 = vsel %vm9340_vm14, 4294967295, %v18280_v61  ;;  %v9352_v1 = vsel %vm9340_vm14, -1.0, %v18277_v46  ;;  %v9362_v35 = vpop.eup %7789  ;;  %v18288_v46 = vmov 0  ;;  %v9374_v47 = vsel %vm9322_vm0, -1.0, %v8625_v54 }
 0x3c1   : > { %18282 = vst [vmem:[#allocation21_spill] sm:$0xff] %v18281_v61  ;;  %18284 = vst [vmem:[#allocation12_spill] sm:$0xff] %v9352_v1  ;;  %1515 = vmax.xlane.f32.xlu1 %v9352_v1  ;;  %v7097_v52 = vpop.f32.mrb[36].mxu1  ;;  %7801 = vpow2.f32 %v922_v63  ;;  %v9376_v38 = vpop.eup %7791  ;;  %v18293_v16 = vmov 0  ;;  %v18309_v23 = vmov 0 }
 0x3c2   : > { %vm1375_vm8 = vcmp.eq.f32.partialorder %v7097_v52, 0.0  ;;  %1517 = vmax.xlane.f32.xlu0 %v9359_v42  ;;  %v1306_v17 = vpop.f32.mrb[37].mxu1  ;;  %18286 = vst [vmem:[#allocation36_spill] sm:$0xff] %v9362_v35  ;;  %18291 = vst [vmem:[#allocation22_spill] sm:$0xff] %v9376_v38  ;;  %7803 = vpow2.f32 %v918_v15  ;;  %v18297_v52 = vld [vmem:[#allocation31_spill] sm:$0xff]  ;;  %v18299_v35 = vld [vmem:[#allocation38_spill] sm:$0xff] }
 0x3c3   : > { %vm9367_vm15 = vmand %vm18287_vm1, %vm1375_vm8  ;;  %vm1373_vm14 = vcmp.eq.f32.partialorder %v1306_v17, 0.0  ;;  %v7098_v0 = vpop.f32.mrb[38].mxu1  ;;  %vm18292_vm8 = vcmp.eq.f32.partialorder %v8633_v55, %v8889_v28  ;;  %v9389_v54 = vpop.eup %7793  ;;  %v928_v17 = vmul.f32 1.442695, %v18297_v52  ;;  %vm18300_vm0 = vcmp.eq.f32.partialorder %v18298_v44, %v18299_v35  ;;  %v18305_v52 = vld [vmem:[#allocation27_spill] sm:$0xff]  ;;  %v18306_v38 = vld [vmem:[#allocation17_spill] sm:$0xff] }
 0x3c4   : > { %v18289_v46 = vsel %vm9367_vm15, 4294967295, %v18288_v46  ;;  %vm9384_vm1 = vmand %vm18292_vm8, %vm1373_vm14  ;;  %vm1376_vm10 = vcmp.eq.f32.partialorder %v7098_v0, 0.0  ;;  %v1309_v63 = vpop.f32.mrb[39].mxu1  ;;  %18296 = vst [vmem:[#allocation57_spill] sm:$0xff] %v9389_v54  ;;  %v18301_v28 = vmov 0  ;;  %v9407_v32 = vpop.eup %7795  ;;  %v18307_v35 = vld [vmem:[#allocation37_spill] sm:$0xff] }
 0x3c5   : > { %18290 = vst [vmem:[#allocation25_spill] sm:$0xff] %v18289_v46  ;;  %v18294_v16 = vsel %vm9384_vm1, 4294967295, %v18293_v16  ;;  %1519 = vmax.xlane.f32.xlu1 %v9374_v47  ;;  %vm9398_vm9 = vmand %vm18300_vm0, %vm1376_vm10  ;;  %vm1374_vm14 = vcmp.eq.f32.partialorder %v1309_v63, 0.0  ;;  %v9405_v0 = vsel %vm9384_vm1, -1.0, %v8633_v55  ;;  %v924_v61 = vmul.f32 1.442695, %v18305_v52 }
 0x3c6   : > { %18295 = vst [vmem:[#allocation56_spill] sm:$0xff] %v18294_v16  ;;  %v18302_v28 = vsel %vm9398_vm9, 4294967295, %v18301_v28  ;;  %18304 = vst [vmem:[#allocation20_spill] sm:$0xff] %v9407_v32  ;;  %vm18308_vm0 = vcmp.eq.f32.partialorder %v18306_v38, %v18307_v35  ;;  %1521 = vmax.xlane.f32.xlu0 %v9405_v0  ;;  %v18312_v63 = vld [vmem:[#allocation33_spill] sm:$0xff]  ;;  %7805 = vpow2.f32 %v928_v17  ;;  %v9435_v41 = vsel %vm9367_vm15, -1.0, %v8649_v40  ;;  %v18350_v32 = vld [vmem:[#allocation28_spill] sm:$0xff] }
 0x3c7   : > { %18303 = vst [vmem:[#allocation31_spill] sm:$0xff] %v18302_v28  ;;  %vm9416_vm10 = vmand %vm18308_vm0, %vm1374_vm14  ;;  %v930_v55 = vmul.f32 1.442695, %v18312_v63  ;;  %v18314_v15 = vld [vmem:[#allocation29_spill] sm:$0xff]  ;;  %7807 = vpow2.f32 %v924_v61  ;;  %vm18316_vm14 = vcmp.eq.f32.partialorder %v8681_v33, %v8934_v5  ;;  %v9450_v40 = vsel %vm9398_vm9, -1.0, %v18298_v44  ;;  %v18357_v28 = vld [vmem:[#allocation44_spill] sm:$0xff] }
 0x3c8   : > { %v18310_v23 = vsel %vm9416_vm10, 4294967295, %v18309_v23  ;;  %v9428_v52 = vsel %vm9416_vm10, -1.0, %v18306_v38  ;;  %v926_v54 = vmul.f32 1.442695, %v18314_v15  ;;  %v9438_v16 = vpop.eup %7797  ;;  %v18317_v38 = vmov 0  ;;  %18320 = vst [vmem:[#allocation33_spill] sm:$0xff] %v9450_v40 }
 0x3c9   : > { %18311 = vst [vmem:[#allocation38_spill] sm:$0xff] %v18310_v23  ;;  %18313 = vst [vmem:[#allocation27_spill] sm:$0xff] %v9428_v52  ;;  %1523 = vmax.xlane.f32.xlu1 %v9428_v52  ;;  %v7101_v35 = vpop.f32.mrb[40].mxu1  ;;  %7809 = vpow2.f32 %v930_v55  ;;  %v9452_v61 = vpop.eup %7799  ;;  %v18323_v5 = vmov 0  ;;  %v18330_v15 = vmov 0  ;;  %v18351_v23 = vld [vmem:[#allocation41_spill] sm:$0xff] }
 0x3ca   : > { %vm1379_vm8 = vcmp.eq.f32.partialorder %v7101_v35, 0.0  ;;  %1525 = vmax.xlane.f32.xlu0 %v9435_v41  ;;  %v1322_v63 = vpop.f32.mrb[41].mxu1  ;;  %18315 = vst [vmem:[#allocation17_spill] sm:$0xff] %v9438_v16  ;;  %18321 = vst [vmem:[#allocation29_spill] sm:$0xff] %v9452_v61  ;;  %7811 = vpow2.f32 %v926_v54  ;;  %v18327_v35 = vld [vmem:[#allocation26_spill] sm:$0xff]  ;;  %v18334_v54 = vld [vmem:[#allocation23_spill] sm:$0xff] }
 0x3cb   : > { %vm9443_vm0 = vmand %vm18316_vm14, %vm1379_vm8  ;;  %vm1377_vm10 = vcmp.eq.f32.partialorder %v1322_v63, 0.0  ;;  %v7102_v17 = vpop.f32.mrb[42].mxu1  ;;  %vm18322_vm8 = vcmp.eq.f32.partialorder %v8665_v4, %v8919_v62  ;;  %v9465_v44 = vpop.eup %7801  ;;  %v18328_v63 = vld [vmem:[#allocation40_spill] sm:$0xff]  ;;  %v18335_v61 = vld [vmem:[#allocation39_spill] sm:$0xff] }
 0x3cc   : > { %v18318_v38 = vsel %vm9443_vm0, 4294967295, %v18317_v38  ;;  %vm9460_vm14 = vmand %vm18322_vm8, %vm1377_vm10  ;;  %vm1380_vm1 = vcmp.eq.f32.partialorder %v7102_v17, 0.0  ;;  %v1325_v55 = vpop.f32.mrb[43].mxu1  ;;  %18326 = vst [vmem:[#allocation59_spill] sm:$0xff] %v9465_v44  ;;  %vm18329_vm9 = vcmp.eq.f32.partialorder %v18327_v35, %v18328_v63  ;;  %v9482_v17 = vpop.eup %7803  ;;  %vm18336_vm8 = vcmp.eq.f32.partialorder %v18334_v54, %v18335_v61 }
 0x3cd   : > { %18319 = vst [vmem:[#allocation37_spill] sm:$0xff] %v18318_v38  ;;  %v18324_v5 = vsel %vm9460_vm14, 4294967295, %v18323_v5  ;;  %1527 = vmax.xlane.f32.xlu1 %v9450_v40  ;;  %vm9473_vm15 = vmand %vm18329_vm9, %vm1380_vm1  ;;  %vm1378_vm10 = vcmp.eq.f32.partialorder %v1325_v55, 0.0  ;;  %v9480_v62 = vsel %vm9460_vm14, -1.0, %v8665_v4  ;;  %v18337_v63 = vmov 0  ;;  %v18342_v4 = vld [vmem:[#allocation32_spill] sm:$0xff] }
 0x3ce   : > { %18325 = vst [vmem:[#allocation58_spill] sm:$0xff] %v18324_v5  ;;  %v18331_v15 = vsel %vm9473_vm15, 4294967295, %v18330_v15  ;;  %18333 = vst [vmem:[#allocation40_spill] sm:$0xff] %v9482_v17  ;;  %1529 = vmax.xlane.f32.xlu0 %v9480_v62  ;;  %v9507_v61 = vsel %vm9443_vm0, -1.0, %v8681_v33  ;;  %v18343_v17 = vld [vmem:[#allocation43_spill] sm:$0xff]  ;;  %v9522_v33 = vsel %vm9473_vm15, -1.0, %v18327_v35  ;;  %vm18358_vm15 = vcmp.eq.f32.partialorder %v8721_v60, %v18357_v28 }
 0x3cf   : > { %18332 = vst [vmem:[#allocation26_spill] sm:$0xff] %v18331_v15  ;;  %vm9490_vm3 = vmand %vm18336_vm8, %vm1378_vm10  ;;  %vm18344_vm1 = vcmp.eq.f32.partialorder %v18342_v4, %v18343_v17  ;;  %v18353_v17 = vmov 0  ;;  %v18359_v38 = vmov 0  ;;  %v18364_v35 = vld [vmem:[#allocation30_spill] sm:$0xff]  ;;  %v18367_v28 = vmov 0 }
 0x3d0   : > { %v18338_v63 = vsel %vm9490_vm3, 4294967295, %v18337_v63  ;;  %v9501_v55 = vsel %vm9490_vm3, -1.0, %v18334_v54  ;;  %v9510_v5 = vpop.eup %7805  ;;  %v18345_v54 = vmov 0  ;;  %18348 = vst [vmem:[#allocation43_spill] sm:$0xff] %v9522_v33  ;;  %vm18352_vm3 = vcmp.eq.f32.partialorder %v18350_v32, %v18351_v23 }
 0x3d1   : > { %18339 = vst [vmem:[#allocation23_spill] sm:$0xff] %v18338_v63  ;;  %18340 = vst [vmem:[#allocation39_spill] sm:$0xff] %v9501_v55  ;;  %1531 = vmax.xlane.f32.xlu1 %v9501_v55  ;;  %v7105_v16 = vpop.f32.mrb[44].mxu1 }
 0x3d2   : > { %vm1383_vm9 = vcmp.eq.f32.partialorder %v7105_v16, 0.0  ;;  %1533 = vmax.xlane.f32.xlu0 %v9507_v61  ;;  %v1338_v44 = vpop.f32.mrb[45].mxu1  ;;  %18341 = vst [vmem:[#allocation60_spill] sm:$0xff] %v9510_v5  ;;  %v9524_v16 = vpop.eup %7807 }
 0x3d3   : > { %vm9515_vm10 = vmand %vm18344_vm1, %vm1383_vm9  ;;  %vm1381_vm8 = vcmp.eq.f32.partialorder %v1338_v44, 0.0  ;;  %v7106_v63 = vpop.f32.mrb[46].mxu1  ;;  %18349 = vst [vmem:[#allocation61_spill] sm:$0xff] %v9524_v16  ;;  %v9537_v15 = vpop.eup %7809  ;;  %v18365_v16 = vld [vmem:[#allocation42_spill] sm:$0xff] }
 0x3d4   : > { %v18346_v54 = vsel %vm9515_vm10, 4294967295, %v18345_v54  ;;  %vm9532_vm9 = vmand %vm18352_vm3, %vm1381_vm8  ;;  %vm1384_vm1 = vcmp.eq.f32.partialorder %v7106_v63, 0.0  ;;  %v1341_v44 = vpop.f32.mrb[47].mxu1  ;;  %18356 = vst [vmem:[#allocation41_spill] sm:$0xff] %v9537_v15  ;;  %v9554_v63 = vpop.eup %7811  ;;  %vm18366_vm8 = vcmp.eq.f32.partialorder %v18364_v35, %v18365_v16  ;;  %v9579_v16 = vsel %vm9515_vm10, -1.0, %v18342_v4 }
 0x3d5   : > { %18347 = vst [vmem:[#allocation32_spill] sm:$0xff] %v18346_v54  ;;  %v18354_v17 = vsel %vm9532_vm9, 4294967295, %v18353_v17  ;;  %1535 = vmax.xlane.f32.xlu1 %v9522_v33  ;;  %vm9545_vm14 = vmand %vm18358_vm15, %vm1384_vm1  ;;  %vm1382_vm3 = vcmp.eq.f32.partialorder %v1341_v44, 0.0  ;;  %v9552_v23 = vsel %vm9532_vm9, -1.0, %v18350_v32  ;;  %v18371_v4 = vmov 1.0|1.0  }
 0x3d6   : > { %18355 = vst [vmem:[#allocation28_spill] sm:$0xff] %v18354_v17  ;;  %v18360_v38 = vsel %vm9545_vm14, 4294967295, %v18359_v38  ;;  %18362 = vst [vmem:[#allocation62_spill] sm:$0xff] %v9552_v23  ;;  %1537 = vmax.xlane.f32.xlu0 %v9552_v23  ;;  %v9585_v5 = vsel %vm9545_vm14, -1.0, %v8721_v60  ;;  %v9635_v17 = vld [vmem:[%s16971_s3 + $0x8] sm:$0xff]  }
 0x3d7   : > { %18361 = vst [vmem:[#allocation44_spill] sm:$0xff] %v18360_v38  ;;  %18363 = vst [vmem:[#allocation63_spill] sm:$0xff] %v9554_v63  ;;  %v9625_v38 = vld [vmem:[%s16971_s3] sm:$0xff]  }
 0x3d8   : > { %vm9562_vm0 = vmand %vm18366_vm8, %vm1382_vm3  ;;  %18372 = vst [vmem:[#allocation64_spill] sm:$0xff] %v9625_v38 }
 0x3d9   : > { %v18368_v28 = vsel %vm9562_vm0, 4294967295, %v18367_v28  ;;  %v9573_v44 = vsel %vm9562_vm0, -1.0, %v18364_v35  ;;  %18373 = vst [vmem:[#allocation65_spill] sm:$0xff] %v9635_v17 }
 0x3da   : > { %18369 = vst [vmem:[#allocation30_spill] sm:$0xff] %v18368_v28  ;;  %18370 = vst [vmem:[#allocation42_spill] sm:$0xff] %v9573_v44  ;;  %1539 = vmax.xlane.f32.xlu1 %v9573_v44  ;;  %1541 = vmax.xlane.f32.xlu0 %v9579_v16 }
 0x3de   : > { %1543 = vmax.xlane.f32.xlu1 %v9585_v5 }
 0x42b   : > { %v9588_v32 = vpop.xlane.xlu0 %1481 }
 0x42c   : > { %vm17138_vm15 = vcmp.eq.f32.partialorder %v9024_v39, %v9588_v32 }
 0x42d   : > { %v9590_v35 = vpop.xlane.xlu1 %1483 }
 0x42e   : > { %vm17133_vm1 = vcmp.eq.f32.partialorder %v9047_v51, %v9590_v35 }
 0x42f   : > { %vm6152_vm3 = vmpackc.low %vm17133_vm1, %vm17138_vm15  ;;  %v9602_v60 = vpop.xlane.xlu0 %1485 }
 0x430   : > { %7123 = vmatprep.mubr.msk.bf16.mxu0 %vm6152_vm3, %v18371_v4  ;;  %vm17183_vm8 = vcmp.eq.f32.partialorder %v9055_v37, %v9602_v60 }
 0x431   : > { %v9605_v63 = vpop.xlane.xlu1 %1487 }
 0x432   : > { %vm17137_vm0 = vcmp.eq.f32.partialorder %v9070_v53, %v9605_v63 }
 0x433   : > { %vm6154_vm14 = vmpackc.low %vm17137_vm0, %vm17183_vm8  ;;  %v9617_v28 = vpop.xlane.xlu0 %1489 }
 0x434   : > { %7124 = vmatmul.mubr.msk.bf16.vlgmr.msra.gmra.mrb[16].mxu0 %vm6154_vm14, %v18371_v4  ;;  %vm17151_vm3 = vcmp.eq.f32.partialorder %v9100_v43, %v9617_v28 }
 0x435   : > { %v9620_v15 = vpop.xlane.xlu1 %1491  ;;  %7204 = vmatpush3.bf16.msra.mxu0 %v9625_v38 }
 0x436   : > { %vm17144_vm1 = vcmp.eq.f32.partialorder %v9123_v59, %v9620_v15  ;;  %7205 = vmatprep.subr.bf16.mxu0 %v9635_v17 }
 0x437   : > { %vm6156_vm14 = vmpackc.low %vm17144_vm1, %vm17151_vm3  ;;  %v9644_v54 = vpop.xlane.xlu0 %1493 }
 0x438   : > { %7127 = vmatprep.mubr.msk.bf16.mxu0 %vm6156_vm14, %v18371_v4  ;;  %vm17157_vm0 = vcmp.eq.f32.partialorder %v9131_v30, %v9644_v54 }
 0x439   : > { %v9647_v46 = vpop.xlane.xlu1 %1495  ;;  %7206 = vmatpush3.bf16.msra.mxu0 %v9635_v17 }
 0x43a   : > { %vm17145_vm15 = vcmp.eq.f32.partialorder %v9137_v49, %v9647_v46  ;;  %7207 = vmatprep.subr.bf16.mxu0 %v9657_v27 }
 0x43b   : > { %vm6158_vm14 = vmpackc.low %vm17145_vm15, %vm17157_vm0  ;;  %v9666_v17 = vpop.xlane.xlu0 %1497 }
 0x43c   : > { %7128 = vmatmul.mubr.msk.bf16.gmra.mrb[20].mxu0 %vm6158_vm14, %v18371_v4  ;;  %vm17156_vm1 = vcmp.eq.f32.partialorder %v9177_v8, %v9666_v17 }
 0x43d   : > { %7208 = vmatpush3.bf16.msra.mxu0 %v9657_v27 }
 0x43e   : > { %v9670_v48 = vpop.xlane.xlu1 %1499  ;;  %7209 = vmatprep.subr.bf16.mxu0 %v9675_v34 }
 0x43f   : > { %18375 = vst [vmem:[#allocation67_spill] sm:$0xff] %v9670_v48  ;;  %vm17152_vm15 = vcmp.eq.f32.partialorder %v9200_v12, %v9670_v48  ;;  %v9688_v27 = vpop.xlane.xlu0 %1501  ;;  %v9723_v12 = vld [vmem:[%s16971_s3 + $0x28] sm:$0xff]  }
 0x440   : > { %vm6160_vm14 = vmpackc.low %vm17152_vm15, %vm17156_vm1  ;;  %vm17164_vm3 = vcmp.eq.f32.partialorder %v9207_v26, %v9688_v27  ;;  %18381 = vst [vmem:[#allocation73_spill] sm:$0xff] %v9723_v12  ;;  %vm18417_vm12 = vcmp.eq.f32.partialorder %v9207_v26, %v9688_v27 }
 0x441   : > { %7131 = vmatprep.mubr.msk.bf16.mxu0 %vm6160_vm14, %v18371_v4  ;;  %7210 = vmatpush3.bf16.msra.mxu0 %v9675_v34 }
 0x442   : > { %v9692_v58 = vpop.xlane.xlu1 %1503  ;;  %7211 = vmatprep.subr.bf16.mxu0 %v9697_v31 }
 0x443   : > { %18377 = vst [vmem:[#allocation69_spill] sm:$0xff] %v9692_v58  ;;  %vm17163_vm15 = vcmp.eq.f32.partialorder %v9222_v29, %v9692_v58  ;;  %v9710_v34 = vpop.xlane.xlu0 %1505 }
 0x444   : > { %vm6162_vm14 = vmpackc.low %vm17163_vm15, %vm17164_vm3  ;;  %18379 = vst [vmem:[#allocation71_spill] sm:$0xff] %v9710_v34  ;;  %vm17170_vm1 = vcmp.eq.f32.partialorder %v9253_v2, %v9710_v34  ;;  %v9745_v34 = vld [vmem:[%s16971_s3 + $0x30] sm:$0xff]  }
 0x445   : > { %7132 = vmatmul.mubr.msk.bf16.gmra.mrb[24].mxu0 %vm6162_vm14, %v18371_v4  ;;  %18383 = vst [vmem:[#allocation75_spill] sm:$0xff] %v9745_v34 }
 0x446   : > { %v9713_v48 = vpop.xlane.xlu1 %1507  ;;  %7212 = vmatpush3.bf16.msra.mxu0 %v9697_v31 }
 0x447   : > { %18380 = vst [vmem:[#allocation72_spill] sm:$0xff] %v9713_v48  ;;  %vm17169_vm0 = vcmp.eq.f32.partialorder %v9276_v21, %v9713_v48  ;;  %7213 = vmatprep.subr.bf16.mxu0 %v9723_v12  ;;  %v9732_v31 = vpop.xlane.xlu0 %1509  ;;  %v9767_v21 = vld [vmem:[%s16971_s3 + $0x38] sm:$0xff]  }
 0x448   : > { %vm6164_vm14 = vmpackc.low %vm17169_vm0, %vm17170_vm1  ;;  %vm17177_vm15 = vcmp.eq.f32.partialorder %v9283_v25, %v9732_v31  ;;  %18385 = vst [vmem:[#allocation77_spill] sm:$0xff] %v9767_v21 }
 0x449   : > { %7135 = vmatprep.mubr.msk.bf16.mxu0 %vm6164_vm14, %v18371_v4 }
 0x44a   : > { %v9735_v58 = vpop.xlane.xlu1 %1511  ;;  %7214 = vmatpush3.bf16.msra.mxu0 %v9723_v12 }
 0x44b   : > { %18382 = vst [vmem:[#allocation74_spill] sm:$0xff] %v9735_v58  ;;  %vm17176_vm3 = vcmp.eq.f32.partialorder %v9298_v10, %v9735_v58  ;;  %7215 = vmatprep.subr.bf16.mxu0 %v9745_v34  ;;  %v9754_v12 = vpop.xlane.xlu0 %1513 }
 0x44c   : > { %vm6166_vm14 = vmpackc.low %vm17176_vm3, %vm17177_vm15  ;;  %vm17182_vm0 = vcmp.eq.f32.partialorder %v9329_v13, %v9754_v12 }
 0x44d   : > { %7136 = vmatmul.mubr.msk.bf16.gmra.mrb[28].mxu0 %vm6166_vm14, %v18371_v4 }
 0x44e   : > { %v9757_v48 = vpop.xlane.xlu1 %1515  ;;  %7216 = vmatpush3.bf16.msra.mxu0 %v9745_v34 }
 0x44f   : > { %18384 = vst [vmem:[#allocation76_spill] sm:$0xff] %v9757_v48  ;;  %vm17178_vm1 = vcmp.eq.f32.partialorder %v9352_v1, %v9757_v48  ;;  %7217 = vmatprep.subr.bf16.mxu0 %v9767_v21  ;;  %v9776_v34 = vpop.xlane.xlu0 %1517 }
 0x450   : > { %vm6168_vm14 = vmpackc.low %vm17178_vm1, %vm17182_vm0  ;;  %vm17189_vm3 = vcmp.eq.f32.partialorder %v9359_v42, %v9776_v34 }
 0x451   : > { %7139 = vmatprep.mubr.msk.bf16.mxu0 %vm6168_vm14, %v18371_v4 }
 0x452   : > { %v9779_v58 = vpop.xlane.xlu1 %1519  ;;  %7218 = vmatpush3.bf16.msra.mxu0 %v9767_v21 }
 0x453   : > { %vm17188_vm15 = vcmp.eq.f32.partialorder %v9374_v47, %v9779_v58  ;;  %7299 = vmatprep.subr.bf16.mxu0 %v9625_v38  ;;  %v9793_v48 = vpop.xlane.xlu0 %1521 }
 0x454   : > { %vm6170_vm1 = vmpackc.low %vm17188_vm15, %vm17189_vm3  ;;  %vm17194_vm14 = vcmp.eq.f32.partialorder %v9405_v0, %v9793_v48 }
 0x455   : > { %7140 = vmatmul.mubr.msk.bf16.gmra.mrb[32].mxu0 %vm6170_vm1, %v18371_v4 }
 0x456   : > { %v9796_v21 = vpop.xlane.xlu1 %1523 }
 0x457   : > { %18386 = vst [vmem:[#allocation78_spill] sm:$0xff] %v9796_v21  ;;  %vm17193_vm0 = vcmp.eq.f32.partialorder %v9428_v52, %v9796_v21  ;;  %v9808_v38 = vpop.xlane.xlu0 %1525 }
 0x458   : > { %vm6172_vm8 = vmpackc.low %vm17193_vm0, %vm17194_vm14  ;;  %vm17199_vm1 = vcmp.eq.f32.partialorder %v9435_v41, %v9808_v38 }
 0x459   : > { %7143 = vmatprep.mubr.msk.bf16.mxu0 %vm6172_vm8, %v18371_v4 }
 0x45a   : > { %v9811_v1 = vpop.xlane.xlu1 %1527 }
 0x45b   : > { %18387 = vst [vmem:[#allocation79_spill] sm:$0xff] %v9811_v1  ;;  %vm17198_vm15 = vcmp.eq.f32.partialorder %v9450_v40, %v9811_v1  ;;  %v9823_v21 = vpop.xlane.xlu0 %1529 }
 0x45c   : > { %vm6174_vm3 = vmpackc.low %vm17198_vm15, %vm17199_vm1  ;;  %vm17204_vm8 = vcmp.eq.f32.partialorder %v9480_v62, %v9823_v21 }
 0x45d   : > { %7144 = vmatmul.mubr.msk.bf16.gmra.mrb[36].mxu0 %vm6174_vm3, %v18371_v4 }
 0x45e   : > { %v9826_v52 = vpop.xlane.xlu1 %1531 }
 0x45f   : > { %18388 = vst [vmem:[#allocation80_spill] sm:$0xff] %v9826_v52  ;;  %vm17203_vm0 = vcmp.eq.f32.partialorder %v9501_v55, %v9826_v52  ;;  %v9838_v1 = vpop.xlane.xlu0 %1533 }
 0x460   : > { %vm6176_vm14 = vmpackc.low %vm17203_vm0, %vm17204_vm8  ;;  %vm17209_vm3 = vcmp.eq.f32.partialorder %v9507_v61, %v9838_v1 }
 0x461   : > { %7147 = vmatprep.mubr.msk.bf16.mxu0 %vm6176_vm14, %v18371_v4 }
 0x462   : > { %v9841_v40 = vpop.xlane.xlu1 %1535 }
 0x463   : > { %18389 = vst [vmem:[#allocation81_spill] sm:$0xff] %v9841_v40  ;;  %vm17208_vm15 = vcmp.eq.f32.partialorder %v9522_v33, %v9841_v40  ;;  %v9853_v52 = vpop.xlane.xlu0 %1537 }
 0x464   : > { %vm6178_vm1 = vmpackc.low %vm17208_vm15, %vm17209_vm3  ;;  %18390 = vst [vmem:[#allocation82_spill] sm:$0xff] %v9853_v52  ;;  %vm17214_vm14 = vcmp.eq.f32.partialorder %v9552_v23, %v9853_v52 }
 0x465   : > { %7148 = vmatmul.mubr.msk.bf16.gmra.mrb[40].mxu0 %vm6178_vm1, %v18371_v4 }
 0x467   : > { %v9856_v55 = vpop.xlane.xlu1 %1539  ;;  %v9868_v40 = vpop.xlane.xlu0 %1541 }
 0x468   : > { %18391 = vst [vmem:[#allocation83_spill] sm:$0xff] %v9856_v55  ;;  %vm17211_vm0 = vcmp.eq.f32.partialorder %v9573_v44, %v9856_v55  ;;  %18392 = vst [vmem:[#allocation84_spill] sm:$0xff] %v9868_v40  ;;  %vm17222_vm1 = vcmp.eq.f32.partialorder %v9579_v16, %v9868_v40  ;;  %v18396_v40 = vsel %vm8993_vm13, %v8988_v20, 0.0  ;;  %vm18399_vm13 = vcmp.eq.f32.partialorder %v9070_v53, %v9605_v63 }
 0x469   : > { %vm6180_vm8 = vmpackc.low %vm17211_vm0, %vm17214_vm14 }
 0x46a   : > { %7151 = vmatprep.mubr.msk.bf16.mxu0 %vm6180_vm8, %v18371_v4  ;;  %vm18393_vm8 = vcmp.eq.f32.partialorder %v9055_v37, %v9602_v60 }
 0x46b   : > { %v9871_v33 = vpop.xlane.xlu1 %1543 }
 0x46c   : > { %vm17221_vm15 = vcmp.eq.f32.partialorder %v9585_v5, %v9871_v33 }
 0x46d   : > { %vm6182_vm3 = vmpackc.low %vm17221_vm15, %vm17222_vm1 }
 0x46e   : > { %7152 = vmatmul.mubr.msk.bf16.gmra.mrb[44].mxu0 %vm6182_vm3, %v18371_v4  ;;  %vm18397_vm3 = vcmp.eq.f32.partialorder %v9024_v39, %v9588_v32 }
 0x507   : > { %v7125_v55 = vpop.f32.mrb[16].mxu0 }
 0x508   : > { %vm1820_vm0 = vcmp.eq.f32.partialorder %v7125_v55, 0.0  ;;  %v1691_v44 = vpop.f32.mrb[17].mxu0 }
 0x509   : > { %vm9887_vm14 = vmand %vm18393_vm8, %vm1820_vm0  ;;  %vm1818_vm9 = vcmp.eq.f32.partialorder %v1691_v44, 0.0  ;;  %v7126_v23 = vpop.f32.mrb[18].mxu0  ;;  %v18398_v44 = vsel %vm9005_vm7, %v8997_v7, 0.0  ;;  %vm18403_vm7 = vcmp.eq.f32.partialorder %v9047_v51, %v9590_v35 }
 0x50a   : > { %v9898_v4 = vsel %vm9887_vm14, %v8988_v20, %v18396_v40  ;;  %vm1850_vm15 = vmand %vm18397_vm3, %vm1818_vm9  ;;  %vm1821_vm1 = vcmp.eq.f32.partialorder %v7126_v23, 0.0  ;;  %v1694_v55 = vpop.f32.mrb[19].mxu0  ;;  %v9947_v35 = vsel %vm9887_vm14, -1.0, %v9055_v37  ;;  %v18408_v37 = vsel %vm9063_vm6, %v9058_v24, 0.0 }
 0x50b   : > { %v9908_v60 = vsel %vm1850_vm15, %v8997_v7, %v18398_v44  ;;  %vm9913_vm0 = vmand %vm18399_vm13, %vm1821_vm1  ;;  %vm1819_vm8 = vcmp.eq.f32.partialorder %v1694_v55, 0.0  ;;  %v9918_v40 = vsel %vm1850_vm15, -1.0, %v9024_v39  ;;  %v18404_v39 = vsel %vm9035_vm2, %v9026_v9, 0.0 }
 0x50c   : > { %v9927_v23 = vsel %vm9913_vm0, %v9009_v45, %v18402_v11  ;;  %vm1851_vm9 = vmand %vm18403_vm7, %vm1819_vm8  ;;  %1946 = vmax.xlane.f32.xlu0 %v9918_v40  ;;  %vm18405_vm2 = vcmp.eq.f32.partialorder %v9131_v30, %v9644_v54  ;;  %v9960_v44 = vsel %vm9913_vm0, -1.0, %v9070_v53  ;;  %vm18409_vm14 = vcmp.eq.f32.partialorder %v9100_v43, %v9617_v28 }
 0x50d   : > { %v9938_v63 = vsel %vm1851_vm9, %v9026_v9, %v18404_v39  ;;  %v9941_v18 = vsel %vm1851_vm9, -1.0, %v9047_v51  ;;  %v18410_v53 = vsel %vm9080_vm11, %v9072_v50, 0.0  ;;  %vm18411_vm6 = vcmp.eq.f32.partialorder %v9137_v49, %v9647_v46 }
 0x50e   : > { %1948 = vmax.xlane.f32.xlu1 %v9941_v18  ;;  %v18412_v28 = vsel %vm9093_vm5, %v9085_v6, 0.0  ;;  %vm18414_vm11 = vcmp.eq.f32.partialorder %v9123_v59, %v9620_v15 }
 0x50f   : > { %v7129_v32 = vpop.f32.mrb[20].mxu0 }
 0x510   : > { %vm1824_vm4 = vcmp.eq.f32.partialorder %v7129_v32, 0.0  ;;  %1950 = vmax.xlane.f32.xlu0 %v9947_v35  ;;  %v1707_v14 = vpop.f32.mrb[21].mxu0 }
 0x511   : > { %vm9953_vm15 = vmand %vm18405_vm2, %vm1824_vm4  ;;  %vm1822_vm1 = vcmp.eq.f32.partialorder %v1707_v14, 0.0  ;;  %v7130_v51 = vpop.f32.mrb[22].mxu0  ;;  %v18422_v14 = vld [vmem:[#allocation6_spill] sm:$0xff] }
 0x512   : > { %v9969_v52 = vsel %vm9953_vm15, %v9058_v24, %v18408_v37  ;;  %vm1854_vm3 = vmand %vm18409_vm14, %vm1822_vm1  ;;  %vm1825_vm13 = vcmp.eq.f32.partialorder %v7130_v51, 0.0  ;;  %1952 = vmax.xlane.f32.xlu1 %v9960_v44  ;;  %v1710_v54 = vpop.f32.mrb[23].mxu0  ;;  %v10013_v46 = vsel %vm9953_vm15, -1.0, %v9131_v30  ;;  %v18420_v30 = vld [vmem:[#allocation9_spill] sm:$0xff]  ;;  %vm18425_vm15 = vcmp.eq.f32.partialorder %v9177_v8, %v9666_v17  ;;  %v18426_v51 = vld [vmem:[#allocation47_spill] sm:$0xff] }
 0x513   : > { %v9980_v3 = vsel %vm1854_vm3, %v9072_v50, %v18410_v53  ;;  %vm1857_vm0 = vmand %vm18411_vm6, %vm1825_vm13  ;;  %vm1823_vm8 = vcmp.eq.f32.partialorder %v1710_v54, 0.0  ;;  %v9986_v36 = vsel %vm1854_vm3, -1.0, %v9100_v43  ;;  %vm18421_vm2 = vnez %v18420_v30  ;;  %v18428_v37 = vld [vmem:[#allocation7_spill] sm:$0xff] }
 0x514   : > { %v9993_v11 = vsel %vm1857_vm0, %v9085_v6, %v18412_v28  ;;  %vm1855_vm7 = vmand %vm18414_vm11, %vm1823_vm8  ;;  %1954 = vmax.xlane.f32.xlu0 %v9986_v36  ;;  %v10017_v39 = vsel %vm1857_vm0, -1.0, %v9137_v49  ;;  %v18423_v55 = vsel %vm18421_vm2, %v18422_v14, 0.0  ;;  %vm18427_vm3 = vnez %v18426_v51  ;;  %v18431_v28 = vld [vmem:[#allocation69_spill] sm:$0xff]  ;;  %v18441_v51 = vld [vmem:[#allocation67_spill] sm:$0xff] }
 0x515   : > { %18413 = vst [vmem:[#allocation85_spill] sm:$0xff] %v9993_v11  ;;  %v10004_v43 = vsel %vm1855_vm7, %v9102_v19, %v18415_v22  ;;  %v10007_v57 = vsel %vm1855_vm7, -1.0, %v9123_v59  ;;  %v18429_v54 = vsel %vm18427_vm3, %v18428_v37, 0.0  ;;  %vm18432_vm13 = vcmp.eq.f32.partialorder %v9222_v29, %v18431_v28  ;;  %v18455_v59 = vld [vmem:[#allocation34_spill] sm:$0xff] }
 0x516   : > { %18416 = vst [vmem:[#allocation86_spill] sm:$0xff] %v10004_v43  ;;  %1956 = vmax.xlane.f32.xlu1 %v10007_v57  ;;  %v18460_v22 = vld [vmem:[#allocation50_spill] sm:$0xff] }
 0x518   : > { %v7133_v15 = vpop.f32.mrb[24].mxu0  ;;  %1958 = vmax.xlane.f32.xlu0 %v10013_v46 }
 0x519   : > { %vm1828_vm5 = vcmp.eq.f32.partialorder %v7133_v15, 0.0  ;;  %v1723_v56 = vpop.f32.mrb[25].mxu0  ;;  %v18435_v15 = vld [vmem:[#allocation13_spill] sm:$0xff] }
 0x51a   : > { %vm10022_vm9 = vmand %vm18417_vm12, %vm1828_vm5  ;;  %vm1826_vm4 = vcmp.eq.f32.partialorder %v1723_v56, 0.0  ;;  %v7134_v32 = vpop.f32.mrb[26].mxu0  ;;  %1960 = vmax.xlane.f32.xlu1 %v10017_v39  ;;  %vm18436_vm8 = vnez %v18435_v15  ;;  %v18437_v56 = vld [vmem:[#allocation48_spill] sm:$0xff] }
 0x51b   : > { %v10034_v49 = vsel %vm10022_vm9, %v18422_v14, %v18423_v55  ;;  %vm1858_vm1 = vmand %vm18425_vm15, %vm1826_vm4  ;;  %vm1829_vm14 = vcmp.eq.f32.partialorder %v7134_v32, 0.0  ;;  %v1726_v27 = vpop.f32.mrb[27].mxu0  ;;  %v18438_v32 = vsel %vm18436_vm8, %v18437_v56, 0.0  ;;  %v18440_v55 = vld [vmem:[#allocation5_spill] sm:$0xff]  ;;  %vm18449_vm4 = vcmp.eq.f32.partialorder %v9283_v25, %v9732_v31  ;;  %v18458_v31 = vld [vmem:[#allocation71_spill] sm:$0xff] }
 0x51c   : > { %18424 = vst [vmem:[#allocation9_spill] sm:$0xff] %v10034_v49  ;;  %v10044_v53 = vsel %vm1858_vm1, %v18428_v37, %v18429_v54  ;;  %vm10049_vm6 = vmand %vm18432_vm13, %vm1829_vm14  ;;  %vm1827_vm0 = vcmp.eq.f32.partialorder %v1726_v27, 0.0  ;;  %v10054_v17 = vsel %vm1858_vm1, -1.0, %v9177_v8  ;;  %vm18442_vm11 = vcmp.eq.f32.partialorder %v18440_v55, %v18441_v51  ;;  %v18443_v54 = vld [vmem:[#allocation10_spill] sm:$0xff]  ;;  %v18445_v27 = vld [vmem:[#allocation49_spill] sm:$0xff] }
 0x51d   : > { %18430 = vst [vmem:[#allocation47_spill] sm:$0xff] %v10044_v53  ;;  %v10063_v30 = vsel %vm10049_vm6, %v18437_v56, %v18438_v32  ;;  %vm1859_vm7 = vmand %vm18442_vm11, %vm1827_vm0  ;;  %1962 = vmax.xlane.f32.xlu0 %v10054_v17  ;;  %vm18444_vm5 = vnez %v18443_v54  ;;  %v10083_v51 = vsel %vm10022_vm9, -1.0, %v9207_v26  ;;  %v18453_v26 = vld [vmem:[#allocation14_spill] sm:$0xff]  ;;  %vm18459_vm1 = vcmp.eq.f32.partialorder %v9253_v2, %v18458_v31  ;;  %v18619_v53 = vld [vmem:[#allocation68_spill] sm:$0xff] }
 0x51e   : > { %18439 = vst [vmem:[#allocation69_spill] sm:$0xff] %v10063_v30  ;;  %v18446_v8 = vsel %vm18444_vm5, %v18445_v27, 0.0  ;;  %v10077_v15 = vsel %vm1859_vm7, -1.0, %v18440_v55  ;;  %vm18454_vm9 = vnez %v18453_v26  ;;  %vm18461_vm13 = vnez %v18460_v22  ;;  %v18465_v30 = vld [vmem:[#allocation74_spill] sm:$0xff] }
 0x51f   : > { %v10074_v28 = vsel %vm1859_vm7, %v18445_v27, %v18446_v8  ;;  %18448 = vst [vmem:[#allocation5_spill] sm:$0xff] %v10077_v15  ;;  %1964 = vmax.xlane.f32.xlu1 %v10077_v15  ;;  %v10096_v27 = vsel %vm10049_vm6, -1.0, %v9222_v29  ;;  %v18462_v29 = vld [vmem:[#allocation11_spill] sm:$0xff]  ;;  %vm18466_vm6 = vcmp.eq.f32.partialorder %v9298_v10, %v18465_v30  ;;  %v18469_v31 = vld [vmem:[#allocation18_spill] sm:$0xff] }
 0x520   : > { %18447 = vst [vmem:[#allocation13_spill] sm:$0xff] %v10074_v28  ;;  %v7137_v32 = vpop.f32.mrb[28].mxu0  ;;  %18452 = vst [vmem:[#allocation67_spill] sm:$0xff] %v10096_v27  ;;  %v18463_v56 = vsel %vm18461_vm13, %v18462_v29, 0.0  ;;  %vm18470_vm11 = vnez %v18469_v31  ;;  %v18477_v30 = vld [vmem:[#allocation15_spill] sm:$0xff]  ;;  %v18621_v49 = vld [vmem:[#allocation70_spill] sm:$0xff] }
 0x521   : > { %vm1832_vm12 = vcmp.eq.f32.partialorder %v7137_v32, 0.0  ;;  %1966 = vmax.xlane.f32.xlu0 %v10083_v51  ;;  %v1739_v54 = vpop.f32.mrb[29].mxu0  ;;  %v18456_v32 = vsel %vm18454_vm9, %v18455_v59, 0.0  ;;  %v18488_v8 = vld [vmem:[#allocation35_spill] sm:$0xff] }
 0x522   : > { %vm10089_vm2 = vmand %vm18449_vm4, %vm1832_vm12  ;;  %vm1830_vm15 = vcmp.eq.f32.partialorder %v1739_v54, 0.0  ;;  %v7138_v55 = vpop.f32.mrb[30].mxu0  ;;  %vm18478_vm12 = vnez %v18477_v30 }
 0x523   : > { %v10105_v28 = vsel %vm10089_vm2, %v18455_v59, %v18456_v32  ;;  %vm1862_vm14 = vmand %vm18459_vm1, %vm1830_vm15  ;;  %vm1833_vm3 = vcmp.eq.f32.partialorder %v7138_v55, 0.0  ;;  %1968 = vmax.xlane.f32.xlu1 %v10096_v27  ;;  %v1742_v54 = vpop.f32.mrb[31].mxu0  ;;  %v18471_v59 = vld [vmem:[#allocation51_spill] sm:$0xff]  ;;  %vm18483_vm15 = vcmp.eq.f32.partialorder %v9359_v42, %v9776_v34  ;;  %v18492_v32 = vld [vmem:[#allocation53_spill] sm:$0xff] }
 0x524   : > { %18457 = vst [vmem:[#allocation10_spill] sm:$0xff] %v10105_v28  ;;  %v10116_v26 = vsel %vm1862_vm14, %v18462_v29, %v18463_v56  ;;  %vm10121_vm0 = vmand %vm18466_vm6, %vm1833_vm3  ;;  %vm1831_vm8 = vcmp.eq.f32.partialorder %v1742_v54, 0.0  ;;  %v10126_v55 = vsel %vm1862_vm14, -1.0, %v9253_v2  ;;  %v18472_v22 = vsel %vm18470_vm11, %v18471_v59, 0.0  ;;  %v18474_v29 = vld [vmem:[#allocation8_spill] sm:$0xff] }
 0x525   : > { %18464 = vst [vmem:[#allocation14_spill] sm:$0xff] %v10116_v26  ;;  %v10135_v56 = vsel %vm10121_vm0, %v18471_v59, %v18472_v22  ;;  %v18475_v26 = vld [vmem:[#allocation72_spill] sm:$0xff]  ;;  %1970 = vmax.xlane.f32.xlu0 %v10126_v55  ;;  %vm18491_vm14 = vcmp.eq.f32.partialorder %v9329_v13, %v9754_v12  ;;  %vm18493_vm6 = vnez %v18492_v32 }
 0x526   : > { %18473 = vst [vmem:[#allocation71_spill] sm:$0xff] %v10135_v56  ;;  %vm18476_vm7 = vcmp.eq.f32.partialorder %v18474_v29, %v18475_v26  ;;  %v18479_v54 = vld [vmem:[#allocation52_spill] sm:$0xff]  ;;  %v10155_v26 = vsel %vm10089_vm2, -1.0, %v9283_v25  ;;  %v18486_v25 = vld [vmem:[#allocation19_spill] sm:$0xff]  ;;  %v18672_v43 = vld [vmem:[#allocation5_spill] sm:$0xff] }
 0x527   : > { %vm1863_vm5 = vmand %vm18476_vm7, %vm1831_vm8  ;;  %v18480_v2 = vsel %vm18478_vm12, %v18479_v54, 0.0  ;;  %vm18487_vm2 = vnez %v18486_v25  ;;  %v18606_v56 = vld [vmem:[#allocation83_spill] sm:$0xff] }
 0x528   : > { %v10146_v28 = vsel %vm1863_vm5, %v18479_v54, %v18480_v2  ;;  %v10149_v31 = vsel %vm1863_vm5, -1.0, %v18474_v29  ;;  %v7141_v22 = vpop.f32.mrb[32].mxu0  ;;  %v10168_v54 = vsel %vm10121_vm0, -1.0, %v9298_v10  ;;  %v18494_v10 = vld [vmem:[#allocation16_spill] sm:$0xff]  ;;  %vm18497_vm0 = vcmp.eq.f32.partialorder %v9374_v47, %v9779_v58  ;;  %v18508_v58 = vld [vmem:[#allocation21_spill] sm:$0xff]  ;;  %v18664_v11 = vld [vmem:[#allocation67_spill] sm:$0xff] }
 0x529   : > { %18481 = vst [vmem:[#allocation50_spill] sm:$0xff] %v10146_v28  ;;  %18482 = vst [vmem:[#allocation74_spill] sm:$0xff] %v10149_v31  ;;  %1972 = vmax.xlane.f32.xlu1 %v10149_v31  ;;  %vm1836_vm4 = vcmp.eq.f32.partialorder %v7141_v22, 0.0  ;;  %1974 = vmax.xlane.f32.xlu0 %v10155_v26  ;;  %v1755_v30 = vpop.f32.mrb[33].mxu0  ;;  %v18489_v22 = vsel %vm18487_vm2, %v18488_v8, 0.0  ;;  %v18519_v2 = vld [vmem:[#allocation36_spill] sm:$0xff] }
 0x52a   : > { %vm10161_vm9 = vmand %vm18483_vm15, %vm1836_vm4  ;;  %vm1834_vm1 = vcmp.eq.f32.partialorder %v1755_v30, 0.0  ;;  %v7142_v29 = vpop.f32.mrb[34].mxu0  ;;  %v18495_v30 = vsel %vm18493_vm6, %v18494_v10, 0.0  ;;  %vm18509_vm4 = vnez %v18508_v58 }
 0x52b   : > { %v10177_v28 = vsel %vm10161_vm9, %v18488_v8, %v18489_v22  ;;  %vm1866_vm3 = vmand %vm18491_vm14, %vm1834_vm1  ;;  %vm1837_vm13 = vcmp.eq.f32.partialorder %v7142_v29, 0.0  ;;  %v1758_v34 = vpop.f32.mrb[35].mxu0  ;;  %v18500_v29 = vld [vmem:[#allocation24_spill] sm:$0xff]  ;;  %v18502_v8 = vld [vmem:[#allocation54_spill] sm:$0xff]  ;;  %vm18514_vm1 = vcmp.eq.f32.partialorder %v9435_v41, %v9808_v38 }
 0x52c   : > { %18490 = vst [vmem:[#allocation18_spill] sm:$0xff] %v10177_v28  ;;  %v10188_v25 = vsel %vm1866_vm3, %v18494_v10, %v18495_v30  ;;  %vm10193_vm8 = vmand %vm18497_vm0, %vm1837_vm13  ;;  %vm1835_vm11 = vcmp.eq.f32.partialorder %v1758_v34, 0.0  ;;  %v10198_v12 = vsel %vm1866_vm3, -1.0, %v9329_v13  ;;  %vm18501_vm7 = vnez %v18500_v29  ;;  %v18505_v10 = vld [vmem:[#allocation12_spill] sm:$0xff]  ;;  %v18510_v34 = vld [vmem:[#allocation55_spill] sm:$0xff] }
 0x52d   : > { %1976 = vmax.xlane.f32.xlu1 %v10168_v54  ;;  %18496 = vst [vmem:[#allocation8_spill] sm:$0xff] %v10188_v25  ;;  %v18503_v32 = vsel %vm18501_vm7, %v18502_v8, 0.0  ;;  %v18506_v25 = vld [vmem:[#allocation76_spill] sm:$0xff]  ;;  %1978 = vmax.xlane.f32.xlu0 %v10198_v12  ;;  %v18511_v13 = vsel %vm18509_vm4, %v18510_v34, 0.0  ;;  %vm18522_vm3 = vcmp.eq.f32.partialorder %v9405_v0, %v9793_v48 }
 0x52e   : > { %v10207_v30 = vsel %vm10193_vm8, %v18502_v8, %v18503_v32  ;;  %vm18507_vm5 = vcmp.eq.f32.partialorder %v18505_v10, %v18506_v25  ;;  %v10227_v25 = vsel %vm10161_vm9, -1.0, %v9359_v42  ;;  %v18517_v42 = vld [vmem:[#allocation25_spill] sm:$0xff]  ;;  %v18523_v22 = vld [vmem:[#allocation56_spill] sm:$0xff] }
 0x52f   : > { %18504 = vst [vmem:[#allocation72_spill] sm:$0xff] %v10207_v30  ;;  %vm1867_vm12 = vmand %vm18507_vm5, %vm1835_vm11  ;;  %vm18518_vm9 = vnez %v18517_v42  ;;  %vm18524_vm0 = vnez %v18523_v22  ;;  %v18528_v8 = vld [vmem:[#allocation33_spill] sm:$0xff]  ;;  %v18529_v30 = vld [vmem:[#allocation79_spill] sm:$0xff] }
 0x530   : > { %v10218_v28 = vsel %vm1867_vm12, %v18510_v34, %v18511_v13  ;;  %v10221_v29 = vsel %vm1867_vm12, -1.0, %v18505_v10  ;;  %v7145_v32 = vpop.f32.mrb[36].mxu0  ;;  %v10240_v34 = vsel %vm10193_vm8, -1.0, %v9374_v47  ;;  %v18525_v47 = vld [vmem:[#allocation22_spill] sm:$0xff]  ;;  %vm18530_vm8 = vcmp.eq.f32.partialorder %v18528_v8, %v18529_v30  ;;  %v18553_v13 = vld [vmem:[#allocation17_spill] sm:$0xff] }
 0x531   : > { %18512 = vst [vmem:[#allocation15_spill] sm:$0xff] %v10218_v28  ;;  %18513 = vst [vmem:[#allocation19_spill] sm:$0xff] %v10221_v29  ;;  %1980 = vmax.xlane.f32.xlu1 %v10221_v29  ;;  %vm1840_vm15 = vcmp.eq.f32.partialorder %v7145_v32, 0.0  ;;  %1982 = vmax.xlane.f32.xlu0 %v10227_v25  ;;  %v1771_v58 = vpop.f32.mrb[37].mxu0  ;;  %v18520_v32 = vsel %vm18518_vm9, %v18519_v2, 0.0  ;;  %v18541_v30 = vld [vmem:[#allocation38_spill] sm:$0xff] }
 0x532   : > { %vm10233_vm2 = vmand %vm18514_vm1, %vm1840_vm15  ;;  %vm1838_vm14 = vcmp.eq.f32.partialorder %v1771_v58, 0.0  ;;  %v7146_v10 = vpop.f32.mrb[38].mxu0  ;;  %v18526_v58 = vsel %vm18524_vm0, %v18525_v47, 0.0  ;;  %vm18542_vm15 = vnez %v18541_v30 }
 0x533   : > { %v10249_v28 = vsel %vm10233_vm2, %v18519_v2, %v18520_v32  ;;  %vm1870_vm13 = vmand %vm18522_vm3, %vm1838_vm14  ;;  %vm1841_vm6 = vcmp.eq.f32.partialorder %v7146_v10, 0.0  ;;  %v1774_v38 = vpop.f32.mrb[39].mxu0  ;;  %v18533_v10 = vld [vmem:[#allocation31_spill] sm:$0xff]  ;;  %v18535_v2 = vld [vmem:[#allocation57_spill] sm:$0xff]  ;;  %vm18547_vm14 = vcmp.eq.f32.partialorder %v9507_v61, %v9838_v1 }
 0x534   : > { %18521 = vst [vmem:[#allocation53_spill] sm:$0xff] %v10249_v28  ;;  %v10260_v42 = vsel %vm1870_vm13, %v18525_v47, %v18526_v58  ;;  %vm10265_vm11 = vmand %vm18530_vm8, %vm1841_vm6  ;;  %vm1839_vm7 = vcmp.eq.f32.partialorder %v1774_v38, 0.0  ;;  %v10270_v48 = vsel %vm1870_vm13, -1.0, %v9405_v0  ;;  %vm18534_vm5 = vnez %v18533_v10  ;;  %v18538_v47 = vld [vmem:[#allocation27_spill] sm:$0xff]  ;;  %v18543_v38 = vld [vmem:[#allocation20_spill] sm:$0xff] }
 0x535   : > { %1984 = vmax.xlane.f32.xlu1 %v10240_v34  ;;  %18527 = vst [vmem:[#allocation24_spill] sm:$0xff] %v10260_v42  ;;  %v18536_v22 = vsel %vm18534_vm5, %v18535_v2, 0.0  ;;  %v18539_v42 = vld [vmem:[#allocation78_spill] sm:$0xff]  ;;  %1986 = vmax.xlane.f32.xlu0 %v10270_v48  ;;  %v18544_v0 = vsel %vm18542_vm15, %v18543_v38, 0.0  ;;  %vm18556_vm13 = vcmp.eq.f32.partialorder %v9480_v62, %v9823_v21 }
 0x536   : > { %v10279_v58 = vsel %vm10265_vm11, %v18535_v2, %v18536_v22  ;;  %vm18540_vm12 = vcmp.eq.f32.partialorder %v18538_v47, %v18539_v42  ;;  %v10299_v42 = vsel %vm10233_vm2, -1.0, %v9435_v41  ;;  %v18551_v41 = vld [vmem:[#allocation37_spill] sm:$0xff]  ;;  %v18557_v32 = vld [vmem:[#allocation58_spill] sm:$0xff]  ;;  %v18562_v2 = vld [vmem:[#allocation43_spill] sm:$0xff] }
 0x537   : > { %18537 = vst [vmem:[#allocation12_spill] sm:$0xff] %v10279_v58  ;;  %vm1871_vm4 = vmand %vm18540_vm12, %vm1839_vm7  ;;  %vm18552_vm2 = vnez %v18551_v41  ;;  %vm18558_vm8 = vnez %v18557_v32  ;;  %v18563_v58 = vld [vmem:[#allocation81_spill] sm:$0xff] }
 0x538   : > { %v10290_v28 = vsel %vm1871_vm4, %v18543_v38, %v18544_v0  ;;  %v10293_v10 = vsel %vm1871_vm4, -1.0, %v18538_v47  ;;  %v7149_v22 = vpop.f32.mrb[40].mxu0  ;;  %v10312_v38 = vsel %vm10265_vm11, -1.0, %v18528_v8  ;;  %v18559_v8 = vld [vmem:[#allocation29_spill] sm:$0xff]  ;;  %vm18564_vm11 = vcmp.eq.f32.partialorder %v18562_v2, %v18563_v58  ;;  %v18575_v58 = vld [vmem:[#allocation23_spill] sm:$0xff]  ;;  %v18587_v0 = vld [vmem:[#allocation60_spill] sm:$0xff] }
 0x539   : > { %18545 = vst [vmem:[#allocation76_spill] sm:$0xff] %v10290_v28  ;;  %18546 = vst [vmem:[#allocation21_spill] sm:$0xff] %v10293_v10  ;;  %1988 = vmax.xlane.f32.xlu1 %v10293_v10  ;;  %vm1844_vm1 = vcmp.eq.f32.partialorder %v7149_v22, 0.0  ;;  %1990 = vmax.xlane.f32.xlu0 %v10299_v42  ;;  %v1787_v30 = vpop.f32.mrb[41].mxu0  ;;  %v18554_v22 = vsel %vm18552_vm2, %v18553_v13, 0.0 }
 0x53a   : > { %vm10305_vm9 = vmand %vm18547_vm14, %vm1844_vm1  ;;  %vm1842_vm3 = vcmp.eq.f32.partialorder %v1787_v30, 0.0  ;;  %v7150_v47 = vpop.f32.mrb[42].mxu0  ;;  %18550 = vst [vmem:[#allocation25_spill] sm:$0xff] %v10312_v38  ;;  %v18560_v30 = vsel %vm18558_vm8, %v18559_v8, 0.0  ;;  %vm18576_vm1 = vnez %v18575_v58 }
 0x53b   : > { %v10321_v28 = vsel %vm10305_vm9, %v18553_v13, %v18554_v22  ;;  %vm1874_vm6 = vmand %vm18556_vm13, %vm1842_vm3  ;;  %vm1845_vm0 = vcmp.eq.f32.partialorder %v7150_v47, 0.0  ;;  %v1790_v1 = vpop.f32.mrb[43].mxu0  ;;  %v18567_v47 = vld [vmem:[#allocation26_spill] sm:$0xff]  ;;  %v18569_v13 = vld [vmem:[#allocation59_spill] sm:$0xff] }
 0x53c   : > { %18555 = vst [vmem:[#allocation56_spill] sm:$0xff] %v10321_v28  ;;  %v10332_v41 = vsel %vm1874_vm6, %v18559_v8, %v18560_v30  ;;  %vm10337_vm7 = vmand %vm18564_vm11, %vm1845_vm0  ;;  %vm1843_vm5 = vcmp.eq.f32.partialorder %v1790_v1, 0.0  ;;  %v10342_v21 = vsel %vm1874_vm6, -1.0, %v9480_v62  ;;  %vm18568_vm12 = vnez %v18567_v47  ;;  %v18572_v8 = vld [vmem:[#allocation39_spill] sm:$0xff]  ;;  %v18577_v1 = vld [vmem:[#allocation40_spill] sm:$0xff] }
 0x53d   : > { %1992 = vmax.xlane.f32.xlu1 %v10312_v38  ;;  %18561 = vst [vmem:[#allocation33_spill] sm:$0xff] %v10332_v41  ;;  %v18570_v32 = vsel %vm18568_vm12, %v18569_v13, 0.0  ;;  %v18573_v41 = vld [vmem:[#allocation80_spill] sm:$0xff]  ;;  %1994 = vmax.xlane.f32.xlu0 %v10342_v21  ;;  %v18578_v62 = vsel %vm18576_vm1, %v18577_v1, 0.0 }
 0x53e   : > { %v10351_v30 = vsel %vm10337_vm7, %v18569_v13, %v18570_v32  ;;  %vm18574_vm4 = vcmp.eq.f32.partialorder %v18572_v8, %v18573_v41  ;;  %v10371_v41 = vsel %vm10305_vm9, -1.0, %v9507_v61  ;;  %v18581_v13 = vld [vmem:[#allocation84_spill] sm:$0xff] }
 0x53f   : > { %18571 = vst [vmem:[#allocation79_spill] sm:$0xff] %v10351_v30  ;;  %vm1875_vm15 = vmand %vm18574_vm4, %vm1843_vm5  ;;  %vm18582_vm3 = vcmp.eq.f32.partialorder %v9579_v16, %v18581_v13  ;;  %v18590_v13 = vld [vmem:[#allocation62_spill] sm:$0xff]  ;;  %v18593_v22 = vld [vmem:[#allocation28_spill] sm:$0xff] }
 0x540   : > { %v10362_v28 = vsel %vm1875_vm15, %v18577_v1, %v18578_v62  ;;  %v10365_v47 = vsel %vm1875_vm15, -1.0, %v18572_v8  ;;  %v10384_v1 = vsel %vm10337_vm7, -1.0, %v18562_v2  ;;  %v18591_v30 = vld [vmem:[#allocation82_spill] sm:$0xff]  ;;  %vm18594_vm8 = vnez %v18593_v22  ;;  %v18595_v2 = vld [vmem:[#allocation61_spill] sm:$0xff] }
 0x541   : > { %18579 = vst [vmem:[#allocation31_spill] sm:$0xff] %v10362_v28  ;;  %18580 = vst [vmem:[#allocation27_spill] sm:$0xff] %v10365_v47  ;;  %1996 = vmax.xlane.f32.xlu1 %v10365_v47  ;;  %v7153_v32 = vpop.f32.mrb[44].mxu0  ;;  %1998 = vmax.xlane.f32.xlu0 %v10371_v41  ;;  %vm18592_vm9 = vcmp.eq.f32.partialorder %v18590_v13, %v18591_v30  ;;  %v18596_v59 = vsel %vm18594_vm8, %v18595_v2, 0.0  ;;  %v18600_v30 = vld [vmem:[#allocation44_spill] sm:$0xff]  ;;  %v18605_v22 = vld [vmem:[#allocation42_spill] sm:$0xff] }
 0x542   : > { %vm1848_vm14 = vcmp.eq.f32.partialorder %v7153_v32, 0.0  ;;  %v1803_v58 = vpop.f32.mrb[45].mxu0  ;;  %18585 = vst [vmem:[#allocation78_spill] sm:$0xff] %v10384_v1  ;;  %v18588_v32 = vsel %vm9515_vm10, %v18587_v0, 0.0  ;;  %vm18598_vm10 = vcmp.eq.f32.partialorder %v9585_v5, %v9871_v33  ;;  %vm18601_vm5 = vnez %v18600_v30  ;;  %v18610_v33 = vld [vmem:[#allocation63_spill] sm:$0xff] }
 0x543   : > { %vm10377_vm2 = vmand %vm18582_vm3, %vm1848_vm14  ;;  %vm1846_vm13 = vcmp.eq.f32.partialorder %v1803_v58, 0.0  ;;  %v7154_v8 = vpop.f32.mrb[46].mxu0  ;;  %vm18607_vm12 = vcmp.eq.f32.partialorder %v18605_v22, %v18606_v56 }
 0x544   : > { %v10393_v28 = vsel %vm10377_vm2, %v18587_v0, %v18588_v32  ;;  %vm1878_vm6 = vmand %vm18592_vm9, %vm1846_vm13  ;;  %vm1849_vm0 = vcmp.eq.f32.partialorder %v7154_v8, 0.0  ;;  %v1806_v58 = vpop.f32.mrb[47].mxu0  ;;  %v18602_v8 = vld [vmem:[#allocation41_spill] sm:$0xff] }
 0x545   : > { %18589 = vst [vmem:[#allocation38_spill] sm:$0xff] %v10393_v28  ;;  %2000 = vmax.xlane.f32.xlu1 %v10384_v1  ;;  %v10404_v61 = vsel %vm1878_vm6, %v18595_v2, %v18596_v59  ;;  %vm1881_vm11 = vmand %vm18598_vm10, %vm1849_vm0  ;;  %vm1847_vm7 = vcmp.eq.f32.partialorder %v1806_v58, 0.0  ;;  %v10410_v32 = vsel %vm1878_vm6, -1.0, %v18590_v13  ;;  %v18603_v0 = vsel %vm18601_vm5, %v18602_v8, 0.0  ;;  %v18608_v59 = vld [vmem:[#allocation30_spill] sm:$0xff] }
 0x546   : > { %18597 = vst [vmem:[#allocation37_spill] sm:$0xff] %v10404_v61  ;;  %18599 = vst [vmem:[#allocation58_spill] sm:$0xff] %v10410_v32  ;;  %v10417_v28 = vsel %vm1881_vm11, %v18602_v8, %v18603_v0  ;;  %2002 = vmax.xlane.f32.xlu0 %v10410_v32  ;;  %vm18609_vm15 = vnez %v18608_v59  ;;  %v10437_v0 = vsel %vm10377_vm2, -1.0, %v9579_v16  ;;  %v10441_v56 = vsel %vm1881_vm11, -1.0, %v9585_v5  ;;  %v18616_v8 = vld [vmem:[#allocation65_spill] sm:$0xff]  ;;  %v18617_v61 = vld [vmem:[#allocation66_spill] sm:$0xff] }
 0x547   : > { %18604 = vst [vmem:[#allocation43_spill] sm:$0xff] %v10417_v28  ;;  %vm1879_vm4 = vmand %vm18607_vm12, %vm1847_vm7  ;;  %v18611_v58 = vsel %vm18609_vm15, %v18610_v33, 0.0  ;;  %v18614_v16 = vmov 1.0|1.0  }
 0x548   : > { %v10428_v13 = vsel %vm1879_vm4, %v18610_v33, %v18611_v58  ;;  %v10431_v30 = vsel %vm1879_vm4, -1.0, %v18605_v22 }
 0x549   : > { %18612 = vst [vmem:[#allocation81_spill] sm:$0xff] %v10428_v13  ;;  %18613 = vst [vmem:[#allocation26_spill] sm:$0xff] %v10431_v30  ;;  %2004 = vmax.xlane.f32.xlu1 %v10431_v30  ;;  %v18615_v13 = vld [vmem:[#allocation64_spill] sm:$0xff] }
 0x54a   : > { %2006 = vmax.xlane.f32.xlu0 %v10437_v0 }
 0x54d   : > { %2008 = vmax.xlane.f32.xlu1 %v10441_v56 }
 0x599   : > { %v10444_v59 = vpop.xlane.xlu0 %1946 }
 0x59a   : > { %vm2010_vm1 = vcmp.eq.f32.partialorder %v9918_v40, %v10444_v59 }
 0x59b   : > { %v10446_v58 = vpop.xlane.xlu1 %1948 }
 0x59c   : > { %vm2011_vm14 = vcmp.eq.f32.partialorder %v9941_v18, %v10446_v58 }
 0x59d   : > { %vm6216_vm3 = vmpackc.low %vm2011_vm14, %vm2010_vm1  ;;  %v10458_v5 = vpop.xlane.xlu0 %1950 }
 0x59e   : > { %7171 = vmatprep.mubr.msk.bf16.mxu1 %vm6216_vm3, %v18614_v16  ;;  %vm2012_vm2 = vcmp.eq.f32.partialorder %v9947_v35, %v10458_v5 }
 0x59f   : > { %v10461_v62 = vpop.xlane.xlu1 %1952 }
 0x5a0   : > { %vm2013_vm13 = vcmp.eq.f32.partialorder %v9960_v44, %v10461_v62 }
 0x5a1   : > { %vm6218_vm9 = vmpackc.low %vm2013_vm13, %vm2012_vm2  ;;  %v10473_v22 = vpop.xlane.xlu0 %1954 }
 0x5a2   : > { %7172 = vmatmul.mubr.msk.bf16.vlgmr.msra.gmra.mrb[48].mxu1 %vm6218_vm9, %v18614_v16  ;;  %vm2014_vm6 = vcmp.eq.f32.partialorder %v9986_v36, %v10473_v22 }
 0x5a3   : > { %v10476_v33 = vpop.xlane.xlu1 %1956  ;;  %7252 = vmatpush3.bf16.msra.mxu1 %v18615_v13 }
 0x5a4   : > { %vm2015_vm0 = vcmp.eq.f32.partialorder %v10007_v57, %v10476_v33  ;;  %7253 = vmatprep.subr.bf16.mxu1 %v18616_v8 }
 0x5a5   : > { %vm6220_vm8 = vmpackc.low %vm2015_vm0, %vm2014_vm6  ;;  %v10490_v28 = vpop.xlane.xlu0 %1958 }
 0x5a6   : > { %7175 = vmatprep.mubr.msk.bf16.mxu1 %vm6220_vm8, %v18614_v16  ;;  %vm2016_vm10 = vcmp.eq.f32.partialorder %v10013_v46, %v10490_v28 }
 0x5a7   : > { %v10493_v2 = vpop.xlane.xlu1 %1960  ;;  %7254 = vmatpush3.bf16.msra.mxu1 %v18616_v8 }
 0x5a8   : > { %vm2017_vm11 = vcmp.eq.f32.partialorder %v10017_v39, %v10493_v2  ;;  %7255 = vmatprep.subr.bf16.mxu1 %v18617_v61  ;;  %v18650_v2 = vmov 0 }
 0x5a9   : > { %vm6222_vm7 = vmpackc.low %vm2017_vm11, %vm2016_vm10 }
 0x5aa   : > { %v10507_v37 = vpop.xlane.xlu0 %1962  ;;  %7176 = vmatmul.mubr.msk.bf16.gmra.mrb[52].mxu1 %vm6222_vm7, %v18614_v16 }
 0x5ab   : > { %7256 = vmatpush3.bf16.msra.mxu1 %v18617_v61  ;;  %vm2018_vm5 = vcmp.eq.f32.partialorder %v10054_v17, %v10507_v37 }
 0x5ac   : > { %v10511_v8 = vpop.xlane.xlu1 %1964  ;;  %7257 = vmatprep.subr.bf16.mxu1 %v18619_v53 }
 0x5ad   : > { %18618 = vst [vmem:[#allocation39_spill] sm:$0xff] %v10511_v8  ;;  %vm17275_vm12 = vcmp.eq.f32.partialorder %v10077_v15, %v10511_v8  ;;  %v18623_v15 = vld [vmem:[#allocation73_spill] sm:$0xff] }
 0x5ae   : > { %vm6224_vm4 = vmpackc.low %vm17275_vm12, %vm2018_vm5  ;;  %v10524_v14 = vpop.xlane.xlu0 %1966 }
 0x5af   : > { %7179 = vmatprep.mubr.msk.bf16.mxu1 %vm6224_vm4, %v18614_v16  ;;  %7258 = vmatpush3.bf16.msra.mxu1 %v18619_v53  ;;  %vm2020_vm15 = vcmp.eq.f32.partialorder %v10083_v51, %v10524_v14 }
 0x5b0   : > { %v10528_v61 = vpop.xlane.xlu1 %1968  ;;  %7259 = vmatprep.subr.bf16.mxu1 %v18621_v49 }
 0x5b1   : > { %18620 = vst [vmem:[#allocation80_spill] sm:$0xff] %v10528_v61  ;;  %vm17289_vm3 = vcmp.eq.f32.partialorder %v10096_v27, %v10528_v61  ;;  %v18625_v27 = vld [vmem:[#allocation75_spill] sm:$0xff] }
 0x5b2   : > { %vm6226_vm9 = vmpackc.low %vm17289_vm3, %vm2020_vm15  ;;  %v10541_v8 = vpop.xlane.xlu0 %1970 }
 0x5b3   : > { %7180 = vmatmul.mubr.msk.bf16.gmra.mrb[56].mxu1 %vm6226_vm9, %v18614_v16  ;;  %vm17280_vm8 = vcmp.eq.f32.partialorder %v10126_v55, %v10541_v8 }
 0x5b4   : > { %7260 = vmatpush3.bf16.msra.mxu1 %v18621_v49 }
 0x5b5   : > { %7261 = vmatprep.subr.bf16.mxu1 %v18623_v15 }
 0x5b6   : > { %v10544_v53 = vpop.xlane.xlu1 %1972  ;;  %v10558_v61 = vpop.xlane.xlu0 %1974 }
 0x5b7   : > { %18622 = vst [vmem:[#allocation23_spill] sm:$0xff] %v10544_v53  ;;  %vm17278_vm7 = vcmp.eq.f32.partialorder %v10149_v31, %v10544_v53  ;;  %vm17285_vm9 = vcmp.eq.f32.partialorder %v10155_v26, %v10558_v61  ;;  %v18627_v31 = vld [vmem:[#allocation77_spill] sm:$0xff] }
 0x5b8   : > { %vm6228_vm4 = vmpackc.low %vm17278_vm7, %vm17280_vm8  ;;  %7262 = vmatpush3.bf16.msra.mxu1 %v18623_v15  ;;  %v18665_v6 = vld [vmem:[#allocation80_spill] sm:$0xff] }
 0x5b9   : > { %7183 = vmatprep.mubr.msk.bf16.mxu1 %vm6228_vm4, %v18614_v16  ;;  %7263 = vmatprep.subr.bf16.mxu1 %v18625_v27 }
 0x5ba   : > { %v10561_v49 = vpop.xlane.xlu1 %1976  ;;  %v10575_v53 = vpop.xlane.xlu0 %1978 }
 0x5bb   : > { %18624 = vst [vmem:[#allocation84_spill] sm:$0xff] %v10561_v49  ;;  %vm17283_vm12 = vcmp.eq.f32.partialorder %v10168_v54, %v10561_v49  ;;  %vm17288_vm4 = vcmp.eq.f32.partialorder %v10198_v12, %v10575_v53 }
 0x5bc   : > { %vm6230_vm7 = vmpackc.low %vm17283_vm12, %vm17285_vm9  ;;  %7264 = vmatpush3.bf16.msra.mxu1 %v18625_v27 }
 0x5bd   : > { %7184 = vmatmul.mubr.msk.bf16.gmra.mrb[60].mxu1 %vm6230_vm7, %v18614_v16  ;;  %7265 = vmatprep.subr.bf16.mxu1 %v18627_v31 }
 0x5be   : > { %v10578_v15 = vpop.xlane.xlu1 %1980  ;;  %v10592_v49 = vpop.xlane.xlu0 %1982 }
 0x5bf   : > { %18626 = vst [vmem:[#allocation32_spill] sm:$0xff] %v10578_v15  ;;  %vm17286_vm8 = vcmp.eq.f32.partialorder %v10221_v29, %v10578_v15  ;;  %vm17293_vm7 = vcmp.eq.f32.partialorder %v10227_v25, %v10592_v49 }
 0x5c0   : > { %vm6232_vm12 = vmpackc.low %vm17286_vm8, %vm17288_vm4  ;;  %7266 = vmatpush3.bf16.msra.mxu1 %v18627_v31 }
 0x5c1   : > { %7187 = vmatprep.mubr.msk.bf16.mxu1 %vm6232_vm12, %v18614_v16  ;;  %7347 = vmatprep.subr.bf16.mxu1 %v18615_v13 }
 0x5c2   : > { %v10595_v27 = vpop.xlane.xlu1 %1984  ;;  %v10609_v15 = vpop.xlane.xlu0 %1986 }
 0x5c3   : > { %vm17292_vm9 = vcmp.eq.f32.partialorder %v10240_v34, %v10595_v27  ;;  %vm17298_vm12 = vcmp.eq.f32.partialorder %v10270_v48, %v10609_v15 }
 0x5c4   : > { %vm6234_vm8 = vmpackc.low %vm17292_vm9, %vm17293_vm7 }
 0x5c5   : > { %7188 = vmatmul.mubr.msk.bf16.gmra.mrb[64].mxu1 %vm6234_vm8, %v18614_v16 }
 0x5c6   : > { %v10612_v31 = vpop.xlane.xlu1 %1988  ;;  %v10624_v13 = vpop.xlane.xlu0 %1990 }
 0x5c7   : > { %18628 = vst [vmem:[#allocation62_spill] sm:$0xff] %v10612_v31  ;;  %vm17297_vm4 = vcmp.eq.f32.partialorder %v10293_v10, %v10612_v31  ;;  %vm17303_vm8 = vcmp.eq.f32.partialorder %v10299_v42, %v10624_v13 }
 0x5c8   : > { %vm6236_vm3 = vmpackc.low %vm17297_vm4, %vm17298_vm12 }
 0x5c9   : > { %7191 = vmatprep.mubr.msk.bf16.mxu1 %vm6236_vm3, %v18614_v16 }
 0x5ca   : > { %v10627_v29 = vpop.xlane.xlu1 %1992  ;;  %v10639_v31 = vpop.xlane.xlu0 %1994 }
 0x5cb   : > { %18629 = vst [vmem:[#allocation82_spill] sm:$0xff] %v10627_v29  ;;  %vm17302_vm9 = vcmp.eq.f32.partialorder %v10312_v38, %v10627_v29  ;;  %vm17308_vm3 = vcmp.eq.f32.partialorder %v10342_v21, %v10639_v31 }
 0x5cc   : > { %vm6238_vm7 = vmpackc.low %vm17302_vm9, %vm17303_vm8 }
 0x5cd   : > { %7192 = vmatmul.mubr.msk.bf16.gmra.mrb[68].mxu1 %vm6238_vm7, %v18614_v16 }
 0x5ce   : > { %v10642_v10 = vpop.xlane.xlu1 %1996  ;;  %v10654_v29 = vpop.xlane.xlu0 %1998 }
 0x5cf   : > { %18630 = vst [vmem:[#allocation28_spill] sm:$0xff] %v10642_v10  ;;  %vm17307_vm4 = vcmp.eq.f32.partialorder %v10365_v47, %v10642_v10  ;;  %vm17313_vm7 = vcmp.eq.f32.partialorder %v10371_v41, %v10654_v29 }
 0x5d0   : > { %vm6240_vm12 = vmpackc.low %vm17307_vm4, %vm17308_vm3 }
 0x5d1   : > { %7195 = vmatprep.mubr.msk.bf16.mxu1 %vm6240_vm12, %v18614_v16 }
 0x5d2   : > { %v10657_v38 = vpop.xlane.xlu1 %2000 }
 0x5d3   : > { %18631 = vst [vmem:[#allocation44_spill] sm:$0xff] %v10657_v38  ;;  %vm17312_vm9 = vcmp.eq.f32.partialorder %v10384_v1, %v10657_v38  ;;  %v10669_v10 = vpop.xlane.xlu0 %2002 }
 0x5d4   : > { %vm6242_vm8 = vmpackc.low %vm17312_vm9, %vm17313_vm7  ;;  %18632 = vst [vmem:[#allocation42_spill] sm:$0xff] %v10669_v10  ;;  %vm17319_vm12 = vcmp.eq.f32.partialorder %v10410_v32, %v10669_v10 }
 0x5d5   : > { %7196 = vmatmul.mubr.msk.bf16.gmra.mrb[72].mxu1 %vm6242_vm8, %v18614_v16 }
 0x5d6   : > { %v10672_v47 = vpop.xlane.xlu1 %2004 }
 0x5d7   : > { %18633 = vst [vmem:[#allocation83_spill] sm:$0xff] %v10672_v47  ;;  %vm17315_vm4 = vcmp.eq.f32.partialorder %v10431_v30, %v10672_v47  ;;  %v10684_v38 = vpop.xlane.xlu0 %2006 }
 0x5d8   : > { %vm6244_vm3 = vmpackc.low %vm17315_vm4, %vm17319_vm12  ;;  %vm17333_vm8 = vcmp.eq.f32.partialorder %v10437_v0, %v10684_v38 }
 0x5d9   : > { %7199 = vmatprep.mubr.msk.bf16.mxu1 %vm6244_vm3, %v18614_v16 }
 0x5da   : > { %v10687_v1 = vpop.xlane.xlu1 %2008 }
 0x5db   : > { %18634 = vst [vmem:[#allocation30_spill] sm:$0xff] %v10687_v1  ;;  %vm17323_vm9 = vcmp.eq.f32.partialorder %v10441_v56, %v10687_v1 }
 0x5dc   : > { %vm6246_vm7 = vmpackc.low %vm17323_vm9, %vm17333_vm8 }
 0x5dd   : > { %7200 = vmatmul.mubr.msk.bf16.gmra.mrb[76].mxu1 %vm6246_vm7, %v18614_v16 }
 0x675   : > { %v7173_v47 = vpop.f32.mrb[48].mxu1 }
 0x676   : > { %vm2285_vm4 = vcmp.eq.f32.partialorder %v7173_v47, 0.0  ;;  %v2156_v30 = vpop.f32.mrb[49].mxu1 }
 0x677   : > { %vm10703_vm3 = vmand %vm2012_vm2, %vm2285_vm4  ;;  %vm2283_vm12 = vcmp.eq.f32.partialorder %v2156_v30, 0.0  ;;  %v7174_v32 = vpop.f32.mrb[50].mxu1 }
 0x678   : > { %vm10714_vm7 = vmand %vm2010_vm1, %vm2283_vm12  ;;  %vm2286_vm9 = vcmp.eq.f32.partialorder %v7174_v32, 0.0  ;;  %v2159_v5 = vpop.f32.mrb[51].mxu1  ;;  %v10759_v58 = vsel %vm10703_vm3, -1.0, %v9947_v35 }
 0x679   : > { %vm10725_vm2 = vmand %vm2013_vm13, %vm2286_vm9  ;;  %vm2284_vm4 = vcmp.eq.f32.partialorder %v2159_v5, 0.0  ;;  %v10732_v59 = vsel %vm10714_vm7, -1.0, %v9918_v40 }
 0x67a   : > { %vm10741_vm1 = vmand %vm2011_vm14, %vm2284_vm4  ;;  %2411 = vmax.xlane.f32.xlu0 %v10732_v59  ;;  %v10772_v1 = vsel %vm10725_vm2, -1.0, %v9960_v44  ;;  %v18859_v47 = vsel %vm10725_vm2, %v9009_v45, %v9927_v23 }
 0x67b   : > { %v10753_v5 = vsel %vm10741_vm1, -1.0, %v9941_v18 }
 0x67c   : > { %2413 = vmax.xlane.f32.xlu1 %v10753_v5 }
 0x67d   : > { %v7177_v32 = vpop.f32.mrb[52].mxu1 }
 0x67e   : > { %vm2289_vm14 = vcmp.eq.f32.partialorder %v7177_v32, 0.0  ;;  %2415 = vmax.xlane.f32.xlu0 %v10759_v58  ;;  %v2172_v30 = vpop.f32.mrb[53].mxu1  ;;  %v18647_v32 = vmov 0 }
 0x67f   : > { %vm10765_vm13 = vmand %vm2016_vm10, %vm2289_vm14  ;;  %vm2287_vm9 = vcmp.eq.f32.partialorder %v2172_v30, 0.0  ;;  %v7178_v18 = vpop.f32.mrb[54].mxu1 }
 0x680   : > { %vm10781_vm12 = vmand %vm2014_vm6, %vm2287_vm9  ;;  %vm2290_vm10 = vcmp.eq.f32.partialorder %v7178_v18, 0.0  ;;  %2417 = vmax.xlane.f32.xlu1 %v10772_v1  ;;  %v2175_v30 = vpop.f32.mrb[55].mxu1  ;;  %v10827_v33 = vsel %vm10765_vm13, -1.0, %v10013_v46 }
 0x681   : > { %vm10793_vm4 = vmand %vm2017_vm11, %vm2290_vm10  ;;  %vm2288_vm6 = vcmp.eq.f32.partialorder %v2175_v30, 0.0  ;;  %v10800_v22 = vsel %vm10781_vm12, -1.0, %v9986_v36 }
 0x682   : > { %v18648_v32 = vsel %vm10793_vm4, 4294967295, %v18647_v32  ;;  %vm10809_vm14 = vmand %vm2015_vm0, %vm2288_vm6  ;;  %2419 = vmax.xlane.f32.xlu0 %v10800_v22  ;;  %v10833_v36 = vsel %vm10793_vm4, -1.0, %v10017_v39  ;;  %v18659_v39 = vmov 0  ;;  %vm18666_vm6 = vcmp.eq.f32.partialorder %v18664_v11, %v18665_v6 }
 0x683   : > { %18649 = vst [vmem:[#allocation64_spill] sm:$0xff] %v18648_v32  ;;  %v18651_v2 = vsel %vm10809_vm14, 4294967295, %v18650_v2  ;;  %v10821_v30 = vsel %vm10809_vm14, -1.0, %v10007_v57  ;;  %v18654_v57 = vmov 0  ;;  %v18667_v32 = vmov 0 }
 0x684   : > { %18652 = vst [vmem:[#allocation65_spill] sm:$0xff] %v18651_v2  ;;  %18653 = vst [vmem:[#allocation66_spill] sm:$0xff] %v10821_v30  ;;  %2421 = vmax.xlane.f32.xlu1 %v10821_v30  ;;  %v18675_v6 = vmov 0 }
 0x686   : > { %v7181_v18 = vpop.f32.mrb[56].mxu1  ;;  %2423 = vmax.xlane.f32.xlu0 %v10827_v33 }
 0x687   : > { %vm2293_vm0 = vcmp.eq.f32.partialorder %v7181_v18, 0.0  ;;  %v2188_v44 = vpop.f32.mrb[57].mxu1 }
 0x688   : > { %vm10838_vm11 = vmand %vm2020_vm15, %vm2293_vm0  ;;  %vm2291_vm9 = vcmp.eq.f32.partialorder %v2188_v44, 0.0  ;;  %v7182_v46 = vpop.f32.mrb[58].mxu1  ;;  %2425 = vmax.xlane.f32.xlu1 %v10833_v36  ;;  %v18673_v44 = vld [vmem:[#allocation39_spill] sm:$0xff] }
 0x689   : > { %v18655_v57 = vsel %vm10838_vm11, 4294967295, %v18654_v57  ;;  %vm10850_vm10 = vmand %vm2018_vm5, %vm2291_vm9  ;;  %vm2294_vm15 = vcmp.eq.f32.partialorder %v7182_v46, 0.0  ;;  %v2191_v14 = vpop.f32.mrb[59].mxu1  ;;  %vm18674_vm5 = vcmp.eq.f32.partialorder %v18672_v43, %v18673_v44  ;;  %v10895_v44 = vsel %vm10838_vm11, -1.0, %v10083_v51 }
 0x68a   : > { %18656 = vst [vmem:[#allocation68_spill] sm:$0xff] %v18655_v57  ;;  %v18660_v39 = vsel %vm10850_vm10, 4294967295, %v18659_v39  ;;  %vm10861_vm0 = vmand %vm18666_vm6, %vm2294_vm15  ;;  %vm2292_vm8 = vcmp.eq.f32.partialorder %v2191_v14, 0.0  ;;  %v10868_v37 = vsel %vm10850_vm10, -1.0, %v10054_v17  ;;  %vm18681_vm15 = vcmp.eq.f32.partialorder %v10155_v26, %v10558_v61  ;;  %v11331_v57 = vld [vmem:[%s16971_s3 + $0x18] sm:$0xff]  }
 0x68b   : > { %18661 = vst [vmem:[#allocation70_spill] sm:$0xff] %v18660_v39  ;;  %v18668_v32 = vsel %vm10861_vm0, 4294967295, %v18667_v32  ;;  %vm10877_vm9 = vmand %vm18674_vm5, %vm2292_vm8  ;;  %2427 = vmax.xlane.f32.xlu0 %v10868_v37  ;;  %v18682_v17 = vmov 0  ;;  %v10908_v14 = vsel %vm10861_vm0, -1.0, %v18664_v11  ;;  %v18688_v61 = vmov 0  ;;  %v18700_v39 = vld [vmem:[#allocation74_spill] sm:$0xff] }
 0x68c   : > { %18669 = vst [vmem:[#allocation73_spill] sm:$0xff] %v18668_v32  ;;  %v18676_v6 = vsel %vm10877_vm9, 4294967295, %v18675_v6  ;;  %v10889_v2 = vsel %vm10877_vm9, -1.0, %v18672_v43  ;;  %vm18687_vm9 = vcmp.eq.f32.partialorder %v10126_v55, %v10541_v8  ;;  %v18693_v32 = vld [vmem:[#allocation84_spill] sm:$0xff]  ;;  %v18701_v11 = vld [vmem:[#allocation23_spill] sm:$0xff]  ;;  %18833 = vst [vmem:[#allocation98_spill] sm:$0xff] %v11331_v57 }
 0x68d   : > { %18677 = vst [vmem:[#allocation75_spill] sm:$0xff] %v18676_v6  ;;  %18680 = vst [vmem:[#allocation77_spill] sm:$0xff] %v10889_v2  ;;  %2429 = vmax.xlane.f32.xlu1 %v10889_v2 }
 0x68f   : > { %2431 = vmax.xlane.f32.xlu0 %v10895_v44 }
 0x690   : > { %v7185_v35 = vpop.f32.mrb[60].mxu1 }
 0x691   : > { %vm2297_vm8 = vcmp.eq.f32.partialorder %v7185_v35, 0.0  ;;  %v2204_v46 = vpop.f32.mrb[61].mxu1  ;;  %2433 = vmax.xlane.f32.xlu1 %v10908_v14  ;;  %v18695_v35 = vmov 0 }
 0x692   : > { %vm10901_vm6 = vmand %vm18681_vm15, %vm2297_vm8  ;;  %vm2295_vm5 = vcmp.eq.f32.partialorder %v2204_v46, 0.0  ;;  %v7186_v43 = vpop.f32.mrb[62].mxu1  ;;  %vm18694_vm15 = vcmp.eq.f32.partialorder %v10168_v54, %v18693_v32  ;;  %v18703_v32 = vmov 0 }
 0x693   : > { %v18683_v17 = vsel %vm10901_vm6, 4294967295, %v18682_v17  ;;  %vm10917_vm10 = vmand %vm18687_vm9, %vm2295_vm5  ;;  %vm2298_vm8 = vcmp.eq.f32.partialorder %v7186_v43, 0.0  ;;  %v2207_v46 = vpop.f32.mrb[63].mxu1  ;;  %vm18702_vm5 = vcmp.eq.f32.partialorder %v18700_v39, %v18701_v11  ;;  %v10963_v11 = vsel %vm10901_vm6, -1.0, %v10155_v26 }
 0x694   : > { %18684 = vst [vmem:[#allocation67_spill] sm:$0xff] %v18683_v17  ;;  %v18689_v61 = vsel %vm10917_vm10, 4294967295, %v18688_v61  ;;  %vm10929_vm0 = vmand %vm18694_vm15, %vm2298_vm8  ;;  %vm2296_vm9 = vcmp.eq.f32.partialorder %v2207_v46, 0.0  ;;  %v10936_v8 = vsel %vm10917_vm10, -1.0, %v10126_v55  ;;  %vm18709_vm15 = vcmp.eq.f32.partialorder %v10227_v25, %v10592_v49 }
 0x695   : > { %18690 = vst [vmem:[#allocation80_spill] sm:$0xff] %v18689_v61  ;;  %v18696_v35 = vsel %vm10929_vm0, 4294967295, %v18695_v35  ;;  %vm10945_vm11 = vmand %vm18702_vm5, %vm2296_vm9  ;;  %2435 = vmax.xlane.f32.xlu0 %v10936_v8  ;;  %v18710_v55 = vmov 0  ;;  %v10976_v46 = vsel %vm10929_vm0, -1.0, %v10168_v54  ;;  %v18716_v49 = vmov 0  ;;  %v18728_v54 = vld [vmem:[#allocation32_spill] sm:$0xff] }
 0x696   : > { %18697 = vst [vmem:[#allocation5_spill] sm:$0xff] %v18696_v35  ;;  %v18704_v32 = vsel %vm10945_vm11, 4294967295, %v18703_v32  ;;  %v10957_v18 = vsel %vm10945_vm11, -1.0, %v18700_v39  ;;  %vm18715_vm11 = vcmp.eq.f32.partialorder %v10198_v12, %v10575_v53  ;;  %v18727_v35 = vld [vmem:[#allocation19_spill] sm:$0xff]  ;;  %v18818_v61 = vld [vmem:[#allocation26_spill] sm:$0xff] }
 0x697   : > { %18705 = vst [vmem:[#allocation39_spill] sm:$0xff] %v18704_v32  ;;  %18708 = vst [vmem:[#allocation84_spill] sm:$0xff] %v10957_v18  ;;  %2437 = vmax.xlane.f32.xlu1 %v10957_v18 }
 0x698   : > { %v7189_v19 = vpop.f32.mrb[64].mxu1 }
 0x699   : > { %vm2301_vm8 = vcmp.eq.f32.partialorder %v7189_v19, 0.0  ;;  %2439 = vmax.xlane.f32.xlu0 %v10963_v11  ;;  %v2220_v43 = vpop.f32.mrb[65].mxu1  ;;  %v18722_v19 = vmov 0 }
 0x69a   : > { %vm10969_vm9 = vmand %vm18709_vm15, %vm2301_vm8  ;;  %vm2299_vm5 = vcmp.eq.f32.partialorder %v2220_v43, 0.0  ;;  %v7190_v39 = vpop.f32.mrb[66].mxu1  ;;  %vm18721_vm15 = vcmp.eq.f32.partialorder %v10240_v34, %v10595_v27  ;;  %v18730_v27 = vmov 0 }
 0x69b   : > { %v18711_v55 = vsel %vm10969_vm9, 4294967295, %v18710_v55  ;;  %vm10985_vm10 = vmand %vm18715_vm11, %vm2299_vm5  ;;  %vm2302_vm8 = vcmp.eq.f32.partialorder %v7190_v39, 0.0  ;;  %2441 = vmax.xlane.f32.xlu1 %v10976_v46  ;;  %v2223_v43 = vpop.f32.mrb[67].mxu1  ;;  %vm18729_vm5 = vcmp.eq.f32.partialorder %v18727_v35, %v18728_v54  ;;  %v11031_v54 = vsel %vm10969_vm9, -1.0, %v10227_v25 }
 0x69c   : > { %18712 = vst [vmem:[#allocation74_spill] sm:$0xff] %v18711_v55  ;;  %v18717_v49 = vsel %vm10985_vm10, 4294967295, %v18716_v49  ;;  %vm10997_vm0 = vmand %vm18721_vm15, %vm2302_vm8  ;;  %vm2300_vm11 = vcmp.eq.f32.partialorder %v2223_v43, 0.0  ;;  %v11004_v53 = vsel %vm10985_vm10, -1.0, %v10198_v12  ;;  %vm18736_vm15 = vcmp.eq.f32.partialorder %v10299_v42, %v10624_v13  ;;  %v18756_v55 = vld [vmem:[#allocation21_spill] sm:$0xff] }
 0x69d   : > { %18718 = vst [vmem:[#allocation23_spill] sm:$0xff] %v18717_v49  ;;  %v18723_v19 = vsel %vm10997_vm0, 4294967295, %v18722_v19  ;;  %vm11013_vm6 = vmand %vm18729_vm5, %vm2300_vm11  ;;  %2443 = vmax.xlane.f32.xlu0 %v11004_v53  ;;  %v18737_v12 = vmov 0  ;;  %v11044_v43 = vsel %vm10997_vm0, -1.0, %v10240_v34  ;;  %v18743_v13 = vmov 0  ;;  %v18749_v49 = vld [vmem:[#allocation82_spill] sm:$0xff] }
 0x69e   : > { %18724 = vst [vmem:[#allocation87_spill] sm:$0xff] %v18723_v19  ;;  %v18731_v27 = vsel %vm11013_vm6, 4294967295, %v18730_v27  ;;  %v11025_v51 = vsel %vm11013_vm6, -1.0, %v18727_v35  ;;  %vm18742_vm6 = vcmp.eq.f32.partialorder %v10270_v48, %v10609_v15  ;;  %v18748_v19 = vld [vmem:[#allocation25_spill] sm:$0xff]  ;;  %v18757_v34 = vld [vmem:[#allocation62_spill] sm:$0xff] }
 0x69f   : > { %18732 = vst [vmem:[#allocation19_spill] sm:$0xff] %v18731_v27  ;;  %18735 = vst [vmem:[#allocation32_spill] sm:$0xff] %v11025_v51  ;;  %2445 = vmax.xlane.f32.xlu1 %v11025_v51 }
 0x6a0   : > { %v7193_v6 = vpop.f32.mrb[68].mxu1 }
 0x6a1   : > { %vm2305_vm8 = vcmp.eq.f32.partialorder %v7193_v6, 0.0  ;;  %2447 = vmax.xlane.f32.xlu0 %v11031_v54  ;;  %v2236_v39 = vpop.f32.mrb[69].mxu1  ;;  %v18751_v6 = vmov 0 }
 0x6a2   : > { %vm11037_vm11 = vmand %vm18736_vm15, %vm2305_vm8  ;;  %vm2303_vm5 = vcmp.eq.f32.partialorder %v2236_v39, 0.0  ;;  %v7194_v35 = vpop.f32.mrb[70].mxu1  ;;  %vm18750_vm15 = vcmp.eq.f32.partialorder %v18748_v19, %v18749_v49  ;;  %v18759_v49 = vmov 0 }
 0x6a3   : > { %v18738_v12 = vsel %vm11037_vm11, 4294967295, %v18737_v12  ;;  %vm11053_vm10 = vmand %vm18742_vm6, %vm2303_vm5  ;;  %vm2306_vm8 = vcmp.eq.f32.partialorder %v7194_v35, 0.0  ;;  %2449 = vmax.xlane.f32.xlu1 %v11044_v43  ;;  %v2239_v39 = vpop.f32.mrb[71].mxu1  ;;  %vm18758_vm5 = vcmp.eq.f32.partialorder %v18756_v55, %v18757_v34  ;;  %v11099_v34 = vsel %vm11037_vm11, -1.0, %v10299_v42  ;;  %v18803_v42 = vld [vmem:[#allocation42_spill] sm:$0xff] }
 0x6a4   : > { %18739 = vst [vmem:[#allocation88_spill] sm:$0xff] %v18738_v12  ;;  %v18744_v13 = vsel %vm11053_vm10, 4294967295, %v18743_v13  ;;  %vm11065_vm0 = vmand %vm18750_vm15, %vm2306_vm8  ;;  %vm2304_vm6 = vcmp.eq.f32.partialorder %v2239_v39, 0.0  ;;  %v11072_v15 = vsel %vm11053_vm10, -1.0, %v10270_v48  ;;  %vm18765_vm15 = vcmp.eq.f32.partialorder %v10371_v41, %v10654_v29  ;;  %v18786_v12 = vld [vmem:[#allocation27_spill] sm:$0xff] }
 0x6a5   : > { %18745 = vst [vmem:[#allocation89_spill] sm:$0xff] %v18744_v13  ;;  %v18752_v6 = vsel %vm11065_vm0, 4294967295, %v18751_v6  ;;  %vm11081_vm9 = vmand %vm18758_vm5, %vm2304_vm6  ;;  %2451 = vmax.xlane.f32.xlu0 %v11072_v15  ;;  %v18766_v48 = vmov 0  ;;  %v11112_v39 = vsel %vm11065_vm0, -1.0, %v18748_v19  ;;  %v18773_v29 = vmov 0  ;;  %v18779_v13 = vld [vmem:[#allocation44_spill] sm:$0xff] }
 0x6a6   : > { %18753 = vst [vmem:[#allocation25_spill] sm:$0xff] %v18752_v6  ;;  %v18760_v49 = vsel %vm11081_vm9, 4294967295, %v18759_v49  ;;  %v11093_v26 = vsel %vm11081_vm9, -1.0, %v18756_v55  ;;  %18769 = vst [vmem:[#allocation90_spill] sm:$0xff] %v11112_v39  ;;  %vm18772_vm9 = vcmp.eq.f32.partialorder %v10342_v21, %v10639_v31  ;;  %v18778_v6 = vld [vmem:[#allocation78_spill] sm:$0xff]  ;;  %v18787_v19 = vld [vmem:[#allocation28_spill] sm:$0xff] }
 0x6a7   : > { %18761 = vst [vmem:[#allocation82_spill] sm:$0xff] %v18760_v49  ;;  %18764 = vst [vmem:[#allocation21_spill] sm:$0xff] %v11093_v26  ;;  %2453 = vmax.xlane.f32.xlu1 %v11093_v26 }
 0x6a8   : > { %v7197_v32 = vpop.f32.mrb[72].mxu1 }
 0x6a9   : > { %vm2309_vm8 = vcmp.eq.f32.partialorder %v7197_v32, 0.0  ;;  %2455 = vmax.xlane.f32.xlu0 %v11099_v34  ;;  %v2252_v35 = vpop.f32.mrb[73].mxu1  ;;  %v18781_v32 = vmov 0 }
 0x6aa   : > { %vm11105_vm6 = vmand %vm18765_vm15, %vm2309_vm8  ;;  %vm2307_vm5 = vcmp.eq.f32.partialorder %v2252_v35, 0.0  ;;  %v7198_v55 = vpop.f32.mrb[74].mxu1  ;;  %vm18780_vm15 = vcmp.eq.f32.partialorder %v18778_v6, %v18779_v13  ;;  %v18789_v13 = vmov 0 }
 0x6ab   : > { %v18767_v48 = vsel %vm11105_vm6, 4294967295, %v18766_v48  ;;  %vm11121_vm10 = vmand %vm18772_vm9, %vm2307_vm5  ;;  %vm2310_vm8 = vcmp.eq.f32.partialorder %v7198_v55, 0.0  ;;  %2457 = vmax.xlane.f32.xlu1 %v11112_v39  ;;  %v2255_v35 = vpop.f32.mrb[75].mxu1  ;;  %vm18788_vm5 = vcmp.eq.f32.partialorder %v18786_v12, %v18787_v19  ;;  %v11167_v19 = vsel %vm11105_vm6, -1.0, %v10371_v41  ;;  %v11291_v41 = vld [vmem:[%s16971_s3 + $0x8] sm:$0xff]  }
 0x6ac   : > { %18768 = vst [vmem:[#allocation62_spill] sm:$0xff] %v18767_v48  ;;  %v18774_v29 = vsel %vm11121_vm10, 4294967295, %v18773_v29  ;;  %vm11133_vm0 = vmand %vm18780_vm15, %vm2310_vm8  ;;  %vm2308_vm9 = vcmp.eq.f32.partialorder %v2255_v35, 0.0  ;;  %v11140_v31 = vsel %vm11121_vm10, -1.0, %v10342_v21  ;;  %vm18795_vm15 = vcmp.eq.f32.partialorder %v10437_v0, %v10684_v38  ;;  %v18810_v48 = vld [vmem:[#allocation30_spill] sm:$0xff] }
 0x6ad   : > { %18775 = vst [vmem:[#allocation91_spill] sm:$0xff] %v18774_v29  ;;  %v18782_v32 = vsel %vm11133_vm0, 4294967295, %v18781_v32  ;;  %vm11149_vm11 = vmand %vm18788_vm5, %vm2308_vm9  ;;  %2459 = vmax.xlane.f32.xlu0 %v11140_v31  ;;  %v18796_v21 = vmov 0  ;;  %v11180_v35 = vsel %vm11133_vm0, -1.0, %v18778_v6  ;;  %v18805_v38 = vmov 0  ;;  %v18819_v6 = vld [vmem:[#allocation83_spill] sm:$0xff] }
 0x6ae   : > { %18783 = vst [vmem:[#allocation78_spill] sm:$0xff] %v18782_v32  ;;  %v18790_v13 = vsel %vm11149_vm11, 4294967295, %v18789_v13  ;;  %v11161_v25 = vsel %vm11149_vm11, -1.0, %v18786_v12  ;;  %18799 = vst [vmem:[#allocation92_spill] sm:$0xff] %v11180_v35 }
 0x6af   : > { %18791 = vst [vmem:[#allocation44_spill] sm:$0xff] %v18790_v13  ;;  %18794 = vst [vmem:[#allocation27_spill] sm:$0xff] %v11161_v25  ;;  %2461 = vmax.xlane.f32.xlu1 %v11161_v25  ;;  %v18802_v13 = vld [vmem:[#allocation58_spill] sm:$0xff] }
 0x6b0   : > { %v7201_v27 = vpop.f32.mrb[76].mxu1  ;;  %vm18804_vm11 = vcmp.eq.f32.partialorder %v18802_v13, %v18803_v42  ;;  %18830 = vst [vmem:[#allocation95_spill] sm:$0xff] %v11291_v41 }
 0x6b1   : > { %vm2313_vm8 = vcmp.eq.f32.partialorder %v7201_v27, 0.0  ;;  %2463 = vmax.xlane.f32.xlu0 %v11167_v19  ;;  %v2268_v55 = vpop.f32.mrb[77].mxu1  ;;  %v18812_v27 = vmov 0 }
 0x6b2   : > { %vm11173_vm9 = vmand %vm18795_vm15, %vm2313_vm8  ;;  %vm2311_vm5 = vcmp.eq.f32.partialorder %v2268_v55, 0.0  ;;  %v7202_v12 = vpop.f32.mrb[78].mxu1  ;;  %vm18811_vm15 = vcmp.eq.f32.partialorder %v10441_v56, %v18810_v48  ;;  %v18821_v48 = vmov 0 }
 0x6b3   : > { %v18797_v21 = vsel %vm11173_vm9, 4294967295, %v18796_v21  ;;  %vm11189_vm10 = vmand %vm18804_vm11, %vm2311_vm5  ;;  %vm2314_vm8 = vcmp.eq.f32.partialorder %v7202_v12, 0.0  ;;  %2465 = vmax.xlane.f32.xlu1 %v11180_v35  ;;  %v2271_v55 = vpop.f32.mrb[79].mxu1  ;;  %vm18820_vm5 = vcmp.eq.f32.partialorder %v18818_v61, %v18819_v6  ;;  %v11235_v6 = vsel %vm11173_vm9, -1.0, %v10437_v0  ;;  %v11281_v12 = vld [vmem:[%s16971_s3] sm:$0xff]  }
 0x6b4   : > { %18798 = vst [vmem:[#allocation28_spill] sm:$0xff] %v18797_v21  ;;  %v18806_v38 = vsel %vm11189_vm10, 4294967295, %v18805_v38  ;;  %vm11201_vm0 = vmand %vm18811_vm15, %vm2314_vm8  ;;  %vm2312_vm11 = vcmp.eq.f32.partialorder %v2271_v55, 0.0  ;;  %v11208_v42 = vsel %vm11189_vm10, -1.0, %v18802_v13  ;;  %v11313_v21 = vld [vmem:[%s16971_s3 + $0x10] sm:$0xff]  }
 0x6b5   : > { %18807 = vst [vmem:[#allocation58_spill] sm:$0xff] %v18806_v38  ;;  %v18813_v27 = vsel %vm11201_vm0, 4294967295, %v18812_v27  ;;  %18815 = vst [vmem:[#allocation30_spill] sm:$0xff] %v11208_v42  ;;  %2467 = vmax.xlane.f32.xlu0 %v11208_v42  ;;  %v11241_v49 = vsel %vm11201_vm0, -1.0, %v10441_v56  ;;  %v18827_v56 = vmov 1.0|1.0  }
 0x6b6   : > { %18814 = vst [vmem:[#allocation42_spill] sm:$0xff] %v18813_v27  ;;  %vm11217_vm6 = vmand %vm18820_vm5, %vm2312_vm11 }
 0x6b7   : > { %v18822_v48 = vsel %vm11217_vm6, 4294967295, %v18821_v48  ;;  %v11229_v32 = vsel %vm11217_vm6, -1.0, %v18818_v61  ;;  %18829 = vst [vmem:[#allocation94_spill] sm:$0xff] %v11281_v12  ;;  %18831 = vst [vmem:[#allocation96_spill] sm:$0xff] %v11313_v21 }
 0x6b8   : > { %18823 = vst [vmem:[#allocation26_spill] sm:$0xff] %v18822_v48  ;;  %18826 = vst [vmem:[#allocation83_spill] sm:$0xff] %v11229_v32  ;;  %2469 = vmax.xlane.f32.xlu1 %v11229_v32 }
 0x6b9   : > { %2471 = vmax.xlane.f32.xlu0 %v11235_v6 }
 0x6bc   : > { %2473 = vmax.xlane.f32.xlu1 %v11241_v49 }
 0x707   : > { %v11244_v13 = vpop.xlane.xlu0 %2411 }
 0x708   : > { %vm17379_vm8 = vcmp.eq.f32.partialorder %v10732_v59, %v11244_v13 }
 0x709   : > { %v11246_v61 = vpop.xlane.xlu1 %2413 }
 0x70a   : > { %vm17375_vm15 = vcmp.eq.f32.partialorder %v10753_v5, %v11246_v61 }
 0x70b   : > { %vm6280_vm11 = vmpackc.low %vm17375_vm15, %vm17379_vm8  ;;  %v11258_v0 = vpop.xlane.xlu0 %2415 }
 0x70c   : > { %7219 = vmatprep.mubr.msk.bf16.mxu0 %vm6280_vm11, %v18827_v56  ;;  %vm17424_vm5 = vcmp.eq.f32.partialorder %v10759_v58, %v11258_v0 }
 0x70d   : > { %v11261_v55 = vpop.xlane.xlu1 %2417 }
 0x70e   : > { %vm17378_vm6 = vcmp.eq.f32.partialorder %v10772_v1, %v11261_v55 }
 0x70f   : > { %vm6282_vm0 = vmpackc.low %vm17378_vm6, %vm17424_vm5  ;;  %v11273_v29 = vpop.xlane.xlu0 %2419 }
 0x710   : > { %7220 = vmatmul.mubr.msk.bf16.vlgmr.msra.gmra.mrb[48].mxu0 %vm6282_vm0, %v18827_v56  ;;  %vm17392_vm11 = vcmp.eq.f32.partialorder %v10800_v22, %v11273_v29 }
 0x711   : > { %v11276_v48 = vpop.xlane.xlu1 %2421  ;;  %7300 = vmatpush3.bf16.msra.mxu0 %v11281_v12 }
 0x712   : > { %18828 = vst [vmem:[#allocation93_spill] sm:$0xff] %v11276_v48  ;;  %vm17385_vm15 = vcmp.eq.f32.partialorder %v10821_v30, %v11276_v48  ;;  %7301 = vmatprep.subr.bf16.mxu0 %v11291_v41  ;;  %v11353_v30 = vld [vmem:[%s16971_s3 + $0x20] sm:$0xff]  }
 0x713   : > { %vm6284_vm0 = vmpackc.low %vm17385_vm15, %vm17392_vm11  ;;  %v11300_v27 = vpop.xlane.xlu0 %2423  ;;  %18835 = vst [vmem:[#allocation100_spill] sm:$0xff] %v11353_v30 }
 0x714   : > { %7223 = vmatprep.mubr.msk.bf16.mxu0 %vm6284_vm0, %v18827_v56  ;;  %vm17398_vm6 = vcmp.eq.f32.partialorder %v10827_v33, %v11300_v27 }
 0x715   : > { %v11303_v38 = vpop.xlane.xlu1 %2425  ;;  %7302 = vmatpush3.bf16.msra.mxu0 %v11291_v41 }
 0x716   : > { %vm17386_vm8 = vcmp.eq.f32.partialorder %v10833_v36, %v11303_v38  ;;  %7303 = vmatprep.subr.bf16.mxu0 %v11313_v21 }
 0x717   : > { %vm6286_vm0 = vmpackc.low %vm17386_vm8, %vm17398_vm6 }
 0x718   : > { %v11322_v41 = vpop.xlane.xlu0 %2427  ;;  %7224 = vmatmul.mubr.msk.bf16.gmra.mrb[52].mxu0 %vm6286_vm0, %v18827_v56 }
 0x719   : > { %7304 = vmatpush3.bf16.msra.mxu0 %v11313_v21  ;;  %vm17397_vm15 = vcmp.eq.f32.partialorder %v10868_v37, %v11322_v41 }
 0x71a   : > { %v11326_v17 = vpop.xlane.xlu1 %2429  ;;  %7305 = vmatprep.subr.bf16.mxu0 %v11331_v57 }
 0x71b   : > { %18832 = vst [vmem:[#allocation97_spill] sm:$0xff] %v11326_v17  ;;  %vm17393_vm8 = vcmp.eq.f32.partialorder %v10889_v2, %v11326_v17  ;;  %v11379_v2 = vld [vmem:[%s16971_s3 + $0x28] sm:$0xff]  }
 0x71c   : > { %vm6288_vm0 = vmpackc.low %vm17393_vm8, %vm17397_vm15  ;;  %v11344_v21 = vpop.xlane.xlu0 %2431  ;;  %18838 = vst [vmem:[#allocation103_spill] sm:$0xff] %v11379_v2 }
 0x71d   : > { %7227 = vmatprep.mubr.msk.bf16.mxu0 %vm6288_vm0, %v18827_v56  ;;  %7306 = vmatpush3.bf16.msra.mxu0 %v11331_v57  ;;  %vm17405_vm11 = vcmp.eq.f32.partialorder %v10895_v44, %v11344_v21 }
 0x71e   : > { %v11348_v48 = vpop.xlane.xlu1 %2433  ;;  %7307 = vmatprep.subr.bf16.mxu0 %v11353_v30 }
 0x71f   : > { %18834 = vst [vmem:[#allocation99_spill] sm:$0xff] %v11348_v48  ;;  %vm17404_vm8 = vcmp.eq.f32.partialorder %v10908_v14, %v11348_v48 }
 0x720   : > { %vm6290_vm0 = vmpackc.low %vm17404_vm8, %vm17405_vm11 }
 0x721   : > { %7228 = vmatmul.mubr.msk.bf16.gmra.mrb[56].mxu0 %vm6290_vm0, %v18827_v56 }
 0x722   : > { %v11366_v57 = vpop.xlane.xlu0 %2435  ;;  %7308 = vmatpush3.bf16.msra.mxu0 %v11353_v30 }
 0x723   : > { %18836 = vst [vmem:[#allocation101_spill] sm:$0xff] %v11366_v57  ;;  %vm17411_vm15 = vcmp.eq.f32.partialorder %v10936_v8, %v11366_v57  ;;  %7309 = vmatprep.subr.bf16.mxu0 %v11379_v2  ;;  %v11401_v57 = vld [vmem:[%s16971_s3 + $0x30] sm:$0xff]  }
 0x724   : > { %v11369_v17 = vpop.xlane.xlu1 %2437  ;;  %18840 = vst [vmem:[#allocation105_spill] sm:$0xff] %v11401_v57 }
 0x725   : > { %18837 = vst [vmem:[#allocation102_spill] sm:$0xff] %v11369_v17  ;;  %vm17410_vm6 = vcmp.eq.f32.partialorder %v10957_v18, %v11369_v17  ;;  %v11423_v18 = vld [vmem:[%s16971_s3 + $0x38] sm:$0xff]  }
 0x726   : > { %vm6292_vm0 = vmpackc.low %vm17410_vm6, %vm17411_vm15  ;;  %v11388_v30 = vpop.xlane.xlu0 %2439  ;;  %7310 = vmatpush3.bf16.msra.mxu0 %v11379_v2  ;;  %18842 = vst [vmem:[#allocation107_spill] sm:$0xff] %v11423_v18 }
 0x727   : > { %7231 = vmatprep.mubr.msk.bf16.mxu0 %vm6292_vm0, %v18827_v56  ;;  %vm17418_vm8 = vcmp.eq.f32.partialorder %v10963_v11, %v11388_v30  ;;  %7311 = vmatprep.subr.bf16.mxu0 %v11401_v57 }
 0x728   : > { %v11391_v48 = vpop.xlane.xlu1 %2441 }
 0x729   : > { %18839 = vst [vmem:[#allocation104_spill] sm:$0xff] %v11391_v48  ;;  %vm17417_vm11 = vcmp.eq.f32.partialorder %v10976_v46, %v11391_v48 }
 0x72a   : > { %vm6294_vm0 = vmpackc.low %vm17417_vm11, %vm17418_vm8  ;;  %v11410_v2 = vpop.xlane.xlu0 %2443  ;;  %7312 = vmatpush3.bf16.msra.mxu0 %v11401_v57 }
 0x72b   : > { %7232 = vmatmul.mubr.msk.bf16.gmra.mrb[60].mxu0 %vm6294_vm0, %v18827_v56  ;;  %vm17423_vm6 = vcmp.eq.f32.partialorder %v11004_v53, %v11410_v2  ;;  %7313 = vmatprep.subr.bf16.mxu0 %v11423_v18 }
 0x72c   : > { %v11413_v17 = vpop.xlane.xlu1 %2445 }
 0x72d   : > { %18841 = vst [vmem:[#allocation106_spill] sm:$0xff] %v11413_v17  ;;  %vm17419_vm15 = vcmp.eq.f32.partialorder %v11025_v51, %v11413_v17 }
 0x72e   : > { %vm6296_vm0 = vmpackc.low %vm17419_vm15, %vm17423_vm6  ;;  %v11432_v57 = vpop.xlane.xlu0 %2447  ;;  %7314 = vmatpush3.bf16.msra.mxu0 %v11423_v18 }
 0x72f   : > { %7235 = vmatprep.mubr.msk.bf16.mxu0 %vm6296_vm0, %v18827_v56  ;;  %vm17430_vm11 = vcmp.eq.f32.partialorder %v11031_v54, %v11432_v57  ;;  %7395 = vmatprep.subr.bf16.mxu0 %v11281_v12 }
 0x730   : > { %v11435_v48 = vpop.xlane.xlu1 %2449 }
 0x731   : > { %vm17429_vm8 = vcmp.eq.f32.partialorder %v11044_v43, %v11435_v48 }
 0x732   : > { %vm6298_vm15 = vmpackc.low %vm17429_vm8, %vm17430_vm11  ;;  %v11449_v17 = vpop.xlane.xlu0 %2451 }
 0x733   : > { %7236 = vmatmul.mubr.msk.bf16.gmra.mrb[64].mxu0 %vm6298_vm15, %v18827_v56  ;;  %vm17435_vm0 = vcmp.eq.f32.partialorder %v11072_v15, %v11449_v17 }
 0x734   : > { %v11452_v18 = vpop.xlane.xlu1 %2453 }
 0x735   : > { %18843 = vst [vmem:[#allocation108_spill] sm:$0xff] %v11452_v18  ;;  %vm17434_vm6 = vcmp.eq.f32.partialorder %v11093_v26, %v11452_v18 }
 0x736   : > { %vm6300_vm5 = vmpackc.low %vm17434_vm6, %vm17435_vm0  ;;  %v11464_v12 = vpop.xlane.xlu0 %2455 }
 0x737   : > { %7239 = vmatprep.mubr.msk.bf16.mxu0 %vm6300_vm5, %v18827_v56  ;;  %vm17440_vm15 = vcmp.eq.f32.partialorder %v11099_v34, %v11464_v12 }
 0x738   : > { %v11467_v51 = vpop.xlane.xlu1 %2457 }
 0x739   : > { %18844 = vst [vmem:[#allocation109_spill] sm:$0xff] %v11467_v51  ;;  %vm17439_vm8 = vcmp.eq.f32.partialorder %v11112_v39, %v11467_v51 }
 0x73a   : > { %vm6302_vm11 = vmpackc.low %vm17439_vm8, %vm17440_vm15  ;;  %v11479_v18 = vpop.xlane.xlu0 %2459 }
 0x73b   : > { %7240 = vmatmul.mubr.msk.bf16.gmra.mrb[68].mxu0 %vm6302_vm11, %v18827_v56  ;;  %vm17445_vm5 = vcmp.eq.f32.partialorder %v11140_v31, %v11479_v18 }
 0x73c   : > { %v11482_v26 = vpop.xlane.xlu1 %2461 }
 0x73d   : > { %18845 = vst [vmem:[#allocation110_spill] sm:$0xff] %v11482_v26  ;;  %vm17444_vm6 = vcmp.eq.f32.partialorder %v11161_v25, %v11482_v26 }
 0x73e   : > { %vm6304_vm0 = vmpackc.low %vm17444_vm6, %vm17445_vm5  ;;  %v11494_v51 = vpop.xlane.xlu0 %2463 }
 0x73f   : > { %7243 = vmatprep.mubr.msk.bf16.mxu0 %vm6304_vm0, %v18827_v56  ;;  %vm17450_vm11 = vcmp.eq.f32.partialorder %v11167_v19, %v11494_v51 }
 0x740   : > { %v11497_v39 = vpop.xlane.xlu1 %2465 }
 0x741   : > { %18846 = vst [vmem:[#allocation111_spill] sm:$0xff] %v11497_v39  ;;  %vm17449_vm8 = vcmp.eq.f32.partialorder %v11180_v35, %v11497_v39 }
 0x742   : > { %vm6306_vm15 = vmpackc.low %vm17449_vm8, %vm17450_vm11  ;;  %v11509_v26 = vpop.xlane.xlu0 %2467 }
 0x743   : > { %18847 = vst [vmem:[#allocation112_spill] sm:$0xff] %v11509_v26  ;;  %7244 = vmatmul.mubr.msk.bf16.gmra.mrb[72].mxu0 %vm6306_vm15, %v18827_v56  ;;  %vm17455_vm0 = vcmp.eq.f32.partialorder %v11208_v42, %v11509_v26 }
 0x745   : > { %v11512_v25 = vpop.xlane.xlu1 %2469 }
 0x746   : > { %18848 = vst [vmem:[#allocation113_spill] sm:$0xff] %v11512_v25  ;;  %vm17452_vm6 = vcmp.eq.f32.partialorder %v11229_v32, %v11512_v25  ;;  %v11524_v39 = vpop.xlane.xlu0 %2471 }
 0x747   : > { %vm6308_vm5 = vmpackc.low %vm17452_vm6, %vm17455_vm0  ;;  %vm17463_vm15 = vcmp.eq.f32.partialorder %v11235_v6, %v11524_v39 }
 0x748   : > { %7247 = vmatprep.mubr.msk.bf16.mxu0 %vm6308_vm5, %v18827_v56  ;;  %vm18850_vm5 = vcmp.eq.f32.partialorder %v10759_v58, %v11258_v0  ;;  %v18871_v0 = vld [vmem:[#allocation85_spill] sm:$0xff] }
 0x749   : > { %v11527_v35 = vpop.xlane.xlu1 %2473 }
 0x74a   : > { %18849 = vst [vmem:[#allocation114_spill] sm:$0xff] %v11527_v35  ;;  %vm17462_vm8 = vcmp.eq.f32.partialorder %v11241_v49, %v11527_v35  ;;  %v18853_v35 = vsel %vm10703_vm3, %v8988_v20, %v9898_v4  ;;  %vm18856_vm3 = vcmp.eq.f32.partialorder %v10772_v1, %v11261_v55  ;;  %v18878_v4 = vld [vmem:[#allocation46_spill] sm:$0xff] }
 0x74b   : > { %vm6310_vm11 = vmpackc.low %vm17462_vm8, %vm17463_vm15 }
 0x74c   : > { %7248 = vmatmul.mubr.msk.bf16.gmra.mrb[76].mxu0 %vm6310_vm11, %v18827_v56  ;;  %vm18854_vm11 = vcmp.eq.f32.partialorder %v10732_v59, %v11244_v13 }
 0x7e3   : > { %v7221_v25 = vpop.f32.mrb[48].mxu0 }
 0x7e4   : > { %vm2750_vm6 = vcmp.eq.f32.partialorder %v7221_v25, 0.0  ;;  %v2621_v32 = vpop.f32.mrb[49].mxu0 }
 0x7e5   : > { %vm11543_vm0 = vmand %vm18850_vm5, %vm2750_vm6  ;;  %vm2748_vm10 = vcmp.eq.f32.partialorder %v2621_v32, 0.0  ;;  %v7222_v42 = vpop.f32.mrb[50].mxu0  ;;  %v18855_v32 = vsel %vm10714_vm7, %v8997_v7, %v9908_v60  ;;  %vm18860_vm7 = vcmp.eq.f32.partialorder %v10753_v5, %v11246_v61  ;;  %v18870_v61 = vld [vmem:[#allocation45_spill] sm:$0xff] }
 0x7e6   : > { %v11555_v56 = vsel %vm11543_vm0, %v8988_v20, %v18853_v35  ;;  %vm2780_vm8 = vmand %vm18854_vm11, %vm2748_vm10  ;;  %vm2751_vm6 = vcmp.eq.f32.partialorder %v7222_v42, 0.0  ;;  %v2624_v25 = vpop.f32.mrb[51].mxu0  ;;  %v11607_v55 = vsel %vm11543_vm0, -1.0, %v10759_v58  ;;  %v18865_v58 = vsel %vm10765_vm13, %v9058_v24, %v9969_v52 }
 0x7e7   : > { %v11566_v10 = vsel %vm2780_vm8, %v8997_v7, %v18855_v32  ;;  %vm11571_vm5 = vmand %vm18856_vm3, %vm2751_vm6  ;;  %vm2749_vm15 = vcmp.eq.f32.partialorder %v2624_v25, 0.0  ;;  %v11576_v35 = vsel %vm2780_vm8, -1.0, %v10732_v59  ;;  %v18861_v59 = vsel %vm10741_vm1, %v9026_v9, %v9938_v63  ;;  %v18875_v32 = vld [vmem:[#allocation93_spill] sm:$0xff]  ;;  %v18887_v63 = vld [vmem:[#allocation6_spill] sm:$0xff] }
 0x7e8   : > { %v11586_v60 = vsel %vm11571_vm5, %v9009_v45, %v18859_v47  ;;  %vm2781_vm10 = vmand %vm18860_vm7, %vm2749_vm15  ;;  %2876 = vmax.xlane.f32.xlu0 %v11576_v35  ;;  %vm18862_vm1 = vcmp.eq.f32.partialorder %v10827_v33, %v11300_v27  ;;  %v11620_v13 = vsel %vm11571_vm5, -1.0, %v10772_v1  ;;  %vm18866_vm0 = vcmp.eq.f32.partialorder %v10800_v22, %v11273_v29  ;;  %v18879_v47 = vld [vmem:[#allocation86_spill] sm:$0xff] }
 0x7e9   : > { %v11598_v16 = vsel %vm2781_vm10, %v9026_v9, %v18861_v59  ;;  %v11601_v23 = vsel %vm2781_vm10, -1.0, %v10753_v5  ;;  %v18867_v1 = vsel %vm10781_vm12, %v9072_v50, %v9980_v3  ;;  %vm18868_vm13 = vcmp.eq.f32.partialorder %v10833_v36, %v11303_v38  ;;  %v18874_v3 = vld [vmem:[#allocation66_spill] sm:$0xff]  ;;  %v18895_v38 = vld [vmem:[#allocation47_spill] sm:$0xff] }
 0x7ea   : > { %2878 = vmax.xlane.f32.xlu1 %v11601_v23  ;;  %v18872_v25 = vsel %vm10793_vm4, %v18870_v61, %v18871_v0  ;;  %vm18876_vm12 = vcmp.eq.f32.partialorder %v18874_v3, %v18875_v32  ;;  %v18888_v0 = vld [vmem:[#allocation9_spill] sm:$0xff]  ;;  %v18894_v32 = vld [vmem:[#allocation7_spill] sm:$0xff] }
 0x7eb   : > { %v7225_v42 = vpop.f32.mrb[52].mxu0 }
 0x7ec   : > { %vm2754_vm2 = vcmp.eq.f32.partialorder %v7225_v42, 0.0  ;;  %2880 = vmax.xlane.f32.xlu0 %v11607_v55  ;;  %v2637_v62 = vpop.f32.mrb[53].mxu0 }
 0x7ed   : > { %vm11613_vm8 = vmand %vm18862_vm1, %vm2754_vm2  ;;  %vm2752_vm15 = vcmp.eq.f32.partialorder %v2637_v62, 0.0  ;;  %v7226_v5 = vpop.f32.mrb[54].mxu0 }
 0x7ee   : > { %v11630_v26 = vsel %vm11613_vm8, %v9058_v24, %v18865_v58  ;;  %vm2784_vm11 = vmand %vm18866_vm0, %vm2752_vm15  ;;  %vm2755_vm6 = vcmp.eq.f32.partialorder %v7226_v5, 0.0  ;;  %2882 = vmax.xlane.f32.xlu1 %v11620_v13  ;;  %v2640_v27 = vpop.f32.mrb[55].mxu0  ;;  %v11677_v62 = vsel %vm11613_vm8, -1.0, %v10827_v33  ;;  %v18885_v33 = vld [vmem:[#allocation68_spill] sm:$0xff]  ;;  %vm18891_vm8 = vcmp.eq.f32.partialorder %v10868_v37, %v11322_v41 }
 0x7ef   : > { %v11642_v52 = vsel %vm2784_vm11, %v9072_v50, %v18867_v1  ;;  %vm2787_vm3 = vmand %vm18868_vm13, %vm2755_vm6  ;;  %vm2753_vm5 = vcmp.eq.f32.partialorder %v2640_v27, 0.0  ;;  %v11648_v40 = vsel %vm2784_vm11, -1.0, %v10800_v22  ;;  %v18880_v22 = vsel %vm10809_vm14, %v18878_v4, %v18879_v47  ;;  %v18924_v1 = vld [vmem:[#allocation34_spill] sm:$0xff] }
 0x7f0   : > { %v11656_v28 = vsel %vm2787_vm3, %v18870_v61, %v18872_v25  ;;  %vm2785_vm7 = vmand %vm18876_vm12, %vm2753_vm5  ;;  %2884 = vmax.xlane.f32.xlu0 %v11648_v40  ;;  %v11681_v27 = vsel %vm2787_vm3, -1.0, %v10833_v36  ;;  %vm18882_vm14 = vcmp.eq.f32.partialorder %v10895_v44, %v11344_v21  ;;  %vm18886_vm1 = vnez %v18885_v33  ;;  %v18904_v33 = vld [vmem:[#allocation48_spill] sm:$0xff] }
 0x7f1   : > { %18873 = vst [vmem:[#allocation64_spill] sm:$0xff] %v11656_v28  ;;  %v11668_v59 = vsel %vm2785_vm7, %v18878_v4, %v18880_v22  ;;  %v11671_v42 = vsel %vm2785_vm7, -1.0, %v18874_v3  ;;  %v18889_v25 = vsel %vm18886_vm1, %v18887_v63, %v18888_v0  ;;  %v18892_v3 = vld [vmem:[#allocation70_spill] sm:$0xff]  ;;  %v18905_v0 = vld [vmem:[#allocation69_spill] sm:$0xff] }
 0x7f2   : > { %18881 = vst [vmem:[#allocation85_spill] sm:$0xff] %v11668_v59  ;;  %2886 = vmax.xlane.f32.xlu1 %v11671_v42  ;;  %vm18893_vm11 = vnez %v18892_v3 }
 0x7f3   : > { %v18896_v47 = vsel %vm18893_vm11, %v18894_v32, %v18895_v38  ;;  %v18908_v38 = vld [vmem:[#allocation77_spill] sm:$0xff] }
 0x7f4   : > { %v7229_v5 = vpop.f32.mrb[56].mxu0  ;;  %2888 = vmax.xlane.f32.xlu0 %v11677_v62 }
 0x7f5   : > { %vm2758_vm4 = vcmp.eq.f32.partialorder %v7229_v5, 0.0  ;;  %v2653_v58 = vpop.f32.mrb[57].mxu0  ;;  %v18898_v5 = vld [vmem:[#allocation99_spill] sm:$0xff] }
 0x7f6   : > { %vm11686_vm10 = vmand %vm18882_vm14, %vm2758_vm4  ;;  %vm2756_vm2 = vcmp.eq.f32.partialorder %v2653_v58, 0.0  ;;  %v7230_v29 = vpop.f32.mrb[58].mxu0  ;;  %2890 = vmax.xlane.f32.xlu1 %v11681_v27  ;;  %vm18899_vm6 = vcmp.eq.f32.partialorder %v10908_v14, %v18898_v5  ;;  %v18914_v5 = vld [vmem:[#allocation13_spill] sm:$0xff] }
 0x7f7   : > { %v11699_v36 = vsel %vm11686_vm10, %v18887_v63, %v18889_v25  ;;  %vm2788_vm15 = vmand %vm18891_vm8, %vm2756_vm2  ;;  %vm2759_vm0 = vcmp.eq.f32.partialorder %v7230_v29, 0.0  ;;  %v2656_v21 = vpop.f32.mrb[59].mxu0  ;;  %v18902_v29 = vld [vmem:[#allocation73_spill] sm:$0xff]  ;;  %vm18918_vm2 = vcmp.eq.f32.partialorder %v10963_v11, %v11388_v30 }
 0x7f8   : > { %18890 = vst [vmem:[#allocation66_spill] sm:$0xff] %v11699_v36  ;;  %v11710_v22 = vsel %vm2788_vm15, %v18894_v32, %v18896_v47  ;;  %vm11715_vm13 = vmand %vm18899_vm6, %vm2759_vm0  ;;  %vm2757_vm3 = vcmp.eq.f32.partialorder %v2656_v21, 0.0  ;;  %v11720_v41 = vsel %vm2788_vm15, -1.0, %v10868_v37  ;;  %vm18903_vm5 = vnez %v18902_v29  ;;  %v18909_v47 = vld [vmem:[#allocation97_spill] sm:$0xff]  ;;  %v18911_v21 = vld [vmem:[#allocation75_spill] sm:$0xff] }
 0x7f9   : > { %18897 = vst [vmem:[#allocation93_spill] sm:$0xff] %v11710_v22  ;;  %v18906_v25 = vsel %vm18903_vm5, %v18904_v33, %v18905_v0  ;;  %vm18910_vm12 = vcmp.eq.f32.partialorder %v18908_v38, %v18909_v47  ;;  %2892 = vmax.xlane.f32.xlu0 %v11720_v41  ;;  %vm18912_vm4 = vnez %v18911_v21  ;;  %v18913_v37 = vld [vmem:[#allocation49_spill] sm:$0xff]  ;;  %v11751_v47 = vsel %vm11686_vm10, -1.0, %v10895_v44  ;;  %v18922_v44 = vld [vmem:[#allocation67_spill] sm:$0xff]  ;;  %v19108_v22 = vld [vmem:[#allocation98_spill] sm:$0xff] }
 0x7fa   : > { %v11730_v3 = vsel %vm11715_vm13, %v18904_v33, %v18906_v25  ;;  %vm2789_vm7 = vmand %vm18910_vm12, %vm2757_vm3  ;;  %v18915_v32 = vsel %vm18912_vm4, %v18913_v37, %v18914_v5  ;;  %v11764_v5 = vsel %vm11715_vm13, -1.0, %v10908_v14  ;;  %vm18923_vm10 = vnez %v18922_v44  ;;  %v18930_v14 = vld [vmem:[#allocation80_spill] sm:$0xff]  ;;  %v18933_v44 = vld [vmem:[#allocation14_spill] sm:$0xff] }
 0x7fb   : > { %18907 = vst [vmem:[#allocation65_spill] sm:$0xff] %v11730_v3  ;;  %v11742_v29 = vsel %vm2789_vm7, %v18913_v37, %v18915_v32  ;;  %v11745_v0 = vsel %vm2789_vm7, -1.0, %v18908_v38  ;;  %18921 = vst [vmem:[#allocation9_spill] sm:$0xff] %v11764_v5  ;;  %vm18931_vm6 = vnez %v18930_v14  ;;  %v18936_v3 = vld [vmem:[#allocation104_spill] sm:$0xff]  ;;  %v18942_v14 = vld [vmem:[#allocation51_spill] sm:$0xff] }
 0x7fc   : > { %18916 = vst [vmem:[#allocation86_spill] sm:$0xff] %v11742_v29  ;;  %18917 = vst [vmem:[#allocation68_spill] sm:$0xff] %v11745_v0  ;;  %2894 = vmax.xlane.f32.xlu1 %v11745_v0  ;;  %v18928_v29 = vld [vmem:[#allocation101_spill] sm:$0xff]  ;;  %vm18937_vm13 = vcmp.eq.f32.partialorder %v10976_v46, %v18936_v3  ;;  %v18947_v3 = vld [vmem:[#allocation102_spill] sm:$0xff] }
 0x7fd   : > { %2896 = vmax.xlane.f32.xlu0 %v11751_v47  ;;  %vm18929_vm15 = vcmp.eq.f32.partialorder %v10936_v8, %v18928_v29  ;;  %v18961_v32 = vld [vmem:[#allocation35_spill] sm:$0xff]  ;;  %v19110_v36 = vld [vmem:[#allocation100_spill] sm:$0xff] }
 0x7fe   : > { %v7233_v25 = vpop.f32.mrb[60].mxu0 }
 0x7ff   : > { %vm2762_vm14 = vcmp.eq.f32.partialorder %v7233_v25, 0.0  ;;  %v2669_v21 = vpop.f32.mrb[61].mxu0  ;;  %v18925_v25 = vld [vmem:[#allocation10_spill] sm:$0xff] }
 0x800   : > { %vm11757_vm1 = vmand %vm18918_vm2, %vm2762_vm14  ;;  %vm2760_vm8 = vcmp.eq.f32.partialorder %v2669_v21, 0.0  ;;  %v7234_v38 = vpop.f32.mrb[62].mxu0  ;;  %v18926_v37 = vsel %vm18923_vm10, %v18924_v1, %v18925_v25  ;;  %2898 = vmax.xlane.f32.xlu1 %v11764_v5  ;;  %v18932_v21 = vld [vmem:[#allocation11_spill] sm:$0xff] }
 0x801   : > { %v11774_v30 = vsel %vm11757_vm1, %v18924_v1, %v18926_v37  ;;  %vm2792_vm0 = vmand %vm18929_vm15, %vm2760_vm8  ;;  %vm2763_vm11 = vcmp.eq.f32.partialorder %v7234_v38, 0.0  ;;  %v2672_v58 = vpop.f32.mrb[63].mxu0  ;;  %v18934_v33 = vsel %vm18931_vm6, %v18932_v21, %v18933_v44  ;;  %v18940_v38 = vld [vmem:[#allocation5_spill] sm:$0xff]  ;;  %v18943_v1 = vld [vmem:[#allocation71_spill] sm:$0xff]  ;;  %vm18956_vm8 = vcmp.eq.f32.partialorder %v11031_v54, %v11432_v57 }
 0x802   : > { %18927 = vst [vmem:[#allocation70_spill] sm:$0xff] %v11774_v30  ;;  %v11786_v25 = vsel %vm2792_vm0, %v18932_v21, %v18934_v33  ;;  %vm11791_vm3 = vmand %vm18937_vm13, %vm2763_vm11  ;;  %vm2761_vm5 = vcmp.eq.f32.partialorder %v2672_v58, 0.0  ;;  %v11796_v29 = vsel %vm2792_vm0, -1.0, %v10936_v8  ;;  %vm18941_vm12 = vnez %v18940_v38  ;;  %v18946_v44 = vld [vmem:[#allocation84_spill] sm:$0xff]  ;;  %v18949_v58 = vld [vmem:[#allocation39_spill] sm:$0xff] }
 0x803   : > { %18935 = vst [vmem:[#allocation47_spill] sm:$0xff] %v11786_v25  ;;  %v18944_v30 = vsel %vm18941_vm12, %v18942_v14, %v18943_v1  ;;  %vm18948_vm7 = vcmp.eq.f32.partialorder %v18946_v44, %v18947_v3  ;;  %2900 = vmax.xlane.f32.xlu0 %v11796_v29  ;;  %vm18950_vm14 = vnez %v18949_v58  ;;  %v18951_v8 = vld [vmem:[#allocation52_spill] sm:$0xff]  ;;  %v18952_v21 = vld [vmem:[#allocation50_spill] sm:$0xff]  ;;  %v11827_v3 = vsel %vm11757_vm1, -1.0, %v10963_v11  ;;  %v19153_v28 = vld [vmem:[#allocation9_spill] sm:$0xff] }
 0x804   : > { %v11806_v33 = vsel %vm11791_vm3, %v18942_v14, %v18944_v30  ;;  %vm2793_vm4 = vmand %vm18948_vm7, %vm2761_vm5  ;;  %v18953_v25 = vsel %vm18950_vm14, %v18951_v8, %v18952_v21  ;;  %v18959_v11 = vld [vmem:[#allocation74_spill] sm:$0xff]  ;;  %vm18965_vm0 = vcmp.eq.f32.partialorder %v11004_v53, %v11410_v2  ;;  %v18996_v21 = vld [vmem:[#allocation36_spill] sm:$0xff] }
 0x805   : > { %18945 = vst [vmem:[#allocation99_spill] sm:$0xff] %v11806_v33  ;;  %v11818_v38 = vsel %vm2793_vm4, %v18951_v8, %v18953_v25  ;;  %v11821_v1 = vsel %vm2793_vm4, -1.0, %v18946_v44  ;;  %v11840_v44 = vsel %vm11791_vm3, -1.0, %v10976_v46  ;;  %vm18960_vm1 = vnez %v18959_v11  ;;  %v18966_v46 = vld [vmem:[#allocation23_spill] sm:$0xff]  ;;  %v18969_v11 = vld [vmem:[#allocation8_spill] sm:$0xff]  ;;  %v19084_v14 = vld [vmem:[#allocation114_spill] sm:$0xff] }
 0x806   : > { %18954 = vst [vmem:[#allocation73_spill] sm:$0xff] %v11818_v38  ;;  %18955 = vst [vmem:[#allocation69_spill] sm:$0xff] %v11821_v1  ;;  %2902 = vmax.xlane.f32.xlu1 %v11821_v1  ;;  %v7237_v30 = vpop.f32.mrb[64].mxu0  ;;  %vm18967_vm13 = vnez %v18966_v46  ;;  %vm18972_vm3 = vcmp.eq.f32.partialorder %v11044_v43, %v11435_v48  ;;  %v18977_v46 = vld [vmem:[#allocation54_spill] sm:$0xff]  ;;  %v19094_v33 = vld [vmem:[#allocation113_spill] sm:$0xff] }
 0x807   : > { %vm2766_vm2 = vcmp.eq.f32.partialorder %v7237_v30, 0.0  ;;  %2904 = vmax.xlane.f32.xlu0 %v11827_v3  ;;  %v2685_v58 = vpop.f32.mrb[65].mxu0  ;;  %v18962_v30 = vld [vmem:[#allocation18_spill] sm:$0xff]  ;;  %v19161_v59 = vld [vmem:[#allocation68_spill] sm:$0xff] }
 0x808   : > { %vm11833_vm10 = vmand %vm18956_vm8, %vm2766_vm2  ;;  %vm2764_vm15 = vcmp.eq.f32.partialorder %v2685_v58, 0.0  ;;  %v7238_v25 = vpop.f32.mrb[66].mxu0  ;;  %v18963_v8 = vsel %vm18960_vm1, %v18961_v32, %v18962_v30  ;;  %v18968_v58 = vld [vmem:[#allocation16_spill] sm:$0xff]  ;;  %v18982_v48 = vld [vmem:[#allocation106_spill] sm:$0xff] }
 0x809   : > { %v11850_v57 = vsel %vm11833_vm10, %v18961_v32, %v18963_v8  ;;  %vm2796_vm11 = vmand %vm18965_vm0, %vm2764_vm15  ;;  %vm2767_vm6 = vcmp.eq.f32.partialorder %v7238_v25, 0.0  ;;  %v2688_v37 = vpop.f32.mrb[67].mxu0  ;;  %v18970_v38 = vsel %vm18967_vm13, %v18968_v58, %v18969_v11  ;;  %v18975_v25 = vld [vmem:[#allocation87_spill] sm:$0xff]  ;;  %v18978_v32 = vld [vmem:[#allocation72_spill] sm:$0xff]  ;;  %vm18991_vm15 = vcmp.eq.f32.partialorder %v11099_v34, %v11464_v12 }
 0x80a   : > { %18964 = vst [vmem:[#allocation77_spill] sm:$0xff] %v11850_v57  ;;  %2906 = vmax.xlane.f32.xlu1 %v11840_v44  ;;  %v11862_v30 = vsel %vm2796_vm11, %v18968_v58, %v18970_v38  ;;  %vm11867_vm5 = vmand %vm18972_vm3, %vm2767_vm6  ;;  %vm2765_vm12 = vcmp.eq.f32.partialorder %v2688_v37, 0.0  ;;  %v11872_v2 = vsel %vm2796_vm11, -1.0, %v11004_v53  ;;  %vm18976_vm7 = vnez %v18975_v25  ;;  %v18981_v11 = vld [vmem:[#allocation32_spill] sm:$0xff]  ;;  %v18984_v37 = vld [vmem:[#allocation19_spill] sm:$0xff] }
 0x80b   : > { %18971 = vst [vmem:[#allocation97_spill] sm:$0xff] %v11862_v30  ;;  %v18979_v57 = vsel %vm18976_vm7, %v18977_v46, %v18978_v32  ;;  %vm18983_vm4 = vcmp.eq.f32.partialorder %v18981_v11, %v18982_v48  ;;  %2908 = vmax.xlane.f32.xlu0 %v11872_v2  ;;  %vm18985_vm2 = vnez %v18984_v37  ;;  %v18986_v53 = vld [vmem:[#allocation55_spill] sm:$0xff]  ;;  %v11903_v48 = vsel %vm11833_vm10, -1.0, %v11031_v54  ;;  %v18994_v54 = vld [vmem:[#allocation88_spill] sm:$0xff] }
 0x80c   : > { %v11882_v38 = vsel %vm11867_vm5, %v18977_v46, %v18979_v57  ;;  %vm2797_vm14 = vmand %vm18983_vm4, %vm2765_vm12  ;;  %v18987_v58 = vld [vmem:[#allocation15_spill] sm:$0xff]  ;;  %vm18995_vm10 = vnez %v18994_v54  ;;  %vm19000_vm11 = vcmp.eq.f32.partialorder %v11072_v15, %v11449_v17  ;;  %v19004_v54 = vld [vmem:[#allocation24_spill] sm:$0xff] }
 0x80d   : > { %18980 = vst [vmem:[#allocation75_spill] sm:$0xff] %v11882_v38  ;;  %v18988_v30 = vsel %vm18985_vm2, %v18986_v53, %v18987_v58  ;;  %v11897_v32 = vsel %vm2797_vm14, -1.0, %v18981_v11  ;;  %v11916_v11 = vsel %vm11867_vm5, -1.0, %v11044_v43  ;;  %v19001_v43 = vld [vmem:[#allocation89_spill] sm:$0xff]  ;;  %v19007_v46 = vld [vmem:[#allocation90_spill] sm:$0xff] }
 0x80e   : > { %v11894_v25 = vsel %vm2797_vm14, %v18986_v53, %v18988_v30  ;;  %18990 = vst [vmem:[#allocation67_spill] sm:$0xff] %v11897_v32  ;;  %2910 = vmax.xlane.f32.xlu1 %v11897_v32  ;;  %v7241_v57 = vpop.f32.mrb[68].mxu0  ;;  %vm19002_vm3 = vnez %v19001_v43  ;;  %v19008_v38 = vld [vmem:[#allocation109_spill] sm:$0xff] }
 0x80f   : > { %18989 = vst [vmem:[#allocation13_spill] sm:$0xff] %v11894_v25  ;;  %vm2770_vm8 = vcmp.eq.f32.partialorder %v7241_v57, 0.0  ;;  %2912 = vmax.xlane.f32.xlu0 %v11903_v48  ;;  %v2701_v37 = vpop.f32.mrb[69].mxu0  ;;  %v18997_v57 = vld [vmem:[#allocation53_spill] sm:$0xff]  ;;  %vm19009_vm5 = vcmp.eq.f32.partialorder %v19007_v46, %v19008_v38  ;;  %v19019_v38 = vld [vmem:[#allocation108_spill] sm:$0xff] }
 0x810   : > { %vm11909_vm1 = vmand %vm18991_vm15, %vm2770_vm8  ;;  %vm2768_vm0 = vcmp.eq.f32.partialorder %v2701_v37, 0.0  ;;  %v7242_v30 = vpop.f32.mrb[70].mxu0  ;;  %v18998_v53 = vsel %vm18995_vm10, %v18996_v21, %v18997_v57  ;;  %v19003_v37 = vld [vmem:[#allocation22_spill] sm:$0xff]  ;;  %v19014_v43 = vld [vmem:[#allocation57_spill] sm:$0xff] }
 0x811   : > { %v11926_v12 = vsel %vm11909_vm1, %v18996_v21, %v18998_v53  ;;  %vm2800_vm6 = vmand %vm19000_vm11, %vm2768_vm0  ;;  %vm2771_vm13 = vcmp.eq.f32.partialorder %v7242_v30, 0.0  ;;  %v2704_v8 = vpop.f32.mrb[71].mxu0  ;;  %v19005_v25 = vsel %vm19002_vm3, %v19003_v37, %v19004_v54  ;;  %v19012_v30 = vld [vmem:[#allocation25_spill] sm:$0xff]  ;;  %v19015_v21 = vld [vmem:[#allocation12_spill] sm:$0xff]  ;;  %vm19028_vm0 = vcmp.eq.f32.partialorder %v11167_v19, %v11494_v51 }
 0x812   : > { %18999 = vst [vmem:[#allocation10_spill] sm:$0xff] %v11926_v12  ;;  %2914 = vmax.xlane.f32.xlu1 %v11916_v11  ;;  %v11938_v57 = vsel %vm2800_vm6, %v19003_v37, %v19005_v25  ;;  %vm11943_vm12 = vmand %vm19009_vm5, %vm2771_vm13  ;;  %vm2769_vm7 = vcmp.eq.f32.partialorder %v2704_v8, 0.0  ;;  %v11948_v17 = vsel %vm2800_vm6, -1.0, %v11072_v15  ;;  %vm19013_vm4 = vnez %v19012_v30  ;;  %v19018_v54 = vld [vmem:[#allocation21_spill] sm:$0xff]  ;;  %v19021_v8 = vld [vmem:[#allocation82_spill] sm:$0xff] }
 0x813   : > { %19006 = vst [vmem:[#allocation101_spill] sm:$0xff] %v11938_v57  ;;  %v19016_v12 = vsel %vm19013_vm4, %v19014_v43, %v19015_v21  ;;  %vm19020_vm14 = vcmp.eq.f32.partialorder %v19018_v54, %v19019_v38  ;;  %2916 = vmax.xlane.f32.xlu0 %v11948_v17  ;;  %vm19022_vm8 = vnez %v19021_v8  ;;  %v19023_v15 = vld [vmem:[#allocation20_spill] sm:$0xff]  ;;  %v11979_v38 = vsel %vm11909_vm1, -1.0, %v11099_v34  ;;  %v19032_v34 = vld [vmem:[#allocation62_spill] sm:$0xff]  ;;  %v19034_v58 = vld [vmem:[#allocation17_spill] sm:$0xff] }
 0x814   : > { %v11958_v25 = vsel %vm11943_vm12, %v19014_v43, %v19016_v12  ;;  %vm2801_vm2 = vmand %vm19020_vm14, %vm2769_vm7  ;;  %v19024_v37 = vld [vmem:[#allocation76_spill] sm:$0xff]  ;;  %vm19033_vm1 = vnez %v19032_v34  ;;  %vm19038_vm6 = vcmp.eq.f32.partialorder %v11140_v31, %v11479_v18  ;;  %v19042_v34 = vld [vmem:[#allocation33_spill] sm:$0xff] }
 0x815   : > { %19017 = vst [vmem:[#allocation80_spill] sm:$0xff] %v11958_v25  ;;  %v19025_v57 = vsel %vm19022_vm8, %v19023_v15, %v19024_v37  ;;  %v11973_v21 = vsel %vm2801_vm2, -1.0, %v19018_v54  ;;  %v11992_v54 = vsel %vm11943_vm12, -1.0, %v19007_v46  ;;  %v19039_v46 = vld [vmem:[#allocation91_spill] sm:$0xff]  ;;  %v19045_v43 = vld [vmem:[#allocation92_spill] sm:$0xff] }
 0x816   : > { %v11970_v30 = vsel %vm2801_vm2, %v19023_v15, %v19025_v57  ;;  %19027 = vst [vmem:[#allocation104_spill] sm:$0xff] %v11973_v21  ;;  %2918 = vmax.xlane.f32.xlu1 %v11973_v21  ;;  %v7245_v12 = vpop.f32.mrb[72].mxu0  ;;  %19031 = vst [vmem:[#allocation5_spill] sm:$0xff] %v11992_v54  ;;  %vm19040_vm5 = vnez %v19039_v46  ;;  %v19046_v25 = vld [vmem:[#allocation111_spill] sm:$0xff]  ;;  %v19071_v37 = vld [vmem:[#allocation60_spill] sm:$0xff] }
 0x817   : > { %19026 = vst [vmem:[#allocation14_spill] sm:$0xff] %v11970_v30  ;;  %vm2774_vm15 = vcmp.eq.f32.partialorder %v7245_v12, 0.0  ;;  %2920 = vmax.xlane.f32.xlu0 %v11979_v38  ;;  %v2717_v8 = vpop.f32.mrb[73].mxu0  ;;  %v19035_v12 = vld [vmem:[#allocation56_spill] sm:$0xff]  ;;  %vm19047_vm12 = vcmp.eq.f32.partialorder %v19045_v43, %v19046_v25  ;;  %v19052_v46 = vld [vmem:[#allocation59_spill] sm:$0xff]  ;;  %v19057_v25 = vld [vmem:[#allocation110_spill] sm:$0xff] }
 0x818   : > { %vm11985_vm10 = vmand %vm19028_vm0, %vm2774_vm15  ;;  %vm2772_vm11 = vcmp.eq.f32.partialorder %v2717_v8, 0.0  ;;  %v7246_v57 = vpop.f32.mrb[74].mxu0  ;;  %v19036_v15 = vsel %vm19033_vm1, %v19034_v58, %v19035_v12  ;;  %v19041_v8 = vld [vmem:[#allocation29_spill] sm:$0xff] }
 0x819   : > { %v12002_v51 = vsel %vm11985_vm10, %v19034_v58, %v19036_v15  ;;  %vm2804_vm13 = vmand %vm19038_vm6, %vm2772_vm11  ;;  %vm2775_vm3 = vcmp.eq.f32.partialorder %v7246_v57, 0.0  ;;  %v2720_v53 = vpop.f32.mrb[75].mxu0  ;;  %v19043_v30 = vsel %vm19040_vm5, %v19041_v8, %v19042_v34  ;;  %v19050_v57 = vld [vmem:[#allocation78_spill] sm:$0xff]  ;;  %v19053_v58 = vld [vmem:[#allocation79_spill] sm:$0xff]  ;;  %vm19066_vm11 = vcmp.eq.f32.partialorder %v11235_v6, %v11524_v39 }
 0x81a   : > { %19037 = vst [vmem:[#allocation71_spill] sm:$0xff] %v12002_v51  ;;  %2922 = vmax.xlane.f32.xlu1 %v11992_v54  ;;  %v12014_v12 = vsel %vm2804_vm13, %v19041_v8, %v19043_v30  ;;  %vm12019_vm7 = vmand %vm19047_vm12, %vm2775_vm3  ;;  %vm2773_vm4 = vcmp.eq.f32.partialorder %v2720_v53, 0.0  ;;  %v12024_v18 = vsel %vm2804_vm13, -1.0, %v11140_v31  ;;  %vm19051_vm14 = vnez %v19050_v57  ;;  %v19056_v34 = vld [vmem:[#allocation27_spill] sm:$0xff]  ;;  %v19059_v53 = vld [vmem:[#allocation44_spill] sm:$0xff] }
 0x81b   : > { %19044 = vst [vmem:[#allocation84_spill] sm:$0xff] %v12014_v12  ;;  %v19054_v51 = vsel %vm19051_vm14, %v19052_v46, %v19053_v58  ;;  %vm19058_vm2 = vcmp.eq.f32.partialorder %v19056_v34, %v19057_v25  ;;  %2924 = vmax.xlane.f32.xlu0 %v12024_v18  ;;  %vm19060_vm15 = vnez %v19059_v53  ;;  %v19061_v31 = vld [vmem:[#allocation40_spill] sm:$0xff]  ;;  %v19062_v8 = vld [vmem:[#allocation31_spill] sm:$0xff]  ;;  %v12055_v25 = vsel %vm11985_vm10, -1.0, %v11167_v19  ;;  %v19081_v19 = vld [vmem:[#allocation37_spill] sm:$0xff] }
 0x81c   : > { %v12034_v30 = vsel %vm12019_vm7, %v19052_v46, %v19054_v51  ;;  %vm2805_vm8 = vmand %vm19058_vm2, %vm2773_vm4  ;;  %v19063_v12 = vsel %vm19060_vm15, %v19061_v31, %v19062_v8  ;;  %v19076_v46 = vld [vmem:[#allocation112_spill] sm:$0xff] }
 0x81d   : > { %19055 = vst [vmem:[#allocation102_spill] sm:$0xff] %v12034_v30  ;;  %v12046_v57 = vsel %vm2805_vm8, %v19061_v31, %v19063_v12  ;;  %v12049_v58 = vsel %vm2805_vm8, -1.0, %v19056_v34  ;;  %v12068_v34 = vsel %vm12019_vm7, -1.0, %v19045_v43  ;;  %v19078_v43 = vld [vmem:[#allocation58_spill] sm:$0xff] }
 0x81e   : > { %19064 = vst [vmem:[#allocation39_spill] sm:$0xff] %v12046_v57  ;;  %19065 = vst [vmem:[#allocation50_spill] sm:$0xff] %v12049_v58  ;;  %2926 = vmax.xlane.f32.xlu1 %v12049_v58  ;;  %v19075_v57 = vld [vmem:[#allocation30_spill] sm:$0xff]  ;;  %vm19079_vm5 = vnez %v19078_v43 }
 0x81f   : > { %v7249_v51 = vpop.f32.mrb[76].mxu0  ;;  %2928 = vmax.xlane.f32.xlu0 %v12055_v25  ;;  %19069 = vst [vmem:[#allocation74_spill] sm:$0xff] %v12068_v34  ;;  %vm19077_vm10 = vcmp.eq.f32.partialorder %v19075_v57, %v19076_v46 }
 0x820   : > { %vm2778_vm0 = vcmp.eq.f32.partialorder %v7249_v51, 0.0  ;;  %v2733_v53 = vpop.f32.mrb[77].mxu0  ;;  %v19072_v51 = vld [vmem:[#allocation38_spill] sm:$0xff] }
 0x821   : > { %vm12061_vm1 = vmand %vm19066_vm11, %vm2778_vm0  ;;  %vm2776_vm6 = vcmp.eq.f32.partialorder %v2733_v53, 0.0  ;;  %v7250_v12 = vpop.f32.mrb[78].mxu0  ;;  %v19073_v31 = vsel %vm11173_vm9, %v19071_v37, %v19072_v51  ;;  %v19080_v53 = vld [vmem:[#allocation61_spill] sm:$0xff]  ;;  %vm19085_vm9 = vcmp.eq.f32.partialorder %v11241_v49, %v19084_v14  ;;  %v19096_v14 = vld [vmem:[#allocation26_spill] sm:$0xff] }
 0x822   : > { %v12078_v39 = vsel %vm12061_vm1, %v19071_v37, %v19073_v31  ;;  %vm2808_vm13 = vmand %vm19077_vm10, %vm2776_vm6  ;;  %vm2779_vm3 = vcmp.eq.f32.partialorder %v7250_v12, 0.0  ;;  %2930 = vmax.xlane.f32.xlu1 %v12068_v34  ;;  %v2736_v15 = vpop.f32.mrb[79].mxu0  ;;  %v19082_v30 = vsel %vm19079_vm5, %v19080_v53, %v19081_v19  ;;  %v19087_v31 = vld [vmem:[#allocation42_spill] sm:$0xff]  ;;  %v19089_v12 = vld [vmem:[#allocation41_spill] sm:$0xff]  ;;  %vm19097_vm8 = vnez %v19096_v14 }
 0x823   : > { %19074 = vst [vmem:[#allocation18_spill] sm:$0xff] %v12078_v39  ;;  %v12090_v51 = vsel %vm2808_vm13, %v19080_v53, %v19082_v30  ;;  %vm2811_vm12 = vmand %vm19085_vm9, %vm2779_vm3  ;;  %vm2777_vm7 = vcmp.eq.f32.partialorder %v2736_v15, 0.0  ;;  %v12096_v46 = vsel %vm2808_vm13, -1.0, %v19075_v57  ;;  %vm19088_vm4 = vnez %v19087_v31  ;;  %v19090_v37 = vld [vmem:[#allocation43_spill] sm:$0xff]  ;;  %v19099_v15 = vld [vmem:[#allocation81_spill] sm:$0xff] }
 0x824   : > { %19083 = vst [vmem:[#allocation23_spill] sm:$0xff] %v12090_v51  ;;  %19086 = vst [vmem:[#allocation8_spill] sm:$0xff] %v12096_v46  ;;  %v19091_v39 = vsel %vm19088_vm4, %v19089_v12, %v19090_v37  ;;  %v19093_v19 = vld [vmem:[#allocation83_spill] sm:$0xff]  ;;  %2932 = vmax.xlane.f32.xlu0 %v12096_v46  ;;  %v12129_v37 = vsel %vm2811_vm12, -1.0, %v11241_v49 }
 0x825   : > { %v12104_v43 = vsel %vm2811_vm12, %v19089_v12, %v19091_v39  ;;  %vm19095_vm14 = vcmp.eq.f32.partialorder %v19093_v19, %v19094_v33  ;;  %v19098_v30 = vld [vmem:[#allocation63_spill] sm:$0xff]  ;;  %v12125_v33 = vsel %vm12061_vm1, -1.0, %v11235_v6  ;;  %v19103_v6 = vmov 1.0|1.0  }
 0x826   : > { %19092 = vst [vmem:[#allocation87_spill] sm:$0xff] %v12104_v43  ;;  %vm2809_vm2 = vmand %vm19095_vm14, %vm2777_vm7  ;;  %v19100_v57 = vsel %vm19097_vm8, %v19098_v30, %v19099_v15  ;;  %v19106_v43 = vld [vmem:[#allocation96_spill] sm:$0xff] }
 0x827   : > { %v12116_v53 = vsel %vm2809_vm2, %v19098_v30, %v19100_v57  ;;  %v12119_v31 = vsel %vm2809_vm2, -1.0, %v19093_v19  ;;  %v19104_v57 = vld [vmem:[#allocation94_spill] sm:$0xff]  ;;  %v19105_v30 = vld [vmem:[#allocation95_spill] sm:$0xff] }
 0x828   : > { %19101 = vst [vmem:[#allocation72_spill] sm:$0xff] %v12116_v53  ;;  %19102 = vst [vmem:[#allocation32_spill] sm:$0xff] %v12119_v31  ;;  %2934 = vmax.xlane.f32.xlu1 %v12119_v31  ;;  %2936 = vmax.xlane.f32.xlu0 %v12125_v33 }
 0x82c   : > { %2938 = vmax.xlane.f32.xlu1 %v12129_v37 }
 0x875   : > { %v12132_v39 = vpop.xlane.xlu0 %2876 }
 0x876   : > { %vm2940_vm15 = vcmp.eq.f32.partialorder %v11576_v35, %v12132_v39 }
 0x877   : > { %v12134_v14 = vpop.xlane.xlu1 %2878 }
 0x878   : > { %vm2941_vm0 = vcmp.eq.f32.partialorder %v11601_v23, %v12134_v14 }
 0x879   : > { %vm6344_vm11 = vmpackc.low %vm2941_vm0, %vm2940_vm15  ;;  %v12146_v49 = vpop.xlane.xlu0 %2880 }
 0x87a   : > { %7267 = vmatprep.mubr.msk.bf16.mxu1 %vm6344_vm11, %v19103_v6  ;;  %vm2942_vm1 = vcmp.eq.f32.partialorder %v11607_v55, %v12146_v49 }
 0x87b   : > { %v12149_v8 = vpop.xlane.xlu1 %2882 }
 0x87c   : > { %vm2943_vm6 = vcmp.eq.f32.partialorder %v11620_v13, %v12149_v8 }
 0x87d   : > { %vm6346_vm10 = vmpackc.low %vm2943_vm6, %vm2942_vm1  ;;  %v12161_v19 = vpop.xlane.xlu0 %2884 }
 0x87e   : > { %7268 = vmatmul.mubr.msk.bf16.vlgmr.msra.gmra.mrb[80].mxu1 %vm6346_vm10, %v19103_v6  ;;  %vm2944_vm13 = vcmp.eq.f32.partialorder %v11648_v40, %v12161_v19 }
 0x87f   : > { %v12164_v15 = vpop.xlane.xlu1 %2886  ;;  %7348 = vmatpush3.bf16.msra.mxu1 %v19104_v57 }
 0x880   : > { %vm2945_vm3 = vcmp.eq.f32.partialorder %v11671_v42, %v12164_v15  ;;  %7349 = vmatprep.subr.bf16.mxu1 %v19105_v30 }
 0x881   : > { %vm6348_vm5 = vmpackc.low %vm2945_vm3, %vm2944_vm13  ;;  %v12178_v53 = vpop.xlane.xlu0 %2888 }
 0x882   : > { %7271 = vmatprep.mubr.msk.bf16.mxu1 %vm6348_vm5, %v19103_v6  ;;  %vm2946_vm9 = vcmp.eq.f32.partialorder %v11677_v62, %v12178_v53 }
 0x883   : > { %v12181_v12 = vpop.xlane.xlu1 %2890  ;;  %7350 = vmatpush3.bf16.msra.mxu1 %v19105_v30 }
 0x884   : > { %vm2947_vm12 = vcmp.eq.f32.partialorder %v11681_v27, %v12181_v12  ;;  %7351 = vmatprep.subr.bf16.mxu1 %v19106_v43  ;;  %v19139_v12 = vmov 0 }
 0x885   : > { %vm6350_vm7 = vmpackc.low %vm2947_vm12, %vm2946_vm9 }
 0x886   : > { %v12195_v51 = vpop.xlane.xlu0 %2892  ;;  %7272 = vmatmul.mubr.msk.bf16.gmra.mrb[84].mxu1 %vm6350_vm7, %v19103_v6 }
 0x887   : > { %7352 = vmatpush3.bf16.msra.mxu1 %v19106_v43  ;;  %vm2948_vm4 = vcmp.eq.f32.partialorder %v11720_v41, %v12195_v51 }
 0x888   : > { %7353 = vmatprep.subr.bf16.mxu1 %v19108_v22 }
 0x889   : > { %v12199_v30 = vpop.xlane.xlu1 %2894 }
 0x88a   : > { %19107 = vst [vmem:[#allocation106_spill] sm:$0xff] %v12199_v30  ;;  %vm17516_vm14 = vcmp.eq.f32.partialorder %v11745_v0, %v12199_v30  ;;  %v12212_v63 = vpop.xlane.xlu0 %2896  ;;  %v19112_v0 = vld [vmem:[#allocation103_spill] sm:$0xff] }
 0x88b   : > { %vm6352_vm2 = vmpackc.low %vm17516_vm14, %vm2948_vm4  ;;  %7354 = vmatpush3.bf16.msra.mxu1 %v19108_v22  ;;  %vm2950_vm8 = vcmp.eq.f32.partialorder %v11751_v47, %v12212_v63 }
 0x88c   : > { %7275 = vmatprep.mubr.msk.bf16.mxu1 %vm6352_vm2, %v19103_v6  ;;  %7355 = vmatprep.subr.bf16.mxu1 %v19110_v36 }
 0x88d   : > { %v12216_v43 = vpop.xlane.xlu1 %2898 }
 0x88e   : > { %19109 = vst [vmem:[#allocation19_spill] sm:$0xff] %v12216_v43  ;;  %vm17530_vm11 = vcmp.eq.f32.partialorder %v11764_v5, %v12216_v43  ;;  %v19114_v5 = vld [vmem:[#allocation105_spill] sm:$0xff] }
 0x88f   : > { %vm6354_vm10 = vmpackc.low %vm17530_vm11, %vm2950_vm8  ;;  %7356 = vmatpush3.bf16.msra.mxu1 %v19110_v36 }
 0x890   : > { %v12229_v30 = vpop.xlane.xlu0 %2900  ;;  %7276 = vmatmul.mubr.msk.bf16.gmra.mrb[88].mxu1 %vm6354_vm10, %v19103_v6  ;;  %7357 = vmatprep.subr.bf16.mxu1 %v19112_v0 }
 0x891   : > { %vm17521_vm5 = vcmp.eq.f32.partialorder %v11796_v29, %v12229_v30 }
 0x893   : > { %v12232_v22 = vpop.xlane.xlu1 %2902  ;;  %7358 = vmatpush3.bf16.msra.mxu1 %v19112_v0 }
 0x894   : > { %19111 = vst [vmem:[#allocation15_spill] sm:$0xff] %v12232_v22  ;;  %vm17519_vm7 = vcmp.eq.f32.partialorder %v11821_v1, %v12232_v22  ;;  %v12246_v43 = vpop.xlane.xlu0 %2904  ;;  %7359 = vmatprep.subr.bf16.mxu1 %v19114_v5  ;;  %v19116_v1 = vld [vmem:[#allocation107_spill] sm:$0xff] }
 0x895   : > { %vm6356_vm2 = vmpackc.low %vm17519_vm7, %vm17521_vm5  ;;  %vm17526_vm10 = vcmp.eq.f32.partialorder %v11827_v3, %v12246_v43  ;;  %v19154_v61 = vld [vmem:[#allocation19_spill] sm:$0xff] }
 0x896   : > { %7279 = vmatprep.mubr.msk.bf16.mxu1 %vm6356_vm2, %v19103_v6 }
 0x897   : > { %v12249_v36 = vpop.xlane.xlu1 %2906  ;;  %7360 = vmatpush3.bf16.msra.mxu1 %v19114_v5 }
 0x898   : > { %19113 = vst [vmem:[#allocation88_spill] sm:$0xff] %v12249_v36  ;;  %vm17524_vm14 = vcmp.eq.f32.partialorder %v11840_v44, %v12249_v36  ;;  %v12263_v22 = vpop.xlane.xlu0 %2908  ;;  %7361 = vmatprep.subr.bf16.mxu1 %v19116_v1 }
 0x899   : > { %vm6358_vm7 = vmpackc.low %vm17524_vm14, %vm17526_vm10  ;;  %vm17529_vm2 = vcmp.eq.f32.partialorder %v11872_v2, %v12263_v22 }
 0x89a   : > { %7280 = vmatmul.mubr.msk.bf16.gmra.mrb[92].mxu1 %vm6358_vm7, %v19103_v6 }
 0x89b   : > { %v12266_v0 = vpop.xlane.xlu1 %2910  ;;  %7362 = vmatpush3.bf16.msra.mxu1 %v19116_v1 }
 0x89c   : > { %19115 = vst [vmem:[#allocation53_spill] sm:$0xff] %v12266_v0  ;;  %vm17527_vm5 = vcmp.eq.f32.partialorder %v11897_v32, %v12266_v0  ;;  %v12280_v36 = vpop.xlane.xlu0 %2912  ;;  %7443 = vmatprep.subr.bf16.mxu1 %v19104_v57 }
 0x89d   : > { %vm6360_vm14 = vmpackc.low %vm17527_vm5, %vm17529_vm2  ;;  %vm17534_vm7 = vcmp.eq.f32.partialorder %v11903_v48, %v12280_v36 }
 0x89e   : > { %7283 = vmatprep.mubr.msk.bf16.mxu1 %vm6360_vm14, %v19103_v6 }
 0x89f   : > { %v12283_v5 = vpop.xlane.xlu1 %2914 }
 0x8a0   : > { %vm17533_vm10 = vcmp.eq.f32.partialorder %v11916_v11, %v12283_v5  ;;  %v12297_v0 = vpop.xlane.xlu0 %2916 }
 0x8a1   : > { %vm6362_vm5 = vmpackc.low %vm17533_vm10, %vm17534_vm7  ;;  %vm17539_vm14 = vcmp.eq.f32.partialorder %v11948_v17, %v12297_v0 }
 0x8a2   : > { %7284 = vmatmul.mubr.msk.bf16.gmra.mrb[96].mxu1 %vm6362_vm5, %v19103_v6 }
 0x8a3   : > { %v12300_v1 = vpop.xlane.xlu1 %2918 }
 0x8a4   : > { %19117 = vst [vmem:[#allocation89_spill] sm:$0xff] %v12300_v1  ;;  %vm17538_vm2 = vcmp.eq.f32.partialorder %v11973_v21, %v12300_v1  ;;  %v12312_v57 = vpop.xlane.xlu0 %2920 }
 0x8a5   : > { %vm6364_vm11 = vmpackc.low %vm17538_vm2, %vm17539_vm14  ;;  %vm17544_vm5 = vcmp.eq.f32.partialorder %v11979_v38, %v12312_v57 }
 0x8a6   : > { %7287 = vmatprep.mubr.msk.bf16.mxu1 %vm6364_vm11, %v19103_v6 }
 0x8a7   : > { %v12315_v32 = vpop.xlane.xlu1 %2922 }
 0x8a8   : > { %19118 = vst [vmem:[#allocation24_spill] sm:$0xff] %v12315_v32  ;;  %vm17543_vm10 = vcmp.eq.f32.partialorder %v11992_v54, %v12315_v32  ;;  %v12327_v1 = vpop.xlane.xlu0 %2924 }
 0x8a9   : > { %vm6366_vm7 = vmpackc.low %vm17543_vm10, %vm17544_vm5  ;;  %vm17549_vm11 = vcmp.eq.f32.partialorder %v12024_v18, %v12327_v1 }
 0x8aa   : > { %7288 = vmatmul.mubr.msk.bf16.gmra.mrb[100].mxu1 %vm6366_vm7, %v19103_v6 }
 0x8ab   : > { %v12330_v21 = vpop.xlane.xlu1 %2926 }
 0x8ac   : > { %19119 = vst [vmem:[#allocation90_spill] sm:$0xff] %v12330_v21  ;;  %vm17548_vm2 = vcmp.eq.f32.partialorder %v12049_v58, %v12330_v21  ;;  %v12342_v32 = vpop.xlane.xlu0 %2928 }
 0x8ad   : > { %vm6368_vm14 = vmpackc.low %vm17548_vm2, %vm17549_vm11  ;;  %vm17554_vm7 = vcmp.eq.f32.partialorder %v12055_v25, %v12342_v32 }
 0x8ae   : > { %7291 = vmatprep.mubr.msk.bf16.mxu1 %vm6368_vm14, %v19103_v6 }
 0x8af   : > { %v12345_v54 = vpop.xlane.xlu1 %2930 }
 0x8b0   : > { %19120 = vst [vmem:[#allocation109_spill] sm:$0xff] %v12345_v54  ;;  %vm17553_vm10 = vcmp.eq.f32.partialorder %v12068_v34, %v12345_v54 }
 0x8b1   : > { %vm6370_vm5 = vmpackc.low %vm17553_vm10, %vm17554_vm7  ;;  %v12357_v21 = vpop.xlane.xlu0 %2932 }
 0x8b2   : > { %19121 = vst [vmem:[#allocation25_spill] sm:$0xff] %v12357_v21  ;;  %7292 = vmatmul.mubr.msk.bf16.gmra.mrb[104].mxu1 %vm6370_vm5, %v19103_v6  ;;  %vm17560_vm14 = vcmp.eq.f32.partialorder %v12096_v46, %v12357_v21 }
 0x8b5   : > { %v12360_v58 = vpop.xlane.xlu1 %2934  ;;  %v12372_v54 = vpop.xlane.xlu0 %2936 }
 0x8b6   : > { %19122 = vst [vmem:[#allocation12_spill] sm:$0xff] %v12360_v58  ;;  %vm17556_vm2 = vcmp.eq.f32.partialorder %v12119_v31, %v12360_v58  ;;  %vm17572_vm5 = vcmp.eq.f32.partialorder %v12125_v33, %v12372_v54 }
 0x8b7   : > { %vm6372_vm11 = vmpackc.low %vm17556_vm2, %vm17560_vm14 }
 0x8b8   : > { %7295 = vmatprep.mubr.msk.bf16.mxu1 %vm6372_vm11, %v19103_v6 }
 0x8b9   : > { %v12375_v34 = vpop.xlane.xlu1 %2938 }
 0x8ba   : > { %19123 = vst [vmem:[#allocation21_spill] sm:$0xff] %v12375_v34  ;;  %vm17564_vm10 = vcmp.eq.f32.partialorder %v12129_v37, %v12375_v34 }
 0x8bb   : > { %vm6374_vm7 = vmpackc.low %vm17564_vm10, %vm17572_vm5 }
 0x8bc   : > { %7296 = vmatmul.mubr.msk.bf16.gmra.mrb[108].mxu1 %vm6374_vm7, %v19103_v6 }
 0x951   : > { %v7269_v58 = vpop.f32.mrb[80].mxu1 }
 0x952   : > { %vm3215_vm2 = vcmp.eq.f32.partialorder %v7269_v58, 0.0  ;;  %v3086_v31 = vpop.f32.mrb[81].mxu1 }
 0x953   : > { %vm12391_vm11 = vmand %vm2942_vm1, %vm3215_vm2  ;;  %vm3213_vm14 = vcmp.eq.f32.partialorder %v3086_v31, 0.0  ;;  %v7270_v46 = vpop.f32.mrb[82].mxu1 }
 0x954   : > { %vm12402_vm7 = vmand %vm2940_vm15, %vm3213_vm14  ;;  %vm3216_vm10 = vcmp.eq.f32.partialorder %v7270_v46, 0.0  ;;  %v3089_v49 = vpop.f32.mrb[83].mxu1  ;;  %v12447_v14 = vsel %vm12391_vm11, -1.0, %v11607_v55 }
 0x955   : > { %vm12413_vm1 = vmand %vm2943_vm6, %vm3216_vm10  ;;  %vm3214_vm2 = vcmp.eq.f32.partialorder %v3089_v49, 0.0  ;;  %v12420_v39 = vsel %vm12402_vm7, -1.0, %v11576_v35 }
 0x956   : > { %vm12429_vm15 = vmand %vm2941_vm0, %vm3214_vm2  ;;  %3341 = vmax.xlane.f32.xlu0 %v12420_v39  ;;  %v12460_v34 = vsel %vm12413_vm1, -1.0, %v11620_v13  ;;  %v19348_v58 = vsel %vm12413_vm1, %v9009_v45, %v11586_v60 }
 0x957   : > { %v12441_v49 = vsel %vm12429_vm15, -1.0, %v11601_v23 }
 0x958   : > { %3343 = vmax.xlane.f32.xlu1 %v12441_v49 }
 0x959   : > { %v7273_v46 = vpop.f32.mrb[84].mxu1 }
 0x95a   : > { %vm3219_vm0 = vcmp.eq.f32.partialorder %v7273_v46, 0.0  ;;  %3345 = vmax.xlane.f32.xlu0 %v12447_v14  ;;  %v3102_v31 = vpop.f32.mrb[85].mxu1  ;;  %v19136_v46 = vmov 0 }
 0x95b   : > { %vm12453_vm6 = vmand %vm2946_vm9, %vm3219_vm0  ;;  %vm3217_vm10 = vcmp.eq.f32.partialorder %v3102_v31, 0.0  ;;  %v7274_v23 = vpop.f32.mrb[86].mxu1 }
 0x95c   : > { %vm12469_vm14 = vmand %vm2944_vm13, %vm3217_vm10  ;;  %vm3220_vm9 = vcmp.eq.f32.partialorder %v7274_v23, 0.0  ;;  %3347 = vmax.xlane.f32.xlu1 %v12460_v34  ;;  %v3105_v31 = vpop.f32.mrb[87].mxu1  ;;  %v12515_v15 = vsel %vm12453_vm6, -1.0, %v11677_v62 }
 0x95d   : > { %vm12481_vm2 = vmand %vm2947_vm12, %vm3220_vm9  ;;  %vm3218_vm13 = vcmp.eq.f32.partialorder %v3105_v31, 0.0  ;;  %v12488_v19 = vsel %vm12469_vm14, -1.0, %v11648_v40 }
 0x95e   : > { %v19137_v46 = vsel %vm12481_vm2, 4294967295, %v19136_v46  ;;  %vm12497_vm0 = vmand %vm2945_vm3, %vm3218_vm13  ;;  %3349 = vmax.xlane.f32.xlu0 %v12488_v19  ;;  %v12521_v40 = vsel %vm12481_vm2, -1.0, %v11681_v27  ;;  %v19148_v27 = vmov 0  ;;  %vm19155_vm13 = vcmp.eq.f32.partialorder %v19153_v28, %v19154_v61 }
 0x95f   : > { %19138 = vst [vmem:[#allocation108_spill] sm:$0xff] %v19137_v46  ;;  %v19140_v12 = vsel %vm12497_vm0, 4294967295, %v19139_v12  ;;  %v12509_v31 = vsel %vm12497_vm0, -1.0, %v11671_v42  ;;  %v19143_v42 = vmov 0  ;;  %v19156_v46 = vmov 0 }
 0x960   : > { %19141 = vst [vmem:[#allocation82_spill] sm:$0xff] %v19140_v12  ;;  %19142 = vst [vmem:[#allocation76_spill] sm:$0xff] %v12509_v31  ;;  %3351 = vmax.xlane.f32.xlu1 %v12509_v31  ;;  %v19164_v61 = vmov 0 }
 0x962   : > { %3353 = vmax.xlane.f32.xlu0 %v12515_v15 }
 0x963   : > { %v7277_v23 = vpop.f32.mrb[88].mxu1 }
 0x964   : > { %vm3223_vm3 = vcmp.eq.f32.partialorder %v7277_v23, 0.0  ;;  %v3118_v13 = vpop.f32.mrb[89].mxu1  ;;  %3355 = vmax.xlane.f32.xlu1 %v12521_v40 }
 0x965   : > { %vm12526_vm12 = vmand %vm2950_vm8, %vm3223_vm3  ;;  %vm3221_vm10 = vcmp.eq.f32.partialorder %v3118_v13, 0.0  ;;  %v7278_v62 = vpop.f32.mrb[90].mxu1  ;;  %v19162_v13 = vld [vmem:[#allocation106_spill] sm:$0xff] }
 0x966   : > { %v19144_v42 = vsel %vm12526_vm12, 4294967295, %v19143_v42  ;;  %vm12538_vm9 = vmand %vm2948_vm4, %vm3221_vm10  ;;  %vm3224_vm8 = vcmp.eq.f32.partialorder %v7278_v62, 0.0  ;;  %v3121_v63 = vpop.f32.mrb[91].mxu1  ;;  %vm19163_vm4 = vcmp.eq.f32.partialorder %v19161_v59, %v19162_v13  ;;  %v12583_v13 = vsel %vm12526_vm12, -1.0, %v11751_v47 }
 0x967   : > { %19145 = vst [vmem:[#allocation62_spill] sm:$0xff] %v19144_v42  ;;  %v19149_v27 = vsel %vm12538_vm9, 4294967295, %v19148_v27  ;;  %vm12549_vm3 = vmand %vm19155_vm13, %vm3224_vm8  ;;  %vm3222_vm5 = vcmp.eq.f32.partialorder %v3121_v63, 0.0  ;;  %v12556_v51 = vsel %vm12538_vm9, -1.0, %v11720_v41  ;;  %vm19170_vm8 = vcmp.eq.f32.partialorder %v11827_v3, %v12246_v43  ;;  %v13019_v42 = vld [vmem:[%s16971_s3 + $0x18] sm:$0xff]  }
 0x968   : > { %19150 = vst [vmem:[#allocation56_spill] sm:$0xff] %v19149_v27  ;;  %v19157_v46 = vsel %vm12549_vm3, 4294967295, %v19156_v46  ;;  %vm12565_vm10 = vmand %vm19163_vm4, %vm3222_vm5  ;;  %3357 = vmax.xlane.f32.xlu0 %v12556_v51  ;;  %v19171_v41 = vmov 0  ;;  %v12596_v63 = vsel %vm12549_vm3, -1.0, %v19153_v28  ;;  %v19177_v43 = vmov 0  ;;  %v19189_v27 = vld [vmem:[#allocation69_spill] sm:$0xff] }
 0x969   : > { %19158 = vst [vmem:[#allocation91_spill] sm:$0xff] %v19157_v46  ;;  %v19165_v61 = vsel %vm12565_vm10, 4294967295, %v19164_v61  ;;  %v12577_v12 = vsel %vm12565_vm10, -1.0, %v19161_v59  ;;  %vm19176_vm10 = vcmp.eq.f32.partialorder %v11796_v29, %v12229_v30  ;;  %v19182_v46 = vld [vmem:[#allocation88_spill] sm:$0xff]  ;;  %v19190_v28 = vld [vmem:[#allocation15_spill] sm:$0xff]  ;;  %19322 = vst [vmem:[#allocation69_spill] sm:$0xff] %v13019_v42 }
 0x96a   : > { %19166 = vst [vmem:[#allocation33_spill] sm:$0xff] %v19165_v61  ;;  %19169 = vst [vmem:[#allocation92_spill] sm:$0xff] %v12577_v12  ;;  %3359 = vmax.xlane.f32.xlu1 %v12577_v12 }
 0x96c   : > { %3361 = vmax.xlane.f32.xlu0 %v12583_v13 }
 0x96d   : > { %v7281_v55 = vpop.f32.mrb[92].mxu1 }
 0x96e   : > { %vm3227_vm5 = vcmp.eq.f32.partialorder %v7281_v55, 0.0  ;;  %v3134_v62 = vpop.f32.mrb[93].mxu1  ;;  %3363 = vmax.xlane.f32.xlu1 %v12596_v63  ;;  %v19184_v55 = vmov 0 }
 0x96f   : > { %vm12589_vm13 = vmand %vm19170_vm8, %vm3227_vm5  ;;  %vm3225_vm4 = vcmp.eq.f32.partialorder %v3134_v62, 0.0  ;;  %v7282_v59 = vpop.f32.mrb[94].mxu1  ;;  %vm19183_vm8 = vcmp.eq.f32.partialorder %v11840_v44, %v19182_v46  ;;  %v19192_v46 = vmov 0 }
 0x970   : > { %v19172_v41 = vsel %vm12589_vm13, 4294967295, %v19171_v41  ;;  %vm12605_vm9 = vmand %vm19176_vm10, %vm3225_vm4  ;;  %vm3228_vm5 = vcmp.eq.f32.partialorder %v7282_v59, 0.0  ;;  %v3137_v62 = vpop.f32.mrb[95].mxu1  ;;  %vm19191_vm4 = vcmp.eq.f32.partialorder %v19189_v27, %v19190_v28  ;;  %v12651_v28 = vsel %vm12589_vm13, -1.0, %v11827_v3 }
 0x971   : > { %19173 = vst [vmem:[#allocation111_spill] sm:$0xff] %v19172_v41  ;;  %v19178_v43 = vsel %vm12605_vm9, 4294967295, %v19177_v43  ;;  %vm12617_vm3 = vmand %vm19183_vm8, %vm3228_vm5  ;;  %vm3226_vm10 = vcmp.eq.f32.partialorder %v3137_v62, 0.0  ;;  %v12624_v30 = vsel %vm12605_vm9, -1.0, %v11796_v29  ;;  %vm19198_vm8 = vcmp.eq.f32.partialorder %v11903_v48, %v12280_v36 }
 0x972   : > { %19179 = vst [vmem:[#allocation78_spill] sm:$0xff] %v19178_v43  ;;  %v19185_v55 = vsel %vm12617_vm3, 4294967295, %v19184_v55  ;;  %vm12633_vm12 = vmand %vm19191_vm4, %vm3226_vm10  ;;  %3365 = vmax.xlane.f32.xlu0 %v12624_v30  ;;  %v19199_v29 = vmov 0  ;;  %v12664_v62 = vsel %vm12617_vm3, -1.0, %v11840_v44  ;;  %v19205_v36 = vmov 0  ;;  %v19217_v44 = vld [vmem:[#allocation53_spill] sm:$0xff] }
 0x973   : > { %19186 = vst [vmem:[#allocation79_spill] sm:$0xff] %v19185_v55  ;;  %v19193_v46 = vsel %vm12633_vm12, 4294967295, %v19192_v46  ;;  %v12645_v23 = vsel %vm12633_vm12, -1.0, %v19189_v27  ;;  %vm19204_vm12 = vcmp.eq.f32.partialorder %v11872_v2, %v12263_v22  ;;  %v19216_v55 = vld [vmem:[#allocation67_spill] sm:$0xff]  ;;  %v19307_v43 = vld [vmem:[#allocation32_spill] sm:$0xff] }
 0x974   : > { %19194 = vst [vmem:[#allocation27_spill] sm:$0xff] %v19193_v46  ;;  %19197 = vst [vmem:[#allocation110_spill] sm:$0xff] %v12645_v23  ;;  %3367 = vmax.xlane.f32.xlu1 %v12645_v23 }
 0x975   : > { %v7285_v4 = vpop.f32.mrb[96].mxu1 }
 0x976   : > { %vm3231_vm5 = vcmp.eq.f32.partialorder %v7285_v4, 0.0  ;;  %3369 = vmax.xlane.f32.xlu0 %v12651_v28  ;;  %v3150_v59 = vpop.f32.mrb[97].mxu1  ;;  %v19211_v4 = vmov 0 }
 0x977   : > { %vm12657_vm10 = vmand %vm19198_vm8, %vm3231_vm5  ;;  %vm3229_vm4 = vcmp.eq.f32.partialorder %v3150_v59, 0.0  ;;  %v7286_v27 = vpop.f32.mrb[98].mxu1  ;;  %vm19210_vm8 = vcmp.eq.f32.partialorder %v11916_v11, %v12283_v5  ;;  %v19219_v5 = vmov 0 }
 0x978   : > { %v19200_v29 = vsel %vm12657_vm10, 4294967295, %v19199_v29  ;;  %vm12673_vm9 = vmand %vm19204_vm12, %vm3229_vm4  ;;  %vm3232_vm5 = vcmp.eq.f32.partialorder %v7286_v27, 0.0  ;;  %3371 = vmax.xlane.f32.xlu1 %v12664_v62  ;;  %v3153_v59 = vpop.f32.mrb[99].mxu1  ;;  %vm19218_vm4 = vcmp.eq.f32.partialorder %v19216_v55, %v19217_v44  ;;  %v12719_v44 = vsel %vm12657_vm10, -1.0, %v11903_v48 }
 0x979   : > { %19201 = vst [vmem:[#allocation44_spill] sm:$0xff] %v19200_v29  ;;  %v19206_v36 = vsel %vm12673_vm9, 4294967295, %v19205_v36  ;;  %vm12685_vm3 = vmand %vm19210_vm8, %vm3232_vm5  ;;  %vm3230_vm12 = vcmp.eq.f32.partialorder %v3153_v59, 0.0  ;;  %v12692_v22 = vsel %vm12673_vm9, -1.0, %v11872_v2  ;;  %vm19225_vm8 = vcmp.eq.f32.partialorder %v11979_v38, %v12312_v57  ;;  %v19245_v29 = vld [vmem:[#allocation104_spill] sm:$0xff] }
 0x97a   : > { %19207 = vst [vmem:[#allocation31_spill] sm:$0xff] %v19206_v36  ;;  %v19212_v4 = vsel %vm12685_vm3, 4294967295, %v19211_v4  ;;  %vm12701_vm13 = vmand %vm19218_vm4, %vm3230_vm12  ;;  %3373 = vmax.xlane.f32.xlu0 %v12692_v22  ;;  %v19226_v2 = vmov 0  ;;  %v12732_v59 = vsel %vm12685_vm3, -1.0, %v11916_v11  ;;  %v19232_v57 = vmov 0  ;;  %v19238_v36 = vld [vmem:[#allocation24_spill] sm:$0xff] }
 0x97b   : > { %19213 = vst [vmem:[#allocation28_spill] sm:$0xff] %v19212_v4  ;;  %v19220_v5 = vsel %vm12701_vm13, 4294967295, %v19219_v5  ;;  %v12713_v47 = vsel %vm12701_vm13, -1.0, %v19216_v55  ;;  %vm19231_vm13 = vcmp.eq.f32.partialorder %v11948_v17, %v12297_v0  ;;  %v19237_v4 = vld [vmem:[#allocation5_spill] sm:$0xff] }
 0x97c   : > { %19221 = vst [vmem:[#allocation38_spill] sm:$0xff] %v19220_v5  ;;  %19224 = vst [vmem:[#allocation30_spill] sm:$0xff] %v12713_v47  ;;  %3375 = vmax.xlane.f32.xlu1 %v12713_v47  ;;  %v19246_v11 = vld [vmem:[#allocation89_spill] sm:$0xff] }
 0x97d   : > { %v7289_v61 = vpop.f32.mrb[100].mxu1 }
 0x97e   : > { %vm3235_vm5 = vcmp.eq.f32.partialorder %v7289_v61, 0.0  ;;  %3377 = vmax.xlane.f32.xlu0 %v12719_v44  ;;  %v3166_v27 = vpop.f32.mrb[101].mxu1  ;;  %v19240_v61 = vmov 0 }
 0x97f   : > { %vm12725_vm12 = vmand %vm19225_vm8, %vm3235_vm5  ;;  %vm3233_vm4 = vcmp.eq.f32.partialorder %v3166_v27, 0.0  ;;  %v7290_v55 = vpop.f32.mrb[102].mxu1  ;;  %vm19239_vm8 = vcmp.eq.f32.partialorder %v19237_v4, %v19238_v36  ;;  %v19248_v36 = vmov 0 }
 0x980   : > { %v19227_v2 = vsel %vm12725_vm12, 4294967295, %v19226_v2  ;;  %vm12741_vm9 = vmand %vm19231_vm13, %vm3233_vm4  ;;  %vm3236_vm5 = vcmp.eq.f32.partialorder %v7290_v55, 0.0  ;;  %3379 = vmax.xlane.f32.xlu1 %v12732_v59  ;;  %v3169_v27 = vpop.f32.mrb[103].mxu1  ;;  %vm19247_vm4 = vcmp.eq.f32.partialorder %v19245_v29, %v19246_v11  ;;  %v12787_v11 = vsel %vm12725_vm12, -1.0, %v11979_v38  ;;  %v19292_v38 = vld [vmem:[#allocation25_spill] sm:$0xff] }
 0x981   : > { %19228 = vst [vmem:[#allocation112_spill] sm:$0xff] %v19227_v2  ;;  %v19233_v57 = vsel %vm12741_vm9, 4294967295, %v19232_v57  ;;  %vm12753_vm3 = vmand %vm19239_vm8, %vm3236_vm5  ;;  %vm3234_vm13 = vcmp.eq.f32.partialorder %v3169_v27, 0.0  ;;  %v12760_v0 = vsel %vm12741_vm9, -1.0, %v11948_v17  ;;  %vm19254_vm8 = vcmp.eq.f32.partialorder %v12055_v25, %v12342_v32  ;;  %v19275_v2 = vld [vmem:[#allocation50_spill] sm:$0xff] }
 0x982   : > { %19234 = vst [vmem:[#allocation58_spill] sm:$0xff] %v19233_v57  ;;  %v19241_v61 = vsel %vm12753_vm3, 4294967295, %v19240_v61  ;;  %vm12769_vm10 = vmand %vm19247_vm4, %vm3234_vm13  ;;  %3381 = vmax.xlane.f32.xlu0 %v12760_v0  ;;  %v19255_v17 = vmov 0  ;;  %v12800_v27 = vsel %vm12753_vm3, -1.0, %v19237_v4  ;;  %v19262_v32 = vmov 0  ;;  %v19268_v57 = vld [vmem:[#allocation109_spill] sm:$0xff] }
 0x983   : > { %19242 = vst [vmem:[#allocation37_spill] sm:$0xff] %v19241_v61  ;;  %v19249_v36 = vsel %vm12769_vm10, 4294967295, %v19248_v36  ;;  %v12781_v3 = vsel %vm12769_vm10, -1.0, %v19245_v29  ;;  %19258 = vst [vmem:[#allocation83_spill] sm:$0xff] %v12800_v27  ;;  %vm19261_vm10 = vcmp.eq.f32.partialorder %v12024_v18, %v12327_v1  ;;  %v19267_v61 = vld [vmem:[#allocation74_spill] sm:$0xff] }
 0x984   : > { %19250 = vst [vmem:[#allocation114_spill] sm:$0xff] %v19249_v36  ;;  %19253 = vst [vmem:[#allocation42_spill] sm:$0xff] %v12781_v3  ;;  %3383 = vmax.xlane.f32.xlu1 %v12781_v3  ;;  %v19276_v4 = vld [vmem:[#allocation90_spill] sm:$0xff] }
 0x985   : > { %v7293_v46 = vpop.f32.mrb[104].mxu1 }
 0x986   : > { %vm3239_vm5 = vcmp.eq.f32.partialorder %v7293_v46, 0.0  ;;  %3385 = vmax.xlane.f32.xlu0 %v12787_v11  ;;  %v3182_v55 = vpop.f32.mrb[105].mxu1  ;;  %v19270_v46 = vmov 0 }
 0x987   : > { %vm12793_vm13 = vmand %vm19254_vm8, %vm3239_vm5  ;;  %vm3237_vm4 = vcmp.eq.f32.partialorder %v3182_v55, 0.0  ;;  %v7294_v29 = vpop.f32.mrb[106].mxu1  ;;  %vm19269_vm8 = vcmp.eq.f32.partialorder %v19267_v61, %v19268_v57  ;;  %v19278_v57 = vmov 0 }
 0x988   : > { %v19256_v17 = vsel %vm12793_vm13, 4294967295, %v19255_v17  ;;  %vm12809_vm9 = vmand %vm19261_vm10, %vm3237_vm4  ;;  %vm3240_vm5 = vcmp.eq.f32.partialorder %v7294_v29, 0.0  ;;  %3387 = vmax.xlane.f32.xlu1 %v12800_v27  ;;  %v3185_v55 = vpop.f32.mrb[107].mxu1  ;;  %vm19277_vm4 = vcmp.eq.f32.partialorder %v19275_v2, %v19276_v4  ;;  %v12855_v4 = vsel %vm12793_vm13, -1.0, %v12055_v25  ;;  %v12979_v25 = vld [vmem:[%s16971_s3 + $0x8] sm:$0xff]  }
 0x989   : > { %19257 = vst [vmem:[#allocation43_spill] sm:$0xff] %v19256_v17  ;;  %v19263_v32 = vsel %vm12809_vm9, 4294967295, %v19262_v32  ;;  %vm12821_vm3 = vmand %vm19269_vm8, %vm3240_vm5  ;;  %vm3238_vm10 = vcmp.eq.f32.partialorder %v3185_v55, 0.0  ;;  %v12828_v1 = vsel %vm12809_vm9, -1.0, %v12024_v18  ;;  %vm19284_vm8 = vcmp.eq.f32.partialorder %v12125_v33, %v12372_v54  ;;  %v19299_v17 = vld [vmem:[#allocation21_spill] sm:$0xff] }
 0x98a   : > { %19264 = vst [vmem:[#allocation113_spill] sm:$0xff] %v19263_v32  ;;  %v19271_v46 = vsel %vm12821_vm3, 4294967295, %v19270_v46  ;;  %vm12837_vm12 = vmand %vm19277_vm4, %vm3238_vm10  ;;  %3389 = vmax.xlane.f32.xlu0 %v12828_v1  ;;  %v19285_v18 = vmov 0  ;;  %v12868_v55 = vsel %vm12821_vm3, -1.0, %v19267_v61  ;;  %v19294_v54 = vmov 0  ;;  %v19308_v61 = vld [vmem:[#allocation12_spill] sm:$0xff] }
 0x98b   : > { %19272 = vst [vmem:[#allocation26_spill] sm:$0xff] %v19271_v46  ;;  %v19279_v57 = vsel %vm12837_vm12, 4294967295, %v19278_v57  ;;  %v12849_v48 = vsel %vm12837_vm12, -1.0, %v19275_v2  ;;  %19288 = vst [vmem:[#allocation96_spill] sm:$0xff] %v12868_v55 }
 0x98c   : > { %19280 = vst [vmem:[#allocation81_spill] sm:$0xff] %v19279_v57  ;;  %19283 = vst [vmem:[#allocation94_spill] sm:$0xff] %v12849_v48  ;;  %3391 = vmax.xlane.f32.xlu1 %v12849_v48  ;;  %v19291_v57 = vld [vmem:[#allocation8_spill] sm:$0xff] }
 0x98d   : > { %vm19293_vm12 = vcmp.eq.f32.partialorder %v19291_v57, %v19292_v38  ;;  %19319 = vst [vmem:[#allocation68_spill] sm:$0xff] %v12979_v25 }
 0x98e   : > { %3393 = vmax.xlane.f32.xlu0 %v12855_v4 }
 0x98f   : > { %v7297_v5 = vpop.f32.mrb[108].mxu1 }
 0x990   : > { %vm3243_vm5 = vcmp.eq.f32.partialorder %v7297_v5, 0.0  ;;  %v3198_v29 = vpop.f32.mrb[109].mxu1  ;;  %3395 = vmax.xlane.f32.xlu1 %v12868_v55  ;;  %v19301_v5 = vmov 0 }
 0x991   : > { %vm12861_vm10 = vmand %vm19284_vm8, %vm3243_vm5  ;;  %vm3241_vm4 = vcmp.eq.f32.partialorder %v3198_v29, 0.0  ;;  %v7298_v2 = vpop.f32.mrb[110].mxu1  ;;  %vm19300_vm8 = vcmp.eq.f32.partialorder %v12129_v37, %v19299_v17  ;;  %v19310_v17 = vmov 0 }
 0x992   : > { %v19286_v18 = vsel %vm12861_vm10, 4294967295, %v19285_v18  ;;  %vm12877_vm9 = vmand %vm19293_vm12, %vm3241_vm4  ;;  %vm3244_vm5 = vcmp.eq.f32.partialorder %v7298_v2, 0.0  ;;  %v3201_v29 = vpop.f32.mrb[111].mxu1  ;;  %vm19309_vm4 = vcmp.eq.f32.partialorder %v19307_v43, %v19308_v61  ;;  %v12923_v61 = vsel %vm12861_vm10, -1.0, %v12125_v33  ;;  %v12969_v2 = vld [vmem:[%s16971_s3] sm:$0xff]  }
 0x993   : > { %19287 = vst [vmem:[#allocation95_spill] sm:$0xff] %v19286_v18  ;;  %v19295_v54 = vsel %vm12877_vm9, 4294967295, %v19294_v54  ;;  %vm12889_vm3 = vmand %vm19300_vm8, %vm3244_vm5  ;;  %vm3242_vm12 = vcmp.eq.f32.partialorder %v3201_v29, 0.0  ;;  %v12896_v38 = vsel %vm12877_vm9, -1.0, %v19291_v57  ;;  %v13001_v18 = vld [vmem:[%s16971_s3 + $0x10] sm:$0xff]  }
 0x994   : > { %19296 = vst [vmem:[#allocation98_spill] sm:$0xff] %v19295_v54  ;;  %v19302_v5 = vsel %vm12889_vm3, 4294967295, %v19301_v5  ;;  %19304 = vst [vmem:[#allocation103_spill] sm:$0xff] %v12896_v38  ;;  %3397 = vmax.xlane.f32.xlu0 %v12896_v38  ;;  %v12929_v36 = vsel %vm12889_vm3, -1.0, %v12129_v37  ;;  %v19316_v37 = vmov 1.0|1.0  }
 0x995   : > { %19303 = vst [vmem:[#allocation100_spill] sm:$0xff] %v19302_v5  ;;  %vm12905_vm13 = vmand %vm19309_vm4, %vm3242_vm12 }
 0x996   : > { %v19311_v17 = vsel %vm12905_vm13, 4294967295, %v19310_v17  ;;  %v12917_v46 = vsel %vm12905_vm13, -1.0, %v19307_v43  ;;  %19318 = vst [vmem:[#allocation19_spill] sm:$0xff] %v12969_v2  ;;  %19320 = vst [vmem:[#allocation106_spill] sm:$0xff] %v13001_v18 }
 0x997   : > { %19312 = vst [vmem:[#allocation105_spill] sm:$0xff] %v19311_v17  ;;  %19315 = vst [vmem:[#allocation107_spill] sm:$0xff] %v12917_v46  ;;  %3399 = vmax.xlane.f32.xlu1 %v12917_v46 }
 0x998   : > { %3401 = vmax.xlane.f32.xlu0 %v12923_v61 }
 0x99b   : > { %3403 = vmax.xlane.f32.xlu1 %v12929_v36 }
 0x9e3   : > { %v12932_v57 = vpop.xlane.xlu0 %3341 }
 0x9e4   : > { %vm17618_vm5 = vcmp.eq.f32.partialorder %v12420_v39, %v12932_v57 }
 0x9e5   : > { %v12934_v43 = vpop.xlane.xlu1 %3343 }
 0x9e6   : > { %vm17614_vm8 = vcmp.eq.f32.partialorder %v12441_v49, %v12934_v43 }
 0x9e7   : > { %vm6408_vm12 = vmpackc.low %vm17614_vm8, %vm17618_vm5  ;;  %v12946_v33 = vpop.xlane.xlu0 %3345 }
 0x9e8   : > { %7315 = vmatprep.mubr.msk.bf16.mxu0 %vm6408_vm12, %v19316_v37  ;;  %vm17663_vm4 = vcmp.eq.f32.partialorder %v12447_v14, %v12946_v33 }
 0x9e9   : > { %v12949_v29 = vpop.xlane.xlu1 %3347 }
 0x9ea   : > { %vm17617_vm13 = vcmp.eq.f32.partialorder %v12460_v34, %v12949_v29 }
 0x9eb   : > { %vm6410_vm3 = vmpackc.low %vm17617_vm13, %vm17663_vm4  ;;  %v12961_v32 = vpop.xlane.xlu0 %3349 }
 0x9ec   : > { %7316 = vmatmul.mubr.msk.bf16.vlgmr.msra.gmra.mrb[80].mxu0 %vm6410_vm3, %v19316_v37  ;;  %vm17631_vm12 = vcmp.eq.f32.partialorder %v12488_v19, %v12961_v32 }
 0x9ed   : > { %v12964_v17 = vpop.xlane.xlu1 %3351  ;;  %7396 = vmatpush3.bf16.msra.mxu0 %v12969_v2 }
 0x9ee   : > { %19317 = vst [vmem:[#allocation9_spill] sm:$0xff] %v12964_v17  ;;  %vm17624_vm8 = vcmp.eq.f32.partialorder %v12509_v31, %v12964_v17  ;;  %7397 = vmatprep.subr.bf16.mxu0 %v12979_v25  ;;  %v13041_v31 = vld [vmem:[%s16971_s3 + $0x20] sm:$0xff]  }
 0x9ef   : > { %vm6412_vm3 = vmpackc.low %vm17624_vm8, %vm17631_vm12  ;;  %v12988_v5 = vpop.xlane.xlu0 %3353  ;;  %19324 = vst [vmem:[#allocation67_spill] sm:$0xff] %v13041_v31 }
 0x9f0   : > { %7319 = vmatprep.mubr.msk.bf16.mxu0 %vm6412_vm3, %v19316_v37  ;;  %vm17637_vm13 = vcmp.eq.f32.partialorder %v12515_v15, %v12988_v5 }
 0x9f1   : > { %v12991_v54 = vpop.xlane.xlu1 %3355  ;;  %7398 = vmatpush3.bf16.msra.mxu0 %v12979_v25 }
 0x9f2   : > { %vm17625_vm5 = vcmp.eq.f32.partialorder %v12521_v40, %v12991_v54  ;;  %7399 = vmatprep.subr.bf16.mxu0 %v13001_v18 }
 0x9f3   : > { %vm6414_vm3 = vmpackc.low %vm17625_vm5, %vm17637_vm13 }
 0x9f4   : > { %7320 = vmatmul.mubr.msk.bf16.gmra.mrb[84].mxu0 %vm6414_vm3, %v19316_v37 }
 0x9f5   : > { %v13010_v25 = vpop.xlane.xlu0 %3357  ;;  %7400 = vmatpush3.bf16.msra.mxu0 %v13001_v18 }
 0x9f6   : > { %7401 = vmatprep.subr.bf16.mxu0 %v13019_v42  ;;  %vm17636_vm8 = vcmp.eq.f32.partialorder %v12556_v51, %v13010_v25 }
 0x9f7   : > { %v13014_v41 = vpop.xlane.xlu1 %3359 }
 0x9f8   : > { %19321 = vst [vmem:[#allocation88_spill] sm:$0xff] %v13014_v41  ;;  %vm17632_vm5 = vcmp.eq.f32.partialorder %v12577_v12, %v13014_v41  ;;  %v13067_v12 = vld [vmem:[%s16971_s3 + $0x28] sm:$0xff]  }
 0x9f9   : > { %vm6416_vm3 = vmpackc.low %vm17632_vm5, %vm17636_vm8  ;;  %v13032_v18 = vpop.xlane.xlu0 %3361  ;;  %7402 = vmatpush3.bf16.msra.mxu0 %v13019_v42  ;;  %19327 = vst [vmem:[#allocation24_spill] sm:$0xff] %v13067_v12 }
 0x9fa   : > { %7323 = vmatprep.mubr.msk.bf16.mxu0 %vm6416_vm3, %v19316_v37  ;;  %7403 = vmatprep.subr.bf16.mxu0 %v13041_v31  ;;  %vm17644_vm12 = vcmp.eq.f32.partialorder %v12583_v13, %v13032_v18 }
 0x9fb   : > { %v13036_v17 = vpop.xlane.xlu1 %3363 }
 0x9fc   : > { %19323 = vst [vmem:[#allocation15_spill] sm:$0xff] %v13036_v17  ;;  %vm17643_vm5 = vcmp.eq.f32.partialorder %v12596_v63, %v13036_v17 }
 0x9fd   : > { %vm6418_vm3 = vmpackc.low %vm17643_vm5, %vm17644_vm12  ;;  %7404 = vmatpush3.bf16.msra.mxu0 %v13041_v31 }
 0x9fe   : > { %7324 = vmatmul.mubr.msk.bf16.gmra.mrb[88].mxu0 %vm6418_vm3, %v19316_v37  ;;  %7405 = vmatprep.subr.bf16.mxu0 %v13067_v12 }
 0x9ff   : > { %v13054_v42 = vpop.xlane.xlu0 %3365 }
 0xa00   : > { %19325 = vst [vmem:[#allocation53_spill] sm:$0xff] %v13054_v42  ;;  %vm17650_vm8 = vcmp.eq.f32.partialorder %v12624_v30, %v13054_v42  ;;  %v13089_v42 = vld [vmem:[%s16971_s3 + $0x30] sm:$0xff]  }
 0xa01   : > { %v13057_v41 = vpop.xlane.xlu1 %3367  ;;  %7406 = vmatpush3.bf16.msra.mxu0 %v13067_v12  ;;  %19329 = vst [vmem:[#allocation89_spill] sm:$0xff] %v13089_v42 }
 0xa02   : > { %19326 = vst [vmem:[#allocation5_spill] sm:$0xff] %v13057_v41  ;;  %vm17649_vm13 = vcmp.eq.f32.partialorder %v12645_v23, %v13057_v41  ;;  %7407 = vmatprep.subr.bf16.mxu0 %v13089_v42  ;;  %v13111_v23 = vld [vmem:[%s16971_s3 + $0x38] sm:$0xff]  }
 0xa03   : > { %vm6420_vm3 = vmpackc.low %vm17649_vm13, %vm17650_vm8  ;;  %v13076_v31 = vpop.xlane.xlu0 %3369  ;;  %19331 = vst [vmem:[#allocation109_spill] sm:$0xff] %v13111_v23 }
 0xa04   : > { %7327 = vmatprep.mubr.msk.bf16.mxu0 %vm6420_vm3, %v19316_v37  ;;  %vm17657_vm5 = vcmp.eq.f32.partialorder %v12651_v28, %v13076_v31 }
 0xa05   : > { %v13079_v17 = vpop.xlane.xlu1 %3371  ;;  %7408 = vmatpush3.bf16.msra.mxu0 %v13089_v42 }
 0xa06   : > { %19328 = vst [vmem:[#allocation104_spill] sm:$0xff] %v13079_v17  ;;  %vm17656_vm12 = vcmp.eq.f32.partialorder %v12664_v62, %v13079_v17  ;;  %7409 = vmatprep.subr.bf16.mxu0 %v13111_v23 }
 0xa07   : > { %vm6422_vm3 = vmpackc.low %vm17656_vm12, %vm17657_vm5  ;;  %v13098_v12 = vpop.xlane.xlu0 %3373 }
 0xa08   : > { %7328 = vmatmul.mubr.msk.bf16.gmra.mrb[92].mxu0 %vm6422_vm3, %v19316_v37  ;;  %vm17662_vm13 = vcmp.eq.f32.partialorder %v12692_v22, %v13098_v12 }
 0xa09   : > { %v13101_v41 = vpop.xlane.xlu1 %3375  ;;  %7410 = vmatpush3.bf16.msra.mxu0 %v13111_v23 }
 0xa0a   : > { %19330 = vst [vmem:[#allocation74_spill] sm:$0xff] %v13101_v41  ;;  %vm17658_vm8 = vcmp.eq.f32.partialorder %v12713_v47, %v13101_v41  ;;  %7491 = vmatprep.subr.bf16.mxu0 %v12969_v2 }
 0xa0b   : > { %vm6424_vm3 = vmpackc.low %vm17658_vm8, %vm17662_vm13  ;;  %v13120_v42 = vpop.xlane.xlu0 %3377 }
 0xa0c   : > { %7331 = vmatprep.mubr.msk.bf16.mxu0 %vm6424_vm3, %v19316_v37  ;;  %vm17668_vm12 = vcmp.eq.f32.partialorder %v12719_v44, %v13120_v42 }
 0xa0d   : > { %v13123_v17 = vpop.xlane.xlu1 %3379 }
 0xa0e   : > { %vm17667_vm5 = vcmp.eq.f32.partialorder %v12732_v59, %v13123_v17 }
 0xa0f   : > { %vm6426_vm8 = vmpackc.low %vm17667_vm5, %vm17668_vm12  ;;  %v13137_v41 = vpop.xlane.xlu0 %3381 }
 0xa10   : > { %7332 = vmatmul.mubr.msk.bf16.gmra.mrb[96].mxu0 %vm6426_vm8, %v19316_v37  ;;  %vm17673_vm3 = vcmp.eq.f32.partialorder %v12760_v0, %v13137_v41 }
 0xa11   : > { %v13140_v23 = vpop.xlane.xlu1 %3383 }
 0xa12   : > { %19332 = vst [vmem:[#allocation50_spill] sm:$0xff] %v13140_v23  ;;  %vm17672_vm13 = vcmp.eq.f32.partialorder %v12781_v3, %v13140_v23 }
 0xa13   : > { %vm6428_vm4 = vmpackc.low %vm17672_vm13, %vm17673_vm3  ;;  %v13152_v2 = vpop.xlane.xlu0 %3385 }
 0xa14   : > { %7335 = vmatprep.mubr.msk.bf16.mxu0 %vm6428_vm4, %v19316_v37  ;;  %vm17678_vm8 = vcmp.eq.f32.partialorder %v12787_v11, %v13152_v2 }
 0xa15   : > { %v13155_v47 = vpop.xlane.xlu1 %3387 }
 0xa16   : > { %19333 = vst [vmem:[#allocation90_spill] sm:$0xff] %v13155_v47  ;;  %vm17677_vm5 = vcmp.eq.f32.partialorder %v12800_v27, %v13155_v47 }
 0xa17   : > { %vm6430_vm12 = vmpackc.low %vm17677_vm5, %vm17678_vm8  ;;  %v13167_v23 = vpop.xlane.xlu0 %3389 }
 0xa18   : > { %7336 = vmatmul.mubr.msk.bf16.gmra.mrb[100].mxu0 %vm6430_vm12, %v19316_v37  ;;  %vm17683_vm4 = vcmp.eq.f32.partialorder %v12828_v1, %v13167_v23 }
 0xa19   : > { %v13170_v3 = vpop.xlane.xlu1 %3391 }
 0xa1a   : > { %19334 = vst [vmem:[#allocation8_spill] sm:$0xff] %v13170_v3  ;;  %vm17682_vm13 = vcmp.eq.f32.partialorder %v12849_v48, %v13170_v3 }
 0xa1b   : > { %vm6432_vm3 = vmpackc.low %vm17682_vm13, %vm17683_vm4  ;;  %v13182_v47 = vpop.xlane.xlu0 %3393 }
 0xa1c   : > { %7339 = vmatprep.mubr.msk.bf16.mxu0 %vm6432_vm3, %v19316_v37  ;;  %vm17688_vm12 = vcmp.eq.f32.partialorder %v12855_v4, %v13182_v47 }
 0xa1d   : > { %v13185_v27 = vpop.xlane.xlu1 %3395 }
 0xa1e   : > { %19335 = vst [vmem:[#allocation25_spill] sm:$0xff] %v13185_v27  ;;  %vm17687_vm5 = vcmp.eq.f32.partialorder %v12868_v55, %v13185_v27 }
 0xa1f   : > { %vm6434_vm8 = vmpackc.low %vm17687_vm5, %vm17688_vm12 }
 0xa20   : > { %7340 = vmatmul.mubr.msk.bf16.gmra.mrb[104].mxu0 %vm6434_vm8, %v19316_v37 }
 0xa21   : > { %v13197_v3 = vpop.xlane.xlu0 %3397 }
 0xa22   : > { %19336 = vst [vmem:[#allocation21_spill] sm:$0xff] %v13197_v3  ;;  %vm17693_vm3 = vcmp.eq.f32.partialorder %v12896_v38, %v13197_v3 }
 0xa24   : > { %v13200_v48 = vpop.xlane.xlu1 %3399 }
 0xa25   : > { %19337 = vst [vmem:[#allocation32_spill] sm:$0xff] %v13200_v48  ;;  %vm17690_vm13 = vcmp.eq.f32.partialorder %v12917_v46, %v13200_v48  ;;  %v13212_v27 = vpop.xlane.xlu0 %3401 }
 0xa26   : > { %vm6436_vm4 = vmpackc.low %vm17690_vm13, %vm17693_vm3  ;;  %vm17701_vm8 = vcmp.eq.f32.partialorder %v12923_v61, %v13212_v27 }
 0xa27   : > { %7343 = vmatprep.mubr.msk.bf16.mxu0 %vm6436_vm4, %v19316_v37  ;;  %vm19339_vm4 = vcmp.eq.f32.partialorder %v12447_v14, %v12946_v33  ;;  %v19360_v33 = vld [vmem:[#allocation64_spill] sm:$0xff] }
 0xa28   : > { %v13215_v55 = vpop.xlane.xlu1 %3403 }
 0xa29   : > { %19338 = vst [vmem:[#allocation12_spill] sm:$0xff] %v13215_v55  ;;  %vm17700_vm5 = vcmp.eq.f32.partialorder %v12929_v36, %v13215_v55  ;;  %v19342_v55 = vsel %vm12391_vm11, %v8988_v20, %v11555_v56  ;;  %vm19345_vm11 = vcmp.eq.f32.partialorder %v12460_v34, %v12949_v29  ;;  %v19367_v56 = vld [vmem:[#allocation46_spill] sm:$0xff] }
 0xa2a   : > { %vm6438_vm12 = vmpackc.low %vm17700_vm5, %vm17701_vm8 }
 0xa2b   : > { %7344 = vmatmul.mubr.msk.bf16.gmra.mrb[108].mxu0 %vm6438_vm12, %v19316_v37  ;;  %vm19343_vm12 = vcmp.eq.f32.partialorder %v12420_v39, %v12932_v57 }
 0xabf   : > { %v7317_v48 = vpop.f32.mrb[80].mxu0 }
 0xac0   : > { %vm3680_vm13 = vcmp.eq.f32.partialorder %v7317_v48, 0.0  ;;  %v3551_v46 = vpop.f32.mrb[81].mxu0 }
 0xac1   : > { %vm13231_vm3 = vmand %vm19339_vm4, %vm3680_vm13  ;;  %vm3678_vm9 = vcmp.eq.f32.partialorder %v3551_v46, 0.0  ;;  %v7318_v38 = vpop.f32.mrb[82].mxu0  ;;  %v19344_v46 = vsel %vm12402_vm7, %v8997_v7, %v11566_v10  ;;  %vm19349_vm7 = vcmp.eq.f32.partialorder %v12441_v49, %v12934_v43  ;;  %v19359_v43 = vld [vmem:[#allocation45_spill] sm:$0xff] }
 0xac2   : > { %v13243_v37 = vsel %vm13231_vm3, %v8988_v20, %v19342_v55  ;;  %vm3710_vm5 = vmand %vm19343_vm12, %vm3678_vm9  ;;  %vm3681_vm13 = vcmp.eq.f32.partialorder %v7318_v38, 0.0  ;;  %v3554_v48 = vpop.f32.mrb[83].mxu0  ;;  %v13295_v29 = vsel %vm13231_vm3, -1.0, %v12447_v14  ;;  %v19354_v14 = vsel %vm12453_vm6, %v9058_v24, %v11630_v26 }
 0xac3   : > { %v13254_v21 = vsel %vm3710_vm5, %v8997_v7, %v19344_v46  ;;  %vm13259_vm4 = vmand %vm19345_vm11, %vm3681_vm13  ;;  %vm3679_vm8 = vcmp.eq.f32.partialorder %v3554_v48, 0.0  ;;  %v13264_v55 = vsel %vm3710_vm5, -1.0, %v12420_v39  ;;  %v19350_v39 = vsel %vm12429_vm15, %v9026_v9, %v11598_v16  ;;  %v19364_v46 = vld [vmem:[#allocation9_spill] sm:$0xff]  ;;  %v19376_v16 = vld [vmem:[#allocation6_spill] sm:$0xff] }
 0xac4   : > { %v13274_v10 = vsel %vm13259_vm4, %v9009_v45, %v19348_v58  ;;  %vm3711_vm9 = vmand %vm19349_vm7, %vm3679_vm8  ;;  %3806 = vmax.xlane.f32.xlu0 %v13264_v55  ;;  %vm19351_vm15 = vcmp.eq.f32.partialorder %v12515_v15, %v12988_v5  ;;  %v13308_v57 = vsel %vm13259_vm4, -1.0, %v12460_v34  ;;  %vm19355_vm3 = vcmp.eq.f32.partialorder %v12488_v19, %v12961_v32  ;;  %v19368_v58 = vld [vmem:[#allocation85_spill] sm:$0xff] }
 0xac5   : > { %v13286_v6 = vsel %vm3711_vm9, %v9026_v9, %v19350_v39  ;;  %v13289_v60 = vsel %vm3711_vm9, -1.0, %v12441_v49  ;;  %v19356_v34 = vsel %vm12469_vm14, %v9072_v50, %v11642_v52  ;;  %vm19357_vm6 = vcmp.eq.f32.partialorder %v12521_v40, %v12991_v54  ;;  %v19363_v52 = vld [vmem:[#allocation76_spill] sm:$0xff]  ;;  %v19384_v54 = vld [vmem:[#allocation93_spill] sm:$0xff] }
 0xac6   : > { %3808 = vmax.xlane.f32.xlu1 %v13289_v60  ;;  %v19361_v48 = vsel %vm12481_vm2, %v19359_v43, %v19360_v33  ;;  %vm19365_vm14 = vcmp.eq.f32.partialorder %v19363_v52, %v19364_v46  ;;  %v19377_v33 = vld [vmem:[#allocation66_spill] sm:$0xff]  ;;  %v19383_v46 = vld [vmem:[#allocation7_spill] sm:$0xff] }
 0xac7   : > { %v7321_v38 = vpop.f32.mrb[84].mxu0 }
 0xac8   : > { %vm3684_vm1 = vcmp.eq.f32.partialorder %v7321_v38, 0.0  ;;  %3810 = vmax.xlane.f32.xlu0 %v13295_v29  ;;  %v3567_v8 = vpop.f32.mrb[85].mxu0 }
 0xac9   : > { %vm13301_vm5 = vmand %vm19351_vm15, %vm3684_vm1  ;;  %vm3682_vm8 = vcmp.eq.f32.partialorder %v3567_v8, 0.0  ;;  %v7322_v49 = vpop.f32.mrb[86].mxu0 }
 0xaca   : > { %v13318_v3 = vsel %vm13301_vm5, %v9058_v24, %v19354_v14  ;;  %vm3714_vm12 = vmand %vm19355_vm3, %vm3682_vm8  ;;  %vm3685_vm13 = vcmp.eq.f32.partialorder %v7322_v49, 0.0  ;;  %3812 = vmax.xlane.f32.xlu1 %v13308_v57  ;;  %v3570_v5 = vpop.f32.mrb[87].mxu0  ;;  %v13365_v8 = vsel %vm13301_vm5, -1.0, %v12515_v15  ;;  %v19374_v15 = vld [vmem:[#allocation62_spill] sm:$0xff]  ;;  %vm19380_vm5 = vcmp.eq.f32.partialorder %v12556_v51, %v13010_v25 }
 0xacb   : > { %v13330_v26 = vsel %vm3714_vm12, %v9072_v50, %v19356_v34  ;;  %vm3717_vm11 = vmand %vm19357_vm6, %vm3685_vm13  ;;  %vm3683_vm4 = vcmp.eq.f32.partialorder %v3570_v5, 0.0  ;;  %v13336_v35 = vsel %vm3714_vm12, -1.0, %v12488_v19  ;;  %v19369_v19 = vsel %vm12497_vm0, %v19367_v56, %v19368_v58  ;;  %v19413_v34 = vld [vmem:[#allocation34_spill] sm:$0xff] }
 0xacc   : > { %v13344_v53 = vsel %vm3717_vm11, %v19359_v43, %v19361_v48  ;;  %vm3715_vm7 = vmand %vm19365_vm14, %vm3683_vm4  ;;  %3814 = vmax.xlane.f32.xlu0 %v13336_v35  ;;  %v13369_v5 = vsel %vm3717_vm11, -1.0, %v12521_v40  ;;  %vm19371_vm0 = vcmp.eq.f32.partialorder %v12583_v13, %v13032_v18  ;;  %vm19375_vm15 = vnez %v19374_v15  ;;  %v19393_v15 = vld [vmem:[#allocation48_spill] sm:$0xff] }
 0xacd   : > { %19362 = vst [vmem:[#allocation108_spill] sm:$0xff] %v13344_v53  ;;  %v13356_v39 = vsel %vm3715_vm7, %v19367_v56, %v19369_v19  ;;  %v13359_v38 = vsel %vm3715_vm7, -1.0, %v19363_v52  ;;  %v19378_v48 = vsel %vm19375_vm15, %v19376_v16, %v19377_v33  ;;  %v19381_v52 = vld [vmem:[#allocation56_spill] sm:$0xff]  ;;  %v19394_v33 = vld [vmem:[#allocation65_spill] sm:$0xff]  ;;  %v19644_v43 = vmov 0 }
 0xace   : > { %19370 = vst [vmem:[#allocation64_spill] sm:$0xff] %v13356_v39  ;;  %3816 = vmax.xlane.f32.xlu1 %v13359_v38  ;;  %vm19382_vm12 = vnez %v19381_v52 }
 0xacf   : > { %v19385_v58 = vsel %vm19382_vm12, %v19383_v46, %v19384_v54  ;;  %v19397_v54 = vld [vmem:[#allocation92_spill] sm:$0xff] }
 0xad0   : > { %3818 = vmax.xlane.f32.xlu0 %v13365_v8 }
 0xad1   : > { %v7325_v49 = vpop.f32.mrb[88].mxu0 }
 0xad2   : > { %vm3688_vm2 = vcmp.eq.f32.partialorder %v7325_v49, 0.0  ;;  %v3583_v14 = vpop.f32.mrb[89].mxu0  ;;  %3820 = vmax.xlane.f32.xlu1 %v13369_v5  ;;  %v19387_v49 = vld [vmem:[#allocation15_spill] sm:$0xff] }
 0xad3   : > { %vm13374_vm9 = vmand %vm19371_vm0, %vm3688_vm2  ;;  %vm3686_vm1 = vcmp.eq.f32.partialorder %v3583_v14, 0.0  ;;  %v7326_v32 = vpop.f32.mrb[90].mxu0  ;;  %vm19388_vm13 = vcmp.eq.f32.partialorder %v12596_v63, %v19387_v49  ;;  %v19403_v49 = vld [vmem:[#allocation86_spill] sm:$0xff] }
 0xad4   : > { %v13387_v40 = vsel %vm13374_vm9, %v19376_v16, %v19378_v48  ;;  %vm3718_vm8 = vmand %vm19380_vm5, %vm3686_vm1  ;;  %vm3689_vm3 = vcmp.eq.f32.partialorder %v7326_v32, 0.0  ;;  %v3586_v18 = vpop.f32.mrb[91].mxu0  ;;  %v19391_v32 = vld [vmem:[#allocation91_spill] sm:$0xff]  ;;  %vm19407_vm1 = vcmp.eq.f32.partialorder %v12651_v28, %v13076_v31 }
 0xad5   : > { %19379 = vst [vmem:[#allocation76_spill] sm:$0xff] %v13387_v40  ;;  %v13398_v19 = vsel %vm3718_vm8, %v19383_v46, %v19385_v58  ;;  %vm13403_vm6 = vmand %vm19388_vm13, %vm3689_vm3  ;;  %vm3687_vm11 = vcmp.eq.f32.partialorder %v3586_v18, 0.0  ;;  %v13408_v25 = vsel %vm3718_vm8, -1.0, %v12556_v51  ;;  %vm19392_vm4 = vnez %v19391_v32  ;;  %v19398_v58 = vld [vmem:[#allocation88_spill] sm:$0xff]  ;;  %v19400_v18 = vld [vmem:[#allocation33_spill] sm:$0xff] }
 0xad6   : > { %19386 = vst [vmem:[#allocation9_spill] sm:$0xff] %v13398_v19  ;;  %v19395_v48 = vsel %vm19392_vm4, %v19393_v15, %v19394_v33  ;;  %vm19399_vm14 = vcmp.eq.f32.partialorder %v19397_v54, %v19398_v58  ;;  %3822 = vmax.xlane.f32.xlu0 %v13408_v25  ;;  %vm19401_vm2 = vnez %v19400_v18  ;;  %v19402_v51 = vld [vmem:[#allocation49_spill] sm:$0xff]  ;;  %v13439_v58 = vsel %vm13374_vm9, -1.0, %v12583_v13  ;;  %v19411_v13 = vld [vmem:[#allocation111_spill] sm:$0xff] }
 0xad7   : > { %v13418_v52 = vsel %vm13403_vm6, %v19393_v15, %v19395_v48  ;;  %vm3719_vm7 = vmand %vm19399_vm14, %vm3687_vm11  ;;  %v19404_v46 = vsel %vm19401_vm2, %v19402_v51, %v19403_v49  ;;  %v13452_v49 = vsel %vm13403_vm6, -1.0, %v12596_v63  ;;  %vm19412_vm9 = vnez %v19411_v13  ;;  %v19419_v63 = vld [vmem:[#allocation78_spill] sm:$0xff]  ;;  %v19422_v13 = vld [vmem:[#allocation47_spill] sm:$0xff] }
 0xad8   : > { %19396 = vst [vmem:[#allocation82_spill] sm:$0xff] %v13418_v52  ;;  %v13430_v32 = vsel %vm3719_vm7, %v19402_v51, %v19404_v46  ;;  %v13433_v33 = vsel %vm3719_vm7, -1.0, %v19397_v54  ;;  %19410 = vst [vmem:[#allocation66_spill] sm:$0xff] %v13452_v49  ;;  %vm19420_vm13 = vnez %v19419_v63  ;;  %v19425_v52 = vld [vmem:[#allocation104_spill] sm:$0xff]  ;;  %v19431_v63 = vld [vmem:[#allocation51_spill] sm:$0xff] }
 0xad9   : > { %19405 = vst [vmem:[#allocation85_spill] sm:$0xff] %v13430_v32  ;;  %19406 = vst [vmem:[#allocation62_spill] sm:$0xff] %v13433_v33  ;;  %3824 = vmax.xlane.f32.xlu1 %v13433_v33  ;;  %v19417_v32 = vld [vmem:[#allocation53_spill] sm:$0xff]  ;;  %vm19426_vm6 = vcmp.eq.f32.partialorder %v12664_v62, %v19425_v52  ;;  %v19450_v46 = vld [vmem:[#allocation35_spill] sm:$0xff] }
 0xada   : > { %3826 = vmax.xlane.f32.xlu0 %v13439_v58  ;;  %vm19418_vm8 = vcmp.eq.f32.partialorder %v12624_v30, %v19417_v32  ;;  %v19436_v52 = vld [vmem:[#allocation5_spill] sm:$0xff]  ;;  %v19599_v16 = vld [vmem:[#allocation67_spill] sm:$0xff] }
 0xadb   : > { %v7329_v48 = vpop.f32.mrb[92].mxu0 }
 0xadc   : > { %vm3692_vm0 = vcmp.eq.f32.partialorder %v7329_v48, 0.0  ;;  %v3599_v18 = vpop.f32.mrb[93].mxu0  ;;  %v19414_v48 = vld [vmem:[#allocation70_spill] sm:$0xff] }
 0xadd   : > { %vm13445_vm15 = vmand %vm19407_vm1, %vm3692_vm0  ;;  %vm3690_vm5 = vcmp.eq.f32.partialorder %v3599_v18, 0.0  ;;  %v7330_v54 = vpop.f32.mrb[94].mxu0  ;;  %v19415_v51 = vsel %vm19412_vm9, %v19413_v34, %v19414_v48  ;;  %3828 = vmax.xlane.f32.xlu1 %v13452_v49  ;;  %v19421_v18 = vld [vmem:[#allocation11_spill] sm:$0xff] }
 0xade   : > { %v13462_v31 = vsel %vm13445_vm15, %v19413_v34, %v19415_v51  ;;  %vm3722_vm3 = vmand %vm19418_vm8, %vm3690_vm5  ;;  %vm3693_vm12 = vcmp.eq.f32.partialorder %v7330_v54, 0.0  ;;  %v3602_v14 = vpop.f32.mrb[95].mxu0  ;;  %v19423_v15 = vsel %vm19420_vm13, %v19421_v18, %v19422_v13  ;;  %v19429_v54 = vld [vmem:[#allocation79_spill] sm:$0xff]  ;;  %v19435_v13 = vld [vmem:[#allocation110_spill] sm:$0xff]  ;;  %vm19445_vm5 = vcmp.eq.f32.partialorder %v12719_v44, %v13120_v42 }
 0xadf   : > { %19416 = vst [vmem:[#allocation56_spill] sm:$0xff] %v13462_v31  ;;  %v13474_v48 = vsel %vm3722_vm3, %v19421_v18, %v19423_v15  ;;  %vm13479_vm11 = vmand %vm19426_vm6, %vm3693_vm12  ;;  %vm3691_vm4 = vcmp.eq.f32.partialorder %v3602_v14, 0.0  ;;  %v13484_v32 = vsel %vm3722_vm3, -1.0, %v12624_v30  ;;  %vm19430_vm14 = vnez %v19429_v54  ;;  %v19432_v34 = vld [vmem:[#allocation99_spill] sm:$0xff]  ;;  %v19440_v30 = vld [vmem:[#allocation52_spill] sm:$0xff] }
 0xae0   : > { %19424 = vst [vmem:[#allocation93_spill] sm:$0xff] %v13474_v48  ;;  %v19433_v31 = vsel %vm19430_vm14, %v19431_v63, %v19432_v34  ;;  %vm19437_vm7 = vcmp.eq.f32.partialorder %v19435_v13, %v19436_v52  ;;  %3830 = vmax.xlane.f32.xlu0 %v13484_v32  ;;  %v19438_v14 = vld [vmem:[#allocation27_spill] sm:$0xff]  ;;  %v19441_v18 = vld [vmem:[#allocation73_spill] sm:$0xff]  ;;  %v13515_v52 = vsel %vm13445_vm15, -1.0, %v12651_v28  ;;  %v19448_v28 = vld [vmem:[#allocation44_spill] sm:$0xff]  ;;  %vm19454_vm3 = vcmp.eq.f32.partialorder %v12692_v22, %v13098_v12 }
 0xae1   : > { %v13494_v15 = vsel %vm13479_vm11, %v19431_v63, %v19433_v31  ;;  %vm3723_vm2 = vmand %vm19437_vm7, %vm3691_vm4  ;;  %vm19439_vm0 = vnez %v19438_v14  ;;  %vm19449_vm15 = vnez %v19448_v28  ;;  %v19458_v28 = vld [vmem:[#allocation97_spill] sm:$0xff]  ;;  %v19573_v63 = vld [vmem:[#allocation12_spill] sm:$0xff] }
 0xae2   : > { %19434 = vst [vmem:[#allocation15_spill] sm:$0xff] %v13494_v15  ;;  %v19442_v48 = vsel %vm19439_vm0, %v19440_v30, %v19441_v18  ;;  %v13509_v34 = vsel %vm3723_vm2, -1.0, %v19435_v13  ;;  %v13528_v13 = vsel %vm13479_vm11, -1.0, %v12664_v62  ;;  %v19455_v62 = vld [vmem:[#allocation31_spill] sm:$0xff]  ;;  %vm19461_vm11 = vcmp.eq.f32.partialorder %v12732_v59, %v13123_v17  ;;  %v19471_v17 = vld [vmem:[#allocation74_spill] sm:$0xff]  ;;  %v19485_v18 = vld [vmem:[#allocation36_spill] sm:$0xff] }
 0xae3   : > { %v13506_v54 = vsel %vm3723_vm2, %v19440_v30, %v19442_v48  ;;  %19444 = vst [vmem:[#allocation65_spill] sm:$0xff] %v13509_v34  ;;  %3832 = vmax.xlane.f32.xlu1 %v13509_v34  ;;  %v7333_v31 = vpop.f32.mrb[96].mxu0  ;;  %vm19456_vm6 = vnez %v19455_v62  ;;  %v19466_v62 = vld [vmem:[#allocation54_spill] sm:$0xff]  ;;  %v19583_v15 = vld [vmem:[#allocation32_spill] sm:$0xff] }
 0xae4   : > { %19443 = vst [vmem:[#allocation91_spill] sm:$0xff] %v13506_v54  ;;  %vm3696_vm1 = vcmp.eq.f32.partialorder %v7333_v31, 0.0  ;;  %3834 = vmax.xlane.f32.xlu0 %v13515_v52  ;;  %v3615_v14 = vpop.f32.mrb[97].mxu0  ;;  %v19451_v31 = vld [vmem:[#allocation77_spill] sm:$0xff] }
 0xae5   : > { %vm13521_vm9 = vmand %vm19445_vm5, %vm3696_vm1  ;;  %vm3694_vm8 = vcmp.eq.f32.partialorder %v3615_v14, 0.0  ;;  %v7334_v48 = vpop.f32.mrb[98].mxu0  ;;  %v19452_v30 = vsel %vm19449_vm15, %v19450_v46, %v19451_v31  ;;  %v19457_v14 = vld [vmem:[#allocation16_spill] sm:$0xff] }
 0xae6   : > { %v13538_v42 = vsel %vm13521_vm9, %v19450_v46, %v19452_v30  ;;  %vm3726_vm12 = vmand %vm19454_vm3, %vm3694_vm8  ;;  %vm3697_vm13 = vcmp.eq.f32.partialorder %v7334_v48, 0.0  ;;  %v3618_v51 = vpop.f32.mrb[99].mxu0  ;;  %v19459_v54 = vsel %vm19456_vm6, %v19457_v14, %v19458_v28  ;;  %v19464_v48 = vld [vmem:[#allocation28_spill] sm:$0xff]  ;;  %v19467_v46 = vld [vmem:[#allocation75_spill] sm:$0xff]  ;;  %vm19480_vm8 = vcmp.eq.f32.partialorder %v12787_v11, %v13152_v2 }
 0xae7   : > { %19453 = vst [vmem:[#allocation92_spill] sm:$0xff] %v13538_v42  ;;  %3836 = vmax.xlane.f32.xlu1 %v13528_v13  ;;  %v13550_v31 = vsel %vm3726_vm12, %v19457_v14, %v19459_v54  ;;  %vm13555_vm4 = vmand %vm19461_vm11, %vm3697_vm13  ;;  %vm3695_vm14 = vcmp.eq.f32.partialorder %v3618_v51, 0.0  ;;  %v13560_v12 = vsel %vm3726_vm12, -1.0, %v12692_v22  ;;  %vm19465_vm7 = vnez %v19464_v48  ;;  %v19470_v28 = vld [vmem:[#allocation30_spill] sm:$0xff]  ;;  %v19475_v22 = vld [vmem:[#allocation55_spill] sm:$0xff] }
 0xae8   : > { %19460 = vst [vmem:[#allocation88_spill] sm:$0xff] %v13550_v31  ;;  %v19468_v42 = vsel %vm19465_vm7, %v19466_v62, %v19467_v46  ;;  %vm19472_vm2 = vcmp.eq.f32.partialorder %v19470_v28, %v19471_v17  ;;  %3838 = vmax.xlane.f32.xlu0 %v13560_v12  ;;  %v19473_v51 = vld [vmem:[#allocation38_spill] sm:$0xff]  ;;  %v19476_v14 = vld [vmem:[#allocation13_spill] sm:$0xff]  ;;  %v13591_v17 = vsel %vm13521_vm9, -1.0, %v12719_v44  ;;  %v19483_v44 = vld [vmem:[#allocation112_spill] sm:$0xff]  ;;  %vm19489_vm12 = vcmp.eq.f32.partialorder %v12760_v0, %v13137_v41 }
 0xae9   : > { %v13570_v54 = vsel %vm13555_vm4, %v19466_v62, %v19468_v42  ;;  %vm3727_vm0 = vmand %vm19472_vm2, %vm3695_vm14  ;;  %vm19474_vm1 = vnez %v19473_v51  ;;  %vm19484_vm9 = vnez %v19483_v44  ;;  %v19493_v44 = vld [vmem:[#allocation101_spill] sm:$0xff]  ;;  %v19496_v62 = vld [vmem:[#allocation83_spill] sm:$0xff] }
 0xaea   : > { %19469 = vst [vmem:[#allocation33_spill] sm:$0xff] %v13570_v54  ;;  %v19477_v31 = vsel %vm19474_vm1, %v19475_v22, %v19476_v14  ;;  %v13585_v46 = vsel %vm3727_vm0, -1.0, %v19470_v28  ;;  %v13604_v28 = vsel %vm13555_vm4, -1.0, %v12732_v59  ;;  %v19490_v59 = vld [vmem:[#allocation58_spill] sm:$0xff]  ;;  %v19523_v14 = vld [vmem:[#allocation17_spill] sm:$0xff] }
 0xaeb   : > { %v13582_v48 = vsel %vm3727_vm0, %v19475_v22, %v19477_v31  ;;  %19479 = vst [vmem:[#allocation111_spill] sm:$0xff] %v13585_v46  ;;  %3840 = vmax.xlane.f32.xlu1 %v13585_v46  ;;  %v7337_v42 = vpop.f32.mrb[100].mxu0  ;;  %vm19491_vm11 = vnez %v19490_v59  ;;  %v19497_v54 = vld [vmem:[#allocation90_spill] sm:$0xff]  ;;  %v19503_v59 = vld [vmem:[#allocation57_spill] sm:$0xff] }
 0xaec   : > { %19478 = vst [vmem:[#allocation86_spill] sm:$0xff] %v13582_v48  ;;  %vm3700_vm5 = vcmp.eq.f32.partialorder %v7337_v42, 0.0  ;;  %3842 = vmax.xlane.f32.xlu0 %v13591_v17  ;;  %v3631_v51 = vpop.f32.mrb[101].mxu0  ;;  %v19486_v42 = vld [vmem:[#allocation10_spill] sm:$0xff]  ;;  %vm19498_vm4 = vcmp.eq.f32.partialorder %v19496_v62, %v19497_v54 }
 0xaed   : > { %vm13597_vm15 = vmand %vm19480_vm8, %vm3700_vm5  ;;  %vm3698_vm3 = vcmp.eq.f32.partialorder %v3631_v51, 0.0  ;;  %v7338_v31 = vpop.f32.mrb[102].mxu0  ;;  %v19487_v22 = vsel %vm19484_vm9, %v19485_v18, %v19486_v42  ;;  %v19492_v51 = vld [vmem:[#allocation22_spill] sm:$0xff] }
 0xaee   : > { %v13614_v2 = vsel %vm13597_vm15, %v19485_v18, %v19487_v22  ;;  %vm3730_vm13 = vmand %vm19489_vm12, %vm3698_vm3  ;;  %vm3701_vm6 = vcmp.eq.f32.partialorder %v7338_v31, 0.0  ;;  %v3634_v30 = vpop.f32.mrb[103].mxu0  ;;  %v19494_v48 = vsel %vm19491_vm11, %v19492_v51, %v19493_v44  ;;  %v19501_v31 = vld [vmem:[#allocation37_spill] sm:$0xff]  ;;  %v19504_v18 = vld [vmem:[#allocation80_spill] sm:$0xff]  ;;  %vm19517_vm3 = vcmp.eq.f32.partialorder %v12855_v4, %v13182_v47 }
 0xaef   : > { %19488 = vst [vmem:[#allocation70_spill] sm:$0xff] %v13614_v2  ;;  %3844 = vmax.xlane.f32.xlu1 %v13604_v28  ;;  %v13626_v42 = vsel %vm3730_vm13, %v19492_v51, %v19494_v48  ;;  %vm13631_vm14 = vmand %vm19498_vm4, %vm3701_vm6  ;;  %vm3699_vm7 = vcmp.eq.f32.partialorder %v3634_v30, 0.0  ;;  %v13636_v41 = vsel %vm3730_vm13, -1.0, %v12760_v0  ;;  %vm19502_vm2 = vnez %v19501_v31  ;;  %v19507_v44 = vld [vmem:[#allocation42_spill] sm:$0xff]  ;;  %v19512_v0 = vld [vmem:[#allocation20_spill] sm:$0xff] }
 0xaf0   : > { %19495 = vst [vmem:[#allocation53_spill] sm:$0xff] %v13626_v42  ;;  %v19505_v2 = vsel %vm19502_vm2, %v19503_v59, %v19504_v18  ;;  %v19508_v54 = vld [vmem:[#allocation50_spill] sm:$0xff]  ;;  %3846 = vmax.xlane.f32.xlu0 %v13636_v41  ;;  %vm19527_vm13 = vcmp.eq.f32.partialorder %v12828_v1, %v13167_v23 }
 0xaf1   : > { %v13646_v48 = vsel %vm13631_vm14, %v19503_v59, %v19505_v2  ;;  %vm19509_vm0 = vcmp.eq.f32.partialorder %v19507_v44, %v19508_v54  ;;  %v19510_v30 = vld [vmem:[#allocation114_spill] sm:$0xff]  ;;  %v13667_v54 = vsel %vm13597_vm15, -1.0, %v12787_v11  ;;  %v19521_v11 = vld [vmem:[#allocation43_spill] sm:$0xff]  ;;  %v19534_v59 = vld [vmem:[#allocation96_spill] sm:$0xff] }
 0xaf2   : > { %19506 = vst [vmem:[#allocation78_spill] sm:$0xff] %v13646_v48  ;;  %vm3731_vm1 = vmand %vm19509_vm0, %vm3699_vm7  ;;  %vm19511_vm5 = vnez %v19510_v30  ;;  %v19513_v51 = vld [vmem:[#allocation14_spill] sm:$0xff]  ;;  %vm19522_vm15 = vnez %v19521_v11  ;;  %v19531_v11 = vld [vmem:[#allocation84_spill] sm:$0xff] }
 0xaf3   : > { %v19514_v42 = vsel %vm19511_vm5, %v19512_v0, %v19513_v51  ;;  %v13661_v18 = vsel %vm3731_vm1, -1.0, %v19507_v44  ;;  %v7341_v2 = vpop.f32.mrb[104].mxu0  ;;  %v13680_v44 = vsel %vm13631_vm14, -1.0, %v19496_v62  ;;  %v19528_v62 = vld [vmem:[#allocation113_spill] sm:$0xff]  ;;  %v19560_v51 = vld [vmem:[#allocation60_spill] sm:$0xff] }
 0xaf4   : > { %v13658_v31 = vsel %vm3731_vm1, %v19512_v0, %v19514_v42  ;;  %19516 = vst [vmem:[#allocation104_spill] sm:$0xff] %v13661_v18  ;;  %3848 = vmax.xlane.f32.xlu1 %v13661_v18  ;;  %vm3704_vm8 = vcmp.eq.f32.partialorder %v7341_v2, 0.0  ;;  %3850 = vmax.xlane.f32.xlu0 %v13667_v54  ;;  %v3647_v30 = vpop.f32.mrb[105].mxu0  ;;  %19520 = vst [vmem:[#allocation79_spill] sm:$0xff] %v13680_v44  ;;  %v19524_v2 = vld [vmem:[#allocation71_spill] sm:$0xff]  ;;  %vm19529_vm4 = vnez %v19528_v62  ;;  %v19535_v48 = vld [vmem:[#allocation25_spill] sm:$0xff] }
 0xaf5   : > { %19515 = vst [vmem:[#allocation47_spill] sm:$0xff] %v13658_v31  ;;  %vm13673_vm9 = vmand %vm19517_vm3, %vm3704_vm8  ;;  %vm3702_vm12 = vcmp.eq.f32.partialorder %v3647_v30, 0.0  ;;  %v7342_v42 = vpop.f32.mrb[106].mxu0  ;;  %v19525_v0 = vsel %vm19522_vm15, %v19523_v14, %v19524_v2  ;;  %v19530_v30 = vld [vmem:[#allocation29_spill] sm:$0xff]  ;;  %vm19536_vm14 = vcmp.eq.f32.partialorder %v19534_v59, %v19535_v48  ;;  %v19541_v62 = vld [vmem:[#allocation59_spill] sm:$0xff] }
 0xaf6   : > { %v13690_v47 = vsel %vm13673_vm9, %v19523_v14, %v19525_v0  ;;  %vm3734_vm6 = vmand %vm19527_vm13, %vm3702_vm12  ;;  %vm3705_vm11 = vcmp.eq.f32.partialorder %v7342_v42, 0.0  ;;  %v3650_v22 = vpop.f32.mrb[107].mxu0  ;;  %v19532_v31 = vsel %vm19529_vm4, %v19530_v30, %v19531_v11  ;;  %v19539_v42 = vld [vmem:[#allocation26_spill] sm:$0xff]  ;;  %v19546_v48 = vld [vmem:[#allocation8_spill] sm:$0xff]  ;;  %vm19555_vm12 = vcmp.eq.f32.partialorder %v12923_v61, %v13212_v27 }
 0xaf7   : > { %19526 = vst [vmem:[#allocation99_spill] sm:$0xff] %v13690_v47  ;;  %v13702_v2 = vsel %vm3734_vm6, %v19530_v30, %v19532_v31  ;;  %vm13707_vm7 = vmand %vm19536_vm14, %vm3705_vm11  ;;  %vm3703_vm2 = vcmp.eq.f32.partialorder %v3650_v22, 0.0  ;;  %v13712_v23 = vsel %vm3734_vm6, -1.0, %v12828_v1  ;;  %vm19540_vm0 = vnez %v19539_v42  ;;  %v19542_v14 = vld [vmem:[#allocation102_spill] sm:$0xff]  ;;  %v19548_v22 = vld [vmem:[#allocation81_spill] sm:$0xff] }
 0xaf8   : > { %3852 = vmax.xlane.f32.xlu1 %v13680_v44  ;;  %19533 = vst [vmem:[#allocation110_spill] sm:$0xff] %v13702_v2  ;;  %v19543_v47 = vsel %vm19540_vm0, %v19541_v62, %v19542_v14  ;;  %v19545_v11 = vld [vmem:[#allocation94_spill] sm:$0xff]  ;;  %3854 = vmax.xlane.f32.xlu0 %v13712_v23  ;;  %vm19549_vm8 = vnez %v19548_v22  ;;  %v19550_v1 = vld [vmem:[#allocation40_spill] sm:$0xff]  ;;  %v19551_v30 = vld [vmem:[#allocation39_spill] sm:$0xff] }
 0xaf9   : > { %v13722_v31 = vsel %vm13707_vm7, %v19541_v62, %v19543_v47  ;;  %vm19547_vm1 = vcmp.eq.f32.partialorder %v19545_v11, %v19546_v48  ;;  %v19552_v2 = vsel %vm19549_vm8, %v19550_v1, %v19551_v30  ;;  %v13743_v48 = vsel %vm13673_vm9, -1.0, %v12855_v4  ;;  %v19565_v62 = vld [vmem:[#allocation21_spill] sm:$0xff]  ;;  %v19570_v4 = vld [vmem:[#allocation23_spill] sm:$0xff] }
 0xafa   : > { %19544 = vst [vmem:[#allocation5_spill] sm:$0xff] %v13722_v31  ;;  %vm3735_vm5 = vmand %vm19547_vm1, %vm3703_vm2 }
 0xafb   : > { %v13734_v42 = vsel %vm3735_vm5, %v19550_v1, %v19552_v2  ;;  %v13737_v14 = vsel %vm3735_vm5, -1.0, %v19545_v11  ;;  %v13756_v11 = vsel %vm13707_vm7, -1.0, %v19534_v59  ;;  %v19567_v59 = vld [vmem:[#allocation98_spill] sm:$0xff] }
 0xafc   : > { %19553 = vst [vmem:[#allocation27_spill] sm:$0xff] %v13734_v42  ;;  %19554 = vst [vmem:[#allocation73_spill] sm:$0xff] %v13737_v14  ;;  %3856 = vmax.xlane.f32.xlu1 %v13737_v14  ;;  %3858 = vmax.xlane.f32.xlu0 %v13743_v48  ;;  %v19564_v42 = vld [vmem:[#allocation103_spill] sm:$0xff]  ;;  %vm19568_vm4 = vnez %v19567_v59 }
 0xafd   : > { %19558 = vst [vmem:[#allocation44_spill] sm:$0xff] %v13756_v11  ;;  %vm19566_vm9 = vcmp.eq.f32.partialorder %v19564_v42, %v19565_v62 }
 0xafe   : > { %v7345_v47 = vpop.f32.mrb[108].mxu0 }
 0xaff   : > { %vm3708_vm3 = vcmp.eq.f32.partialorder %v7345_v47, 0.0  ;;  %v3663_v22 = vpop.f32.mrb[109].mxu0  ;;  %v19561_v47 = vld [vmem:[#allocation18_spill] sm:$0xff] }
 0xb00   : > { %vm13749_vm15 = vmand %vm19555_vm12, %vm3708_vm3  ;;  %vm3706_vm13 = vcmp.eq.f32.partialorder %v3663_v22, 0.0  ;;  %v7346_v2 = vpop.f32.mrb[110].mxu0  ;;  %v19562_v1 = vsel %vm12861_vm10, %v19560_v51, %v19561_v47  ;;  %3860 = vmax.xlane.f32.xlu1 %v13756_v11  ;;  %v19569_v22 = vld [vmem:[#allocation61_spill] sm:$0xff]  ;;  %vm19574_vm10 = vcmp.eq.f32.partialorder %v12929_v36, %v19573_v63 }
 0xb01   : > { %v13766_v27 = vsel %vm13749_vm15, %v19560_v51, %v19562_v1  ;;  %vm3738_vm6 = vmand %vm19566_vm9, %vm3706_vm13  ;;  %vm3709_vm11 = vcmp.eq.f32.partialorder %v7346_v2, 0.0  ;;  %v3666_v0 = vpop.f32.mrb[111].mxu0  ;;  %v19571_v31 = vsel %vm19568_vm4, %v19569_v22, %v19570_v4  ;;  %v19576_v1 = vld [vmem:[#allocation100_spill] sm:$0xff]  ;;  %v19578_v2 = vld [vmem:[#allocation41_spill] sm:$0xff] }
 0xb02   : > { %19563 = vst [vmem:[#allocation77_spill] sm:$0xff] %v13766_v27  ;;  %v13778_v47 = vsel %vm3738_vm6, %v19569_v22, %v19571_v31  ;;  %vm3741_vm14 = vmand %vm19574_vm10, %vm3709_vm11  ;;  %vm3707_vm7 = vcmp.eq.f32.partialorder %v3666_v0, 0.0  ;;  %v13784_v62 = vsel %vm3738_vm6, -1.0, %v19564_v42  ;;  %vm19577_vm2 = vnez %v19576_v1  ;;  %v19579_v51 = vld [vmem:[#allocation87_spill] sm:$0xff]  ;;  %v19585_v63 = vld [vmem:[#allocation105_spill] sm:$0xff] }
 0xb03   : > { %19572 = vst [vmem:[#allocation31_spill] sm:$0xff] %v13778_v47  ;;  %19575 = vst [vmem:[#allocation97_spill] sm:$0xff] %v13784_v62  ;;  %v19580_v27 = vsel %vm19577_vm2, %v19578_v2, %v19579_v51  ;;  %v19582_v4 = vld [vmem:[#allocation107_spill] sm:$0xff]  ;;  %3862 = vmax.xlane.f32.xlu0 %v13784_v62  ;;  %vm19586_vm5 = vnez %v19585_v63  ;;  %v19588_v0 = vld [vmem:[#allocation72_spill] sm:$0xff]  ;;  %v13817_v51 = vsel %vm3741_vm14, -1.0, %v12929_v36 }
 0xb04   : > { %v13792_v59 = vsel %vm3741_vm14, %v19578_v2, %v19580_v27  ;;  %vm19584_vm0 = vcmp.eq.f32.partialorder %v19582_v4, %v19583_v15  ;;  %v19587_v31 = vld [vmem:[#allocation63_spill] sm:$0xff]  ;;  %v13813_v15 = vsel %vm13749_vm15, -1.0, %v12923_v61  ;;  %v19592_v61 = vmov 1.0|1.0   ;;  %v19595_v2 = vld [vmem:[#allocation106_spill] sm:$0xff]  ;;  %v19597_v47 = vld [vmem:[#allocation69_spill] sm:$0xff] }
 0xb05   : > { %19581 = vst [vmem:[#allocation28_spill] sm:$0xff] %v13792_v59  ;;  %vm3739_vm1 = vmand %vm19584_vm0, %vm3707_vm7  ;;  %v19589_v42 = vsel %vm19586_vm5, %v19587_v31, %v19588_v0 }
 0xb06   : > { %v13804_v22 = vsel %vm3739_vm1, %v19587_v31, %v19589_v42  ;;  %v13807_v1 = vsel %vm3739_vm1, -1.0, %v19582_v4  ;;  %v19593_v42 = vld [vmem:[#allocation19_spill] sm:$0xff]  ;;  %v19594_v31 = vld [vmem:[#allocation68_spill] sm:$0xff] }
 0xb07   : > { %19590 = vst [vmem:[#allocation75_spill] sm:$0xff] %v13804_v22  ;;  %19591 = vst [vmem:[#allocation30_spill] sm:$0xff] %v13807_v1  ;;  %3864 = vmax.xlane.f32.xlu1 %v13807_v1  ;;  %3866 = vmax.xlane.f32.xlu0 %v13813_v15 }
 0xb0b   : > { %3868 = vmax.xlane.f32.xlu1 %v13817_v51 }
 0xb51   : > { %v13820_v27 = vpop.xlane.xlu0 %3806 }
 0xb52   : > { %vm3870_vm8 = vcmp.eq.f32.partialorder %v13264_v55, %v13820_v27 }
 0xb53   : > { %v13822_v63 = vpop.xlane.xlu1 %3808 }
 0xb54   : > { %vm3871_vm3 = vcmp.eq.f32.partialorder %v13289_v60, %v13822_v63 }
 0xb55   : > { %vm6472_vm12 = vmpackc.low %vm3871_vm3, %vm3870_vm8  ;;  %v13834_v36 = vpop.xlane.xlu0 %3810 }
 0xb56   : > { %7363 = vmatprep.mubr.msk.bf16.mxu1 %vm6472_vm12, %v19592_v61  ;;  %vm3872_vm15 = vcmp.eq.f32.partialorder %v13295_v29, %v13834_v36 }
 0xb57   : > { %v13837_v30 = vpop.xlane.xlu1 %3812 }
 0xb58   : > { %vm3873_vm13 = vcmp.eq.f32.partialorder %v13308_v57, %v13837_v30 }
 0xb59   : > { %vm6474_vm9 = vmpackc.low %vm3873_vm13, %vm3872_vm15  ;;  %v13849_v4 = vpop.xlane.xlu0 %3814 }
 0xb5a   : > { %7364 = vmatmul.mubr.msk.bf16.vlgmr.msra.gmra.mrb[112].mxu1 %vm6474_vm9, %v19592_v61  ;;  %vm3874_vm6 = vcmp.eq.f32.partialorder %v13336_v35, %v13849_v4 }
 0xb5b   : > { %v13852_v0 = vpop.xlane.xlu1 %3816  ;;  %7444 = vmatpush3.bf16.msra.mxu1 %v19593_v42 }
 0xb5c   : > { %vm3875_vm11 = vcmp.eq.f32.partialorder %v13359_v38, %v13852_v0  ;;  %7445 = vmatprep.subr.bf16.mxu1 %v19594_v31 }
 0xb5d   : > { %vm6476_vm4 = vmpackc.low %vm3875_vm11, %vm3874_vm6  ;;  %v13866_v22 = vpop.xlane.xlu0 %3818 }
 0xb5e   : > { %7367 = vmatprep.mubr.msk.bf16.mxu1 %vm6476_vm4, %v19592_v61  ;;  %vm3876_vm10 = vcmp.eq.f32.partialorder %v13365_v8, %v13866_v22 }
 0xb5f   : > { %v13869_v42 = vpop.xlane.xlu1 %3820  ;;  %7446 = vmatpush3.bf16.msra.mxu1 %v19594_v31 }
 0xb60   : > { %vm3877_vm14 = vcmp.eq.f32.partialorder %v13369_v5, %v13869_v42  ;;  %7447 = vmatprep.subr.bf16.mxu1 %v19595_v2  ;;  %v19628_v42 = vmov 0 }
 0xb61   : > { %vm6478_vm7 = vmpackc.low %vm3877_vm14, %vm3876_vm10 }
 0xb62   : > { %7368 = vmatmul.mubr.msk.bf16.gmra.mrb[116].mxu1 %vm6478_vm7, %v19592_v61 }
 0xb63   : > { %v13883_v59 = vpop.xlane.xlu0 %3822  ;;  %7448 = vmatpush3.bf16.msra.mxu1 %v19595_v2 }
 0xb64   : > { %7449 = vmatprep.subr.bf16.mxu1 %v19597_v47  ;;  %vm3878_vm2 = vcmp.eq.f32.partialorder %v13408_v25, %v13883_v59 }
 0xb66   : > { %v13887_v31 = vpop.xlane.xlu1 %3824 }
 0xb67   : > { %19596 = vst [vmem:[#allocation74_spill] sm:$0xff] %v13887_v31  ;;  %vm17753_vm0 = vcmp.eq.f32.partialorder %v13433_v33, %v13887_v31  ;;  %v13900_v19 = vpop.xlane.xlu0 %3826  ;;  %7450 = vmatpush3.bf16.msra.mxu1 %v19597_v47  ;;  %v19601_v33 = vld [vmem:[#allocation24_spill] sm:$0xff] }
 0xb68   : > { %vm6480_vm1 = vmpackc.low %vm17753_vm0, %vm3878_vm2  ;;  %7451 = vmatprep.subr.bf16.mxu1 %v19599_v16  ;;  %vm3880_vm5 = vcmp.eq.f32.partialorder %v13439_v58, %v13900_v19 }
 0xb69   : > { %7371 = vmatprep.mubr.msk.bf16.mxu1 %vm6480_vm1, %v19592_v61 }
 0xb6a   : > { %v13904_v2 = vpop.xlane.xlu1 %3828 }
 0xb6b   : > { %19598 = vst [vmem:[#allocation38_spill] sm:$0xff] %v13904_v2  ;;  %vm17769_vm12 = vcmp.eq.f32.partialorder %v13452_v49, %v13904_v2  ;;  %7452 = vmatpush3.bf16.msra.mxu1 %v19599_v16  ;;  %v19603_v49 = vld [vmem:[#allocation89_spill] sm:$0xff] }
 0xb6c   : > { %vm6482_vm9 = vmpackc.low %vm17769_vm12, %vm3880_vm5  ;;  %7453 = vmatprep.subr.bf16.mxu1 %v19601_v33 }
 0xb6d   : > { %v13917_v31 = vpop.xlane.xlu0 %3830  ;;  %7372 = vmatmul.mubr.msk.bf16.gmra.mrb[120].mxu1 %vm6482_vm9, %v19592_v61 }
 0xb6e   : > { %vm17758_vm4 = vcmp.eq.f32.partialorder %v13484_v32, %v13917_v31 }
 0xb6f   : > { %7454 = vmatpush3.bf16.msra.mxu1 %v19601_v33 }
 0xb70   : > { %v13920_v47 = vpop.xlane.xlu1 %3832  ;;  %7455 = vmatprep.subr.bf16.mxu1 %v19603_v49 }
 0xb71   : > { %19600 = vst [vmem:[#allocation13_spill] sm:$0xff] %v13920_v47  ;;  %vm17756_vm7 = vcmp.eq.f32.partialorder %v13509_v34, %v13920_v47  ;;  %v13934_v2 = vpop.xlane.xlu0 %3834  ;;  %v19605_v34 = vld [vmem:[#allocation109_spill] sm:$0xff] }
 0xb72   : > { %vm6484_vm1 = vmpackc.low %vm17756_vm7, %vm17758_vm4  ;;  %vm17763_vm9 = vcmp.eq.f32.partialorder %v13515_v52, %v13934_v2  ;;  %v19642_v53 = vld [vmem:[#allocation38_spill] sm:$0xff] }
 0xb73   : > { %7375 = vmatprep.mubr.msk.bf16.mxu1 %vm6484_vm1, %v19592_v61  ;;  %7456 = vmatpush3.bf16.msra.mxu1 %v19603_v49 }
 0xb74   : > { %v13937_v16 = vpop.xlane.xlu1 %3836  ;;  %7457 = vmatprep.subr.bf16.mxu1 %v19605_v34 }
 0xb75   : > { %19602 = vst [vmem:[#allocation112_spill] sm:$0xff] %v13937_v16  ;;  %vm17761_vm0 = vcmp.eq.f32.partialorder %v13528_v13, %v13937_v16  ;;  %v13951_v47 = vpop.xlane.xlu0 %3838 }
 0xb76   : > { %vm6486_vm7 = vmpackc.low %vm17761_vm0, %vm17763_vm9  ;;  %vm17768_vm1 = vcmp.eq.f32.partialorder %v13560_v12, %v13951_v47 }
 0xb77   : > { %7376 = vmatmul.mubr.msk.bf16.gmra.mrb[124].mxu1 %vm6486_vm7, %v19592_v61 }
 0xb78   : > { %v13954_v33 = vpop.xlane.xlu1 %3840  ;;  %7458 = vmatpush3.bf16.msra.mxu1 %v19605_v34 }
 0xb79   : > { %19604 = vst [vmem:[#allocation10_spill] sm:$0xff] %v13954_v33  ;;  %vm17764_vm4 = vcmp.eq.f32.partialorder %v13585_v46, %v13954_v33  ;;  %v13968_v16 = vpop.xlane.xlu0 %3842 }
 0xb7a   : > { %vm6488_vm0 = vmpackc.low %vm17764_vm4, %vm17768_vm1  ;;  %vm17772_vm7 = vcmp.eq.f32.partialorder %v13591_v17, %v13968_v16 }
 0xb7b   : > { %7379 = vmatprep.mubr.msk.bf16.mxu1 %vm6488_vm0, %v19592_v61 }
 0xb7c   : > { %v13971_v49 = vpop.xlane.xlu1 %3844 }
 0xb7d   : > { %19606 = vst [vmem:[#allocation58_spill] sm:$0xff] %v13971_v49  ;;  %vm17771_vm9 = vcmp.eq.f32.partialorder %v13604_v28, %v13971_v49  ;;  %v13984_v33 = vpop.xlane.xlu0 %3846 }
 0xb7e   : > { %vm6490_vm4 = vmpackc.low %vm17771_vm9, %vm17772_vm7  ;;  %vm17777_vm0 = vcmp.eq.f32.partialorder %v13636_v41, %v13984_v33 }
 0xb7f   : > { %7380 = vmatmul.mubr.msk.bf16.gmra.mrb[128].mxu1 %vm6490_vm4, %v19592_v61 }
 0xb81   : > { %v13987_v46 = vpop.xlane.xlu1 %3848  ;;  %v13999_v34 = vpop.xlane.xlu0 %3850 }
 0xb82   : > { %19607 = vst [vmem:[#allocation101_spill] sm:$0xff] %v13987_v46  ;;  %vm17776_vm1 = vcmp.eq.f32.partialorder %v13661_v18, %v13987_v46  ;;  %vm17782_vm4 = vcmp.eq.f32.partialorder %v13667_v54, %v13999_v34 }
 0xb83   : > { %vm6492_vm12 = vmpackc.low %vm17776_vm1, %vm17777_vm0 }
 0xb84   : > { %7383 = vmatprep.mubr.msk.bf16.mxu1 %vm6492_vm12, %v19592_v61 }
 0xb85   : > { %v14002_v49 = vpop.xlane.xlu1 %3852  ;;  %v14014_v46 = vpop.xlane.xlu0 %3854 }
 0xb86   : > { %19608 = vst [vmem:[#allocation83_spill] sm:$0xff] %v14002_v49  ;;  %vm17781_vm9 = vcmp.eq.f32.partialorder %v13680_v44, %v14002_v49  ;;  %vm17787_vm12 = vcmp.eq.f32.partialorder %v13712_v23, %v14014_v46 }
 0xb87   : > { %vm6494_vm7 = vmpackc.low %vm17781_vm9, %vm17782_vm4 }
 0xb88   : > { %7384 = vmatmul.mubr.msk.bf16.gmra.mrb[132].mxu1 %vm6494_vm7, %v19592_v61 }
 0xb89   : > { %v14017_v18 = vpop.xlane.xlu1 %3856  ;;  %v14029_v49 = vpop.xlane.xlu0 %3858 }
 0xb8a   : > { %19609 = vst [vmem:[#allocation90_spill] sm:$0xff] %v14017_v18  ;;  %vm17786_vm1 = vcmp.eq.f32.partialorder %v13737_v14, %v14017_v18  ;;  %vm17792_vm7 = vcmp.eq.f32.partialorder %v13743_v48, %v14029_v49 }
 0xb8b   : > { %vm6496_vm0 = vmpackc.low %vm17786_vm1, %vm17787_vm12 }
 0xb8c   : > { %7387 = vmatprep.mubr.msk.bf16.mxu1 %vm6496_vm0, %v19592_v61 }
 0xb8d   : > { %v14032_v44 = vpop.xlane.xlu1 %3860 }
 0xb8e   : > { %19610 = vst [vmem:[#allocation37_spill] sm:$0xff] %v14032_v44  ;;  %vm17791_vm9 = vcmp.eq.f32.partialorder %v13756_v11, %v14032_v44 }
 0xb8f   : > { %vm6498_vm4 = vmpackc.low %vm17791_vm9, %vm17792_vm7 }
 0xb90   : > { %v14044_v18 = vpop.xlane.xlu0 %3862  ;;  %7388 = vmatmul.mubr.msk.bf16.gmra.mrb[136].mxu1 %vm6498_vm4, %v19592_v61 }
 0xb91   : > { %19611 = vst [vmem:[#allocation80_spill] sm:$0xff] %v14044_v18  ;;  %vm17798_vm0 = vcmp.eq.f32.partialorder %v13784_v62, %v14044_v18 }
 0xb94   : > { %v14047_v14 = vpop.xlane.xlu1 %3864  ;;  %v14059_v44 = vpop.xlane.xlu0 %3866 }
 0xb95   : > { %19612 = vst [vmem:[#allocation42_spill] sm:$0xff] %v14047_v14  ;;  %vm17794_vm1 = vcmp.eq.f32.partialorder %v13807_v1, %v14047_v14  ;;  %vm17809_vm4 = vcmp.eq.f32.partialorder %v13813_v15, %v14059_v44 }
 0xb96   : > { %vm6500_vm12 = vmpackc.low %vm17794_vm1, %vm17798_vm0 }
 0xb97   : > { %7391 = vmatprep.mubr.msk.bf16.mxu1 %vm6500_vm12, %v19592_v61 }
 0xb98   : > { %v14062_v11 = vpop.xlane.xlu1 %3868 }
 0xb99   : > { %19613 = vst [vmem:[#allocation50_spill] sm:$0xff] %v14062_v11  ;;  %vm17802_vm9 = vcmp.eq.f32.partialorder %v13817_v51, %v14062_v11 }
 0xb9a   : > { %vm6502_vm7 = vmpackc.low %vm17802_vm9, %vm17809_vm4 }
 0xb9b   : > { %7392 = vmatmul.mubr.msk.bf16.gmra.mrb[140].mxu1 %vm6502_vm7, %v19592_v61 }
 0xc2d   : > { %v7365_v14 = vpop.f32.mrb[112].mxu1 }
 0xc2e   : > { %vm4145_vm1 = vcmp.eq.f32.partialorder %v7365_v14, 0.0  ;;  %v4016_v1 = vpop.f32.mrb[113].mxu1 }
 0xc2f   : > { %vm14078_vm12 = vmand %vm3872_vm15, %vm4145_vm1  ;;  %vm4143_vm0 = vcmp.eq.f32.partialorder %v4016_v1, 0.0  ;;  %v7366_v62 = vpop.f32.mrb[114].mxu1 }
 0xc30   : > { %vm14089_vm7 = vmand %vm3870_vm8, %vm4143_vm0  ;;  %vm4146_vm9 = vcmp.eq.f32.partialorder %v7366_v62, 0.0  ;;  %v4019_v36 = vpop.f32.mrb[115].mxu1  ;;  %v14134_v63 = vsel %vm14078_vm12, -1.0, %v13295_v29  ;;  %v19649_v29 = vld [vmem:[#allocation62_spill] sm:$0xff] }
 0xc31   : > { %vm14100_vm15 = vmand %vm3873_vm13, %vm4146_vm9  ;;  %vm4144_vm1 = vcmp.eq.f32.partialorder %v4019_v36, 0.0  ;;  %v14107_v27 = vsel %vm14089_vm7, -1.0, %v13264_v55 }
 0xc32   : > { %vm14116_vm8 = vmand %vm3871_vm3, %vm4144_vm1  ;;  %4271 = vmax.xlane.f32.xlu0 %v14107_v27  ;;  %v14147_v11 = vsel %vm14100_vm15, -1.0, %v13308_v57  ;;  %v19830_v14 = vsel %vm14100_vm15, %v9009_v45, %v13274_v10 }
 0xc33   : > { %v14128_v36 = vsel %vm14116_vm8, -1.0, %v13289_v60 }
 0xc34   : > { %4273 = vmax.xlane.f32.xlu1 %v14128_v36 }
 0xc35   : > { %v7369_v62 = vpop.f32.mrb[116].mxu1 }
 0xc36   : > { %vm4149_vm3 = vcmp.eq.f32.partialorder %v7369_v62, 0.0  ;;  %4275 = vmax.xlane.f32.xlu0 %v14134_v63  ;;  %v4032_v1 = vpop.f32.mrb[117].mxu1 }
 0xc37   : > { %vm14140_vm13 = vmand %vm3876_vm10, %vm4149_vm3  ;;  %vm4147_vm9 = vcmp.eq.f32.partialorder %v4032_v1, 0.0  ;;  %v7370_v60 = vpop.f32.mrb[118].mxu1 }
 0xc38   : > { %vm14156_vm0 = vmand %vm3874_vm6, %vm4147_vm9  ;;  %vm4150_vm10 = vcmp.eq.f32.partialorder %v7370_v60, 0.0  ;;  %4277 = vmax.xlane.f32.xlu1 %v14147_v11  ;;  %v4035_v1 = vpop.f32.mrb[119].mxu1  ;;  %v14202_v0 = vsel %vm14140_vm13, -1.0, %v13365_v8 }
 0xc39   : > { %vm14168_vm1 = vmand %vm3877_vm14, %vm4150_vm10  ;;  %vm4148_vm6 = vcmp.eq.f32.partialorder %v4035_v1, 0.0  ;;  %v14175_v4 = vsel %vm14156_vm0, -1.0, %v13336_v35 }
 0xc3a   : > { %vm14184_vm3 = vmand %vm3875_vm11, %vm4148_vm6  ;;  %4279 = vmax.xlane.f32.xlu0 %v14175_v4  ;;  %v14208_v35 = vsel %vm14168_vm1, -1.0, %v13369_v5  ;;  %v19636_v5 = vmov 0 }
 0xc3b   : > { %v19629_v42 = vsel %vm14184_vm3, 4294967295, %v19628_v42  ;;  %v14196_v1 = vsel %vm14184_vm3, -1.0, %v13359_v38  ;;  %v19632_v38 = vmov 0 }
 0xc3c   : > { %19630 = vst [vmem:[#allocation114_spill] sm:$0xff] %v19629_v42  ;;  %19631 = vst [vmem:[#allocation14_spill] sm:$0xff] %v14196_v1  ;;  %4281 = vmax.xlane.f32.xlu1 %v14196_v1  ;;  %v19641_v42 = vld [vmem:[#allocation66_spill] sm:$0xff] }
 0xc3d   : > { %vm19643_vm6 = vcmp.eq.f32.partialorder %v19641_v42, %v19642_v53  ;;  %v19652_v53 = vmov 0 }
 0xc3e   : > { %4283 = vmax.xlane.f32.xlu0 %v14202_v0 }
 0xc40   : > { %v7373_v60 = vpop.f32.mrb[120].mxu1  ;;  %4285 = vmax.xlane.f32.xlu1 %v14208_v35 }
 0xc41   : > { %vm4153_vm11 = vcmp.eq.f32.partialorder %v7373_v60, 0.0  ;;  %v4048_v57 = vpop.f32.mrb[121].mxu1 }
 0xc42   : > { %vm14213_vm14 = vmand %vm3880_vm5, %vm4153_vm11  ;;  %vm4151_vm9 = vcmp.eq.f32.partialorder %v4048_v57, 0.0  ;;  %v7374_v8 = vpop.f32.mrb[122].mxu1  ;;  %v19650_v57 = vld [vmem:[#allocation74_spill] sm:$0xff] }
 0xc43   : > { %v19633_v38 = vsel %vm14213_vm14, 4294967295, %v19632_v38  ;;  %vm14225_vm10 = vmand %vm3878_vm2, %vm4151_vm9  ;;  %vm4154_vm5 = vcmp.eq.f32.partialorder %v7374_v8, 0.0  ;;  %v4051_v19 = vpop.f32.mrb[123].mxu1  ;;  %vm19651_vm2 = vcmp.eq.f32.partialorder %v19649_v29, %v19650_v57  ;;  %v14270_v57 = vsel %vm14213_vm14, -1.0, %v13439_v58 }
 0xc44   : > { %19634 = vst [vmem:[#allocation43_spill] sm:$0xff] %v19633_v38  ;;  %v19637_v5 = vsel %vm14225_vm10, 4294967295, %v19636_v5  ;;  %vm14236_vm11 = vmand %vm19643_vm6, %vm4154_vm5  ;;  %vm4152_vm4 = vcmp.eq.f32.partialorder %v4051_v19, 0.0  ;;  %v14243_v59 = vsel %vm14225_vm10, -1.0, %v13408_v25  ;;  %vm19658_vm5 = vcmp.eq.f32.partialorder %v13515_v52, %v13934_v2  ;;  %v7904_v38 = vld [vmem:[%s16971_s3 + $0x18] sm:$0xff]  }
 0xc45   : > { %19638 = vst [vmem:[#allocation71_spill] sm:$0xff] %v19637_v5  ;;  %v19645_v43 = vsel %vm14236_vm11, 4294967295, %v19644_v43  ;;  %vm14252_vm9 = vmand %vm19651_vm2, %vm4152_vm4  ;;  %4287 = vmax.xlane.f32.xlu0 %v14243_v59  ;;  %v19659_v25 = vmov 0  ;;  %v14283_v19 = vsel %vm14236_vm11, -1.0, %v19641_v42  ;;  %v19665_v2 = vmov 0  ;;  %v19677_v5 = vld [vmem:[#allocation65_spill] sm:$0xff] }
 0xc46   : > { %19646 = vst [vmem:[#allocation113_spill] sm:$0xff] %v19645_v43  ;;  %v19653_v53 = vsel %vm14252_vm9, 4294967295, %v19652_v53  ;;  %v14264_v56 = vsel %vm14252_vm9, -1.0, %v19649_v29  ;;  %vm19664_vm9 = vcmp.eq.f32.partialorder %v13484_v32, %v13917_v31  ;;  %v19670_v43 = vld [vmem:[#allocation112_spill] sm:$0xff]  ;;  %v19678_v42 = vld [vmem:[#allocation13_spill] sm:$0xff] }
 0xc47   : > { %19654 = vst [vmem:[#allocation84_spill] sm:$0xff] %v19653_v53  ;;  %19657 = vst [vmem:[#allocation96_spill] sm:$0xff] %v14264_v56  ;;  %4289 = vmax.xlane.f32.xlu1 %v14264_v56 }
 0xc49   : > { %4291 = vmax.xlane.f32.xlu0 %v14270_v57 }
 0xc4a   : > { %v7377_v40 = vpop.f32.mrb[124].mxu1 }
 0xc4b   : > { %vm4157_vm4 = vcmp.eq.f32.partialorder %v7377_v40, 0.0  ;;  %v4064_v8 = vpop.f32.mrb[125].mxu1  ;;  %4293 = vmax.xlane.f32.xlu1 %v14283_v19  ;;  %v19672_v40 = vmov 0 }
 0xc4c   : > { %vm14276_vm6 = vmand %vm19658_vm5, %vm4157_vm4  ;;  %vm4155_vm2 = vcmp.eq.f32.partialorder %v4064_v8, 0.0  ;;  %v7378_v29 = vpop.f32.mrb[126].mxu1  ;;  %vm19671_vm5 = vcmp.eq.f32.partialorder %v13528_v13, %v19670_v43  ;;  %v19680_v43 = vmov 0 }
 0xc4d   : > { %v19660_v25 = vsel %vm14276_vm6, 4294967295, %v19659_v25  ;;  %vm14292_vm10 = vmand %vm19664_vm9, %vm4155_vm2  ;;  %vm4158_vm4 = vcmp.eq.f32.partialorder %v7378_v29, 0.0  ;;  %v4067_v8 = vpop.f32.mrb[127].mxu1  ;;  %vm19679_vm2 = vcmp.eq.f32.partialorder %v19677_v5, %v19678_v42  ;;  %v14338_v42 = vsel %vm14276_vm6, -1.0, %v13515_v52 }
 0xc4e   : > { %19661 = vst [vmem:[#allocation25_spill] sm:$0xff] %v19660_v25  ;;  %v19666_v2 = vsel %vm14292_vm10, 4294967295, %v19665_v2  ;;  %vm14304_vm11 = vmand %vm19671_vm5, %vm4158_vm4  ;;  %vm4156_vm9 = vcmp.eq.f32.partialorder %v4067_v8, 0.0  ;;  %v14311_v31 = vsel %vm14292_vm10, -1.0, %v13484_v32  ;;  %vm19686_vm5 = vcmp.eq.f32.partialorder %v13591_v17, %v13968_v16  ;;  %v19796_v25 = vld [vmem:[#allocation30_spill] sm:$0xff] }
 0xc4f   : > { %19667 = vst [vmem:[#allocation26_spill] sm:$0xff] %v19666_v2  ;;  %v19673_v40 = vsel %vm14304_vm11, 4294967295, %v19672_v40  ;;  %vm14320_vm14 = vmand %vm19679_vm2, %vm4156_vm9  ;;  %4295 = vmax.xlane.f32.xlu0 %v14311_v31  ;;  %v19687_v32 = vmov 0  ;;  %v14351_v8 = vsel %vm14304_vm11, -1.0, %v13528_v13  ;;  %v19693_v16 = vmov 0  ;;  %v19705_v2 = vld [vmem:[#allocation111_spill] sm:$0xff] }
 0xc50   : > { %19674 = vst [vmem:[#allocation102_spill] sm:$0xff] %v19673_v40  ;;  %v19681_v43 = vsel %vm14320_vm14, 4294967295, %v19680_v43  ;;  %v14332_v60 = vsel %vm14320_vm14, -1.0, %v19677_v5  ;;  %vm19692_vm14 = vcmp.eq.f32.partialorder %v13560_v12, %v13951_v47  ;;  %v19698_v40 = vld [vmem:[#allocation58_spill] sm:$0xff] }
 0xc51   : > { %19682 = vst [vmem:[#allocation94_spill] sm:$0xff] %v19681_v43  ;;  %19685 = vst [vmem:[#allocation8_spill] sm:$0xff] %v14332_v60  ;;  %4297 = vmax.xlane.f32.xlu1 %v14332_v60  ;;  %v19706_v13 = vld [vmem:[#allocation10_spill] sm:$0xff] }
 0xc52   : > { %v7381_v39 = vpop.f32.mrb[128].mxu1 }
 0xc53   : > { %vm4161_vm4 = vcmp.eq.f32.partialorder %v7381_v39, 0.0  ;;  %4299 = vmax.xlane.f32.xlu0 %v14338_v42  ;;  %v4080_v29 = vpop.f32.mrb[129].mxu1  ;;  %v19700_v39 = vmov 0 }
 0xc54   : > { %vm14344_vm9 = vmand %vm19686_vm5, %vm4161_vm4  ;;  %vm4159_vm2 = vcmp.eq.f32.partialorder %v4080_v29, 0.0  ;;  %v7382_v5 = vpop.f32.mrb[130].mxu1  ;;  %vm19699_vm5 = vcmp.eq.f32.partialorder %v13604_v28, %v19698_v40  ;;  %v19708_v40 = vmov 0 }
 0xc55   : > { %v19688_v32 = vsel %vm14344_vm9, 4294967295, %v19687_v32  ;;  %vm14360_vm10 = vmand %vm19692_vm14, %vm4159_vm2  ;;  %vm4162_vm4 = vcmp.eq.f32.partialorder %v7382_v5, 0.0  ;;  %4301 = vmax.xlane.f32.xlu1 %v14351_v8  ;;  %v4083_v29 = vpop.f32.mrb[131].mxu1  ;;  %vm19707_vm2 = vcmp.eq.f32.partialorder %v19705_v2, %v19706_v13  ;;  %v14406_v13 = vsel %vm14344_vm9, -1.0, %v13591_v17 }
 0xc56   : > { %19689 = vst [vmem:[#allocation81_spill] sm:$0xff] %v19688_v32  ;;  %v19694_v16 = vsel %vm14360_vm10, 4294967295, %v19693_v16  ;;  %vm14372_vm11 = vmand %vm19699_vm5, %vm4162_vm4  ;;  %vm4160_vm14 = vcmp.eq.f32.partialorder %v4083_v29, 0.0  ;;  %v14379_v47 = vsel %vm14360_vm10, -1.0, %v13560_v12  ;;  %vm19714_vm5 = vcmp.eq.f32.partialorder %v13667_v54, %v13999_v34  ;;  %v19734_v32 = vld [vmem:[#allocation104_spill] sm:$0xff] }
 0xc57   : > { %19695 = vst [vmem:[#allocation39_spill] sm:$0xff] %v19694_v16  ;;  %v19701_v39 = vsel %vm14372_vm11, 4294967295, %v19700_v39  ;;  %vm14388_vm6 = vmand %vm19707_vm2, %vm4160_vm14  ;;  %4303 = vmax.xlane.f32.xlu0 %v14379_v47  ;;  %v19715_v12 = vmov 0  ;;  %v14419_v29 = vsel %vm14372_vm11, -1.0, %v13604_v28  ;;  %v19721_v34 = vmov 0  ;;  %v19727_v16 = vld [vmem:[#allocation83_spill] sm:$0xff] }
 0xc58   : > { %19702 = vst [vmem:[#allocation95_spill] sm:$0xff] %v19701_v39  ;;  %v19709_v40 = vsel %vm14388_vm6, 4294967295, %v19708_v40  ;;  %v14400_v58 = vsel %vm14388_vm6, -1.0, %v19705_v2  ;;  %vm19720_vm6 = vcmp.eq.f32.partialorder %v13636_v41, %v13984_v33  ;;  %v19726_v39 = vld [vmem:[#allocation79_spill] sm:$0xff]  ;;  %v19735_v28 = vld [vmem:[#allocation101_spill] sm:$0xff] }
 0xc59   : > { %19710 = vst [vmem:[#allocation18_spill] sm:$0xff] %v19709_v40  ;;  %19713 = vst [vmem:[#allocation103_spill] sm:$0xff] %v14400_v58  ;;  %4305 = vmax.xlane.f32.xlu1 %v14400_v58 }
 0xc5b   : > { %v7385_v53 = vpop.f32.mrb[132].mxu1  ;;  %4307 = vmax.xlane.f32.xlu0 %v14406_v13 }
 0xc5c   : > { %vm4165_vm4 = vcmp.eq.f32.partialorder %v7385_v53, 0.0  ;;  %v4096_v5 = vpop.f32.mrb[133].mxu1  ;;  %v19729_v53 = vmov 0 }
 0xc5d   : > { %vm14412_vm14 = vmand %vm19714_vm5, %vm4165_vm4  ;;  %vm4163_vm2 = vcmp.eq.f32.partialorder %v4096_v5, 0.0  ;;  %v7386_v2 = vpop.f32.mrb[134].mxu1  ;;  %4309 = vmax.xlane.f32.xlu1 %v14419_v29  ;;  %vm19728_vm5 = vcmp.eq.f32.partialorder %v19726_v39, %v19727_v16  ;;  %v19737_v16 = vmov 0 }
 0xc5e   : > { %v19716_v12 = vsel %vm14412_vm14, 4294967295, %v19715_v12  ;;  %vm14428_vm10 = vmand %vm19720_vm6, %vm4163_vm2  ;;  %vm4166_vm4 = vcmp.eq.f32.partialorder %v7386_v2, 0.0  ;;  %v4099_v5 = vpop.f32.mrb[135].mxu1  ;;  %vm19736_vm2 = vcmp.eq.f32.partialorder %v19734_v32, %v19735_v28  ;;  %v14474_v28 = vsel %vm14412_vm14, -1.0, %v13667_v54  ;;  %v19781_v54 = vld [vmem:[#allocation80_spill] sm:$0xff] }
 0xc5f   : > { %19717 = vst [vmem:[#allocation21_spill] sm:$0xff] %v19716_v12  ;;  %v19722_v34 = vsel %vm14428_vm10, 4294967295, %v19721_v34  ;;  %vm14440_vm11 = vmand %vm19728_vm5, %vm4166_vm4  ;;  %vm4164_vm6 = vcmp.eq.f32.partialorder %v4099_v5, 0.0  ;;  %v14447_v33 = vsel %vm14428_vm10, -1.0, %v13636_v41  ;;  %vm19743_vm5 = vcmp.eq.f32.partialorder %v13743_v48, %v14029_v49  ;;  %v19764_v12 = vld [vmem:[#allocation73_spill] sm:$0xff] }
 0xc60   : > { %19723 = vst [vmem:[#allocation98_spill] sm:$0xff] %v19722_v34  ;;  %v19730_v53 = vsel %vm14440_vm11, 4294967295, %v19729_v53  ;;  %vm14456_vm9 = vmand %vm19736_vm2, %vm4164_vm6  ;;  %4311 = vmax.xlane.f32.xlu0 %v14447_v33  ;;  %v19744_v41 = vmov 0  ;;  %v14487_v5 = vsel %vm14440_vm11, -1.0, %v19726_v39  ;;  %v19751_v49 = vmov 0  ;;  %v19757_v34 = vld [vmem:[#allocation37_spill] sm:$0xff] }
 0xc61   : > { %19731 = vst [vmem:[#allocation23_spill] sm:$0xff] %v19730_v53  ;;  %v19738_v16 = vsel %vm14456_vm9, 4294967295, %v19737_v16  ;;  %v14468_v52 = vsel %vm14456_vm9, -1.0, %v19734_v32  ;;  %19747 = vst [vmem:[#allocation107_spill] sm:$0xff] %v14487_v5  ;;  %vm19750_vm9 = vcmp.eq.f32.partialorder %v13712_v23, %v14014_v46  ;;  %v19756_v53 = vld [vmem:[#allocation44_spill] sm:$0xff]  ;;  %v19765_v39 = vld [vmem:[#allocation90_spill] sm:$0xff] }
 0xc62   : > { %19739 = vst [vmem:[#allocation12_spill] sm:$0xff] %v19738_v16  ;;  %19742 = vst [vmem:[#allocation100_spill] sm:$0xff] %v14468_v52  ;;  %4313 = vmax.xlane.f32.xlu1 %v14468_v52 }
 0xc63   : > { %v7389_v43 = vpop.f32.mrb[136].mxu1 }
 0xc64   : > { %vm4169_vm4 = vcmp.eq.f32.partialorder %v7389_v43, 0.0  ;;  %4315 = vmax.xlane.f32.xlu0 %v14474_v28  ;;  %v4112_v2 = vpop.f32.mrb[137].mxu1  ;;  %v19759_v43 = vmov 0 }
 0xc65   : > { %vm14480_vm6 = vmand %vm19743_vm5, %vm4169_vm4  ;;  %vm4167_vm2 = vcmp.eq.f32.partialorder %v4112_v2, 0.0  ;;  %v7390_v32 = vpop.f32.mrb[138].mxu1  ;;  %vm19758_vm5 = vcmp.eq.f32.partialorder %v19756_v53, %v19757_v34  ;;  %v19767_v34 = vmov 0 }
 0xc66   : > { %v19745_v41 = vsel %vm14480_vm6, 4294967295, %v19744_v41  ;;  %vm14496_vm10 = vmand %vm19750_vm9, %vm4167_vm2  ;;  %vm4170_vm4 = vcmp.eq.f32.partialorder %v7390_v32, 0.0  ;;  %4317 = vmax.xlane.f32.xlu1 %v14487_v5  ;;  %v4115_v2 = vpop.f32.mrb[139].mxu1  ;;  %vm19766_vm2 = vcmp.eq.f32.partialorder %v19764_v12, %v19765_v39  ;;  %v14542_v39 = vsel %vm14480_vm6, -1.0, %v13743_v48  ;;  %v7902_v48 = vld [vmem:[%s16971_s3 + $0x8] sm:$0xff]  }
 0xc67   : > { %19746 = vst [vmem:[#allocation87_spill] sm:$0xff] %v19745_v41  ;;  %v19752_v49 = vsel %vm14496_vm10, 4294967295, %v19751_v49  ;;  %vm14508_vm11 = vmand %vm19758_vm5, %vm4170_vm4  ;;  %vm4168_vm9 = vcmp.eq.f32.partialorder %v4115_v2, 0.0  ;;  %v14515_v46 = vsel %vm14496_vm10, -1.0, %v13712_v23  ;;  %vm19773_vm5 = vcmp.eq.f32.partialorder %v13813_v15, %v14059_v44  ;;  %v19788_v41 = vld [vmem:[#allocation50_spill] sm:$0xff] }
 0xc68   : > { %19753 = vst [vmem:[#allocation32_spill] sm:$0xff] %v19752_v49  ;;  %v19760_v43 = vsel %vm14508_vm11, 4294967295, %v19759_v43  ;;  %vm14524_vm14 = vmand %vm19766_vm2, %vm4168_vm9  ;;  %4319 = vmax.xlane.f32.xlu0 %v14515_v46  ;;  %v19774_v23 = vmov 0  ;;  %v14555_v2 = vsel %vm14508_vm11, -1.0, %v19756_v53  ;;  %v19783_v44 = vmov 0  ;;  %v19797_v53 = vld [vmem:[#allocation42_spill] sm:$0xff] }
 0xc69   : > { %19761 = vst [vmem:[#allocation105_spill] sm:$0xff] %v19760_v43  ;;  %v19768_v34 = vsel %vm14524_vm14, 4294967295, %v19767_v34  ;;  %v14536_v17 = vsel %vm14524_vm14, -1.0, %v19764_v12  ;;  %19777 = vst [vmem:[#allocation106_spill] sm:$0xff] %v14555_v2 }
 0xc6a   : > { %19769 = vst [vmem:[#allocation72_spill] sm:$0xff] %v19768_v34  ;;  %19772 = vst [vmem:[#allocation19_spill] sm:$0xff] %v14536_v17  ;;  %4321 = vmax.xlane.f32.xlu1 %v14536_v17  ;;  %v19780_v34 = vld [vmem:[#allocation97_spill] sm:$0xff] }
 0xc6b   : > { %vm19782_vm14 = vcmp.eq.f32.partialorder %v19780_v34, %v19781_v54 }
 0xc6c   : > { %4323 = vmax.xlane.f32.xlu0 %v14542_v39 }
 0xc6e   : > { %v7393_v40 = vpop.f32.mrb[140].mxu1  ;;  %4325 = vmax.xlane.f32.xlu1 %v14555_v2 }
 0xc6f   : > { %vm4173_vm4 = vcmp.eq.f32.partialorder %v7393_v40, 0.0  ;;  %v4128_v32 = vpop.f32.mrb[141].mxu1  ;;  %v19790_v40 = vmov 0 }
 0xc70   : > { %vm14548_vm9 = vmand %vm19773_vm5, %vm4173_vm4  ;;  %vm4171_vm2 = vcmp.eq.f32.partialorder %v4128_v32, 0.0  ;;  %v7394_v12 = vpop.f32.mrb[142].mxu1  ;;  %vm19789_vm5 = vcmp.eq.f32.partialorder %v13817_v51, %v19788_v41  ;;  %v19799_v41 = vmov 0 }
 0xc71   : > { %v19775_v23 = vsel %vm14548_vm9, 4294967295, %v19774_v23  ;;  %vm14564_vm10 = vmand %vm19782_vm14, %vm4171_vm2  ;;  %vm4174_vm4 = vcmp.eq.f32.partialorder %v7394_v12, 0.0  ;;  %v4131_v32 = vpop.f32.mrb[143].mxu1  ;;  %vm19798_vm2 = vcmp.eq.f32.partialorder %v19796_v25, %v19797_v53  ;;  %v14610_v53 = vsel %vm14548_vm9, -1.0, %v13813_v15  ;;  %v7901_v12 = vld [vmem:[%s16971_s3] sm:$0xff]  }
 0xc72   : > { %19776 = vst [vmem:[#allocation68_spill] sm:$0xff] %v19775_v23  ;;  %v19784_v44 = vsel %vm14564_vm10, 4294967295, %v19783_v44  ;;  %vm14576_vm11 = vmand %vm19789_vm5, %vm4174_vm4  ;;  %vm4172_vm14 = vcmp.eq.f32.partialorder %v4131_v32, 0.0  ;;  %v14583_v54 = vsel %vm14564_vm10, -1.0, %v19780_v34 }
 0xc73   : > { %19785 = vst [vmem:[#allocation69_spill] sm:$0xff] %v19784_v44  ;;  %v19791_v40 = vsel %vm14576_vm11, 4294967295, %v19790_v40  ;;  %19793 = vst [vmem:[#allocation24_spill] sm:$0xff] %v14583_v54  ;;  %4327 = vmax.xlane.f32.xlu0 %v14583_v54  ;;  %v14616_v16 = vsel %vm14576_vm11, -1.0, %v13817_v51  ;;  %v19805_v51 = vmov 1.0|1.0  }
 0xc74   : > { %19792 = vst [vmem:[#allocation67_spill] sm:$0xff] %v19791_v40  ;;  %vm14592_vm6 = vmand %vm19798_vm2, %vm4172_vm14  ;;  %v7903_v44 = vld [vmem:[%s16971_s3 + $0x10] sm:$0xff]  }
 0xc75   : > { %v19800_v41 = vsel %vm14592_vm6, 4294967295, %v19799_v41  ;;  %v14604_v43 = vsel %vm14592_vm6, -1.0, %v19796_v25 }
 0xc76   : > { %19801 = vst [vmem:[#allocation89_spill] sm:$0xff] %v19800_v41  ;;  %19804 = vst [vmem:[#allocation109_spill] sm:$0xff] %v14604_v43  ;;  %4329 = vmax.xlane.f32.xlu1 %v14604_v43 }
 0xc77   : > { %4331 = vmax.xlane.f32.xlu0 %v14610_v53 }
 0xc7a   : > { %4333 = vmax.xlane.f32.xlu1 %v14616_v16 }
 0xcbf   : > { %v14619_v34 = vpop.xlane.xlu0 %4271 }
 0xcc0   : > { %vm17856_vm4 = vcmp.eq.f32.partialorder %v14107_v27, %v14619_v34 }
 0xcc1   : > { %v14621_v25 = vpop.xlane.xlu1 %4273 }
 0xcc2   : > { %vm17853_vm5 = vcmp.eq.f32.partialorder %v14128_v36, %v14621_v25 }
 0xcc3   : > { %vm6536_vm14 = vmpackc.low %vm17853_vm5, %vm17856_vm4  ;;  %v14633_v15 = vpop.xlane.xlu0 %4275 }
 0xcc4   : > { %7411 = vmatprep.mubr.msk.bf16.mxu0 %vm6536_vm14, %v19805_v51  ;;  %vm17889_vm2 = vcmp.eq.f32.partialorder %v14134_v63, %v14633_v15 }
 0xcc5   : > { %v14636_v32 = vpop.xlane.xlu1 %4277 }
 0xcc6   : > { %vm17855_vm6 = vcmp.eq.f32.partialorder %v14147_v11, %v14636_v32 }
 0xcc7   : > { %vm6538_vm11 = vmpackc.low %vm17855_vm6, %vm17889_vm2  ;;  %v14648_v49 = vpop.xlane.xlu0 %4279 }
 0xcc8   : > { %7412 = vmatmul.mubr.msk.bf16.vlgmr.msra.gmra.mrb[112].mxu0 %vm6538_vm11, %v19805_v51  ;;  %vm17861_vm14 = vcmp.eq.f32.partialorder %v14175_v4, %v14648_v49 }
 0xcc9   : > { %v14651_v41 = vpop.xlane.xlu1 %4281  ;;  %7492 = vmatpush3.bf16.msra.mxu0 %v7901_v12 }
 0xcca   : > { %19806 = vst [vmem:[#allocation66_spill] sm:$0xff] %v14651_v41  ;;  %vm17860_vm5 = vcmp.eq.f32.partialorder %v14196_v1, %v14651_v41  ;;  %7493 = vmatprep.subr.bf16.mxu0 %v7902_v48  ;;  %v7905_v1 = vld [vmem:[%s16971_s3 + $0x20] sm:$0xff]  }
 0xccb   : > { %vm6540_vm11 = vmpackc.low %vm17860_vm5, %vm17861_vm14  ;;  %v14669_v40 = vpop.xlane.xlu0 %4283 }
 0xccc   : > { %7415 = vmatprep.mubr.msk.bf16.mxu0 %vm6540_vm11, %v19805_v51  ;;  %vm17866_vm6 = vcmp.eq.f32.partialorder %v14202_v0, %v14669_v40 }
 0xccd   : > { %v14672_v12 = vpop.xlane.xlu1 %4285  ;;  %7494 = vmatpush3.bf16.msra.mxu0 %v7902_v48 }
 0xcce   : > { %vm17865_vm4 = vcmp.eq.f32.partialorder %v14208_v35, %v14672_v12  ;;  %7495 = vmatprep.subr.bf16.mxu0 %v7903_v44 }
 0xccf   : > { %vm6542_vm11 = vmpackc.low %vm17865_vm4, %vm17866_vm6 }
 0xcd0   : > { %7416 = vmatmul.mubr.msk.bf16.gmra.mrb[116].mxu0 %vm6542_vm11, %v19805_v51 }
 0xcd1   : > { %7496 = vmatpush3.bf16.msra.mxu0 %v7903_v44 }
 0xcd2   : > { %v14687_v23 = vpop.xlane.xlu0 %4287  ;;  %7497 = vmatprep.subr.bf16.mxu0 %v7904_v38 }
 0xcd3   : > { %vm17869_vm5 = vcmp.eq.f32.partialorder %v14243_v59, %v14687_v23 }
 0xcd4   : > { %v14690_v48 = vpop.xlane.xlu1 %4289 }
 0xcd5   : > { %19807 = vst [vmem:[#allocation38_spill] sm:$0xff] %v14690_v48  ;;  %vm17868_vm14 = vcmp.eq.f32.partialorder %v14264_v56, %v14690_v48  ;;  %7498 = vmatpush3.bf16.msra.mxu0 %v7904_v38  ;;  %v7906_v56 = vld [vmem:[%s16971_s3 + $0x28] sm:$0xff]  }
 0xcd6   : > { %vm6544_vm11 = vmpackc.low %vm17868_vm14, %vm17869_vm5  ;;  %v14705_v44 = vpop.xlane.xlu0 %4291  ;;  %7499 = vmatprep.subr.bf16.mxu0 %v7905_v1 }
 0xcd7   : > { %7419 = vmatprep.mubr.msk.bf16.mxu0 %vm6544_vm11, %v19805_v51  ;;  %vm17874_vm4 = vcmp.eq.f32.partialorder %v14270_v57, %v14705_v44 }
 0xcd8   : > { %v14708_v41 = vpop.xlane.xlu1 %4293 }
 0xcd9   : > { %19808 = vst [vmem:[#allocation62_spill] sm:$0xff] %v14708_v41  ;;  %vm17873_vm6 = vcmp.eq.f32.partialorder %v14283_v19, %v14708_v41  ;;  %7500 = vmatpush3.bf16.msra.mxu0 %v7905_v1 }
 0xcda   : > { %vm6546_vm11 = vmpackc.low %vm17873_vm6, %vm17874_vm4  ;;  %7501 = vmatprep.subr.bf16.mxu0 %v7906_v56 }
 0xcdb   : > { %7420 = vmatmul.mubr.msk.bf16.gmra.mrb[120].mxu0 %vm6546_vm11, %v19805_v51 }
 0xcdc   : > { %v14723_v38 = vpop.xlane.xlu0 %4295 }
 0xcdd   : > { %19809 = vst [vmem:[#allocation74_spill] sm:$0xff] %v14723_v38  ;;  %vm17878_vm14 = vcmp.eq.f32.partialorder %v14311_v31, %v14723_v38  ;;  %7502 = vmatpush3.bf16.msra.mxu0 %v7906_v56  ;;  %v7907_v38 = vld [vmem:[%s16971_s3 + $0x30] sm:$0xff]  }
 0xcde   : > { %v14726_v48 = vpop.xlane.xlu1 %4297  ;;  %7503 = vmatprep.subr.bf16.mxu0 %v7907_v38 }
 0xcdf   : > { %19810 = vst [vmem:[#allocation112_spill] sm:$0xff] %v14726_v48  ;;  %vm17877_vm5 = vcmp.eq.f32.partialorder %v14332_v60, %v14726_v48  ;;  %v7908_v60 = vld [vmem:[%s16971_s3 + $0x38] sm:$0xff]  }
 0xce0   : > { %vm6548_vm11 = vmpackc.low %vm17877_vm5, %vm17878_vm14  ;;  %v14741_v41 = vpop.xlane.xlu0 %4299 }
 0xce1   : > { %7423 = vmatprep.mubr.msk.bf16.mxu0 %vm6548_vm11, %v19805_v51  ;;  %vm17883_vm6 = vcmp.eq.f32.partialorder %v14338_v42, %v14741_v41  ;;  %7504 = vmatpush3.bf16.msra.mxu0 %v7907_v38 }
 0xce2   : > { %v14744_v1 = vpop.xlane.xlu1 %4301  ;;  %7505 = vmatprep.subr.bf16.mxu0 %v7908_v60 }
 0xce3   : > { %19811 = vst [vmem:[#allocation65_spill] sm:$0xff] %v14744_v1  ;;  %vm17882_vm4 = vcmp.eq.f32.partialorder %v14351_v8, %v14744_v1 }
 0xce4   : > { %vm6550_vm11 = vmpackc.low %vm17882_vm4, %vm17883_vm6  ;;  %v14759_v48 = vpop.xlane.xlu0 %4303 }
 0xce5   : > { %7424 = vmatmul.mubr.msk.bf16.gmra.mrb[124].mxu0 %vm6550_vm11, %v19805_v51  ;;  %vm17888_vm5 = vcmp.eq.f32.partialorder %v14379_v47, %v14759_v48 }
 0xce6   : > { %v14762_v56 = vpop.xlane.xlu1 %4305  ;;  %7506 = vmatpush3.bf16.msra.mxu0 %v7908_v60 }
 0xce7   : > { %19812 = vst [vmem:[#allocation13_spill] sm:$0xff] %v14762_v56  ;;  %vm17884_vm14 = vcmp.eq.f32.partialorder %v14400_v58, %v14762_v56 }
 0xce8   : > { %vm6552_vm11 = vmpackc.low %vm17884_vm14, %vm17888_vm5  ;;  %v14777_v1 = vpop.xlane.xlu0 %4307 }
 0xce9   : > { %7427 = vmatprep.mubr.msk.bf16.mxu0 %vm6552_vm11, %v19805_v51  ;;  %vm17892_vm4 = vcmp.eq.f32.partialorder %v14406_v13, %v14777_v1 }
 0xcea   : > { %v14780_v38 = vpop.xlane.xlu1 %4309 }
 0xceb   : > { %19813 = vst [vmem:[#allocation58_spill] sm:$0xff] %v14780_v38  ;;  %vm17891_vm6 = vcmp.eq.f32.partialorder %v14419_v29, %v14780_v38 }
 0xcec   : > { %vm6554_vm14 = vmpackc.low %vm17891_vm6, %vm17892_vm4 }
 0xced   : > { %v14792_v56 = vpop.xlane.xlu0 %4311  ;;  %7428 = vmatmul.mubr.msk.bf16.gmra.mrb[128].mxu0 %vm6554_vm14, %v19805_v51 }
 0xcee   : > { %vm17897_vm11 = vcmp.eq.f32.partialorder %v14447_v33, %v14792_v56 }
 0xcef   : > { %v14795_v58 = vpop.xlane.xlu1 %4313 }
 0xcf0   : > { %19814 = vst [vmem:[#allocation111_spill] sm:$0xff] %v14795_v58  ;;  %vm17896_vm5 = vcmp.eq.f32.partialorder %v14468_v52, %v14795_v58 }
 0xcf1   : > { %vm6556_vm2 = vmpackc.low %vm17896_vm5, %vm17897_vm11  ;;  %v14807_v60 = vpop.xlane.xlu0 %4315 }
 0xcf2   : > { %7431 = vmatprep.mubr.msk.bf16.mxu0 %vm6556_vm2, %v19805_v51  ;;  %vm17902_vm14 = vcmp.eq.f32.partialorder %v14474_v28, %v14807_v60 }
 0xcf3   : > { %v14810_v38 = vpop.xlane.xlu1 %4317 }
 0xcf4   : > { %19815 = vst [vmem:[#allocation10_spill] sm:$0xff] %v14810_v38  ;;  %vm17901_vm6 = vcmp.eq.f32.partialorder %v14487_v5, %v14810_v38 }
 0xcf5   : > { %vm6558_vm4 = vmpackc.low %vm17901_vm6, %vm17902_vm14  ;;  %v14822_v58 = vpop.xlane.xlu0 %4319 }
 0xcf6   : > { %7432 = vmatmul.mubr.msk.bf16.gmra.mrb[132].mxu0 %vm6558_vm4, %v19805_v51  ;;  %vm17907_vm2 = vcmp.eq.f32.partialorder %v14515_v46, %v14822_v58 }
 0xcf7   : > { %v14825_v52 = vpop.xlane.xlu1 %4321 }
 0xcf8   : > { %19816 = vst [vmem:[#allocation79_spill] sm:$0xff] %v14825_v52  ;;  %vm17906_vm5 = vcmp.eq.f32.partialorder %v14536_v17, %v14825_v52 }
 0xcf9   : > { %vm6560_vm11 = vmpackc.low %vm17906_vm5, %vm17907_vm2  ;;  %v14837_v38 = vpop.xlane.xlu0 %4323 }
 0xcfa   : > { %7435 = vmatprep.mubr.msk.bf16.mxu0 %vm6560_vm11, %v19805_v51  ;;  %vm17912_vm4 = vcmp.eq.f32.partialorder %v14542_v39, %v14837_v38 }
 0xcfb   : > { %v14840_v5 = vpop.xlane.xlu1 %4325 }
 0xcfc   : > { %19817 = vst [vmem:[#allocation83_spill] sm:$0xff] %v14840_v5  ;;  %vm17911_vm6 = vcmp.eq.f32.partialorder %v14555_v2, %v14840_v5 }
 0xcfd   : > { %vm6562_vm14 = vmpackc.low %vm17911_vm6, %vm17912_vm4 }
 0xcfe   : > { %7436 = vmatmul.mubr.msk.bf16.gmra.mrb[136].mxu0 %vm6562_vm14, %v19805_v51 }
 0xd00   : > { %v14852_v52 = vpop.xlane.xlu0 %4327 }
 0xd01   : > { %19818 = vst [vmem:[#allocation104_spill] sm:$0xff] %v14852_v52  ;;  %vm17917_vm11 = vcmp.eq.f32.partialorder %v14583_v54, %v14852_v52 }
 0xd03   : > { %v14855_v17 = vpop.xlane.xlu1 %4329 }
 0xd04   : > { %19819 = vst [vmem:[#allocation101_spill] sm:$0xff] %v14855_v17  ;;  %vm17914_vm5 = vcmp.eq.f32.partialorder %v14604_v43, %v14855_v17  ;;  %v14867_v5 = vpop.xlane.xlu0 %4331 }
 0xd05   : > { %vm6564_vm2 = vmpackc.low %vm17914_vm5, %vm17917_vm11  ;;  %vm17925_vm14 = vcmp.eq.f32.partialorder %v14610_v53, %v14867_v5 }
 0xd06   : > { %7439 = vmatprep.mubr.msk.bf16.mxu0 %vm6564_vm2, %v19805_v51  ;;  %vm19821_vm2 = vcmp.eq.f32.partialorder %v14134_v63, %v14633_v15 }
 0xd07   : > { %v14870_v2 = vpop.xlane.xlu1 %4333 }
 0xd08   : > { %19820 = vst [vmem:[#allocation44_spill] sm:$0xff] %v14870_v2  ;;  %vm17924_vm6 = vcmp.eq.f32.partialorder %v14616_v16, %v14870_v2  ;;  %v19824_v2 = vsel %vm14078_vm12, %v8988_v20, %v13243_v37  ;;  %vm19827_vm12 = vcmp.eq.f32.partialorder %v14147_v11, %v14636_v32  ;;  %v19849_v37 = vld [vmem:[#allocation64_spill] sm:$0xff] }
 0xd09   : > { %vm6566_vm4 = vmpackc.low %vm17924_vm6, %vm17925_vm14 }
 0xd0a   : > { %7440 = vmatmul.mubr.msk.bf16.gmra.mrb[140].mxu0 %vm6566_vm4, %v19805_v51  ;;  %vm19825_vm4 = vcmp.eq.f32.partialorder %v14107_v27, %v14619_v34 }
 0xd9b   : > { %v7413_v17 = vpop.f32.mrb[112].mxu0 }
 0xd9c   : > { %vm4610_vm5 = vcmp.eq.f32.partialorder %v7413_v17, 0.0  ;;  %v4481_v43 = vpop.f32.mrb[113].mxu0 }
 0xd9d   : > { %vm14886_vm11 = vmand %vm19821_vm2, %vm4610_vm5  ;;  %vm4608_vm10 = vcmp.eq.f32.partialorder %v4481_v43, 0.0  ;;  %v7414_v54 = vpop.f32.mrb[114].mxu0  ;;  %v19826_v43 = vsel %vm14089_vm7, %v8997_v7, %v13254_v21  ;;  %vm19831_vm7 = vcmp.eq.f32.partialorder %v14128_v36, %v14621_v25  ;;  %v19841_v25 = vld [vmem:[#allocation108_spill] sm:$0xff] }
 0xd9e   : > { %v14898_v51 = vsel %vm14886_vm11, %v8988_v20, %v19824_v2  ;;  %vm4640_vm6 = vmand %vm19825_vm4, %vm4608_vm10  ;;  %vm4611_vm5 = vcmp.eq.f32.partialorder %v7414_v54, 0.0  ;;  %v4484_v17 = vpop.f32.mrb[115].mxu0  ;;  %v14950_v32 = vsel %vm14886_vm11, -1.0, %v14134_v63  ;;  %v19836_v63 = vsel %vm14140_vm13, %v9058_v24, %v13318_v3 }
 0xd9f   : > { %v14909_v18 = vsel %vm4640_vm6, %v8997_v7, %v19826_v43  ;;  %vm14914_vm2 = vmand %vm19827_vm12, %vm4611_vm5  ;;  %vm4609_vm14 = vcmp.eq.f32.partialorder %v4484_v17, 0.0  ;;  %v14919_v2 = vsel %vm4640_vm6, -1.0, %v14107_v27  ;;  %v19832_v27 = vsel %vm14116_vm8, %v9026_v9, %v13286_v6  ;;  %v19845_v17 = vld [vmem:[#allocation66_spill] sm:$0xff] }
 0xda0   : > { %v14929_v21 = vsel %vm14914_vm2, %v9009_v45, %v19830_v14  ;;  %vm4641_vm10 = vmand %vm19831_vm7, %vm4609_vm14  ;;  %4736 = vmax.xlane.f32.xlu0 %v14919_v2  ;;  %vm19833_vm8 = vcmp.eq.f32.partialorder %v14202_v0, %v14669_v40  ;;  %v14963_v34 = vsel %vm14914_vm2, -1.0, %v14147_v11  ;;  %vm19837_vm11 = vcmp.eq.f32.partialorder %v14175_v4, %v14648_v49  ;;  %v19840_v49 = vld [vmem:[#allocation45_spill] sm:$0xff]  ;;  %v19848_v43 = vld [vmem:[#allocation46_spill] sm:$0xff] }
 0xda1   : > { %v14941_v61 = vsel %vm4641_vm10, %v9026_v9, %v19832_v27  ;;  %v14944_v10 = vsel %vm4641_vm10, -1.0, %v14128_v36  ;;  %v19838_v11 = vsel %vm14156_vm0, %v9072_v50, %v13330_v26  ;;  %vm19839_vm13 = vcmp.eq.f32.partialorder %v14208_v35, %v14672_v12  ;;  %v19844_v26 = vld [vmem:[#allocation14_spill] sm:$0xff] }
 0xda2   : > { %4738 = vmax.xlane.f32.xlu1 %v14944_v10  ;;  %v19842_v15 = vsel %vm14168_vm1, %v19840_v49, %v19841_v25  ;;  %vm19846_vm0 = vcmp.eq.f32.partialorder %v19844_v26, %v19845_v17  ;;  %v19857_v6 = vld [vmem:[#allocation6_spill] sm:$0xff]  ;;  %v19865_v17 = vld [vmem:[#allocation9_spill] sm:$0xff] }
 0xda3   : > { %v7417_v54 = vpop.f32.mrb[116].mxu0 }
 0xda4   : > { %vm4614_vm15 = vcmp.eq.f32.partialorder %v7417_v54, 0.0  ;;  %4740 = vmax.xlane.f32.xlu0 %v14950_v32  ;;  %v4497_v30 = vpop.f32.mrb[117].mxu0 }
 0xda5   : > { %vm14956_vm6 = vmand %vm19833_vm8, %vm4614_vm15  ;;  %vm4612_vm14 = vcmp.eq.f32.partialorder %v4497_v30, 0.0  ;;  %v7418_v36 = vpop.f32.mrb[118].mxu0 }
 0xda6   : > { %v14973_v52 = vsel %vm14956_vm6, %v9058_v24, %v19836_v63  ;;  %vm4644_vm4 = vmand %vm19837_vm11, %vm4612_vm14  ;;  %vm4615_vm5 = vcmp.eq.f32.partialorder %v7418_v36, 0.0  ;;  %4742 = vmax.xlane.f32.xlu1 %v14963_v34  ;;  %v4500_v40 = vpop.f32.mrb[119].mxu0  ;;  %v15020_v27 = vsel %vm14956_vm6, -1.0, %v14202_v0  ;;  %v19855_v0 = vld [vmem:[#allocation43_spill] sm:$0xff]  ;;  %vm19861_vm6 = vcmp.eq.f32.partialorder %v14243_v59, %v14687_v23  ;;  %v19894_v63 = vld [vmem:[#allocation34_spill] sm:$0xff] }
 0xda7   : > { %v14985_v3 = vsel %vm4644_vm4, %v9072_v50, %v19838_v11  ;;  %vm4647_vm12 = vmand %vm19839_vm13, %vm4615_vm5  ;;  %vm4613_vm2 = vcmp.eq.f32.partialorder %v4500_v40, 0.0  ;;  %v14991_v55 = vsel %vm4644_vm4, -1.0, %v14175_v4  ;;  %v19850_v4 = vsel %vm14184_vm3, %v19848_v43, %v19849_v37  ;;  %v19858_v11 = vld [vmem:[#allocation76_spill] sm:$0xff] }
 0xda8   : > { %v14999_v22 = vsel %vm4647_vm12, %v19840_v49, %v19842_v15  ;;  %vm4645_vm7 = vmand %vm19846_vm0, %vm4613_vm2  ;;  %4744 = vmax.xlane.f32.xlu0 %v14991_v55  ;;  %v15024_v36 = vsel %vm4647_vm12, -1.0, %v14208_v35  ;;  %vm19852_vm3 = vcmp.eq.f32.partialorder %v14270_v57, %v14705_v44  ;;  %vm19856_vm8 = vnez %v19855_v0  ;;  %v19862_v15 = vld [vmem:[#allocation71_spill] sm:$0xff]  ;;  %v19875_v0 = vld [vmem:[#allocation82_spill] sm:$0xff] }
 0xda9   : > { %19843 = vst [vmem:[#allocation37_spill] sm:$0xff] %v14999_v22  ;;  %v15011_v14 = vsel %vm4645_vm7, %v19848_v43, %v19850_v4  ;;  %v15014_v62 = vsel %vm4645_vm7, -1.0, %v19844_v26  ;;  %v19859_v25 = vsel %vm19856_vm8, %v19857_v6, %v19858_v11  ;;  %vm19863_vm4 = vnez %v19862_v15  ;;  %v19864_v26 = vld [vmem:[#allocation7_spill] sm:$0xff]  ;;  %v19868_v4 = vld [vmem:[#allocation62_spill] sm:$0xff]  ;;  %v19878_v15 = vld [vmem:[#allocation96_spill] sm:$0xff] }
 0xdaa   : > { %19851 = vst [vmem:[#allocation73_spill] sm:$0xff] %v15011_v14  ;;  %4746 = vmax.xlane.f32.xlu1 %v15014_v62  ;;  %v19866_v12 = vsel %vm19863_vm4, %v19864_v26, %v19865_v17  ;;  %vm19869_vm5 = vcmp.eq.f32.partialorder %v14283_v19, %v19868_v4  ;;  %v19879_v17 = vld [vmem:[#allocation38_spill] sm:$0xff] }
 0xdab   : > { %vm19880_vm0 = vcmp.eq.f32.partialorder %v19878_v15, %v19879_v17 }
 0xdac   : > { %4748 = vmax.xlane.f32.xlu0 %v15020_v27 }
 0xdae   : > { %v7421_v54 = vpop.f32.mrb[120].mxu0  ;;  %4750 = vmax.xlane.f32.xlu1 %v15024_v36 }
 0xdaf   : > { %vm4618_vm1 = vcmp.eq.f32.partialorder %v7421_v54, 0.0  ;;  %v4513_v30 = vpop.f32.mrb[121].mxu0 }
 0xdb0   : > { %vm15029_vm10 = vmand %vm19852_vm3, %vm4618_vm1  ;;  %vm4616_vm15 = vcmp.eq.f32.partialorder %v4513_v30, 0.0  ;;  %v7422_v40 = vpop.f32.mrb[122].mxu0  ;;  %v19872_v30 = vld [vmem:[#allocation113_spill] sm:$0xff] }
 0xdb1   : > { %v15042_v35 = vsel %vm15029_vm10, %v19857_v6, %v19859_v25  ;;  %vm4648_vm14 = vmand %vm19861_vm6, %vm4616_vm15  ;;  %vm4619_vm11 = vcmp.eq.f32.partialorder %v7422_v40, 0.0  ;;  %v4516_v44 = vpop.f32.mrb[123].mxu0  ;;  %vm19873_vm2 = vnez %v19872_v30  ;;  %v19874_v40 = vld [vmem:[#allocation48_spill] sm:$0xff]  ;;  %v15094_v17 = vsel %vm15029_vm10, -1.0, %v14270_v57  ;;  %v19892_v57 = vld [vmem:[#allocation25_spill] sm:$0xff] }
 0xdb2   : > { %19860 = vst [vmem:[#allocation90_spill] sm:$0xff] %v15042_v35  ;;  %v15053_v37 = vsel %vm4648_vm14, %v19864_v26, %v19866_v12  ;;  %vm15058_vm13 = vmand %vm19869_vm5, %vm4619_vm11  ;;  %vm4617_vm12 = vcmp.eq.f32.partialorder %v4516_v44, 0.0  ;;  %v15063_v23 = vsel %vm4648_vm14, -1.0, %v14243_v59  ;;  %v19876_v11 = vsel %vm19873_vm2, %v19874_v40, %v19875_v0  ;;  %v19881_v44 = vld [vmem:[#allocation84_spill] sm:$0xff]  ;;  %v19883_v59 = vld [vmem:[#allocation49_spill] sm:$0xff] }
 0xdb3   : > { %19867 = vst [vmem:[#allocation97_spill] sm:$0xff] %v15053_v37  ;;  %v15073_v25 = vsel %vm15058_vm13, %v19874_v40, %v19876_v11  ;;  %vm4649_vm7 = vmand %vm19880_vm0, %vm4617_vm12  ;;  %4752 = vmax.xlane.f32.xlu0 %v15063_v23  ;;  %vm19882_vm1 = vnez %v19881_v44  ;;  %v19884_v12 = vld [vmem:[#allocation85_spill] sm:$0xff]  ;;  %vm19888_vm15 = vcmp.eq.f32.partialorder %v14338_v42, %v14741_v41  ;;  %vm19893_vm10 = vnez %v19892_v57 }
 0xdb4   : > { %19877 = vst [vmem:[#allocation80_spill] sm:$0xff] %v15073_v25  ;;  %v19885_v4 = vsel %vm19882_vm1, %v19883_v59, %v19884_v12  ;;  %v15088_v0 = vsel %vm4649_vm7, -1.0, %v19878_v15  ;;  %v19903_v57 = vld [vmem:[#allocation93_spill] sm:$0xff]  ;;  %v19932_v12 = vld [vmem:[#allocation35_spill] sm:$0xff] }
 0xdb5   : > { %v15085_v30 = vsel %vm4649_vm7, %v19883_v59, %v19885_v4  ;;  %19887 = vst [vmem:[#allocation30_spill] sm:$0xff] %v15088_v0  ;;  %4754 = vmax.xlane.f32.xlu1 %v15088_v0  ;;  %v15107_v4 = vsel %vm15058_vm13, -1.0, %v14283_v19  ;;  %v19900_v19 = vld [vmem:[#allocation26_spill] sm:$0xff]  ;;  %v19906_v25 = vld [vmem:[#allocation65_spill] sm:$0xff] }
 0xdb6   : > { %19886 = vst [vmem:[#allocation50_spill] sm:$0xff] %v15085_v30  ;;  %19891 = vst [vmem:[#allocation42_spill] sm:$0xff] %v15107_v4  ;;  %v19898_v30 = vld [vmem:[#allocation74_spill] sm:$0xff]  ;;  %vm19901_vm5 = vnez %v19900_v19  ;;  %vm19907_vm13 = vcmp.eq.f32.partialorder %v14351_v8, %v19906_v25  ;;  %v19912_v19 = vld [vmem:[#allocation51_spill] sm:$0xff] }
 0xdb7   : > { %4756 = vmax.xlane.f32.xlu0 %v15094_v17  ;;  %vm19899_vm14 = vcmp.eq.f32.partialorder %v14311_v31, %v19898_v30  ;;  %v19917_v25 = vld [vmem:[#allocation112_spill] sm:$0xff]  ;;  %v20067_v26 = vld [vmem:[#allocation101_spill] sm:$0xff] }
 0xdb8   : > { %v7425_v11 = vpop.f32.mrb[124].mxu0 }
 0xdb9   : > { %vm4622_vm3 = vcmp.eq.f32.partialorder %v7425_v11, 0.0  ;;  %v4529_v44 = vpop.f32.mrb[125].mxu0  ;;  %v19895_v11 = vld [vmem:[#allocation56_spill] sm:$0xff]  ;;  %4758 = vmax.xlane.f32.xlu1 %v15107_v4 }
 0xdba   : > { %vm15100_vm8 = vmand %vm19888_vm15, %vm4622_vm3  ;;  %vm4620_vm6 = vcmp.eq.f32.partialorder %v4529_v44, 0.0  ;;  %v7426_v15 = vpop.f32.mrb[126].mxu0  ;;  %v19896_v59 = vsel %vm19893_vm10, %v19894_v63, %v19895_v11  ;;  %v19902_v44 = vld [vmem:[#allocation11_spill] sm:$0xff] }
 0xdbb   : > { %v15117_v41 = vsel %vm15100_vm8, %v19894_v63, %v19896_v59  ;;  %vm4652_vm11 = vmand %vm19899_vm14, %vm4620_vm6  ;;  %vm4623_vm4 = vcmp.eq.f32.partialorder %v7426_v15, 0.0  ;;  %v4532_v54 = vpop.f32.mrb[127].mxu0  ;;  %v19904_v40 = vsel %vm19901_vm5, %v19902_v44, %v19903_v57  ;;  %v19910_v15 = vld [vmem:[#allocation102_spill] sm:$0xff]  ;;  %v19913_v63 = vld [vmem:[#allocation15_spill] sm:$0xff]  ;;  %vm19926_vm6 = vcmp.eq.f32.partialorder %v14406_v13, %v14777_v1 }
 0xdbc   : > { %19897 = vst [vmem:[#allocation108_spill] sm:$0xff] %v15117_v41  ;;  %v15129_v11 = vsel %vm4652_vm11, %v19902_v44, %v19904_v40  ;;  %vm15134_vm12 = vmand %vm19907_vm13, %vm4623_vm4  ;;  %vm4621_vm2 = vcmp.eq.f32.partialorder %v4532_v54, 0.0  ;;  %v15139_v30 = vsel %vm4652_vm11, -1.0, %v14311_v31  ;;  %vm19911_vm0 = vnez %v19910_v15  ;;  %v19916_v57 = vld [vmem:[#allocation8_spill] sm:$0xff]  ;;  %v19919_v54 = vld [vmem:[#allocation94_spill] sm:$0xff] }
 0xdbd   : > { %19905 = vst [vmem:[#allocation14_spill] sm:$0xff] %v15129_v11  ;;  %v19914_v41 = vsel %vm19911_vm0, %v19912_v19, %v19913_v63  ;;  %vm19918_vm7 = vcmp.eq.f32.partialorder %v19916_v57, %v19917_v25  ;;  %4760 = vmax.xlane.f32.xlu0 %v15139_v30  ;;  %vm19920_vm3 = vnez %v19919_v54  ;;  %v19921_v31 = vld [vmem:[#allocation52_spill] sm:$0xff]  ;;  %v19922_v44 = vld [vmem:[#allocation91_spill] sm:$0xff]  ;;  %v15170_v25 = vsel %vm15100_vm8, -1.0, %v14338_v42  ;;  %v19930_v42 = vld [vmem:[#allocation81_spill] sm:$0xff] }
 0xdbe   : > { %v15149_v40 = vsel %vm15134_vm12, %v19912_v19, %v19914_v41  ;;  %vm4653_vm1 = vmand %vm19918_vm7, %vm4621_vm2  ;;  %v19923_v11 = vsel %vm19920_vm3, %v19921_v31, %v19922_v44  ;;  %vm19931_vm8 = vnez %v19930_v42  ;;  %vm19936_vm11 = vcmp.eq.f32.partialorder %v14379_v47, %v14759_v48  ;;  %v19940_v42 = vld [vmem:[#allocation88_spill] sm:$0xff]  ;;  %v19943_v19 = vld [vmem:[#allocation58_spill] sm:$0xff] }
 0xdbf   : > { %19915 = vst [vmem:[#allocation66_spill] sm:$0xff] %v15149_v40  ;;  %v15161_v15 = vsel %vm4653_vm1, %v19921_v31, %v19923_v11  ;;  %v15164_v63 = vsel %vm4653_vm1, -1.0, %v19916_v57  ;;  %v15183_v57 = vsel %vm15134_vm12, -1.0, %v14351_v8  ;;  %v19937_v8 = vld [vmem:[#allocation39_spill] sm:$0xff]  ;;  %vm19944_vm12 = vcmp.eq.f32.partialorder %v14419_v29, %v19943_v19  ;;  %v19954_v19 = vld [vmem:[#allocation13_spill] sm:$0xff]  ;;  %v19969_v44 = vld [vmem:[#allocation36_spill] sm:$0xff] }
 0xdc0   : > { %19924 = vst [vmem:[#allocation114_spill] sm:$0xff] %v15161_v15  ;;  %19925 = vst [vmem:[#allocation64_spill] sm:$0xff] %v15164_v63  ;;  %4762 = vmax.xlane.f32.xlu1 %v15164_v63  ;;  %v7429_v41 = vpop.f32.mrb[128].mxu0  ;;  %vm19938_vm13 = vnez %v19937_v8  ;;  %v19949_v8 = vld [vmem:[#allocation54_spill] sm:$0xff]  ;;  %v20057_v40 = vld [vmem:[#allocation44_spill] sm:$0xff] }
 0xdc1   : > { %vm4626_vm15 = vcmp.eq.f32.partialorder %v7429_v41, 0.0  ;;  %4764 = vmax.xlane.f32.xlu0 %v15170_v25  ;;  %v4545_v54 = vpop.f32.mrb[129].mxu0  ;;  %19929 = vst [vmem:[#allocation43_spill] sm:$0xff] %v15183_v57  ;;  %v19933_v41 = vld [vmem:[#allocation92_spill] sm:$0xff]  ;;  %v20114_v14 = vld [vmem:[#allocation42_spill] sm:$0xff] }
 0xdc2   : > { %vm15176_vm10 = vmand %vm19926_vm6, %vm4626_vm15  ;;  %vm4624_vm14 = vcmp.eq.f32.partialorder %v4545_v54, 0.0  ;;  %v7430_v11 = vpop.f32.mrb[130].mxu0  ;;  %v19934_v31 = vsel %vm19931_vm8, %v19932_v12, %v19933_v41  ;;  %v19939_v54 = vld [vmem:[#allocation16_spill] sm:$0xff]  ;;  %v20122_v6 = vld [vmem:[#allocation30_spill] sm:$0xff] }
 0xdc3   : > { %v15193_v1 = vsel %vm15176_vm10, %v19932_v12, %v19934_v31  ;;  %vm4656_vm4 = vmand %vm19936_vm11, %vm4624_vm14  ;;  %vm4627_vm5 = vcmp.eq.f32.partialorder %v7430_v11, 0.0  ;;  %v4548_v59 = vpop.f32.mrb[131].mxu0  ;;  %v19941_v15 = vsel %vm19938_vm13, %v19939_v54, %v19940_v42  ;;  %v19947_v11 = vld [vmem:[#allocation95_spill] sm:$0xff]  ;;  %v19950_v12 = vld [vmem:[#allocation33_spill] sm:$0xff]  ;;  %vm19963_vm14 = vcmp.eq.f32.partialorder %v14474_v28, %v14807_v60 }
 0xdc4   : > { %19935 = vst [vmem:[#allocation76_spill] sm:$0xff] %v15193_v1  ;;  %4766 = vmax.xlane.f32.xlu1 %v15183_v57  ;;  %v15205_v41 = vsel %vm4656_vm4, %v19939_v54, %v19941_v15  ;;  %vm15210_vm2 = vmand %vm19944_vm12, %vm4627_vm5  ;;  %vm4625_vm0 = vcmp.eq.f32.partialorder %v4548_v59, 0.0  ;;  %v15215_v48 = vsel %vm4656_vm4, -1.0, %v14379_v47  ;;  %vm19948_vm7 = vnez %v19947_v11  ;;  %v19953_v42 = vld [vmem:[#allocation103_spill] sm:$0xff]  ;;  %v19956_v59 = vld [vmem:[#allocation18_spill] sm:$0xff] }
 0xdc5   : > { %19942 = vst [vmem:[#allocation71_spill] sm:$0xff] %v15205_v41  ;;  %v19951_v1 = vsel %vm19948_vm7, %v19949_v8, %v19950_v12  ;;  %vm19955_vm1 = vcmp.eq.f32.partialorder %v19953_v42, %v19954_v19  ;;  %4768 = vmax.xlane.f32.xlu0 %v15215_v48  ;;  %vm19957_vm15 = vnez %v19956_v59  ;;  %v19958_v47 = vld [vmem:[#allocation55_spill] sm:$0xff]  ;;  %v19959_v54 = vld [vmem:[#allocation86_spill] sm:$0xff]  ;;  %v15246_v19 = vsel %vm15176_vm10, -1.0, %v14406_v13  ;;  %v19967_v13 = vld [vmem:[#allocation21_spill] sm:$0xff] }
 0xdc6   : > { %v15225_v15 = vsel %vm15210_vm2, %v19949_v8, %v19951_v1  ;;  %vm4657_vm3 = vmand %vm19955_vm1, %vm4625_vm0  ;;  %v19960_v41 = vsel %vm19957_vm15, %v19958_v47, %v19959_v54  ;;  %vm19968_vm10 = vnez %v19967_v13  ;;  %vm19973_vm4 = vcmp.eq.f32.partialorder %v14447_v33, %v14792_v56  ;;  %v19977_v13 = vld [vmem:[#allocation53_spill] sm:$0xff]  ;;  %v19980_v8 = vld [vmem:[#allocation107_spill] sm:$0xff] }
 0xdc7   : > { %19952 = vst [vmem:[#allocation9_spill] sm:$0xff] %v15225_v15  ;;  %v15237_v11 = vsel %vm4657_vm3, %v19958_v47, %v19960_v41  ;;  %v15240_v12 = vsel %vm4657_vm3, -1.0, %v19953_v42  ;;  %v15259_v42 = vsel %vm15210_vm2, -1.0, %v14419_v29  ;;  %v19974_v29 = vld [vmem:[#allocation98_spill] sm:$0xff]  ;;  %v20007_v54 = vld [vmem:[#allocation17_spill] sm:$0xff] }
 0xdc8   : > { %19961 = vst [vmem:[#allocation62_spill] sm:$0xff] %v15237_v11  ;;  %19962 = vst [vmem:[#allocation113_spill] sm:$0xff] %v15240_v12  ;;  %4770 = vmax.xlane.f32.xlu1 %v15240_v12  ;;  %vm19975_vm12 = vnez %v19974_v29  ;;  %v19981_v15 = vld [vmem:[#allocation10_spill] sm:$0xff]  ;;  %v19987_v29 = vld [vmem:[#allocation57_spill] sm:$0xff] }
 0xdc9   : > { %v7433_v1 = vpop.f32.mrb[132].mxu0  ;;  %4772 = vmax.xlane.f32.xlu0 %v15246_v19  ;;  %19966 = vst [vmem:[#allocation82_spill] sm:$0xff] %v15259_v42  ;;  %vm19982_vm2 = vcmp.eq.f32.partialorder %v19980_v8, %v19981_v15  ;;  %v19992_v15 = vld [vmem:[#allocation111_spill] sm:$0xff] }
 0xdca   : > { %vm4630_vm6 = vcmp.eq.f32.partialorder %v7433_v1, 0.0  ;;  %v4561_v59 = vpop.f32.mrb[133].mxu0  ;;  %v19970_v1 = vld [vmem:[#allocation70_spill] sm:$0xff] }
 0xdcb   : > { %vm15252_vm8 = vmand %vm19963_vm14, %vm4630_vm6  ;;  %vm4628_vm11 = vcmp.eq.f32.partialorder %v4561_v59, 0.0  ;;  %v7434_v41 = vpop.f32.mrb[134].mxu0  ;;  %v19971_v47 = vsel %vm19968_vm10, %v19969_v44, %v19970_v1  ;;  %v19976_v59 = vld [vmem:[#allocation22_spill] sm:$0xff] }
 0xdcc   : > { %v15269_v60 = vsel %vm15252_vm8, %v19969_v44, %v19971_v47  ;;  %vm4660_vm5 = vmand %vm19973_vm4, %vm4628_vm11  ;;  %vm4631_vm13 = vcmp.eq.f32.partialorder %v7434_v41, 0.0  ;;  %4774 = vmax.xlane.f32.xlu1 %v15259_v42  ;;  %v4564_v31 = vpop.f32.mrb[135].mxu0  ;;  %v19978_v11 = vsel %vm19975_vm12, %v19976_v59, %v19977_v13  ;;  %v19985_v41 = vld [vmem:[#allocation23_spill] sm:$0xff]  ;;  %v19988_v44 = vld [vmem:[#allocation78_spill] sm:$0xff]  ;;  %vm20001_vm11 = vcmp.eq.f32.partialorder %v14542_v39, %v14837_v38 }
 0xdcd   : > { %19972 = vst [vmem:[#allocation96_spill] sm:$0xff] %v15269_v60  ;;  %v15281_v1 = vsel %vm4660_vm5, %v19976_v59, %v19978_v11  ;;  %vm15286_vm0 = vmand %vm19982_vm2, %vm4631_vm13  ;;  %vm4629_vm7 = vcmp.eq.f32.partialorder %v4564_v31, 0.0  ;;  %v15291_v56 = vsel %vm4660_vm5, -1.0, %v14447_v33  ;;  %vm19986_vm1 = vnez %v19985_v41  ;;  %v19991_v13 = vld [vmem:[#allocation100_spill] sm:$0xff]  ;;  %v19997_v59 = vld [vmem:[#allocation47_spill] sm:$0xff] }
 0xdce   : > { %19979 = vst [vmem:[#allocation38_spill] sm:$0xff] %v15281_v1  ;;  %v19989_v60 = vsel %vm19986_vm1, %v19987_v29, %v19988_v44  ;;  %vm19993_vm3 = vcmp.eq.f32.partialorder %v19991_v13, %v19992_v15  ;;  %4776 = vmax.xlane.f32.xlu0 %v15291_v56  ;;  %v19994_v31 = vld [vmem:[#allocation12_spill] sm:$0xff]  ;;  %v15322_v15 = vsel %vm15252_vm8, -1.0, %v14474_v28  ;;  %v20005_v28 = vld [vmem:[#allocation87_spill] sm:$0xff]  ;;  %vm20011_vm5 = vcmp.eq.f32.partialorder %v14515_v46, %v14822_v58 }
 0xdcf   : > { %v15301_v11 = vsel %vm15286_vm0, %v19987_v29, %v19989_v60  ;;  %vm4661_vm15 = vmand %vm19993_vm3, %vm4629_vm7  ;;  %vm19995_vm6 = vnez %v19994_v31  ;;  %v19996_v33 = vld [vmem:[#allocation20_spill] sm:$0xff]  ;;  %vm20006_vm8 = vnez %v20005_v28  ;;  %v20015_v28 = vld [vmem:[#allocation110_spill] sm:$0xff] }
 0xdd0   : > { %19990 = vst [vmem:[#allocation84_spill] sm:$0xff] %v15301_v11  ;;  %v19998_v1 = vsel %vm19995_vm6, %v19996_v33, %v19997_v59  ;;  %v15316_v44 = vsel %vm4661_vm15, -1.0, %v19991_v13  ;;  %v15335_v13 = vsel %vm15286_vm0, -1.0, %v19980_v8  ;;  %v20012_v8 = vld [vmem:[#allocation32_spill] sm:$0xff]  ;;  %v20018_v29 = vld [vmem:[#allocation106_spill] sm:$0xff]  ;;  %v20019_v11 = vld [vmem:[#allocation83_spill] sm:$0xff] }
 0xdd1   : > { %v15313_v41 = vsel %vm4661_vm15, %v19996_v33, %v19998_v1  ;;  %20000 = vst [vmem:[#allocation25_spill] sm:$0xff] %v15316_v44  ;;  %4778 = vmax.xlane.f32.xlu1 %v15316_v44  ;;  %v7437_v60 = vpop.f32.mrb[136].mxu0  ;;  %20004 = vst [vmem:[#allocation56_spill] sm:$0xff] %v15335_v13  ;;  %vm20013_vm2 = vnez %v20012_v8  ;;  %vm20020_vm0 = vcmp.eq.f32.partialorder %v20018_v29, %v20019_v11  ;;  %v20025_v8 = vld [vmem:[#allocation59_spill] sm:$0xff]  ;;  %v20044_v59 = vld [vmem:[#allocation60_spill] sm:$0xff] }
 0xdd2   : > { %19999 = vst [vmem:[#allocation85_spill] sm:$0xff] %v15313_v41  ;;  %vm4634_vm14 = vcmp.eq.f32.partialorder %v7437_v60, 0.0  ;;  %4780 = vmax.xlane.f32.xlu0 %v15322_v15  ;;  %v4577_v31 = vpop.f32.mrb[137].mxu0  ;;  %v20008_v60 = vld [vmem:[#allocation99_spill] sm:$0xff] }
 0xdd3   : > { %vm15328_vm10 = vmand %vm20001_vm11, %vm4634_vm14  ;;  %vm4632_vm4 = vcmp.eq.f32.partialorder %v4577_v31, 0.0  ;;  %v7438_v1 = vpop.f32.mrb[138].mxu0  ;;  %v20009_v33 = vsel %vm20006_vm8, %v20007_v54, %v20008_v60  ;;  %v20014_v31 = vld [vmem:[#allocation29_spill] sm:$0xff]  ;;  %v20030_v11 = vld [vmem:[#allocation79_spill] sm:$0xff] }
 0xdd4   : > { %v15345_v38 = vsel %vm15328_vm10, %v20007_v54, %v20009_v33  ;;  %vm4664_vm13 = vmand %vm20011_vm5, %vm4632_vm4  ;;  %vm4635_vm12 = vcmp.eq.f32.partialorder %v7438_v1, 0.0  ;;  %v4580_v47 = vpop.f32.mrb[139].mxu0  ;;  %v20016_v41 = vsel %vm20013_vm2, %v20014_v31, %v20015_v28  ;;  %v20023_v1 = vld [vmem:[#allocation105_spill] sm:$0xff]  ;;  %v20029_v28 = vld [vmem:[#allocation19_spill] sm:$0xff]  ;;  %vm20039_vm4 = vcmp.eq.f32.partialorder %v14610_v53, %v14867_v5 }
 0xdd5   : > { %20010 = vst [vmem:[#allocation74_spill] sm:$0xff] %v15345_v38  ;;  %4782 = vmax.xlane.f32.xlu1 %v15335_v13  ;;  %v15357_v60 = vsel %vm4664_vm13, %v20014_v31, %v20016_v41  ;;  %vm15362_vm7 = vmand %vm20020_vm0, %vm4635_vm12  ;;  %vm4633_vm1 = vcmp.eq.f32.partialorder %v4580_v47, 0.0  ;;  %v15367_v58 = vsel %vm4664_vm13, -1.0, %v14515_v46  ;;  %vm20024_vm3 = vnez %v20023_v1  ;;  %v20026_v54 = vld [vmem:[#allocation5_spill] sm:$0xff]  ;;  %v20032_v47 = vld [vmem:[#allocation72_spill] sm:$0xff] }
 0xdd6   : > { %20017 = vst [vmem:[#allocation26_spill] sm:$0xff] %v15357_v60  ;;  %v20027_v38 = vsel %vm20024_vm3, %v20025_v8, %v20026_v54  ;;  %vm20031_vm15 = vcmp.eq.f32.partialorder %v20029_v28, %v20030_v11  ;;  %4784 = vmax.xlane.f32.xlu0 %v15367_v58  ;;  %vm20033_vm14 = vnez %v20032_v47  ;;  %v20034_v46 = vld [vmem:[#allocation40_spill] sm:$0xff]  ;;  %v20035_v31 = vld [vmem:[#allocation27_spill] sm:$0xff]  ;;  %v15398_v11 = vsel %vm15328_vm10, -1.0, %v14542_v39 }
 0xdd7   : > { %v15377_v41 = vsel %vm15362_vm7, %v20025_v8, %v20027_v38  ;;  %vm4665_vm6 = vmand %vm20031_vm15, %vm4633_vm1  ;;  %v20036_v60 = vsel %vm20033_vm14, %v20034_v46, %v20035_v31  ;;  %v20049_v8 = vld [vmem:[#allocation104_spill] sm:$0xff]  ;;  %v20054_v39 = vld [vmem:[#allocation31_spill] sm:$0xff] }
 0xdd8   : > { %20028 = vst [vmem:[#allocation93_spill] sm:$0xff] %v15377_v41  ;;  %v15389_v1 = vsel %vm4665_vm6, %v20034_v46, %v20036_v60  ;;  %v15392_v54 = vsel %vm4665_vm6, -1.0, %v20029_v28  ;;  %v15411_v28 = vsel %vm15362_vm7, -1.0, %v20018_v29  ;;  %v20051_v29 = vld [vmem:[#allocation69_spill] sm:$0xff] }
 0xdd9   : > { %20037 = vst [vmem:[#allocation65_spill] sm:$0xff] %v15389_v1  ;;  %20038 = vst [vmem:[#allocation102_spill] sm:$0xff] %v15392_v54  ;;  %4786 = vmax.xlane.f32.xlu1 %v15392_v54  ;;  %v20048_v1 = vld [vmem:[#allocation24_spill] sm:$0xff]  ;;  %vm20052_vm2 = vnez %v20051_v29 }
 0xdda   : > { %4788 = vmax.xlane.f32.xlu0 %v15398_v11  ;;  %20042 = vst [vmem:[#allocation15_spill] sm:$0xff] %v15411_v28  ;;  %vm20050_vm10 = vcmp.eq.f32.partialorder %v20048_v1, %v20049_v8 }
 0xddd   : > { %v7441_v38 = vpop.f32.mrb[140].mxu0  ;;  %4790 = vmax.xlane.f32.xlu1 %v15411_v28 }
 0xdde   : > { %vm4638_vm11 = vcmp.eq.f32.partialorder %v7441_v38, 0.0  ;;  %v4593_v47 = vpop.f32.mrb[141].mxu0  ;;  %v20045_v38 = vld [vmem:[#allocation77_spill] sm:$0xff] }
 0xddf   : > { %vm15404_vm8 = vmand %vm20039_vm4, %vm4638_vm11  ;;  %vm4636_vm5 = vcmp.eq.f32.partialorder %v4593_v47, 0.0  ;;  %v7442_v60 = vpop.f32.mrb[142].mxu0  ;;  %v20046_v46 = vsel %vm14548_vm9, %v20044_v59, %v20045_v38  ;;  %v20053_v47 = vld [vmem:[#allocation61_spill] sm:$0xff]  ;;  %vm20058_vm9 = vcmp.eq.f32.partialorder %v14616_v16, %v20057_v40 }
 0xde0   : > { %v15421_v5 = vsel %vm15404_vm8, %v20044_v59, %v20046_v46  ;;  %vm4668_vm13 = vmand %vm20050_vm10, %vm4636_vm5  ;;  %vm4639_vm12 = vcmp.eq.f32.partialorder %v7442_v60, 0.0  ;;  %v4596_v33 = vpop.f32.mrb[143].mxu0  ;;  %v20055_v41 = vsel %vm20052_vm2, %v20053_v47, %v20054_v39  ;;  %v20060_v46 = vld [vmem:[#allocation67_spill] sm:$0xff]  ;;  %v20062_v60 = vld [vmem:[#allocation41_spill] sm:$0xff] }
 0xde1   : > { %20047 = vst [vmem:[#allocation8_spill] sm:$0xff] %v15421_v5  ;;  %v15433_v38 = vsel %vm4668_vm13, %v20053_v47, %v20055_v41  ;;  %vm4671_vm0 = vmand %vm20058_vm9, %vm4639_vm12  ;;  %vm4637_vm7 = vcmp.eq.f32.partialorder %v4596_v33, 0.0  ;;  %v15439_v8 = vsel %vm4668_vm13, -1.0, %v20048_v1  ;;  %vm20061_vm1 = vnez %v20060_v46  ;;  %v20063_v59 = vld [vmem:[#allocation28_spill] sm:$0xff]  ;;  %v20066_v39 = vld [vmem:[#allocation109_spill] sm:$0xff] }
 0xde2   : > { %20056 = vst [vmem:[#allocation112_spill] sm:$0xff] %v15433_v38  ;;  %20059 = vst [vmem:[#allocation94_spill] sm:$0xff] %v15439_v8  ;;  %v20064_v5 = vsel %vm20061_vm1, %v20062_v60, %v20063_v59  ;;  %vm20068_vm3 = vcmp.eq.f32.partialorder %v20066_v39, %v20067_v26  ;;  %4792 = vmax.xlane.f32.xlu0 %v15439_v8  ;;  %v20069_v40 = vld [vmem:[#allocation89_spill] sm:$0xff]  ;;  %v20071_v41 = vld [vmem:[#allocation63_spill] sm:$0xff]  ;;  %v15468_v26 = vsel %vm15404_vm8, -1.0, %v14610_v53  ;;  %v15472_v59 = vsel %vm4671_vm0, -1.0, %v14616_v16 }
 0xde3   : > { %v15447_v29 = vsel %vm4671_vm0, %v20062_v60, %v20064_v5  ;;  %vm4669_vm15 = vmand %vm20068_vm3, %vm4637_vm7  ;;  %vm20070_vm6 = vnez %v20069_v40  ;;  %v20072_v33 = vld [vmem:[#allocation75_spill] sm:$0xff]  ;;  %v20076_v53 = vmov 1.0|1.0  }
 0xde4   : > { %20065 = vst [vmem:[#allocation91_spill] sm:$0xff] %v15447_v29  ;;  %v20073_v1 = vsel %vm20070_vm6, %v20071_v41, %v20072_v33  ;;  %v15462_v46 = vsel %vm4669_vm15, -1.0, %v20066_v39 }
 0xde5   : > { %v15459_v47 = vsel %vm4669_vm15, %v20071_v41, %v20073_v1  ;;  %20075 = vst [vmem:[#allocation92_spill] sm:$0xff] %v15462_v46  ;;  %4794 = vmax.xlane.f32.xlu1 %v15462_v46 }
 0xde6   : > { %20074 = vst [vmem:[#allocation81_spill] sm:$0xff] %v15459_v47  ;;  %4796 = vmax.xlane.f32.xlu0 %v15468_v26 }
 0xde9   : > { %4798 = vmax.xlane.f32.xlu1 %v15472_v59 }
 0xdec   : > { %v20274_v22 = vld [vmem:[#allocation92_spill] sm:$0xff] }
 0xe2d   : > { %v15475_v5 = vpop.xlane.xlu0 %4736 }
 0xe2e   : > { %vm4800_vm14 = vcmp.eq.f32.partialorder %v14919_v2, %v15475_v5 }
 0xe2f   : > { %v15477_v40 = vpop.xlane.xlu1 %4738 }
 0xe30   : > { %vm4801_vm11 = vcmp.eq.f32.partialorder %v14944_v10, %v15477_v40 }
 0xe31   : > { %vm6600_vm4 = vmpackc.low %vm4801_vm11, %vm4800_vm14  ;;  %v15489_v16 = vpop.xlane.xlu0 %4740 }
 0xe32   : > { %7459 = vmatprep.mubr.msk.bf16.mxu1 %vm6600_vm4, %v20076_v53  ;;  %vm4802_vm8 = vcmp.eq.f32.partialorder %v14950_v32, %v15489_v16 }
 0xe33   : > { %v15492_v31 = vpop.xlane.xlu1 %4742 }
 0xe34   : > { %vm4803_vm5 = vcmp.eq.f32.partialorder %v14963_v34, %v15492_v31 }
 0xe35   : > { %vm6602_vm10 = vmpackc.low %vm4803_vm5, %vm4802_vm8  ;;  %v15504_v39 = vpop.xlane.xlu0 %4744 }
 0xe36   : > { %7460 = vmatmul.mubr.msk.bf16.vlgmr.msra.gmra.mrb[144].mxu1 %vm6602_vm10, %v20076_v53  ;;  %vm4804_vm13 = vcmp.eq.f32.partialorder %v14991_v55, %v15504_v39 }
 0xe37   : > { %v15507_v33 = vpop.xlane.xlu1 %4746 }
 0xe38   : > { %vm4805_vm12 = vcmp.eq.f32.partialorder %v15014_v62, %v15507_v33 }
 0xe39   : > { %vm6604_vm2 = vmpackc.low %vm4805_vm12, %vm4804_vm13  ;;  %v15519_v1 = vpop.xlane.xlu0 %4748 }
 0xe3a   : > { %7463 = vmatprep.mubr.msk.bf16.mxu1 %vm6604_vm2, %v20076_v53  ;;  %vm4806_vm9 = vcmp.eq.f32.partialorder %v15020_v27, %v15519_v1  ;;  %v20316_v1 = vld [vmem:[#allocation46_spill] sm:$0xff] }
 0xe3b   : > { %v15522_v41 = vpop.xlane.xlu1 %4750 }
 0xe3c   : > { %vm4807_vm0 = vcmp.eq.f32.partialorder %v15024_v36, %v15522_v41  ;;  %v20104_v41 = vmov 0 }
 0xe3d   : > { %vm6606_vm7 = vmpackc.low %vm4807_vm0, %vm4806_vm9 }
 0xe3e   : > { %7464 = vmatmul.mubr.msk.bf16.gmra.mrb[148].mxu1 %vm6606_vm7, %v20076_v53 }
 0xe40   : > { %v15534_v47 = vpop.xlane.xlu0 %4752 }
 0xe41   : > { %vm4808_vm1 = vcmp.eq.f32.partialorder %v15063_v23, %v15534_v47 }
 0xe42   : > { %v15537_v60 = vpop.xlane.xlu1 %4754 }
 0xe43   : > { %20077 = vst [vmem:[#allocation39_spill] sm:$0xff] %v15537_v60  ;;  %vm17977_vm3 = vcmp.eq.f32.partialorder %v15088_v0, %v15537_v60 }
 0xe44   : > { %vm6608_vm15 = vmpackc.low %vm17977_vm3, %vm4808_vm1  ;;  %v15549_v29 = vpop.xlane.xlu0 %4756 }
 0xe45   : > { %7467 = vmatprep.mubr.msk.bf16.mxu1 %vm6608_vm15, %v20076_v53  ;;  %vm4810_vm6 = vcmp.eq.f32.partialorder %v15094_v17, %v15549_v29 }
 0xe46   : > { %v15552_v38 = vpop.xlane.xlu1 %4758 }
 0xe47   : > { %20078 = vst [vmem:[#allocation88_spill] sm:$0xff] %v15552_v38  ;;  %vm17978_vm4 = vcmp.eq.f32.partialorder %v15107_v4, %v15552_v38 }
 0xe48   : > { %vm6610_vm10 = vmpackc.low %vm17978_vm4, %vm4810_vm6 }
 0xe49   : > { %7468 = vmatmul.mubr.msk.bf16.gmra.mrb[152].mxu1 %vm6610_vm10, %v20076_v53 }
 0xe4a   : > { %v15564_v60 = vpop.xlane.xlu0 %4760 }
 0xe4b   : > { %vm17983_vm2 = vcmp.eq.f32.partialorder %v15139_v30, %v15564_v60 }
 0xe4d   : > { %v15567_v0 = vpop.xlane.xlu1 %4762 }
 0xe4e   : > { %20079 = vst [vmem:[#allocation58_spill] sm:$0xff] %v15567_v0  ;;  %vm17982_vm7 = vcmp.eq.f32.partialorder %v15164_v63, %v15567_v0  ;;  %v15579_v38 = vpop.xlane.xlu0 %4764  ;;  %v20115_v43 = vld [vmem:[#allocation88_spill] sm:$0xff] }
 0xe4f   : > { %vm6612_vm15 = vmpackc.low %vm17982_vm7, %vm17983_vm2  ;;  %vm17988_vm10 = vcmp.eq.f32.partialorder %v15170_v25, %v15579_v38 }
 0xe50   : > { %7471 = vmatprep.mubr.msk.bf16.mxu1 %vm6612_vm15, %v20076_v53 }
 0xe51   : > { %v15582_v4 = vpop.xlane.xlu1 %4766 }
 0xe52   : > { %20080 = vst [vmem:[#allocation95_spill] sm:$0xff] %v15582_v4  ;;  %vm17987_vm3 = vcmp.eq.f32.partialorder %v15183_v57, %v15582_v4  ;;  %v15594_v0 = vpop.xlane.xlu0 %4768 }
 0xe53   : > { %vm6614_vm4 = vmpackc.low %vm17987_vm3, %vm17988_vm10  ;;  %vm17993_vm15 = vcmp.eq.f32.partialorder %v15215_v48, %v15594_v0 }
 0xe54   : > { %7472 = vmatmul.mubr.msk.bf16.gmra.mrb[156].mxu1 %vm6614_vm4, %v20076_v53 }
 0xe55   : > { %v15597_v63 = vpop.xlane.xlu1 %4770 }
 0xe56   : > { %20081 = vst [vmem:[#allocation33_spill] sm:$0xff] %v15597_v63  ;;  %vm17992_vm7 = vcmp.eq.f32.partialorder %v15240_v12, %v15597_v63  ;;  %v15609_v4 = vpop.xlane.xlu0 %4772 }
 0xe57   : > { %vm6616_vm2 = vmpackc.low %vm17992_vm7, %vm17993_vm15  ;;  %vm17998_vm4 = vcmp.eq.f32.partialorder %v15246_v19, %v15609_v4 }
 0xe58   : > { %7475 = vmatprep.mubr.msk.bf16.mxu1 %vm6616_vm2, %v20076_v53 }
 0xe59   : > { %v15612_v57 = vpop.xlane.xlu1 %4774 }
 0xe5a   : > { %20082 = vst [vmem:[#allocation103_spill] sm:$0xff] %v15612_v57  ;;  %vm17997_vm3 = vcmp.eq.f32.partialorder %v15259_v42, %v15612_v57 }
 0xe5b   : > { %vm6618_vm10 = vmpackc.low %vm17997_vm3, %vm17998_vm4  ;;  %v15624_v63 = vpop.xlane.xlu0 %4776 }
 0xe5c   : > { %7476 = vmatmul.mubr.msk.bf16.gmra.mrb[160].mxu1 %vm6618_vm10, %v20076_v53  ;;  %vm18003_vm2 = vcmp.eq.f32.partialorder %v15291_v56, %v15624_v63 }
 0xe5e   : > { %v15627_v12 = vpop.xlane.xlu1 %4778 }
 0xe5f   : > { %20083 = vst [vmem:[#allocation13_spill] sm:$0xff] %v15627_v12  ;;  %vm18002_vm7 = vcmp.eq.f32.partialorder %v15316_v44, %v15627_v12  ;;  %v15639_v57 = vpop.xlane.xlu0 %4780 }
 0xe60   : > { %vm6620_vm15 = vmpackc.low %vm18002_vm7, %vm18003_vm2  ;;  %vm18008_vm10 = vcmp.eq.f32.partialorder %v15322_v15, %v15639_v57 }
 0xe61   : > { %7479 = vmatprep.mubr.msk.bf16.mxu1 %vm6620_vm15, %v20076_v53 }
 0xe62   : > { %v15642_v42 = vpop.xlane.xlu1 %4782 }
 0xe63   : > { %20084 = vst [vmem:[#allocation18_spill] sm:$0xff] %v15642_v42  ;;  %vm18007_vm3 = vcmp.eq.f32.partialorder %v15335_v13, %v15642_v42  ;;  %v15654_v12 = vpop.xlane.xlu0 %4784 }
 0xe64   : > { %vm6622_vm4 = vmpackc.low %vm18007_vm3, %vm18008_vm10  ;;  %vm18013_vm15 = vcmp.eq.f32.partialorder %v15367_v58, %v15654_v12 }
 0xe65   : > { %7480 = vmatmul.mubr.msk.bf16.gmra.mrb[164].mxu1 %vm6622_vm4, %v20076_v53 }
 0xe66   : > { %v15657_v44 = vpop.xlane.xlu1 %4786 }
 0xe67   : > { %20085 = vst [vmem:[#allocation86_spill] sm:$0xff] %v15657_v44  ;;  %vm18012_vm7 = vcmp.eq.f32.partialorder %v15392_v54, %v15657_v44  ;;  %v15669_v42 = vpop.xlane.xlu0 %4788 }
 0xe68   : > { %vm6624_vm2 = vmpackc.low %vm18012_vm7, %vm18013_vm15  ;;  %vm18018_vm4 = vcmp.eq.f32.partialorder %v15398_v11, %v15669_v42 }
 0xe69   : > { %7483 = vmatprep.mubr.msk.bf16.mxu1 %vm6624_vm2, %v20076_v53 }
 0xe6a   : > { %v15672_v13 = vpop.xlane.xlu1 %4790 }
 0xe6b   : > { %20086 = vst [vmem:[#allocation21_spill] sm:$0xff] %v15672_v13  ;;  %vm18017_vm3 = vcmp.eq.f32.partialorder %v15411_v28, %v15672_v13 }
 0xe6c   : > { %vm6626_vm10 = vmpackc.low %vm18017_vm3, %vm18018_vm4 }
 0xe6d   : > { %7484 = vmatmul.mubr.msk.bf16.gmra.mrb[168].mxu1 %vm6626_vm10, %v20076_v53 }
 0xe6f   : > { %v15684_v44 = vpop.xlane.xlu0 %4792 }
 0xe70   : > { %20087 = vst [vmem:[#allocation70_spill] sm:$0xff] %v15684_v44  ;;  %vm18026_vm2 = vcmp.eq.f32.partialorder %v15439_v8, %v15684_v44 }
 0xe72   : > { %v15687_v54 = vpop.xlane.xlu1 %4794 }
 0xe73   : > { %20088 = vst [vmem:[#allocation98_spill] sm:$0xff] %v15687_v54  ;;  %vm18023_vm7 = vcmp.eq.f32.partialorder %v15462_v46, %v15687_v54  ;;  %v15699_v13 = vpop.xlane.xlu0 %4796  ;;  %v7909_v54 = vld [vmem:[%s16969_s1] sm:$0xf] }
 0xe74   : > { %vm6628_vm15 = vmpackc.low %vm18023_vm7, %vm18026_vm2  ;;  %vm18033_vm10 = vcmp.eq.f32.partialorder %v15468_v26, %v15699_v13 }
 0xe75   : > { %7487 = vmatprep.mubr.msk.bf16.mxu1 %vm6628_vm15, %v20076_v53 }
 0xe76   : > { %v15702_v28 = vpop.xlane.xlu1 %4798 }
 0xe77   : > { %20089 = vst [vmem:[#allocation53_spill] sm:$0xff] %v15702_v28  ;;  %vm18029_vm3 = vcmp.eq.f32.partialorder %v15472_v59, %v15702_v28 }
 0xe78   : > { %vm6630_vm4 = vmpackc.low %vm18029_vm3, %vm18033_vm10 }
 0xe79   : > { %7488 = vmatmul.mubr.msk.bf16.gmra.mrb[172].mxu1 %vm6630_vm4, %v20076_v53 }
 0xe7a   : > { %7007 = vmatprep.mubr.f32.mxu1 %v7909_v54 }
 0xf09   : > { %v7461_v46 = vpop.f32.mrb[144].mxu1 }
 0xf0a   : > { %vm5075_vm15 = vcmp.eq.f32.partialorder %v7461_v46, 0.0  ;;  %v4946_v44 = vpop.f32.mrb[145].mxu1 }
 0xf0b   : > { %vm15721_vm7 = vmand %vm4802_vm8, %vm5075_vm15  ;;  %vm5073_vm2 = vcmp.eq.f32.partialorder %v4946_v44, 0.0  ;;  %v7462_v28 = vpop.f32.mrb[146].mxu1 }
 0xf0c   : > { %vm15732_vm4 = vmand %vm4800_vm14, %vm5073_vm2  ;;  %vm5076_vm3 = vcmp.eq.f32.partialorder %v7462_v28, 0.0  ;;  %v4949_v46 = vpop.f32.mrb[147].mxu1  ;;  %v15777_v40 = vsel %vm15721_vm7, -1.0, %v14950_v32 }
 0xf0d   : > { %vm15743_vm8 = vmand %vm4803_vm5, %vm5076_vm3  ;;  %vm5074_vm15 = vcmp.eq.f32.partialorder %v4949_v46, 0.0  ;;  %v15750_v5 = vsel %vm15732_vm4, -1.0, %v14919_v2 }
 0xf0e   : > { %vm15759_vm14 = vmand %vm4801_vm11, %vm5074_vm15  ;;  %5201 = vmax.xlane.f32.xlu0 %v15750_v5  ;;  %v15790_v53 = vsel %vm15743_vm8, -1.0, %v14963_v34 }
 0xf0f   : > { %v15771_v46 = vsel %vm15759_vm14, -1.0, %v14944_v10 }
 0xf10   : > { %5203 = vmax.xlane.f32.xlu1 %v15771_v46 }
 0xf11   : > { %v7465_v28 = vpop.f32.mrb[148].mxu1 }
 0xf12   : > { %vm5079_vm11 = vcmp.eq.f32.partialorder %v7465_v28, 0.0  ;;  %5205 = vmax.xlane.f32.xlu0 %v15777_v40  ;;  %v4962_v44 = vpop.f32.mrb[149].mxu1  ;;  %v20102_v28 = vmov 0 }
 0xf13   : > { %vm15783_vm5 = vmand %vm4806_vm9, %vm5079_vm11  ;;  %vm5077_vm3 = vcmp.eq.f32.partialorder %v4962_v44, 0.0  ;;  %v7466_v10 = vpop.f32.mrb[150].mxu1 }
 0xf14   : > { %vm15799_vm2 = vmand %vm4804_vm13, %vm5077_vm3  ;;  %vm5080_vm9 = vcmp.eq.f32.partialorder %v7466_v10, 0.0  ;;  %5207 = vmax.xlane.f32.xlu1 %v15790_v53  ;;  %v4965_v44 = vpop.f32.mrb[151].mxu1  ;;  %v15845_v33 = vsel %vm15783_vm5, -1.0, %v15020_v27 }
 0xf15   : > { %vm15811_vm15 = vmand %vm4807_vm0, %vm5080_vm9  ;;  %vm5078_vm13 = vcmp.eq.f32.partialorder %v4965_v44, 0.0  ;;  %v15818_v39 = vsel %vm15799_vm2, -1.0, %v14991_v55  ;;  %v20308_v54 = vsel %vm15799_vm2, %v9072_v50, %v14985_v3 }
 0xf16   : > { %v20103_v28 = vsel %vm15811_vm15, 4294967295, %v20102_v28  ;;  %vm15827_vm11 = vmand %vm4805_vm12, %vm5078_vm13  ;;  %5209 = vmax.xlane.f32.xlu0 %v15818_v39  ;;  %v15851_v55 = vsel %vm15811_vm15, -1.0, %v15024_v36  ;;  %v20110_v36 = vmov 0  ;;  %vm20116_vm13 = vcmp.eq.f32.partialorder %v20114_v14, %v20115_v43 }
 0xf17   : > { %v20105_v41 = vsel %vm15827_vm11, 4294967295, %v20104_v41  ;;  %v15839_v44 = vsel %vm15827_vm11, -1.0, %v15014_v62  ;;  %v20107_v62 = vmov 0  ;;  %v20125_v43 = vmov 0 }
 0xf18   : > { %20106 = vst [vmem:[#allocation107_spill] sm:$0xff] %v20105_v41  ;;  %5211 = vmax.xlane.f32.xlu1 %v15839_v44  ;;  %v20117_v41 = vmov 0 }
 0xf1a   : > { %5213 = vmax.xlane.f32.xlu0 %v15845_v33 }
 0xf1c   : > { %v7469_v10 = vpop.f32.mrb[152].mxu1  ;;  %5215 = vmax.xlane.f32.xlu1 %v15851_v55 }
 0xf1d   : > { %vm5083_vm12 = vcmp.eq.f32.partialorder %v7469_v10, 0.0  ;;  %v4978_v34 = vpop.f32.mrb[153].mxu1 }
 0xf1e   : > { %vm15856_vm0 = vmand %vm4810_vm6, %vm5083_vm12  ;;  %vm5081_vm3 = vcmp.eq.f32.partialorder %v4978_v34, 0.0  ;;  %v7470_v27 = vpop.f32.mrb[154].mxu1  ;;  %v20123_v34 = vld [vmem:[#allocation39_spill] sm:$0xff] }
 0xf1f   : > { %v20108_v62 = vsel %vm15856_vm0, 4294967295, %v20107_v62  ;;  %vm15868_vm9 = vmand %vm4808_vm1, %vm5081_vm3  ;;  %vm5084_vm6 = vcmp.eq.f32.partialorder %v7470_v27, 0.0  ;;  %v4981_v29 = vpop.f32.mrb[155].mxu1  ;;  %vm20124_vm1 = vcmp.eq.f32.partialorder %v20122_v6, %v20123_v34  ;;  %v15913_v34 = vsel %vm15856_vm0, -1.0, %v15094_v17 }
 0xf20   : > { %20109 = vst [vmem:[#allocation10_spill] sm:$0xff] %v20108_v62  ;;  %v20111_v36 = vsel %vm15868_vm9, 4294967295, %v20110_v36  ;;  %vm15879_vm12 = vmand %vm20116_vm13, %vm5084_vm6  ;;  %vm5082_vm10 = vcmp.eq.f32.partialorder %v4981_v29, 0.0  ;;  %v15886_v47 = vsel %vm15868_vm9, -1.0, %v15063_v23  ;;  %vm20131_vm6 = vcmp.eq.f32.partialorder %v15170_v25, %v15579_v38  ;;  %v20152_v62 = vld [vmem:[#allocation64_spill] sm:$0xff] }
 0xf21   : > { %20112 = vst [vmem:[#allocation23_spill] sm:$0xff] %v20111_v36  ;;  %v20118_v41 = vsel %vm15879_vm12, 4294967295, %v20117_v41  ;;  %vm15895_vm3 = vmand %vm20124_vm1, %vm5082_vm10  ;;  %5217 = vmax.xlane.f32.xlu0 %v15886_v47  ;;  %v20132_v23 = vmov 0  ;;  %v15926_v29 = vsel %vm15879_vm12, -1.0, %v20114_v14  ;;  %v20139_v38 = vmov 0  ;;  %v20145_v36 = vld [vmem:[#allocation95_spill] sm:$0xff] }
 0xf22   : > { %20119 = vst [vmem:[#allocation78_spill] sm:$0xff] %v20118_v41  ;;  %v20126_v43 = vsel %vm15895_vm3, 4294967295, %v20125_v43  ;;  %v15907_v32 = vsel %vm15895_vm3, -1.0, %v20122_v6  ;;  %20135 = vst [vmem:[#allocation47_spill] sm:$0xff] %v15926_v29  ;;  %vm20138_vm3 = vcmp.eq.f32.partialorder %v15139_v30, %v15564_v60  ;;  %v20144_v41 = vld [vmem:[#allocation43_spill] sm:$0xff]  ;;  %v20153_v14 = vld [vmem:[#allocation58_spill] sm:$0xff] }
 0xf23   : > { %20127 = vst [vmem:[#allocation100_spill] sm:$0xff] %v20126_v43  ;;  %20130 = vst [vmem:[#allocation111_spill] sm:$0xff] %v15907_v32  ;;  %5219 = vmax.xlane.f32.xlu1 %v15907_v32 }
 0xf25   : > { %5221 = vmax.xlane.f32.xlu0 %v15913_v34 }
 0xf27   : > { %v7473_v35 = vpop.f32.mrb[156].mxu1  ;;  %5223 = vmax.xlane.f32.xlu1 %v15926_v29 }
 0xf28   : > { %vm5087_vm10 = vcmp.eq.f32.partialorder %v7473_v35, 0.0  ;;  %v4994_v27 = vpop.f32.mrb[157].mxu1  ;;  %v20147_v35 = vmov 0 }
 0xf29   : > { %vm15919_vm13 = vmand %vm20131_vm6, %vm5087_vm10  ;;  %vm5085_vm1 = vcmp.eq.f32.partialorder %v4994_v27, 0.0  ;;  %v7474_v6 = vpop.f32.mrb[158].mxu1  ;;  %vm20146_vm6 = vcmp.eq.f32.partialorder %v20144_v41, %v20145_v36  ;;  %v20155_v36 = vmov 0 }
 0xf2a   : > { %v20133_v23 = vsel %vm15919_vm13, 4294967295, %v20132_v23  ;;  %vm15935_vm9 = vmand %vm20138_vm3, %vm5085_vm1  ;;  %vm5088_vm10 = vcmp.eq.f32.partialorder %v7474_v6, 0.0  ;;  %v4997_v27 = vpop.f32.mrb[159].mxu1  ;;  %vm20154_vm1 = vcmp.eq.f32.partialorder %v20152_v62, %v20153_v14  ;;  %v15981_v14 = vsel %vm15919_vm13, -1.0, %v15170_v25 }
 0xf2b   : > { %20134 = vst [vmem:[#allocation12_spill] sm:$0xff] %v20133_v23  ;;  %v20140_v38 = vsel %vm15935_vm9, 4294967295, %v20139_v38  ;;  %vm15947_vm12 = vmand %vm20146_vm6, %vm5088_vm10  ;;  %vm5086_vm3 = vcmp.eq.f32.partialorder %v4997_v27, 0.0  ;;  %v15954_v60 = vsel %vm15935_vm9, -1.0, %v15139_v30  ;;  %vm20161_vm6 = vcmp.eq.f32.partialorder %v15246_v19, %v15609_v4  ;;  %v20182_v23 = vld [vmem:[#allocation113_spill] sm:$0xff] }
 0xf2c   : > { %20141 = vst [vmem:[#allocation87_spill] sm:$0xff] %v20140_v38  ;;  %v20148_v35 = vsel %vm15947_vm12, 4294967295, %v20147_v35  ;;  %vm15963_vm0 = vmand %vm20154_vm1, %vm5086_vm3  ;;  %5225 = vmax.xlane.f32.xlu0 %v15954_v60  ;;  %v20162_v30 = vmov 0  ;;  %v15994_v27 = vsel %vm15947_vm12, -1.0, %v20144_v41  ;;  %v20169_v4 = vmov 0  ;;  %v20175_v38 = vld [vmem:[#allocation103_spill] sm:$0xff] }
 0xf2d   : > { %20149 = vst [vmem:[#allocation99_spill] sm:$0xff] %v20148_v35  ;;  %v20156_v36 = vsel %vm15963_vm0, 4294967295, %v20155_v36  ;;  %v15975_v10 = vsel %vm15963_vm0, -1.0, %v20152_v62  ;;  %20165 = vst [vmem:[#allocation83_spill] sm:$0xff] %v15994_v27  ;;  %vm20168_vm0 = vcmp.eq.f32.partialorder %v15215_v48, %v15594_v0  ;;  %v20174_v35 = vld [vmem:[#allocation82_spill] sm:$0xff]  ;;  %v20183_v41 = vld [vmem:[#allocation33_spill] sm:$0xff] }
 0xf2e   : > { %20157 = vst [vmem:[#allocation32_spill] sm:$0xff] %v20156_v36  ;;  %20160 = vst [vmem:[#allocation110_spill] sm:$0xff] %v15975_v10  ;;  %5227 = vmax.xlane.f32.xlu1 %v15975_v10 }
 0xf2f   : > { %v7477_v37 = vpop.f32.mrb[160].mxu1 }
 0xf30   : > { %vm5091_vm10 = vcmp.eq.f32.partialorder %v7477_v37, 0.0  ;;  %5229 = vmax.xlane.f32.xlu0 %v15981_v14  ;;  %v5010_v6 = vpop.f32.mrb[161].mxu1  ;;  %v20177_v37 = vmov 0 }
 0xf31   : > { %vm15987_vm3 = vmand %vm20161_vm6, %vm5091_vm10  ;;  %vm5089_vm1 = vcmp.eq.f32.partialorder %v5010_v6, 0.0  ;;  %v7478_v62 = vpop.f32.mrb[162].mxu1  ;;  %vm20176_vm6 = vcmp.eq.f32.partialorder %v20174_v35, %v20175_v38  ;;  %v20185_v38 = vmov 0 }
 0xf32   : > { %v20163_v30 = vsel %vm15987_vm3, 4294967295, %v20162_v30  ;;  %vm16003_vm9 = vmand %vm20168_vm0, %vm5089_vm1  ;;  %vm5092_vm10 = vcmp.eq.f32.partialorder %v7478_v62, 0.0  ;;  %5231 = vmax.xlane.f32.xlu1 %v15994_v27  ;;  %v5013_v6 = vpop.f32.mrb[163].mxu1  ;;  %vm20184_vm1 = vcmp.eq.f32.partialorder %v20182_v23, %v20183_v41  ;;  %v16049_v41 = vsel %vm15987_vm3, -1.0, %v15246_v19 }
 0xf33   : > { %20164 = vst [vmem:[#allocation106_spill] sm:$0xff] %v20163_v30  ;;  %v20170_v4 = vsel %vm16003_vm9, 4294967295, %v20169_v4  ;;  %vm16015_vm12 = vmand %vm20176_vm6, %vm5092_vm10  ;;  %vm5090_vm0 = vcmp.eq.f32.partialorder %v5013_v6, 0.0  ;;  %v16022_v0 = vsel %vm16003_vm9, -1.0, %v15215_v48  ;;  %vm20191_vm6 = vcmp.eq.f32.partialorder %v15322_v15, %v15639_v57  ;;  %v20212_v30 = vld [vmem:[#allocation25_spill] sm:$0xff] }
 0xf34   : > { %20171 = vst [vmem:[#allocation105_spill] sm:$0xff] %v20170_v4  ;;  %v20178_v37 = vsel %vm16015_vm12, 4294967295, %v20177_v37  ;;  %vm16031_vm13 = vmand %vm20184_vm1, %vm5090_vm0  ;;  %5233 = vmax.xlane.f32.xlu0 %v16022_v0  ;;  %v20192_v48 = vmov 0  ;;  %v16062_v6 = vsel %vm16015_vm12, -1.0, %v20174_v35  ;;  %v20199_v57 = vmov 0  ;;  %v20205_v4 = vld [vmem:[#allocation18_spill] sm:$0xff] }
 0xf35   : > { %20179 = vst [vmem:[#allocation5_spill] sm:$0xff] %v20178_v37  ;;  %v20186_v38 = vsel %vm16031_vm13, 4294967295, %v20185_v38  ;;  %v16043_v17 = vsel %vm16031_vm13, -1.0, %v20182_v23  ;;  %20195 = vst [vmem:[#allocation27_spill] sm:$0xff] %v16062_v6  ;;  %vm20198_vm13 = vcmp.eq.f32.partialorder %v15291_v56, %v15624_v63  ;;  %v20204_v37 = vld [vmem:[#allocation56_spill] sm:$0xff]  ;;  %v20213_v35 = vld [vmem:[#allocation13_spill] sm:$0xff] }
 0xf36   : > { %20187 = vst [vmem:[#allocation19_spill] sm:$0xff] %v20186_v38  ;;  %20190 = vst [vmem:[#allocation79_spill] sm:$0xff] %v16043_v17  ;;  %5235 = vmax.xlane.f32.xlu1 %v16043_v17 }
 0xf38   : > { %v7481_v43 = vpop.f32.mrb[164].mxu1  ;;  %5237 = vmax.xlane.f32.xlu0 %v16049_v41 }
 0xf39   : > { %vm5095_vm10 = vcmp.eq.f32.partialorder %v7481_v43, 0.0  ;;  %v5026_v62 = vpop.f32.mrb[165].mxu1  ;;  %v20207_v43 = vmov 0 }
 0xf3a   : > { %vm16055_vm0 = vmand %vm20191_vm6, %vm5095_vm10  ;;  %vm5093_vm1 = vcmp.eq.f32.partialorder %v5026_v62, 0.0  ;;  %v7482_v23 = vpop.f32.mrb[166].mxu1  ;;  %5239 = vmax.xlane.f32.xlu1 %v16062_v6  ;;  %vm20206_vm6 = vcmp.eq.f32.partialorder %v20204_v37, %v20205_v4  ;;  %v20215_v4 = vmov 0 }
 0xf3b   : > { %v20193_v48 = vsel %vm16055_vm0, 4294967295, %v20192_v48  ;;  %vm16071_vm9 = vmand %vm20198_vm13, %vm5093_vm1  ;;  %vm5096_vm10 = vcmp.eq.f32.partialorder %v7482_v23, 0.0  ;;  %v5029_v62 = vpop.f32.mrb[167].mxu1  ;;  %vm20214_vm1 = vcmp.eq.f32.partialorder %v20212_v30, %v20213_v35  ;;  %v16117_v35 = vsel %vm16055_vm0, -1.0, %v15322_v15  ;;  %v20259_v15 = vld [vmem:[#allocation70_spill] sm:$0xff] }
 0xf3c   : > { %20194 = vst [vmem:[#allocation72_spill] sm:$0xff] %v20193_v48  ;;  %v20200_v57 = vsel %vm16071_vm9, 4294967295, %v20199_v57  ;;  %vm16083_vm12 = vmand %vm20206_vm6, %vm5096_vm10  ;;  %vm5094_vm13 = vcmp.eq.f32.partialorder %v5029_v62, 0.0  ;;  %v16090_v63 = vsel %vm16071_vm9, -1.0, %v15291_v56  ;;  %vm20221_vm6 = vcmp.eq.f32.partialorder %v15398_v11, %v15669_v42  ;;  %v20242_v48 = vld [vmem:[#allocation102_spill] sm:$0xff] }
 0xf3d   : > { %20201 = vst [vmem:[#allocation68_spill] sm:$0xff] %v20200_v57  ;;  %v20208_v43 = vsel %vm16083_vm12, 4294967295, %v20207_v43  ;;  %vm16099_vm3 = vmand %vm20214_vm1, %vm5094_vm13  ;;  %5241 = vmax.xlane.f32.xlu0 %v16090_v63  ;;  %v20222_v56 = vmov 0  ;;  %v16130_v62 = vsel %vm16083_vm12, -1.0, %v20204_v37  ;;  %v20229_v42 = vmov 0  ;;  %v20235_v57 = vld [vmem:[#allocation21_spill] sm:$0xff] }
 0xf3e   : > { %20209 = vst [vmem:[#allocation77_spill] sm:$0xff] %v20208_v43  ;;  %v20216_v4 = vsel %vm16099_vm3, 4294967295, %v20215_v4  ;;  %v16111_v25 = vsel %vm16099_vm3, -1.0, %v20212_v30  ;;  %20225 = vst [vmem:[#allocation31_spill] sm:$0xff] %v16130_v62  ;;  %vm20228_vm3 = vcmp.eq.f32.partialorder %v15367_v58, %v15654_v12  ;;  %v20234_v43 = vld [vmem:[#allocation15_spill] sm:$0xff]  ;;  %v20243_v37 = vld [vmem:[#allocation86_spill] sm:$0xff] }
 0xf3f   : > { %20217 = vst [vmem:[#allocation24_spill] sm:$0xff] %v20216_v4  ;;  %20220 = vst [vmem:[#allocation104_spill] sm:$0xff] %v16111_v25  ;;  %5243 = vmax.xlane.f32.xlu1 %v16111_v25 }
 0xf40   : > { %v7485_v36 = vpop.f32.mrb[168].mxu1 }
 0xf41   : > { %vm5099_vm10 = vcmp.eq.f32.partialorder %v7485_v36, 0.0  ;;  %5245 = vmax.xlane.f32.xlu0 %v16117_v35  ;;  %v5042_v23 = vpop.f32.mrb[169].mxu1  ;;  %v20237_v36 = vmov 0 }
 0xf42   : > { %vm16123_vm13 = vmand %vm20221_vm6, %vm5099_vm10  ;;  %vm5097_vm1 = vcmp.eq.f32.partialorder %v5042_v23, 0.0  ;;  %v7486_v30 = vpop.f32.mrb[170].mxu1  ;;  %vm20236_vm6 = vcmp.eq.f32.partialorder %v20234_v43, %v20235_v57  ;;  %v20245_v57 = vmov 0 }
 0xf43   : > { %v20223_v56 = vsel %vm16123_vm13, 4294967295, %v20222_v56  ;;  %vm16139_vm9 = vmand %vm20228_vm3, %vm5097_vm1  ;;  %vm5100_vm10 = vcmp.eq.f32.partialorder %v7486_v30, 0.0  ;;  %5247 = vmax.xlane.f32.xlu1 %v16130_v62  ;;  %v5045_v23 = vpop.f32.mrb[171].mxu1  ;;  %vm20244_vm1 = vcmp.eq.f32.partialorder %v20242_v48, %v20243_v37  ;;  %v16185_v37 = vsel %vm16123_vm13, -1.0, %v15398_v11 }
 0xf44   : > { %20224 = vst [vmem:[#allocation69_spill] sm:$0xff] %v20223_v56  ;;  %v20230_v42 = vsel %vm16139_vm9, 4294967295, %v20229_v42  ;;  %vm16151_vm12 = vmand %vm20236_vm6, %vm5100_vm10  ;;  %vm5098_vm3 = vcmp.eq.f32.partialorder %v5045_v23, 0.0  ;;  %v16158_v12 = vsel %vm16139_vm9, -1.0, %v15367_v58  ;;  %vm20251_vm6 = vcmp.eq.f32.partialorder %v15468_v26, %v15699_v13  ;;  %v20266_v56 = vld [vmem:[#allocation53_spill] sm:$0xff] }
 0xf45   : > { %20231 = vst [vmem:[#allocation44_spill] sm:$0xff] %v20230_v42  ;;  %v20238_v36 = vsel %vm16151_vm12, 4294967295, %v20237_v36  ;;  %vm16167_vm0 = vmand %vm20244_vm1, %vm5098_vm3  ;;  %5249 = vmax.xlane.f32.xlu0 %v16158_v12  ;;  %v20252_v58 = vmov 0  ;;  %v16198_v23 = vsel %vm16151_vm12, -1.0, %v20234_v43  ;;  %v20261_v13 = vmov 0  ;;  %v20275_v43 = vld [vmem:[#allocation98_spill] sm:$0xff] }
 0xf46   : > { %20239 = vst [vmem:[#allocation67_spill] sm:$0xff] %v20238_v36  ;;  %v20246_v57 = vsel %vm16167_vm0, 4294967295, %v20245_v57  ;;  %v16179_v19 = vsel %vm16167_vm0, -1.0, %v20242_v48  ;;  %20255 = vst [vmem:[#allocation89_spill] sm:$0xff] %v16198_v23 }
 0xf47   : > { %20247 = vst [vmem:[#allocation28_spill] sm:$0xff] %v20246_v57  ;;  %20250 = vst [vmem:[#allocation109_spill] sm:$0xff] %v16179_v19  ;;  %5251 = vmax.xlane.f32.xlu1 %v16179_v19  ;;  %v20258_v57 = vld [vmem:[#allocation94_spill] sm:$0xff] }
 0xf48   : > { %vm20260_vm0 = vcmp.eq.f32.partialorder %v20258_v57, %v20259_v15 }
 0xf49   : > { %5253 = vmax.xlane.f32.xlu0 %v16185_v37 }
 0xf4b   : > { %5255 = vmax.xlane.f32.xlu1 %v16198_v23 }
 0xf4c   : > { %v7489_v38 = vpop.f32.mrb[172].mxu1 }
 0xf4d   : > { %vm5103_vm10 = vcmp.eq.f32.partialorder %v7489_v38, 0.0  ;;  %v5058_v30 = vpop.f32.mrb[173].mxu1  ;;  %v20268_v38 = vmov 0 }
 0xf4e   : > { %vm16191_vm3 = vmand %vm20251_vm6, %vm5103_vm10  ;;  %vm5101_vm1 = vcmp.eq.f32.partialorder %v5058_v30, 0.0  ;;  %v7490_v48 = vpop.f32.mrb[174].mxu1  ;;  %vm20267_vm6 = vcmp.eq.f32.partialorder %v15472_v59, %v20266_v56  ;;  %v20277_v56 = vmov 0 }
 0xf4f   : > { %v20253_v58 = vsel %vm16191_vm3, 4294967295, %v20252_v58  ;;  %vm16207_vm9 = vmand %vm20260_vm0, %vm5101_vm1  ;;  %vm5104_vm10 = vcmp.eq.f32.partialorder %v7490_v48, 0.0  ;;  %v5061_v30 = vpop.f32.mrb[175].mxu1  ;;  %vm20276_vm1 = vcmp.eq.f32.partialorder %v20274_v22, %v20275_v43  ;;  %v16253_v43 = vsel %vm16191_vm3, -1.0, %v15468_v26 }
 0xf50   : > { %20254 = vst [vmem:[#allocation101_spill] sm:$0xff] %v20253_v58  ;;  %v20262_v13 = vsel %vm16207_vm9, 4294967295, %v20261_v13  ;;  %vm16219_vm12 = vmand %vm20267_vm6, %vm5104_vm10  ;;  %vm5102_vm0 = vcmp.eq.f32.partialorder %v5061_v30, 0.0  ;;  %v16226_v15 = vsel %vm16207_vm9, -1.0, %v20258_v57 }
 0xf51   : > { %20263 = vst [vmem:[#allocation75_spill] sm:$0xff] %v20262_v13  ;;  %v20269_v38 = vsel %vm16219_vm12, 4294967295, %v20268_v38  ;;  %20271 = vst [vmem:[#allocation88_spill] sm:$0xff] %v16226_v15  ;;  %5257 = vmax.xlane.f32.xlu0 %v16226_v15  ;;  %v16259_v4 = vsel %vm16219_vm12, -1.0, %v15472_v59  ;;  %v20283_v59 = vmov 1.0|1.0  }
 0xf52   : > { %20270 = vst [vmem:[#allocation42_spill] sm:$0xff] %v20269_v38  ;;  %vm16235_vm13 = vmand %vm20276_vm1, %vm5102_vm0 }
 0xf53   : > { %v20278_v56 = vsel %vm16235_vm13, 4294967295, %v20277_v56  ;;  %v16247_v36 = vsel %vm16235_vm13, -1.0, %v20274_v22 }
 0xf54   : > { %20279 = vst [vmem:[#allocation30_spill] sm:$0xff] %v20278_v56  ;;  %20282 = vst [vmem:[#allocation39_spill] sm:$0xff] %v16247_v36  ;;  %5259 = vmax.xlane.f32.xlu1 %v16247_v36 }
 0xf55   : > { %5261 = vmax.xlane.f32.xlu0 %v16253_v43 }
 0xf58   : > { %5263 = vmax.xlane.f32.xlu1 %v16259_v4 }
 0xf9b   : > { %v16262_v57 = vpop.xlane.xlu0 %5201 }
 0xf9c   : > { %vm18082_vm10 = vcmp.eq.f32.partialorder %v15750_v5, %v16262_v57  ;;  %vm20297_vm3 = vcmp.eq.f32.partialorder %v15750_v5, %v16262_v57  ;;  %v20300_v5 = vsel %vm15732_vm4, %v8997_v7, %v14909_v18  ;;  %v20303_v18 = vsel %vm15759_vm14, %v9026_v9, %v14941_v61  ;;  %v20334_v57 = vld [vmem:[#allocation111_spill] sm:$0xff] }
 0xf9d   : > { %v16264_v22 = vpop.xlane.xlu1 %5203 }
 0xf9e   : > { %vm18081_vm6 = vcmp.eq.f32.partialorder %v15771_v46, %v16264_v22 }
 0xf9f   : > { %vm6664_vm0 = vmpackc.low %vm18081_vm6, %vm18082_vm10  ;;  %v16276_v26 = vpop.xlane.xlu0 %5205 }
 0xfa0   : > { %7507 = vmatprep.mubr.msk.bf16.mxu0 %vm6664_vm0, %v20283_v59  ;;  %vm18084_vm1 = vcmp.eq.f32.partialorder %v15777_v40, %v16276_v26 }
 0xfa1   : > { %v16279_v30 = vpop.xlane.xlu1 %5207 }
 0xfa2   : > { %vm18083_vm13 = vcmp.eq.f32.partialorder %v15790_v53, %v16279_v30 }
 0xfa3   : > { %vm6666_vm12 = vmpackc.low %vm18083_vm13, %vm18084_vm1  ;;  %v16291_v42 = vpop.xlane.xlu0 %5209 }
 0xfa4   : > { %7508 = vmatmul.mubr.msk.bf16.vlgmr.msra.gmra.mrb[144].mxu0 %vm6666_vm12, %v20283_v59  ;;  %vm18088_vm0 = vcmp.eq.f32.partialorder %v15818_v39, %v16291_v42 }
 0xfa5   : > { %v16294_v56 = vpop.xlane.xlu1 %5211 }
 0xfa6   : > { %vm18087_vm6 = vcmp.eq.f32.partialorder %v15839_v44, %v16294_v56 }
 0xfa7   : > { %vm6668_vm10 = vmpackc.low %vm18087_vm6, %vm18088_vm0  ;;  %v16306_v48 = vpop.xlane.xlu0 %5213 }
 0xfa8   : > { %7511 = vmatprep.mubr.msk.bf16.mxu0 %vm6668_vm10, %v20283_v59  ;;  %vm18092_vm12 = vcmp.eq.f32.partialorder %v15845_v33, %v16306_v48 }
 0xfa9   : > { %v16309_v11 = vpop.xlane.xlu1 %5215 }
 0xfaa   : > { %vm18091_vm13 = vcmp.eq.f32.partialorder %v15851_v55, %v16309_v11  ;;  %vm20307_vm14 = vcmp.eq.f32.partialorder %v15851_v55, %v16309_v11 }
 0xfab   : > { %vm6670_vm1 = vmpackc.low %vm18091_vm13, %vm18092_vm12 }
 0xfac   : > { %7512 = vmatmul.mubr.msk.bf16.gmra.mrb[148].mxu0 %vm6670_vm1, %v20283_v59 }
 0xfae   : > { %v16321_v38 = vpop.xlane.xlu0 %5217 }
 0xfaf   : > { %vm18096_vm10 = vcmp.eq.f32.partialorder %v15886_v47, %v16321_v38 }
 0xfb0   : > { %v16324_v13 = vpop.xlane.xlu1 %5219 }
 0xfb1   : > { %20284 = vst [vmem:[#allocation43_spill] sm:$0xff] %v16324_v13  ;;  %vm18095_vm6 = vcmp.eq.f32.partialorder %v15907_v32, %v16324_v13 }
 0xfb2   : > { %vm6672_vm0 = vmpackc.low %vm18095_vm6, %vm18096_vm10  ;;  %v16336_v58 = vpop.xlane.xlu0 %5221 }
 0xfb3   : > { %7515 = vmatprep.mubr.msk.bf16.mxu0 %vm6672_vm0, %v20283_v59  ;;  %vm18100_vm1 = vcmp.eq.f32.partialorder %v15913_v34, %v16336_v58 }
 0xfb4   : > { %v16339_v49 = vpop.xlane.xlu1 %5223 }
 0xfb5   : > { %20285 = vst [vmem:[#allocation95_spill] sm:$0xff] %v16339_v49  ;;  %vm18099_vm13 = vcmp.eq.f32.partialorder %v15926_v29, %v16339_v49 }
 0xfb6   : > { %vm6674_vm12 = vmpackc.low %vm18099_vm13, %vm18100_vm1 }
 0xfb7   : > { %7516 = vmatmul.mubr.msk.bf16.gmra.mrb[152].mxu0 %vm6674_vm12, %v20283_v59 }
 0xfb9   : > { %v16351_v13 = vpop.xlane.xlu0 %5225 }
 0xfba   : > { %vm18104_vm0 = vcmp.eq.f32.partialorder %v15954_v60, %v16351_v13 }
 0xfbb   : > { %v16354_v32 = vpop.xlane.xlu1 %5227 }
 0xfbc   : > { %20286 = vst [vmem:[#allocation64_spill] sm:$0xff] %v16354_v32  ;;  %vm18103_vm6 = vcmp.eq.f32.partialorder %v15975_v10, %v16354_v32 }
 0xfbd   : > { %vm6676_vm10 = vmpackc.low %vm18103_vm6, %vm18104_vm0  ;;  %v16366_v49 = vpop.xlane.xlu0 %5229 }
 0xfbe   : > { %7519 = vmatprep.mubr.msk.bf16.mxu0 %vm6676_vm10, %v20283_v59  ;;  %vm18108_vm12 = vcmp.eq.f32.partialorder %v15981_v14, %v16366_v49 }
 0xfbf   : > { %v16369_v29 = vpop.xlane.xlu1 %5231 }
 0xfc0   : > { %20287 = vst [vmem:[#allocation58_spill] sm:$0xff] %v16369_v29  ;;  %vm18107_vm13 = vcmp.eq.f32.partialorder %v15994_v27, %v16369_v29 }
 0xfc1   : > { %vm6678_vm1 = vmpackc.low %vm18107_vm13, %vm18108_vm12  ;;  %v16381_v32 = vpop.xlane.xlu0 %5233 }
 0xfc2   : > { %7520 = vmatmul.mubr.msk.bf16.gmra.mrb[156].mxu0 %vm6678_vm1, %v20283_v59  ;;  %vm18112_vm10 = vcmp.eq.f32.partialorder %v16022_v0, %v16381_v32 }
 0xfc3   : > { %v16384_v10 = vpop.xlane.xlu1 %5235 }
 0xfc4   : > { %20288 = vst [vmem:[#allocation82_spill] sm:$0xff] %v16384_v10  ;;  %vm18111_vm6 = vcmp.eq.f32.partialorder %v16043_v17, %v16384_v10 }
 0xfc5   : > { %vm6680_vm0 = vmpackc.low %vm18111_vm6, %vm18112_vm10  ;;  %v16396_v29 = vpop.xlane.xlu0 %5237 }
 0xfc6   : > { %7523 = vmatprep.mubr.msk.bf16.mxu0 %vm6680_vm0, %v20283_v59  ;;  %vm18116_vm1 = vcmp.eq.f32.partialorder %v16049_v41, %v16396_v29 }
 0xfc7   : > { %v16399_v27 = vpop.xlane.xlu1 %5239 }
 0xfc8   : > { %20289 = vst [vmem:[#allocation103_spill] sm:$0xff] %v16399_v27  ;;  %vm18115_vm13 = vcmp.eq.f32.partialorder %v16062_v6, %v16399_v27 }
 0xfc9   : > { %vm6682_vm12 = vmpackc.low %vm18115_vm13, %vm18116_vm1 }
 0xfca   : > { %v16411_v10 = vpop.xlane.xlu0 %5241  ;;  %7524 = vmatmul.mubr.msk.bf16.gmra.mrb[160].mxu0 %vm6682_vm12, %v20283_v59 }
 0xfcb   : > { %vm18120_vm0 = vcmp.eq.f32.partialorder %v16090_v63, %v16411_v10 }
 0xfcc   : > { %v16414_v17 = vpop.xlane.xlu1 %5243 }
 0xfcd   : > { %20290 = vst [vmem:[#allocation113_spill] sm:$0xff] %v16414_v17  ;;  %vm18119_vm6 = vcmp.eq.f32.partialorder %v16111_v25, %v16414_v17 }
 0xfce   : > { %vm6684_vm10 = vmpackc.low %vm18119_vm6, %vm18120_vm0  ;;  %v16426_v27 = vpop.xlane.xlu0 %5245 }
 0xfcf   : > { %7527 = vmatprep.mubr.msk.bf16.mxu0 %vm6684_vm10, %v20283_v59  ;;  %vm18124_vm12 = vcmp.eq.f32.partialorder %v16117_v35, %v16426_v27 }
 0xfd0   : > { %v16429_v6 = vpop.xlane.xlu1 %5247 }
 0xfd1   : > { %20291 = vst [vmem:[#allocation33_spill] sm:$0xff] %v16429_v6  ;;  %vm18123_vm13 = vcmp.eq.f32.partialorder %v16130_v62, %v16429_v6 }
 0xfd2   : > { %vm6686_vm1 = vmpackc.low %vm18123_vm13, %vm18124_vm12  ;;  %v16441_v17 = vpop.xlane.xlu0 %5249 }
 0xfd3   : > { %7528 = vmatmul.mubr.msk.bf16.gmra.mrb[164].mxu0 %vm6686_vm1, %v20283_v59  ;;  %vm18128_vm10 = vcmp.eq.f32.partialorder %v16158_v12, %v16441_v17 }
 0xfd4   : > { %v16444_v25 = vpop.xlane.xlu1 %5251 }
 0xfd5   : > { %20292 = vst [vmem:[#allocation56_spill] sm:$0xff] %v16444_v25  ;;  %vm18127_vm6 = vcmp.eq.f32.partialorder %v16179_v19, %v16444_v25 }
 0xfd6   : > { %vm6688_vm0 = vmpackc.low %vm18127_vm6, %vm18128_vm10  ;;  %v16456_v6 = vpop.xlane.xlu0 %5253 }
 0xfd7   : > { %7531 = vmatprep.mubr.msk.bf16.mxu0 %vm6688_vm0, %v20283_v59  ;;  %vm18132_vm1 = vcmp.eq.f32.partialorder %v16185_v37, %v16456_v6 }
 0xfd8   : > { %v16459_v62 = vpop.xlane.xlu1 %5255 }
 0xfd9   : > { %20293 = vst [vmem:[#allocation18_spill] sm:$0xff] %v16459_v62  ;;  %vm18131_vm13 = vcmp.eq.f32.partialorder %v16198_v23, %v16459_v62 }
 0xfda   : > { %vm6690_vm12 = vmpackc.low %vm18131_vm13, %vm18132_vm1 }
 0xfdb   : > { %7532 = vmatmul.mubr.msk.bf16.gmra.mrb[168].mxu0 %vm6690_vm12, %v20283_v59 }
 0xfde   : > { %v16471_v25 = vpop.xlane.xlu0 %5257 }
 0xfdf   : > { %20294 = vst [vmem:[#allocation25_spill] sm:$0xff] %v16471_v25  ;;  %vm18136_vm0 = vcmp.eq.f32.partialorder %v16226_v15, %v16471_v25 }
 0xfe1   : > { %v16474_v19 = vpop.xlane.xlu1 %5259 }
 0xfe2   : > { %20295 = vst [vmem:[#allocation13_spill] sm:$0xff] %v16474_v19  ;;  %vm18134_vm6 = vcmp.eq.f32.partialorder %v16247_v36, %v16474_v19  ;;  %v16486_v62 = vpop.xlane.xlu0 %5261 }
 0xfe3   : > { %vm6692_vm10 = vmpackc.low %vm18134_vm6, %vm18136_vm0  ;;  %vm5295_vm12 = vcmp.eq.f32.partialorder %v16253_v43, %v16486_v62  ;;  %v20467_v62 = vld [vmem:[#allocation75_spill] sm:$0xff]  ;;  %v20469_v43 = vld [vmem:[#allocation61_spill] sm:$0xff] }
 0xfe4   : > { %7535 = vmatprep.mubr.msk.bf16.mxu0 %vm6692_vm10, %v20283_v59  ;;  %vm20296_vm10 = vcmp.eq.f32.partialorder %v15777_v40, %v16276_v26  ;;  %v20337_v26 = vld [vmem:[#allocation78_spill] sm:$0xff] }
 0xfe5   : > { %v16489_v23 = vpop.xlane.xlu1 %5263 }
 0xfe6   : > { %vm5296_vm13 = vcmp.eq.f32.partialorder %v16259_v4, %v16489_v23  ;;  %v20478_v4 = vld [vmem:[#allocation91_spill] sm:$0xff] }
 0xfe7   : > { %vm6694_vm1 = vmpackc.low %vm5296_vm13, %vm5295_vm12 }
 0xfe8   : > { %7536 = vmatmul.mubr.msk.bf16.gmra.mrb[172].mxu0 %vm6694_vm1, %v20283_v59  ;;  %v20298_v59 = vsel %vm15721_vm7, %v8988_v20, %v14898_v51  ;;  %vm20299_vm1 = vcmp.eq.f32.partialorder %v15790_v53, %v16279_v30 }
0x1077   : > { %v7509_v19 = vpop.f32.mrb[144].mxu0 }
0x1078   : > { %vm5540_vm6 = vcmp.eq.f32.partialorder %v7509_v19, 0.0  ;;  %v5411_v36 = vpop.f32.mrb[145].mxu0 }
0x1079   : > { %vm5572_vm0 = vmand %vm20296_vm10, %vm5540_vm6  ;;  %vm5538_vm9 = vcmp.eq.f32.partialorder %v5411_v36, 0.0  ;;  %v7510_v25 = vpop.f32.mrb[146].mxu0  ;;  %v20323_v36 = vld [vmem:[#allocation6_spill] sm:$0xff] }
0x107a   : > { %vm5570_vm11 = vmand %vm20297_vm3, %vm5538_vm9  ;;  %vm5541_vm15 = vcmp.eq.f32.partialorder %v7510_v25, 0.0  ;;  %v5414_v15 = vpop.f32.mrb[147].mxu0  ;;  %v16514_v19 = vsel %vm5572_vm0, %v8988_v20, %v20298_v59  ;;  %vm20301_vm9 = vcmp.eq.f32.partialorder %v15771_v46, %v16264_v22  ;;  %v20302_v20 = vsel %vm15743_vm8, %v9009_v45, %v14929_v21  ;;  %v20314_v46 = vld [vmem:[#allocation107_spill] sm:$0xff]  ;;  %v20321_v25 = vld [vmem:[#allocation10_spill] sm:$0xff] }
0x107b   : > { %vm5573_vm6 = vmand %vm20299_vm1, %vm5541_vm15  ;;  %vm5539_vm10 = vcmp.eq.f32.partialorder %v5414_v15, 0.0  ;;  %v16525_v40 = vsel %vm5570_vm11, %v8997_v7, %v20300_v5  ;;  %vm20304_vm15 = vcmp.eq.f32.partialorder %v15845_v33, %v16306_v48  ;;  %vm20305_vm8 = vcmp.eq.f32.partialorder %v15818_v39, %v16291_v42  ;;  %v20317_v39 = vld [vmem:[#allocation73_spill] sm:$0xff]  ;;  %v20324_v42 = vld [vmem:[#allocation90_spill] sm:$0xff] }
0x107c   : > { %vm5571_vm7 = vmand %vm20301_vm9, %vm5539_vm10  ;;  %v16536_v51 = vsel %vm5573_vm6, %v9009_v45, %v20302_v20  ;;  %vm20309_vm9 = vcmp.eq.f32.partialorder %v15839_v44, %v16294_v56  ;;  %v20326_v48 = vld [vmem:[#allocation47_spill] sm:$0xff]  ;;  %v20339_v59 = vld [vmem:[#allocation48_spill] sm:$0xff] }
0x107d   : > { %v16544_v7 = vsel %vm5571_vm7, %v9026_v9, %v20303_v18  ;;  %v20306_v9 = vsel %vm15783_vm5, %v9058_v24, %v14973_v52  ;;  %vm20310_vm7 = vnez %v20103_v28  ;;  %v20312_v52 = vld [vmem:[#allocation37_spill] sm:$0xff]  ;;  %v20327_v56 = vld [vmem:[#allocation95_spill] sm:$0xff]  ;;  %v20340_v5 = vld [vmem:[#allocation80_spill] sm:$0xff] }
0x107e   : > { %v20335_v22 = vld [vmem:[#allocation43_spill] sm:$0xff] }
0x107f   : > { %v7513_v8 = vpop.f32.mrb[148].mxu0 }
0x1080   : > { %vm5544_vm4 = vcmp.eq.f32.partialorder %v7513_v8, 0.0  ;;  %v5427_v53 = vpop.f32.mrb[149].mxu0  ;;  %v20342_v8 = vld [vmem:[#allocation100_spill] sm:$0xff] }
0x1081   : > { %vm5576_vm11 = vmand %vm20304_vm15, %vm5544_vm4  ;;  %vm5542_vm3 = vcmp.eq.f32.partialorder %v5427_v53, 0.0  ;;  %v7514_v21 = vpop.f32.mrb[150].mxu0  ;;  %vm20315_vm4 = vnez %v20314_v46  ;;  %vm20319_vm15 = vcmp.eq.f32.partialorder %v15913_v34, %v16336_v58  ;;  %v20329_v34 = vld [vmem:[#allocation23_spill] sm:$0xff]  ;;  %v20344_v53 = vld [vmem:[#allocation49_spill] sm:$0xff] }
0x1082   : > { %vm5574_vm0 = vmand %vm20305_vm8, %vm5542_vm3  ;;  %vm5545_vm1 = vcmp.eq.f32.partialorder %v7514_v21, 0.0  ;;  %v5430_v45 = vpop.f32.mrb[151].mxu0  ;;  %v16558_v61 = vsel %vm5576_vm11, %v9058_v24, %v20306_v9  ;;  %v20311_v24 = vld [vmem:[#allocation45_spill] sm:$0xff]  ;;  %v20318_v3 = vsel %vm20315_vm4, %v20316_v1, %v20317_v39  ;;  %vm20320_vm8 = vcmp.eq.f32.partialorder %v15886_v47, %v16321_v38  ;;  %v20331_v58 = vld [vmem:[#allocation7_spill] sm:$0xff] }
0x1083   : > { %vm5577_vm6 = vmand %vm20307_vm14, %vm5545_vm1  ;;  %vm5543_vm10 = vcmp.eq.f32.partialorder %v5430_v45, 0.0  ;;  %v16569_v16 = vsel %vm5574_vm0, %v9072_v50, %v20308_v54  ;;  %v20313_v31 = vsel %vm20310_vm7, %v20311_v24, %v20312_v52  ;;  %vm20322_vm14 = vnez %v20321_v25  ;;  %v20332_v47 = vld [vmem:[#allocation97_spill] sm:$0xff]  ;;  %v20345_v21 = vld [vmem:[#allocation50_spill] sm:$0xff] }
0x1084   : > { %vm5575_vm5 = vmand %vm20309_vm9, %vm5543_vm10  ;;  %v16580_v2 = vsel %vm5577_vm6, %v20311_v24, %v20313_v31  ;;  %v20325_v11 = vsel %vm20322_vm14, %v20323_v36, %v20324_v42  ;;  %vm20328_vm6 = vcmp.eq.f32.partialorder %v20326_v48, %v20327_v56  ;;  %vm20336_vm7 = vcmp.eq.f32.partialorder %v20334_v57, %v20335_v22  ;;  %v20349_v46 = vld [vmem:[#allocation12_spill] sm:$0xff]  ;;  %v20362_v25 = vld [vmem:[#allocation110_spill] sm:$0xff] }
0x1085   : > { %v16588_v50 = vsel %vm5575_vm5, %v20316_v1, %v20318_v3  ;;  %vm20330_vm5 = vnez %v20329_v34  ;;  %v20351_v1 = vld [vmem:[#allocation34_spill] sm:$0xff]  ;;  %v20352_v39 = vld [vmem:[#allocation108_spill] sm:$0xff]  ;;  %v20365_v42 = vld [vmem:[#allocation99_spill] sm:$0xff] }
0x1086   : > { %v20333_v38 = vsel %vm20330_vm5, %v20331_v58, %v20332_v47  ;;  %v20368_v48 = vld [vmem:[#allocation66_spill] sm:$0xff]  ;;  %v20372_v47 = vld [vmem:[#allocation52_spill] sm:$0xff] }
0x108a   : > { %v7517_v55 = vpop.f32.mrb[152].mxu0 }
0x108b   : > { %vm5548_vm2 = vcmp.eq.f32.partialorder %v7517_v55, 0.0  ;;  %v5443_v44 = vpop.f32.mrb[153].mxu0 }
0x108c   : > { %vm5580_vm11 = vmand %vm20319_vm15, %vm5548_vm2  ;;  %vm5546_vm3 = vcmp.eq.f32.partialorder %v5443_v44, 0.0  ;;  %v7518_v28 = vpop.f32.mrb[154].mxu0  ;;  %vm20338_vm2 = vnez %v20337_v26  ;;  %vm20343_vm15 = vnez %v20342_v8  ;;  %v20354_v44 = vld [vmem:[#allocation83_spill] sm:$0xff]  ;;  %v20377_v8 = vld [vmem:[#allocation106_spill] sm:$0xff] }
0x108d   : > { %vm5578_vm0 = vmand %vm20320_vm8, %vm5546_vm3  ;;  %vm5549_vm1 = vcmp.eq.f32.partialorder %v7518_v28, 0.0  ;;  %v5446_v33 = vpop.f32.mrb[155].mxu0  ;;  %v16602_v15 = vsel %vm5580_vm11, %v20323_v36, %v20325_v11  ;;  %v20341_v20 = vsel %vm20338_vm2, %v20339_v59, %v20340_v5  ;;  %v20346_v45 = vsel %vm20343_vm15, %v20344_v53, %v20345_v21  ;;  %v20355_v28 = vld [vmem:[#allocation58_spill] sm:$0xff]  ;;  %v20363_v36 = vld [vmem:[#allocation64_spill] sm:$0xff] }
0x108e   : > { %vm5581_vm10 = vmand %vm20328_vm6, %vm5549_vm1  ;;  %vm5547_vm9 = vcmp.eq.f32.partialorder %v5446_v33, 0.0  ;;  %v16613_v30 = vsel %vm5578_vm0, %v20331_v58, %v20333_v38  ;;  %vm20347_vm3 = vcmp.eq.f32.partialorder %v15981_v14, %v16366_v49  ;;  %vm20348_vm1 = vcmp.eq.f32.partialorder %v15954_v60, %v16351_v13  ;;  %v20357_v49 = vld [vmem:[#allocation87_spill] sm:$0xff]  ;;  %v20360_v60 = vld [vmem:[#allocation14_spill] sm:$0xff] }
0x108f   : > { %vm5579_vm4 = vmand %vm20336_vm7, %vm5547_vm9  ;;  %v16624_v18 = vsel %vm5581_vm10, %v20339_v59, %v20341_v20  ;;  %vm20350_vm10 = vnez %v20349_v46  ;;  %vm20356_vm9 = vcmp.eq.f32.partialorder %v20354_v44, %v20355_v28  ;;  %v20359_v14 = vld [vmem:[#allocation11_spill] sm:$0xff]  ;;  %vm20364_vm2 = vcmp.eq.f32.partialorder %v20362_v25, %v20363_v36  ;;  %v20370_v58 = vld [vmem:[#allocation32_spill] sm:$0xff] }
0x1090   : > { %v16632_v9 = vsel %vm5579_vm4, %v20344_v53, %v20346_v45  ;;  %v20353_v3 = vsel %vm20350_vm10, %v20351_v1, %v20352_v39  ;;  %vm20358_vm4 = vnez %v20357_v49  ;;  %v20367_v11 = vld [vmem:[#allocation51_spill] sm:$0xff]  ;;  %v20373_v38 = vld [vmem:[#allocation114_spill] sm:$0xff]  ;;  %v20380_v21 = vld [vmem:[#allocation76_spill] sm:$0xff] }
0x1091   : > { %v20361_v13 = vsel %vm20358_vm4, %v20359_v14, %v20360_v60  ;;  %v20379_v53 = vld [vmem:[#allocation35_spill] sm:$0xff]  ;;  %v20393_v39 = vld [vmem:[#allocation5_spill] sm:$0xff] }
0x1092   : > { %v20390_v46 = vld [vmem:[#allocation79_spill] sm:$0xff]  ;;  %v20396_v44 = vld [vmem:[#allocation9_spill] sm:$0xff] }
0x1093   : > { %v20400_v60 = vld [vmem:[#allocation55_spill] sm:$0xff] }
0x1095   : > { %v7521_v54 = vpop.f32.mrb[156].mxu0 }
0x1096   : > { %vm5552_vm11 = vcmp.eq.f32.partialorder %v7521_v54, 0.0  ;;  %v5459_v24 = vpop.f32.mrb[157].mxu0 }
0x1097   : > { %vm5584_vm8 = vmand %vm20347_vm3, %vm5552_vm11  ;;  %vm5550_vm0 = vcmp.eq.f32.partialorder %v5459_v24, 0.0  ;;  %v7522_v52 = vpop.f32.mrb[158].mxu0  ;;  %vm20366_vm11 = vnez %v20365_v42  ;;  %vm20371_vm3 = vnez %v20370_v58  ;;  %v20382_v24 = vld [vmem:[#allocation27_spill] sm:$0xff]  ;;  %v20405_v58 = vld [vmem:[#allocation72_spill] sm:$0xff] }
0x1098   : > { %vm5582_vm14 = vmand %vm20348_vm1, %vm5550_vm0  ;;  %vm5553_vm6 = vcmp.eq.f32.partialorder %v7522_v52, 0.0  ;;  %v5462_v31 = vpop.f32.mrb[159].mxu0  ;;  %v16646_v55 = vsel %vm5584_vm8, %v20351_v1, %v20353_v3  ;;  %v20369_v56 = vsel %vm20366_vm11, %v20367_v11, %v20368_v48  ;;  %v20374_v57 = vsel %vm20371_vm3, %v20372_v47, %v20373_v38  ;;  %v20383_v52 = vld [vmem:[#allocation103_spill] sm:$0xff]  ;;  %v20391_v1 = vld [vmem:[#allocation82_spill] sm:$0xff] }
0x1099   : > { %vm5585_vm5 = vmand %vm20356_vm9, %vm5553_vm6  ;;  %vm5551_vm7 = vcmp.eq.f32.partialorder %v5462_v31, 0.0  ;;  %v16657_v33 = vsel %vm5582_vm14, %v20359_v14, %v20361_v13  ;;  %vm20375_vm0 = vcmp.eq.f32.partialorder %v16049_v41, %v16396_v29  ;;  %vm20376_vm6 = vcmp.eq.f32.partialorder %v16022_v0, %v16381_v32  ;;  %v20385_v29 = vld [vmem:[#allocation105_spill] sm:$0xff]  ;;  %v20387_v41 = vld [vmem:[#allocation16_spill] sm:$0xff] }
0x109a   : > { %vm5583_vm15 = vmand %vm20364_vm2, %vm5551_vm7  ;;  %v16668_v34 = vsel %vm5585_vm5, %v20367_v11, %v20369_v56  ;;  %vm20378_vm5 = vnez %v20377_v8  ;;  %vm20384_vm7 = vcmp.eq.f32.partialorder %v20382_v24, %v20383_v52  ;;  %v20388_v32 = vld [vmem:[#allocation71_spill] sm:$0xff]  ;;  %vm20392_vm11 = vcmp.eq.f32.partialorder %v20390_v46, %v20391_v1  ;;  %v20395_v3 = vld [vmem:[#allocation54_spill] sm:$0xff] }
0x109b   : > { %v16676_v22 = vsel %vm5583_vm15, %v20372_v47, %v20374_v57  ;;  %v20381_v45 = vsel %vm20378_vm5, %v20379_v53, %v20380_v21  ;;  %vm20386_vm15 = vnez %v20385_v29  ;;  %v20398_v14 = vld [vmem:[#allocation19_spill] sm:$0xff]  ;;  %v20401_v13 = vld [vmem:[#allocation62_spill] sm:$0xff]  ;;  %v20407_v47 = vld [vmem:[#allocation36_spill] sm:$0xff] }
0x109c   : > { %v20389_v0 = vsel %vm20386_vm15, %v20387_v41, %v20388_v32  ;;  %v20408_v38 = vld [vmem:[#allocation96_spill] sm:$0xff]  ;;  %v20421_v21 = vld [vmem:[#allocation77_spill] sm:$0xff] }
0x109d   : > { %v7525_v26 = vpop.f32.mrb[160].mxu0  ;;  %v20418_v8 = vld [vmem:[#allocation104_spill] sm:$0xff] }
0x109e   : > { %vm5556_vm8 = vcmp.eq.f32.partialorder %v7525_v26, 0.0  ;;  %v5475_v59 = vpop.f32.mrb[161].mxu0  ;;  %v20424_v24 = vld [vmem:[#allocation84_spill] sm:$0xff] }
0x109f   : > { %vm5588_vm1 = vmand %vm20375_vm0, %vm5556_vm8  ;;  %vm5554_vm14 = vcmp.eq.f32.partialorder %v5475_v59, 0.0  ;;  %v7526_v5 = vpop.f32.mrb[162].mxu0  ;;  %vm20394_vm8 = vnez %v20393_v39  ;;  %vm20399_vm0 = vnez %v20398_v14  ;;  %v20413_v59 = vld [vmem:[#allocation68_spill] sm:$0xff]  ;;  %v20433_v14 = vld [vmem:[#allocation69_spill] sm:$0xff] }
0x10a0   : > { %vm5586_vm10 = vmand %vm20376_vm6, %vm5554_vm14  ;;  %vm5557_vm9 = vcmp.eq.f32.partialorder %v7526_v5, 0.0  ;;  %v5478_v20 = vpop.f32.mrb[163].mxu0  ;;  %v16690_v54 = vsel %vm5588_vm1, %v20379_v53, %v20381_v45  ;;  %v20397_v28 = vsel %vm20394_vm8, %v20395_v3, %v20396_v44  ;;  %v20402_v25 = vsel %vm20399_vm0, %v20400_v60, %v20401_v13  ;;  %v20419_v53 = vld [vmem:[#allocation113_spill] sm:$0xff]  ;;  %v20428_v32 = vld [vmem:[#allocation20_spill] sm:$0xff] }
0x10a1   : > { %vm5589_vm4 = vmand %vm20384_vm7, %vm5557_vm9  ;;  %vm5555_vm2 = vcmp.eq.f32.partialorder %v5478_v20, 0.0  ;;  %v16701_v31 = vsel %vm5586_vm10, %v20387_v41, %v20389_v0  ;;  %vm20403_vm14 = vcmp.eq.f32.partialorder %v16117_v35, %v16426_v27  ;;  %vm20404_vm9 = vcmp.eq.f32.partialorder %v16090_v63, %v16411_v10  ;;  %v20410_v27 = vld [vmem:[#allocation31_spill] sm:$0xff]  ;;  %v20411_v35 = vld [vmem:[#allocation33_spill] sm:$0xff] }
0x10a2   : > { %vm5587_vm3 = vmand %vm20392_vm11, %vm5555_vm2  ;;  %5666 = vadd.xlane.f32.xlu0 %v16701_v31  ;;  %v16713_v49 = vsel %vm5589_vm4, %v20395_v3, %v20397_v28  ;;  %vm20406_vm4 = vnez %v20405_v58  ;;  %vm20412_vm2 = vcmp.eq.f32.partialorder %v20410_v27, %v20411_v35  ;;  %v20415_v10 = vld [vmem:[#allocation22_spill] sm:$0xff]  ;;  %vm20420_vm8 = vcmp.eq.f32.partialorder %v20418_v8, %v20419_v53  ;;  %v20423_v45 = vld [vmem:[#allocation57_spill] sm:$0xff] }
0x10a3   : > { %v16721_v36 = vsel %vm5587_vm3, %v20400_v60, %v20402_v25  ;;  %v20409_v57 = vsel %vm20406_vm4, %v20407_v47, %v20408_v38  ;;  %vm20414_vm3 = vnez %v20413_v59  ;;  %v20416_v63 = vld [vmem:[#allocation38_spill] sm:$0xff]  ;;  %v20426_v41 = vld [vmem:[#allocation24_spill] sm:$0xff]  ;;  %v20429_v0 = vld [vmem:[#allocation85_spill] sm:$0xff] }
0x10a4   : > { %5668 = vadd.xlane.f32.xlu1 %v16721_v36  ;;  %v20417_v5 = vsel %vm20414_vm3, %v20415_v10, %v20416_v63  ;;  %v20435_v60 = vld [vmem:[#allocation17_spill] sm:$0xff]  ;;  %v20436_v13 = vld [vmem:[#allocation74_spill] sm:$0xff]  ;;  %v20449_v38 = vld [vmem:[#allocation67_spill] sm:$0xff] }
0x10a5   : > { %v20446_v58 = vld [vmem:[#allocation109_spill] sm:$0xff]  ;;  %v20456_v63 = vld [vmem:[#allocation40_spill] sm:$0xff] }
0x10a6   : > { %v7529_v42 = vpop.f32.mrb[164].mxu0  ;;  %5634 = vadd.xlane.f32.xlu0 %v16525_v40  ;;  %v20452_v27 = vld [vmem:[#allocation93_spill] sm:$0xff] }
0x10a7   : > { %vm5560_vm1 = vcmp.eq.f32.partialorder %v7529_v42, 0.0  ;;  %v5491_v11 = vpop.f32.mrb[165].mxu0 }
0x10a8   : > { %vm5592_vm6 = vmand %vm20403_vm14, %vm5560_vm1  ;;  %vm5558_vm10 = vcmp.eq.f32.partialorder %v5491_v11, 0.0  ;;  %v7530_v48 = vpop.f32.mrb[166].mxu0  ;;  %5636 = vadd.xlane.f32.xlu1 %v16544_v7  ;;  %vm20422_vm1 = vnez %v20421_v21  ;;  %vm20427_vm14 = vnez %v20426_v41  ;;  %v20441_v11 = vld [vmem:[#allocation44_spill] sm:$0xff]  ;;  %v20460_v41 = vld [vmem:[#allocation25_spill] sm:$0xff] }
0x10a9   : > { %vm5590_vm5 = vmand %vm20404_vm9, %vm5558_vm10  ;;  %vm5561_vm7 = vcmp.eq.f32.partialorder %v7530_v48, 0.0  ;;  %v5494_v56 = vpop.f32.mrb[167].mxu0  ;;  %v16738_v26 = vsel %vm5592_vm6, %v20407_v47, %v20409_v57  ;;  %v20425_v52 = vsel %vm20422_vm1, %v20423_v45, %v20424_v24  ;;  %v20430_v46 = vsel %vm20427_vm14, %v20428_v32, %v20429_v0  ;;  %v20447_v47 = vld [vmem:[#allocation56_spill] sm:$0xff]  ;;  %v20451_v57 = vld [vmem:[#allocation59_spill] sm:$0xff] }
0x10aa   : > { %vm5593_vm15 = vmand %vm20412_vm2, %vm5561_vm7  ;;  %vm5559_vm11 = vcmp.eq.f32.partialorder %v5494_v56, 0.0  ;;  %v16749_v20 = vsel %vm5590_vm5, %v20415_v10, %v20417_v5  ;;  %5670 = vadd.xlane.f32.xlu0 %v16690_v54  ;;  %vm20431_vm10 = vcmp.eq.f32.partialorder %v16185_v37, %v16456_v6  ;;  %vm20432_vm7 = vcmp.eq.f32.partialorder %v16158_v12, %v16441_v17  ;;  %v20438_v6 = vld [vmem:[#allocation89_spill] sm:$0xff]  ;;  %v20439_v37 = vld [vmem:[#allocation18_spill] sm:$0xff] }
0x10ab   : > { %vm5591_vm0 = vmand %vm20420_vm8, %vm5559_vm11  ;;  %v16761_v29 = vsel %vm5593_vm15, %v20423_v45, %v20425_v52  ;;  %vm20434_vm15 = vnez %v20433_v14  ;;  %vm20440_vm11 = vcmp.eq.f32.partialorder %v20438_v6, %v20439_v37  ;;  %v20443_v17 = vld [vmem:[#allocation29_spill] sm:$0xff]  ;;  %v20444_v12 = vld [vmem:[#allocation26_spill] sm:$0xff]  ;;  %vm20448_vm1 = vcmp.eq.f32.partialorder %v20446_v58, %v20447_v47 }
0x10ac   : > { %v16769_v1 = vsel %vm5591_vm0, %v20428_v32, %v20430_v46  ;;  %5672 = vadd.xlane.f32.xlu1 %v16713_v49  ;;  %v20437_v25 = vsel %vm20434_vm15, %v20435_v60, %v20436_v13  ;;  %vm20442_vm0 = vnez %v20441_v11  ;;  %v20454_v10 = vld [vmem:[#allocation28_spill] sm:$0xff]  ;;  %v20457_v5 = vld [vmem:[#allocation65_spill] sm:$0xff]  ;;  %v20472_v13 = vld [vmem:[#allocation39_spill] sm:$0xff] }
0x10ad   : > { %v20445_v48 = vsel %vm20442_vm0, %v20443_v17, %v20444_v12  ;;  %v20459_v52 = vld [vmem:[#allocation88_spill] sm:$0xff]  ;;  %v20462_v0 = vld [vmem:[#allocation101_spill] sm:$0xff]  ;;  %v20475_v6 = vld [vmem:[#allocation42_spill] sm:$0xff] }
0x10ae   : > { %v7533_v39 = vpop.f32.mrb[168].mxu0  ;;  %5638 = vadd.xlane.f32.xlu0 %v16514_v19  ;;  %v20464_v46 = vld [vmem:[#allocation60_spill] sm:$0xff]  ;;  %v20477_v37 = vld [vmem:[#allocation41_spill] sm:$0xff]  ;;  %v20482_v12 = vld [vmem:[#allocation63_spill] sm:$0xff] }
0x10af   : > { %vm5564_vm6 = vcmp.eq.f32.partialorder %v7533_v39, 0.0  ;;  %v5507_v3 = vpop.f32.mrb[169].mxu0  ;;  %v20465_v39 = vld [vmem:[#allocation8_spill] sm:$0xff] }
0x10b0   : > { %vm5596_vm9 = vmand %vm20431_vm10, %vm5564_vm6  ;;  %vm5562_vm5 = vcmp.eq.f32.partialorder %v5507_v3, 0.0  ;;  %v7534_v44 = vpop.f32.mrb[170].mxu0  ;;  %5640 = vadd.xlane.f32.xlu1 %v16536_v51  ;;  %vm20450_vm6 = vnez %v20449_v38  ;;  %vm20455_vm10 = vnez %v20454_v10 }
0x10b1   : > { %vm5594_vm4 = vmand %vm20432_vm7, %vm5562_vm5  ;;  %vm5565_vm2 = vcmp.eq.f32.partialorder %v7534_v44, 0.0  ;;  %v5510_v28 = vpop.f32.mrb[171].mxu0  ;;  %v16786_v42 = vsel %vm5596_vm9, %v20435_v60, %v20437_v25  ;;  %v20453_v35 = vsel %vm20450_vm6, %v20451_v57, %v20452_v27  ;;  %v20458_v8 = vsel %vm20455_vm10, %v20456_v63, %v20457_v5  ;;  %v20473_v25 = vld [vmem:[#allocation13_spill] sm:$0xff] }
0x10b2   : > { %vm5597_vm3 = vmand %vm20440_vm11, %vm5565_vm2  ;;  %vm5563_vm8 = vcmp.eq.f32.partialorder %v5510_v28, 0.0  ;;  %v16797_v56 = vsel %vm5594_vm4, %v20443_v17, %v20445_v48  ;;  %5674 = vadd.xlane.f32.xlu0 %v16749_v20  ;;  %vm20461_vm4 = vcmp.eq.f32.partialorder %v20459_v52, %v20460_v41  ;;  %vm20463_vm11 = vnez %v20462_v0  ;;  %v20470_v28 = vld [vmem:[#allocation112_spill] sm:$0xff]  ;;  %v20480_v17 = vld [vmem:[#allocation30_spill] sm:$0xff] }
0x10b3   : > { %vm5595_vm14 = vmand %vm20448_vm1, %vm5563_vm8  ;;  %v16809_v59 = vsel %vm5597_vm3, %v20451_v57, %v20453_v35  ;;  %v20466_v3 = vsel %vm20463_vm11, %v20464_v46, %v20465_v39  ;;  %vm20468_vm8 = vnez %v20467_v62  ;;  %vm20474_vm0 = vcmp.eq.f32.partialorder %v20472_v13, %v20473_v25  ;;  %v20483_v48 = vld [vmem:[#allocation81_spill] sm:$0xff] }
0x10b4   : > { %v16817_v53 = vsel %vm5595_vm14, %v20456_v63, %v20458_v8  ;;  %5676 = vadd.xlane.f32.xlu1 %v16769_v1  ;;  %v20471_v14 = vsel %vm20468_vm8, %v20469_v43, %v20470_v28  ;;  %vm20476_vm14 = vnez %v20475_v6 }
0x10b5   : > { %v20479_v23 = vsel %vm20476_vm14, %v20477_v37, %v20478_v4 }
0x10b6   : > { %5642 = vadd.xlane.f32.xlu0 %v16569_v16 }
0x10b8   : > { %5644 = vadd.xlane.f32.xlu1 %v16588_v50 }
0x10ba   : > { %5678 = vadd.xlane.f32.xlu0 %v16738_v26 }
0x10bb   : > { %v7537_v21 = vpop.f32.mrb[172].mxu0 }
0x10bc   : > { %vm5568_vm9 = vcmp.eq.f32.partialorder %v7537_v21, 0.0  ;;  %v5523_v45 = vpop.f32.mrb[173].mxu0  ;;  %5680 = vadd.xlane.f32.xlu1 %v16761_v29 }
0x10bd   : > { %vm5600_vm5 = vmand %vm5295_vm12, %vm5568_vm9  ;;  %vm5566_vm7 = vcmp.eq.f32.partialorder %v5523_v45, 0.0  ;;  %v7538_v24 = vpop.f32.mrb[174].mxu0 }
0x10be   : > { %vm5598_vm2 = vmand %vm20461_vm4, %vm5566_vm7  ;;  %vm5569_vm15 = vcmp.eq.f32.partialorder %v7538_v24, 0.0  ;;  %v5526_v32 = vpop.f32.mrb[175].mxu0  ;;  %v16834_v44 = vsel %vm5600_vm5, %v20464_v46, %v20466_v3  ;;  %5646 = vadd.xlane.f32.xlu0 %v16558_v61 }
0x10bf   : > { %vm5601_vm12 = vmand %vm5296_vm13, %vm5569_vm15  ;;  %vm5567_vm3 = vcmp.eq.f32.partialorder %v5526_v32, 0.0  ;;  %v16845_v60 = vsel %vm5598_vm2, %v20469_v43, %v20471_v14  ;;  %vm20481_vm13 = vnez %v20480_v17 }
0x10c0   : > { %vm5599_vm1 = vmand %vm20474_vm0, %vm5567_vm3  ;;  %v16857_v11 = vsel %vm5601_vm12, %v20477_v37, %v20479_v23  ;;  %v20484_v58 = vsel %vm20481_vm13, %v20482_v12, %v20483_v48  ;;  %5648 = vadd.xlane.f32.xlu1 %v16580_v2 }
0x10c1   : > { %v16865_v47 = vsel %vm5599_vm1, %v20482_v12, %v20484_v58 }
0x10c2   : > { %5682 = vadd.xlane.f32.xlu0 %v16797_v56 }
0x10c4   : > { %5684 = vadd.xlane.f32.xlu1 %v16817_v53 }
0x10c6   : > { %5650 = vadd.xlane.f32.xlu0 %v16613_v30 }
0x10c8   : > { %5652 = vadd.xlane.f32.xlu1 %v16632_v9 }
0x10ca   : > { %5686 = vadd.xlane.f32.xlu0 %v16786_v42 }
0x10cc   : > { %5688 = vadd.xlane.f32.xlu1 %v16809_v59 }
0x10ce   : > { %5654 = vadd.xlane.f32.xlu0 %v16602_v15 }
0x10d0   : > { %5656 = vadd.xlane.f32.xlu1 %v16624_v18 }
0x10d2   : > { %5690 = vadd.xlane.f32.xlu0 %v16845_v60 }
0x10d4   : > { %5692 = vadd.xlane.f32.xlu1 %v16865_v47 }
0x10d6   : > { %5658 = vadd.xlane.f32.xlu0 %v16657_v33 }
0x10d8   : > { %5660 = vadd.xlane.f32.xlu1 %v16676_v22 }
0x10da   : > { %5694 = vadd.xlane.f32.xlu0 %v16834_v44 }
0x10dc   : > { %5696 = vadd.xlane.f32.xlu1 %v16857_v11 }
0x10de   : > { %5662 = vadd.xlane.f32.xlu0 %v16646_v55 }
0x10e0   : > { %5664 = vadd.xlane.f32.xlu1 %v16668_v34 }
0x112f   : > { %v5667_v38 = vpop.xlane.xlu0 %5666 }
0x1130   : > { %7813 = vrcp.f32 %v5667_v38 }
0x1131   : > { %v5669_v57 = vpop.xlane.xlu1 %5668 }
0x1132   : > { %7815 = vrcp.f32 %v5669_v57 }
0x1133   : > { %v5635_v27 = vpop.xlane.xlu0 %5634 }
0x1134   : > { %7817 = vrcp.f32 %v5635_v27 }
0x1135   : > { %v5637_v35 = vpop.xlane.xlu1 %5636 }
0x1136   : > { %7819 = vrcp.f32 %v5637_v35 }
0x1137   : > { %v5671_v10 = vpop.xlane.xlu0 %5670 }
0x1138   : > { %7821 = vrcp.f32 %v5671_v10 }
0x1139   : > { %v5673_v63 = vpop.xlane.xlu1 %5672 }
0x113a   : > { %v7814_v5 = vpop.eup %7813  ;;  %7823 = vrcp.f32 %v5673_v63 }
0x113b   : > { %v5746_v8 = vmul.f32 %v7814_v5, %v5667_v38  ;;  %v5639_v21 = vpop.xlane.xlu0 %5638 }
0x113c   : > { %v7816_v45 = vpop.eup %7815  ;;  %7825 = vrcp.f32 %v5639_v21 }
0x113d   : > { %v5778_v24 = vsub.f32 2.0, %v5746_v8  ;;  %v5747_v52 = vmul.f32 %v7816_v45, %v5669_v57  ;;  %v5641_v41 = vpop.xlane.xlu1 %5640 }
0x113e   : > { %v7818_v32 = vpop.eup %7817  ;;  %7827 = vrcp.f32 %v5641_v41 }
0x113f   : > { %v5779_v0 = vsub.f32 2.0, %v5747_v52  ;;  %v5730_v46 = vmul.f32 %v7818_v32, %v5635_v27  ;;  %v5675_v39 = vpop.xlane.xlu0 %5674  ;;  %v5810_v62 = vmul.f32 %v7814_v5, %v5778_v24 }
0x1140   : > { %v7820_v3 = vpop.eup %7819  ;;  %7829 = vrcp.f32 %v5675_v39 }
0x1141   : > { %v5811_v43 = vmul.f32 %v7816_v45, %v5779_v0  ;;  %v5762_v28 = vsub.f32 2.0, %v5730_v46  ;;  %v5731_v14 = vmul.f32 %v7820_v3, %v5637_v35  ;;  %v5677_v13 = vpop.xlane.xlu1 %5676  ;;  %v5842_v48 = vmul.f32 %v5810_v62, %v16701_v31 }
0x1142   : > { %v7822_v25 = vpop.eup %7821  ;;  %7831 = vrcp.f32 %v5677_v13 }
0x1143   : > { %v5794_v6 = vmul.f32 %v7818_v32, %v5762_v28  ;;  %v5763_v37 = vsub.f32 2.0, %v5731_v14  ;;  %v5748_v4 = vmul.f32 %v7822_v25, %v5671_v10  ;;  %v5643_v23 = vpop.xlane.xlu0 %5642  ;;  %v5843_v17 = vmul.f32 %v5811_v43, %v16721_v36 }
0x1144   : > { %v7824_v12 = vpop.eup %7823  ;;  %7833 = vrcp.f32 %v5643_v23 }
0x1145   : > { %v5795_v58 = vmul.f32 %v7820_v3, %v5763_v37  ;;  %v5780_v38 = vsub.f32 2.0, %v5748_v4  ;;  %v5749_v57 = vmul.f32 %v7824_v12, %v5673_v63  ;;  %v5645_v27 = vpop.xlane.xlu1 %5644  ;;  %v7539_v35 = vpack.c.bf16 %v5843_v17, %v5842_v48 }
0x1146   : > { %v7826_v5 = vpop.eup %7825  ;;  %7835 = vrcp.f32 %v5645_v27  ;;  %v5826_v8 = vmul.f32 %v5794_v6, %v16525_v40 }
0x1147   : > { %v5827_v45 = vmul.f32 %v5795_v58, %v16544_v7  ;;  %v5781_v24 = vsub.f32 2.0, %v5749_v57  ;;  %v5732_v10 = vmul.f32 %v7826_v5, %v5639_v21  ;;  %v5679_v52 = vpop.xlane.xlu0 %5678  ;;  %v5812_v36 = vmul.f32 %v7822_v25, %v5780_v38  ;;  %7540 = vmatprep.subr.bf16.mxu1 %v7539_v35 }
0x1148   : > { %v7828_v32 = vpop.eup %7827  ;;  %7837 = vrcp.f32 %v5679_v52 }
0x1149   : > { %v5813_v0 = vmul.f32 %v7824_v12, %v5781_v24  ;;  %v5764_v31 = vsub.f32 2.0, %v5732_v10  ;;  %v5733_v46 = vmul.f32 %v7828_v32, %v5641_v41  ;;  %v5681_v3 = vpop.xlane.xlu1 %5680  ;;  %v7541_v63 = vpack.c.bf16 %v5827_v45, %v5826_v8 }
0x114a   : > { %v7830_v62 = vpop.eup %7829  ;;  %7839 = vrcp.f32 %v5681_v3  ;;  %v5844_v25 = vmul.f32 %v5812_v36, %v16690_v54 }
0x114b   : > { %v5796_v43 = vmul.f32 %v7826_v5, %v5764_v31  ;;  %v5765_v28 = vsub.f32 2.0, %v5733_v46  ;;  %v5750_v14 = vmul.f32 %v7830_v62, %v5675_v39  ;;  %7542 = vmatpush3.bf16.xpose.msra.mxu1 %v7541_v63  ;;  %v5647_v40 = vpop.xlane.xlu0 %5646  ;;  %v5845_v7 = vmul.f32 %v5813_v0, %v16713_v49 }
0x114c   : > { %v7832_v21 = vpop.eup %7831  ;;  %7841 = vrcp.f32 %v5647_v40 }
0x114d   : > { %v5797_v6 = vmul.f32 %v7828_v32, %v5765_v28  ;;  %v5782_v37 = vsub.f32 2.0, %v5750_v14  ;;  %v5751_v4 = vmul.f32 %v7832_v21, %v5677_v13  ;;  %v5649_v17 = vpop.xlane.xlu1 %5648  ;;  %v7543_v12 = vpack.c.bf16 %v5845_v7, %v5844_v25 }
0x114e   : > { %v7834_v41 = vpop.eup %7833  ;;  %7843 = vrcp.f32 %v5649_v17  ;;  %v5828_v48 = vmul.f32 %v5796_v43, %v16514_v19 }
0x114f   : > { %v5829_v58 = vmul.f32 %v5797_v6, %v16536_v51  ;;  %v5783_v39 = vsub.f32 2.0, %v5751_v4  ;;  %v5734_v38 = vmul.f32 %v7834_v41, %v5643_v23  ;;  %v5683_v57 = vpop.xlane.xlu0 %5682  ;;  %v5814_v49 = vmul.f32 %v7830_v62, %v5782_v37  ;;  %7544 = vmatprep.subr.bf16.mxu1 %v7543_v12 }
0x1150   : > { %v7836_v5 = vpop.eup %7835  ;;  %7845 = vrcp.f32 %v5683_v57 }
0x1151   : > { %v5815_v35 = vmul.f32 %v7832_v21, %v5783_v39  ;;  %v5766_v54 = vsub.f32 2.0, %v5734_v38  ;;  %v5735_v8 = vmul.f32 %v7836_v5, %v5645_v27  ;;  %v5685_v45 = vpop.xlane.xlu1 %5684  ;;  %v7545_v13 = vpack.c.bf16 %v5829_v58, %v5828_v48 }
0x1152   : > { %v7838_v24 = vpop.eup %7837  ;;  %7847 = vrcp.f32 %v5685_v45  ;;  %v5846_v0 = vmul.f32 %v5814_v49, %v16749_v20 }
0x1153   : > { %v5798_v10 = vmul.f32 %v7834_v41, %v5766_v54  ;;  %v5767_v32 = vsub.f32 2.0, %v5735_v8  ;;  %v5752_v36 = vmul.f32 %v7838_v24, %v5679_v52  ;;  %7546 = vmatpush3.bf16.xpose.msra.mxu1 %v7545_v13  ;;  %v5651_v19 = vpop.xlane.xlu0 %5650  ;;  %v5847_v51 = vmul.f32 %v5815_v35, %v16769_v1 }
0x1154   : > { %v7840_v23 = vpop.eup %7839  ;;  %7849 = vrcp.f32 %v5651_v19 }
0x1155   : > { %v5799_v31 = vmul.f32 %v7836_v5, %v5767_v32  ;;  %v5784_v46 = vsub.f32 2.0, %v5752_v36  ;;  %v5753_v63 = vmul.f32 %v7840_v23, %v5681_v3  ;;  %v5653_v62 = vpop.xlane.xlu1 %5652  ;;  %v7547_v43 = vpack.c.bf16 %v5847_v51, %v5846_v0 }
0x1156   : > { %v7842_v27 = vpop.eup %7841  ;;  %7851 = vrcp.f32 %v5653_v62  ;;  %v5830_v28 = vmul.f32 %v5798_v10, %v16569_v16 }
0x1157   : > { %v5831_v14 = vmul.f32 %v5799_v31, %v16588_v50  ;;  %v5785_v52 = vsub.f32 2.0, %v5753_v63  ;;  %v5736_v7 = vmul.f32 %v7842_v27, %v5647_v40  ;;  %v5687_v21 = vpop.xlane.xlu0 %5686  ;;  %v5816_v1 = vmul.f32 %v7838_v24, %v5784_v46  ;;  %7548 = vmatprep.subr.bf16.mxu1 %v7547_v43 }
0x1158   : > { %v7844_v25 = vpop.eup %7843  ;;  %7853 = vrcp.f32 %v5687_v21 }
0x1159   : > { %v5817_v6 = vmul.f32 %v7840_v23, %v5785_v52  ;;  %v5768_v20 = vsub.f32 2.0, %v5736_v7  ;;  %v5737_v37 = vmul.f32 %v7844_v25, %v5649_v17  ;;  %v5689_v4 = vpop.xlane.xlu1 %5688  ;;  %v7549_v3 = vpack.c.bf16 %v5831_v14, %v5830_v28 }
0x115a   : > { %v7846_v41 = vpop.eup %7845  ;;  %7855 = vrcp.f32 %v5689_v4  ;;  %v5848_v39 = vmul.f32 %v5816_v1, %v16738_v26 }
0x115b   : > { %v5800_v12 = vmul.f32 %v7842_v27, %v5768_v20  ;;  %v5769_v48 = vsub.f32 2.0, %v5737_v37  ;;  %v5754_v58 = vmul.f32 %v7846_v41, %v5683_v57  ;;  %7550 = vmatpush3.bf16.xpose.msra.mxu1 %v7549_v3  ;;  %v5655_v16 = vpop.xlane.xlu0 %5654  ;;  %v5849_v50 = vmul.f32 %v5817_v6, %v16761_v29 }
0x115c   : > { %v7848_v40 = vpop.eup %7847  ;;  %7857 = vrcp.f32 %v5655_v16 }
0x115d   : > { %v5801_v38 = vmul.f32 %v7844_v25, %v5769_v48  ;;  %v5786_v5 = vsub.f32 2.0, %v5754_v58  ;;  %v5755_v49 = vmul.f32 %v7848_v40, %v5685_v45  ;;  %v5657_v35 = vpop.xlane.xlu1 %5656  ;;  %v7551_v54 = vpack.c.bf16 %v5849_v50, %v5848_v39 }
0x115e   : > { %v7850_v17 = vpop.eup %7849  ;;  %7859 = vrcp.f32 %v5657_v35  ;;  %v5832_v8 = vmul.f32 %v5800_v12, %v16558_v61 }
0x115f   : > { %v5833_v13 = vmul.f32 %v5801_v38, %v16580_v2  ;;  %v5787_v57 = vsub.f32 2.0, %v5755_v49  ;;  %v5738_v24 = vmul.f32 %v7850_v17, %v5651_v19  ;;  %v5691_v10 = vpop.xlane.xlu0 %5690  ;;  %v5818_v29 = vmul.f32 %v7846_v41, %v5786_v5  ;;  %7552 = vmatprep.subr.bf16.mxu1 %v7551_v54 }
0x1160   : > { %v7852_v32 = vpop.eup %7851  ;;  %7861 = vrcp.f32 %v5691_v10 }
0x1161   : > { %v5819_v36 = vmul.f32 %v7848_v40, %v5787_v57  ;;  %v5770_v26 = vsub.f32 2.0, %v5738_v24  ;;  %v5739_v51 = vmul.f32 %v7852_v32, %v5653_v62  ;;  %v5693_v23 = vpop.xlane.xlu1 %5692  ;;  %v7553_v45 = vpack.c.bf16 %v5833_v13, %v5832_v8 }
0x1162   : > { %v7854_v0 = vpop.eup %7853  ;;  %7863 = vrcp.f32 %v5693_v23  ;;  %v5850_v27 = vmul.f32 %v5818_v29, %v16797_v56 }
0x1163   : > { %v5802_v31 = vmul.f32 %v7850_v17, %v5770_v26  ;;  %v5771_v46 = vsub.f32 2.0, %v5739_v51  ;;  %v5756_v63 = vmul.f32 %v7854_v0, %v5687_v21  ;;  %7554 = vmatpush3.bf16.xpose.msra.mxu1 %v7553_v45  ;;  %v5659_v61 = vpop.xlane.xlu0 %5658  ;;  %v5851_v2 = vmul.f32 %v5819_v36, %v16817_v53 }
0x1164   : > { %v7856_v19 = vpop.eup %7855  ;;  %7865 = vrcp.f32 %v5659_v61 }
0x1165   : > { %v5803_v43 = vmul.f32 %v7852_v32, %v5771_v46  ;;  %v5788_v28 = vsub.f32 2.0, %v5756_v63  ;;  %v5757_v14 = vmul.f32 %v7856_v19, %v5689_v4  ;;  %v5661_v52 = vpop.xlane.xlu1 %5660  ;;  %v7555_v7 = vpack.c.bf16 %v5851_v2, %v5850_v27 }
0x1166   : > { %v7858_v62 = vpop.eup %7857  ;;  %7867 = vrcp.f32 %v5661_v52  ;;  %v5834_v25 = vmul.f32 %v5802_v31, %v16613_v30 }
0x1167   : > { %v5835_v1 = vmul.f32 %v5803_v43, %v16632_v9  ;;  %v5789_v21 = vsub.f32 2.0, %v5757_v14  ;;  %v5740_v6 = vmul.f32 %v7858_v62, %v5655_v16  ;;  %v5695_v20 = vpop.xlane.xlu0 %5694  ;;  %v5820_v53 = vmul.f32 %v7854_v0, %v5788_v28  ;;  %7556 = vmatprep.subr.bf16.mxu1 %v7555_v7 }
0x1168   : > { %v7860_v37 = vpop.eup %7859  ;;  %7869 = vrcp.f32 %v5695_v20 }
0x1169   : > { %v5821_v3 = vmul.f32 %v7856_v19, %v5789_v21  ;;  %v5772_v56 = vsub.f32 2.0, %v5740_v6  ;;  %v5741_v41 = vmul.f32 %v7860_v37, %v5657_v35  ;;  %v5697_v12 = vpop.xlane.xlu1 %5696  ;;  %v7557_v4 = vpack.c.bf16 %v5835_v1, %v5834_v25 }
0x116a   : > { %v7862_v48 = vpop.eup %7861  ;;  %7871 = vrcp.f32 %v5697_v12  ;;  %v5852_v39 = vmul.f32 %v5820_v53, %v16786_v42 }
0x116b   : > { %v5804_v58 = vmul.f32 %v7858_v62, %v5772_v56  ;;  %v5773_v50 = vsub.f32 2.0, %v5741_v41  ;;  %v5758_v40 = vmul.f32 %v7862_v48, %v5691_v10  ;;  %7558 = vmatpush3.bf16.xpose.msra.mxu1 %v7557_v4  ;;  %v5663_v30 = vpop.xlane.xlu0 %5662  ;;  %v5853_v9 = vmul.f32 %v5821_v3, %v16809_v59  ;;  %v7910_v3 = vld [vmem:[%s16969_s1] sm:$0xf] }
0x116c   : > { %v7864_v16 = vpop.eup %7863  ;;  %7873 = vrcp.f32 %v5663_v30 }
0x116d   : > { %v5805_v38 = vmul.f32 %v7860_v37, %v5773_v50  ;;  %v5790_v5 = vsub.f32 2.0, %v5758_v40  ;;  %v5759_v49 = vmul.f32 %v7864_v16, %v5693_v23  ;;  %v5665_v17 = vpop.xlane.xlu1 %5664  ;;  %v7559_v54 = vpack.c.bf16 %v5853_v9, %v5852_v39 }
0x116e   : > { %v7866_v35 = vpop.eup %7865  ;;  %7875 = vrcp.f32 %v5665_v17  ;;  %v5836_v8 = vmul.f32 %v5804_v58, %v16602_v15 }
0x116f   : > { %v5837_v13 = vmul.f32 %v5805_v38, %v16624_v18  ;;  %v5791_v57 = vsub.f32 2.0, %v5759_v49  ;;  %v5742_v24 = vmul.f32 %v7866_v35, %v5659_v61  ;;  %v5822_v32 = vmul.f32 %v7862_v48, %v5790_v5  ;;  %7560 = vmatprep.subr.bf16.mxu1 %v7559_v54 }
0x1170   : > { %v7868_v10 = vpop.eup %7867 }
0x1171   : > { %v5823_v59 = vmul.f32 %v7864_v16, %v5791_v57  ;;  %v5774_v29 = vsub.f32 2.0, %v5742_v24  ;;  %v5743_v36 = vmul.f32 %v7868_v10, %v5661_v52  ;;  %v7561_v42 = vpack.c.bf16 %v5837_v13, %v5836_v8 }
0x1172   : > { %v7870_v26 = vpop.eup %7869  ;;  %v5854_v15 = vmul.f32 %v5822_v32, %v16845_v60 }
0x1173   : > { %v5806_v51 = vmul.f32 %v7866_v35, %v5774_v29  ;;  %v5775_v23 = vsub.f32 2.0, %v5743_v36  ;;  %v5760_v45 = vmul.f32 %v7870_v26, %v5695_v20  ;;  %7562 = vmatpush3.bf16.xpose.msra.mxu1 %v7561_v42  ;;  %v5855_v0 = vmul.f32 %v5823_v59, %v16865_v47 }
0x1174   : > { %v7872_v31 = vpop.eup %7871 }
0x1175   : > { %v5807_v18 = vmul.f32 %v7868_v10, %v5775_v23  ;;  %v5792_v46 = vsub.f32 2.0, %v5760_v45  ;;  %v5761_v63 = vmul.f32 %v7872_v31, %v5697_v12  ;;  %v5838_v2 = vmul.f32 %v5806_v51, %v16657_v33 }
0x1176   : > { %v7874_v61 = vpop.eup %7873  ;;  %v7563_v19 = vpack.c.bf16 %v5855_v0, %v5854_v15 }
0x1177   : > { %v5839_v27 = vmul.f32 %v5807_v18, %v16676_v22  ;;  %v5824_v43 = vmul.f32 %v7870_v26, %v5792_v46  ;;  %v5793_v28 = vsub.f32 2.0, %v5761_v63  ;;  %v5744_v14 = vmul.f32 %v7874_v61, %v5663_v30 }
0x1178   : > { %v7876_v52 = vpop.eup %7875  ;;  %7564 = vmatprep.subr.bf16.mxu1 %v7563_v19 }
0x1179   : > { %v5825_v62 = vmul.f32 %v7872_v31, %v5793_v28  ;;  %v5776_v7 = vsub.f32 2.0, %v5744_v14  ;;  %v5745_v47 = vmul.f32 %v7876_v52, %v5665_v17  ;;  %v7565_v25 = vpack.c.bf16 %v5839_v27, %v5838_v2 }
0x117a   : > { %v5856_v21 = vmul.f32 %v5824_v43, %v16834_v44 }
0x117b   : > { %v5808_v60 = vmul.f32 %v7874_v61, %v5776_v7  ;;  %v5777_v1 = vsub.f32 2.0, %v5745_v47  ;;  %7566 = vmatpush3.bf16.xpose.msra.mxu1 %v7565_v25  ;;  %v5857_v33 = vmul.f32 %v5825_v62, %v16857_v11 }
0x117d   : > { %v5809_v6 = vmul.f32 %v7876_v52, %v5777_v1  ;;  %v7567_v22 = vpack.c.bf16 %v5857_v33, %v5856_v21  ;;  %v5840_v20 = vmul.f32 %v5808_v60, %v16646_v55 }
0x117f   : > { %v5841_v37 = vmul.f32 %v5809_v6, %v16668_v34  ;;  %7568 = vmatprep.subr.bf16.mxu1 %v7567_v22 }
0x1181   : > { %v7569_v53 = vpack.c.bf16 %v5841_v37, %v5840_v20 }
0x1183   : > { %7570 = vmatpush3.bf16.xpose.msra.mxu1 %v7569_v53 }
0x118a   : > { %7008 = vmatmul.mubr.f32.vlgmr.msra.gmra.mrb[176].mxu1 %v7910_v3 }
0x125d   : > { %v5924_v44 = vpop.f32.mrb[176].mxu1 }
0x125e   : > { %v5926_v11 = vpop.f32.mrb[177].mxu1 }
0x125f   : > { %v5931_v56 = vcombine.low %v5924_v44, %v5926_v11 }
0x1261   : > { %5933 = vst [vmem:[%s191_s12] sm:$0xff] %v5931_v56 }
0x1262   : > { %7924 = shalt.err (!%p7921_p3)
}
0x1263   : > { %s7925_s30 = scalar_lea.hbm %s16926_s22, 128  ;;  %s7929_s7 = scalar_lea.hbm %s16972_s4, 256 }
0x1264   : > { %p7926_p4 = scmp.ne.s32.totalorder %s16926_s22, %s7925_s30  ;;  %p7930_p9 = scmp.lt.u32.totalorder %s16926_s22, %s16972_s4 }
0x1265   : > { %p7931_p10 = scmp.lt.u32.totalorder %s7929_s7, %s7925_s30  ;;  %p7933_p12 = scmp.lt.u32.totalorder %s7925_s30, %s16926_s22 }
0x1266   : > { %p7927_p7 = pnand %p7926_p4, %p8040_p5 }
0x1267   : > { %p7932_p11 = por %p7931_p10, %p7930_p9 }
0x1268   : > { %p7928_p8 = pneg %p7927_p7 }
0x1269   : > { %p7934_p13 = por %p7933_p12, %p7932_p11 }
0x126b   : > { %p7935_p0 = pnand %p7934_p13, %p7928_p8 }
0x126d   : > { %7938 = shalt.err (!%p7935_p0)
}
0x126e   : > { %7573 = dma.vmem_to_hbm [thread:$0]  (%p8040_p5), %s16928_s13, 128, %s16926_s22, %s5935_s23  }
0x126f PF: > { %p7579_p1 = scmp.ge.s32.totalorder %s7973_s18, 2  ;;  %s5961_s10 = sand.u32 1, %s7961_s15  }
0x1270   : > { %s5962_s11 = scalar_lea.sflag [#allocation3], %s5961_s10 }
0x1271   : > { %p7576_p2 = pnand %p7579_p1, %p8044_p6 }
0x1273   : > { %7956 = dma.done.wait (!%p7576_p2), %s5962_s11, 128  }
0x1274   : > { %7958 = vsyncadd (!%p7576_p2), %s5962_s11, 4294967168  ;;  %p14_p3 = scmp.ge.s32.totalorder %s8027_s21, 4   ;;  %s20485_s15 = smov %s7965_s16 }
0x1275   : > { %s20486_s16 = smov %s7969_s17  ;;  %s20487_s17 = smov %s8038_s24 }
0x1276   : > { %s20488_s18 = smov %s8027_s21  ;;  %16 = sbr.rel (!%p14_p3) target bundleno = 3 (0x3), region = 71 }
0x127d   :  { %5967 = vsyncpa [#allocation3], 1 }
0x127e   :  { %5969 = vsyncpa [#allocation3 + $0x1], 1 }

</bundles_post_ra>
